<compile_context>
chip_gen: v7x
topology: tpu7x:2x2x1
jax: 0.10.0
libtpu: 0.0.40
codegen_flags: <defaults>
</compile_context>

<pallas_src>
import functools

import jax
import jax.numpy as jnp
from jax import lax
from jax.experimental import pallas as pl
from jax.experimental.pallas import tpu as pltpu


def _silu(v):
    # x * sigmoid(x); reciprocal on the EUP (approx) frees VALU slots.
    return v * pl.reciprocal(1.0 + jnp.exp(-v), approx=True)


def _round_up(v, m):
    return ((v + m - 1) // m) * m


def _usable_vmem_bytes():
    """Per-generation scoped-VMEM cap with headroom for compiler scratch."""
    try:
        cap = int(pltpu.get_tpu_info().vmem_capacity_bytes)
    except Exception:
        cap = 128 << 20
    return max(min(int(cap * 0.72), cap - (16 << 20)), 32 << 20)


def _estimate_vmem(P, out_rows, Cin, hp, cp, param_bytes, pad_rows):
    """Generous per-grid-step VMEM estimate for tile-size selection."""
    io = 2 * (P * Cin * 2) + 2 * (out_rows * cp * 2)        # double-buffered in/out blocks
    work = (P * hp * 4 * 5            # x1, h, acc, y, shifted copies (f32)
            + P * 2 * hp * 4          # fused split output x12 (f32)
            + P * 3 * hp * 2 * 2      # stage value + slack (bf16)
            + out_rows * (hp * 4 + 2 * hp * 2))             # x2 + conv3 operand
    scratch = pad_rows * 3 * hp * 2
    return io + work + scratch + 2 * param_bytes + (4 << 20)


def _choose_tile_rows(H, W, Cin, hp, cp, n, param_bytes, usable):
    budget = int(usable * 0.9)
    divisors = [d for d in range(1, H + 1) if H % d == 0]
    for th in sorted(divisors, reverse=True):
        halo = 0 if th == H else n
        rows = th + 2 * halo
        pad_off = _round_up(W, 16)
        pad_rows = _round_up(pad_off + rows * W + W, 16)
        aligned = (th == H) or ((th * W) % 8 == 0)
        if aligned and _estimate_vmem(rows * W, th * W, Cin, hp, cp,
                                      param_bytes, pad_rows) <= budget:
            return th
    for th in sorted(divisors):
        if th == H or (th * W) % 8 == 0:
            return th
    return H


def csp_layer_kernel(x_ref,
                     w12_ref, s12_ref, b12_ref,
                     bw1_ref, bs1_ref, bb1_ref,
                     bw2_ref, bs2_ref, bb2_ref,
                     w3_ref, s3_ref, b3_ref,
                     o_ref, pad_ref,
                     *, n, H, W, tile_rows, halo, pad_off, shortcut):
    bf16 = jnp.bfloat16
    win_rows = tile_rows + 2 * halo
    P = win_rows * W                      # positions in the (haloed) window
    out_rows = tile_rows * W
    hp = bw1_ref.shape[-1]
    pad_rows = pad_ref.shape[0]

    x = x_ref[0, 0]                       # (P, Cin) bf16

    # Fused CSP split: [x1 | x2] in a single matmul (N = 2*hp fills the MXU).
    x12 = jnp.dot(x, w12_ref[...], preferred_element_type=jnp.float32)
    x12 = _silu(x12 * s12_ref[...] + b12_ref[...])          # folded-BN + SiLU, f32
    x1 = x12[:, :hp]                                         # (P, hp)
    c0 = halo * W
    x2 = x12[c0:c0 + out_rows, hp:]                          # (out_rows, hp)

    # Zero only the scratch halo rows (interior is fully overwritten per
    # bottleneck).  Unconditional so it is valid per-core under "parallel".
    pad_ref[0:pad_off, :] = jnp.zeros((pad_off, 3 * hp), bf16)
    pad_ref[pad_off + P:, :] = jnp.zeros((pad_rows - pad_off - P, 3 * hp), bf16)

    # Column-border masks for the dx = +-1 taps.
    col = lax.broadcasted_iota(jnp.int32, (P, 1), 0) % W
    mask_l = col >= 1                 # dx=0 reads column w-1 -> invalid at w == 0
    mask_r = col <= W - 2             # dx=2 reads column w+1 -> invalid at w == W-1

    # Row-validity mask (only when row-tiled): window rows outside [0, H) are
    # the image's zero padding and must stay zero going into every 3x3 conv.
    if halo > 0:
        row = lax.broadcasted_iota(jnp.int32, (P, 1), 0) // W
        img_row = pl.program_id(1) * tile_rows - halo + row
        row_ok = jnp.logical_and(img_row >= 0, img_row < H)
    else:
        row_ok = None

    zrow = jnp.zeros((1, hp), jnp.float32)

    def bottleneck(j, x1):
        w9 = bw2_ref[j]                                      # (3, 3*hp, hp) bf16
        h = jnp.dot(x1.astype(bf16), bw1_ref[j], preferred_element_type=jnp.float32)
        h = _silu(h * bs1_ref[j] + bb1_ref[j])               # (P, hp) f32
        if row_ok is not None:
            h = jnp.where(row_ok, h, 0.0)                    # true zero-padding rows
        # dx = -1 / +1 neighbours (value-level 1-row shift + border mask), then
        # lane-concat into the K = 3*hp staging slab (mini im2col along dx).
        h_l = jnp.where(mask_l, jnp.concatenate([zrow, h[:P - 1]], axis=0), 0.0)
        h_r = jnp.where(mask_r, jnp.concatenate([h[1:], zrow], axis=0), 0.0)
        stage = jnp.concatenate(
            [h_l.astype(bf16), h.astype(bf16), h_r.astype(bf16)], axis=-1)
        pad_ref[pad_off:pad_off + P, :] = stage
        # 3 matmuls of K = 3*hp (dy = -1, 0, +1); center row uses the live value.
        acc = jnp.dot(pad_ref[pad_off - W:pad_off - W + P, :], w9[0],
                      preferred_element_type=jnp.float32)
        acc = acc + jnp.dot(stage, w9[1], preferred_element_type=jnp.float32)
        acc = acc + jnp.dot(pad_ref[pad_off + W:pad_off + W + P, :], w9[2],
                            preferred_element_type=jnp.float32)
        y = _silu(acc * bs2_ref[j] + bb2_ref[j])
        if shortcut:                      # use_add (in_channels == out_channels)
            y = y + x1
        return y

    if n >= 3:
        x1 = lax.fori_loop(0, n, bottleneck, x1)
    else:
        for j in range(n):
            x1 = bottleneck(j, x1)

    # conv3 on concat([x1, x2], channel) as a single K = 2*hp matmul.
    x1c = x1[c0:c0 + out_rows, :]
    xc = jnp.concatenate([x1c, x2], axis=-1).astype(bf16)    # (out_rows, 2*hp)
    y = jnp.dot(xc, w3_ref[...], preferred_element_type=jnp.float32)
    o_ref[0] = _silu(y * s3_ref[...] + b3_ref[...]).astype(o_ref.dtype)


PARAM_ORDER = ('w12', 's12', 'b12',
               'bw1', 'bs1', 'bb1', 'bw2', 'bs2', 'bb2',
               'w3', 's3', 'b3')


def _pad_axes(a, targets, value=0.0):
    widths = [(0, 0)] * a.ndim
    changed = False
    for ax, t in targets.items():
        d = t - a.shape[ax]
        if d > 0:
            widths[ax] = (0, d)
            changed = True
    if not changed:
        return a
    return jnp.pad(a, widths, constant_values=value)


def _prepare_params(p, hp, cp):
    """Zero-pad channel dims to lane-dense widths, fuse, cast weights to bf16."""
    bf16 = jnp.bfloat16
    n = p['bw1'].shape[0]
    w12 = jnp.concatenate([_pad_axes(p['w1'], {1: hp}),
                           _pad_axes(p['w2'], {1: hp})], axis=1).astype(bf16)
    s12 = jnp.concatenate([_pad_axes(p['s1'], {1: hp}, 1.0),
                           _pad_axes(p['s2'], {1: hp}, 1.0)], axis=1)
    b12 = jnp.concatenate([_pad_axes(p['b1'], {1: hp}),
                           _pad_axes(p['b2'], {1: hp})], axis=1)
    bw1 = _pad_axes(p['bw1'], {1: hp, 2: hp}).astype(bf16)
    bs1 = _pad_axes(p['bs1'], {2: hp}, 1.0)
    bb1 = _pad_axes(p['bb1'], {2: hp})
    # (n, 9, hp, hp) -> per-dy K = 3*hp weight stacks: [w(dy,0); w(dy,1); w(dy,2)]
    bw2 = _pad_axes(p['bw2'], {2: hp, 3: hp}).reshape(n, 3, 3 * hp, hp).astype(bf16)
    bs2 = _pad_axes(p['bs2'], {2: hp}, 1.0)
    bb2 = _pad_axes(p['bb2'], {2: hp})
    w3 = jnp.concatenate([_pad_axes(p['w3a'], {0: hp}),
                          _pad_axes(p['w3b'], {0: hp})], axis=0)
    w3 = _pad_axes(w3, {1: cp}).astype(bf16)
    s3 = _pad_axes(p['s3'], {1: cp}, 1.0)
    b3 = _pad_axes(p['b3'], {1: cp})
    return dict(w12=w12, s12=s12, b12=b12, bw1=bw1, bs1=bs1, bb1=bb1,
                bw2=bw2, bs2=bs2, bb2=bb2, w3=w3, s3=s3, b3=b3)


def csp_layer(x_nchw, params, *, n, shortcut=True, tile_rows=None):
    """Pallas-backed CSPLayer forward.  Input/output are NCHW float32."""
    N, Cin, H, W = x_nchw.shape
    HW = H * W
    hid = params['w1'].shape[1]
    Cout = params['w3a'].shape[1]
    assert n >= 1 and params['bw1'].shape[0] == n

    hp = _round_up(hid, 128)              # hidden channels, lane-padded
    cp = _round_up(Cout, 128)             # output channels, lane-padded
    prep = _prepare_params(params, hp, cp)
    param_bytes = sum(int(v.size) * v.dtype.itemsize for v in prep.values())

    usable = _usable_vmem_bytes()
    if tile_rows is None:
        tile_rows = _choose_tile_rows(H, W, Cin, hp, cp, n, param_bytes, usable)
    assert H % tile_rows == 0, "tile_rows must divide H"
    T = H // tile_rows
    halo = 0 if T == 1 else n
    win_rows = tile_rows + 2 * halo
    P = win_rows * W
    out_rows = tile_rows * W
    assert T == 1 or out_rows % 8 == 0, "row tiles must be 8-aligned in positions"

    # NCHW -> NHWC bf16, then materialize overlapping row windows (halo rows
    # outside the image are zero; the kernel re-zeros them before each 3x3).
    xh = jnp.transpose(x_nchw, (0, 2, 3, 1)).astype(jnp.bfloat16)   # (N, H, W, Cin)
    if halo > 0:
        zpad = jnp.zeros((N, halo, W, Cin), xh.dtype)
        xpad = jnp.concatenate([zpad, xh, zpad], axis=1)            # (N, H+2n, W, Cin)
        idx = jnp.arange(T)[:, None] * tile_rows + jnp.arange(win_rows)[None, :]
        xw = xpad[:, idx]                                           # (N, T, win_rows, W, Cin)
    else:
        xw = xh[:, None]
    xw = xw.reshape(N, T, P, Cin)

    pad_off = _round_up(W, 16)
    pad_rows = _round_up(pad_off + P + W, 16)

    def _const_spec(a):
        nd = a.ndim
        return pl.BlockSpec(a.shape, lambda b, t, _nd=nd: (0,) * _nd)

    in_specs = [pl.BlockSpec((1, 1, P, Cin), lambda b, t: (b, t, 0, 0))]
    in_specs += [_const_spec(prep[k]) for k in PARAM_ORDER]

    # Advisory cost estimate so XLA schedules the surrounding transposes well.
    step_flops = (2 * P * Cin * (2 * hp)
                  + n * (2 * P * hp * hp + 3 * 2 * P * (3 * hp) * hp)
                  + 2 * out_rows * (2 * hp) * cp)
    cost = pl.CostEstimate(
        flops=int(N * T * step_flops),
        transcendentals=int(N * T * (P * 2 * hp + n * 2 * P * hp + out_rows * cp)),
        bytes_accessed=int(xw.size * 2 + N * HW * cp * 2 + param_bytes))

    kernel = functools.partial(csp_layer_kernel, n=n, H=H, W=W,
                               tile_rows=tile_rows, halo=halo, pad_off=pad_off,
                               shortcut=shortcut)
    out = pl.pallas_call(
        kernel,
        out_shape=jax.ShapeDtypeStruct((N, HW, cp), jnp.bfloat16),
        grid=(N, T),
        in_specs=in_specs,
        out_specs=pl.BlockSpec((1, out_rows, cp), lambda b, t: (b, t, 0)),
        scratch_shapes=[pltpu.VMEM((pad_rows, 3 * hp), jnp.bfloat16)],
        compiler_params=pltpu.CompilerParams(
            dimension_semantics=("parallel", "parallel"),
            vmem_limit_bytes=int(usable)),
        cost_estimate=cost,
    )(xw, *[prep[k] for k in PARAM_ORDER])

    out = out[..., :Cout].astype(jnp.float32)                 # drop lane padding
    return jnp.transpose(out.reshape(N, H, W, Cout), (0, 3, 1, 2))


# ------------------------- parameter construction ------------------------- #
def _fold_bn(gamma, beta, mean, var, eps=1e-5):
    scale = gamma / jnp.sqrt(var + eps)
    bias = beta - mean * scale
    return scale.reshape(1, -1), bias.reshape(1, -1)


def make_params(key, cin, cout, n, expansion=0.5):
    hid = int(cout * expansion)
    ks = iter(jax.random.split(key, 8 + 10 * n + 16))

    def conv_w(shape, scale=0.3):
        return jax.random.normal(next(ks), shape, jnp.float32) * scale

    def bn(c):
        gamma = 1.0 + 0.1 * jax.random.normal(next(ks), (c,), jnp.float32)
        beta = 0.1 * jax.random.normal(next(ks), (c,), jnp.float32)
        mean = 0.1 * jax.random.normal(next(ks), (c,), jnp.float32)
        var = 0.5 + 0.2 * jnp.abs(jax.random.normal(next(ks), (c,), jnp.float32))
        return _fold_bn(gamma, beta, mean, var)

    p = {}
    p['w1'] = conv_w((cin, hid)); p['s1'], p['b1'] = bn(hid)
    p['w2'] = conv_w((cin, hid)); p['s2'], p['b2'] = bn(hid)

    bw1, bs1, bb1, bw2, bs2, bb2 = [], [], [], [], [], []
    for _ in range(n):
        bw1.append(conv_w((hid, hid)))
        s, b = bn(hid); bs1.append(s); bb1.append(b)
        bw2.append(conv_w((9, hid, hid), 0.15))      # 3x3 taps flattened (row-major dy,dx)
        s, b = bn(hid); bs2.append(s); bb2.append(b)
    p['bw1'] = jnp.stack(bw1); p['bs1'] = jnp.stack(bs1); p['bb1'] = jnp.stack(bb1)
    p['bw2'] = jnp.stack(bw2); p['bs2'] = jnp.stack(bs2); p['bb2'] = jnp.stack(bb2)

    w3 = conv_w((2 * hid, cout))
    p['w3a'], p['w3b'] = w3[:hid], w3[hid:]
    p['s3'], p['b3'] = bn(cout)
    return p


# --------------------------- pure-JAX reference --------------------------- #
def ref_csp_layer(x_nchw, p, *, n, shortcut=True):
    x = jnp.transpose(x_nchw, (0, 2, 3, 1))  # NHWC

    def conv(inp, w_hwio, s, b):
        y = lax.conv_general_dilated(inp, w_hwio, (1, 1), 'SAME',
                                     dimension_numbers=('NHWC', 'HWIO', 'NHWC'))
        y = y * s.reshape(1, 1, 1, -1) + b.reshape(1, 1, 1, -1)
        return y / (1.0 + jnp.exp(-y))

    def as1x1(w):
        return w.reshape(1, 1, *w.shape)

    x1 = conv(x, as1x1(p['w1']), p['s1'], p['b1'])
    x2 = conv(x, as1x1(p['w2']), p['s2'], p['b2'])
    hid = x1.shape[-1]
    for j in range(n):
        h1 = conv(x1, as1x1(p['bw1'][j]), p['bs1'][j], p['bb1'][j])
        w3x3 = p['bw2'][j].reshape(3, 3, hid, hid)
        y = conv(h1, w3x3, p['bs2'][j], p['bb2'][j])
        x1 = y + x1 if shortcut else y
    cat = jnp.concatenate([x1, x2], axis=-1)
    w3 = jnp.concatenate([p['w3a'], p['w3b']], axis=0)
    y = conv(cat, as1x1(w3), p['s3'], p['b3'])
    return jnp.transpose(y, (0, 3, 1, 2))


if __name__ == "__main__":
    N, Cin, H, W = 2, 4, 16, 16
    Cout = 4

    key = jax.random.PRNGKey(0)
    kx, k1, k2, k3 = jax.random.split(key, 4)
    x = jax.random.normal(kx, (N, Cin, H, W), jnp.float32)

    # (n, tile_rows): single-tile unrolled path, 2-tile fori_loop path with
    # halo, and a 4-tile path that exercises boundary row masking.
    configs = [(2, None, k1), (3, 8, k2), (1, 4, k3)]
    for n_b, trows, kp in configs:
        params = make_params(kp, Cin, Cout, n_b)
        out = jax.block_until_ready(
            csp_layer(x, params, n=n_b, shortcut=True, tile_rows=trows))
        ref = ref_csp_layer(x, params, n=n_b, shortcut=True)
        assert out.shape == (N, Cout, H, W), out.shape
        max_err = float(jnp.max(jnp.abs(out - ref)))
        # bf16 matmul operands / bf16 output + approx-reciprocal SiLU -> loose tol
        assert jnp.allclose(out, ref, atol=5e-2, rtol=5e-2), \
            f"n={n_b} tile_rows={trows}: max abs err {max_err}"

    print("KERNEL_OK")
</pallas_src>

<mosaic_0001>
module attributes {stable_mosaic.version = 11 : i64} {
  func.func @csp_layer_kernel(%arg0: i32, %arg1: i32, %arg2: memref<1x1x256x4xbf16, #tpu.memory_space<vmem>>, %arg3: memref<4x256xbf16, #tpu.memory_space<vmem>>, %arg4: memref<1x256xf32, #tpu.memory_space<vmem>>, %arg5: memref<1x256xf32, #tpu.memory_space<vmem>>, %arg6: memref<2x128x128xbf16, #tpu.memory_space<vmem>>, %arg7: memref<2x1x128xf32, #tpu.memory_space<vmem>>, %arg8: memref<2x1x128xf32, #tpu.memory_space<vmem>>, %arg9: memref<2x3x384x128xbf16, #tpu.memory_space<vmem>>, %arg10: memref<2x1x128xf32, #tpu.memory_space<vmem>>, %arg11: memref<2x1x128xf32, #tpu.memory_space<vmem>>, %arg12: memref<256x128xbf16, #tpu.memory_space<vmem>>, %arg13: memref<1x128xf32, #tpu.memory_space<vmem>>, %arg14: memref<1x128xf32, #tpu.memory_space<vmem>>, %arg15: memref<1x256x128xbf16, #tpu.memory_space<vmem>>, %arg16: memref<288x384xbf16, #tpu.memory_space<vmem>>) attributes {dimension_semantics = [#tpu.dimension_semantics<parallel>, #tpu.dimension_semantics<parallel>], iteration_bounds = array<i64: 2, 1>, scalar_prefetch = 0 : i64, scratch_operands = 1 : i64, tpu.core_type = #tpu.core_type<tc>, window_params = [{transform_indices = @transform_0, window_bounds = array<i64: 1, 1, 256, 4>}, {pipeline_mode = #tpu.pipeline_mode<synchronous>, transform_indices = @transform_1, window_bounds = array<i64: 4, 256>}, {pipeline_mode = #tpu.pipeline_mode<synchronous>, transform_indices = @transform_2, window_bounds = array<i64: 1, 256>}, {pipeline_mode = #tpu.pipeline_mode<synchronous>, transform_indices = @transform_3, window_bounds = array<i64: 1, 256>}, {pipeline_mode = #tpu.pipeline_mode<synchronous>, transform_indices = @transform_4, window_bounds = array<i64: 2, 128, 128>}, {pipeline_mode = #tpu.pipeline_mode<synchronous>, transform_indices = @transform_5, window_bounds = array<i64: 2, 1, 128>}, {pipeline_mode = #tpu.pipeline_mode<synchronous>, transform_indices = @transform_6, window_bounds = array<i64: 2, 1, 128>}, {pipeline_mode = #tpu.pipeline_mode<synchronous>, transform_indices = @transform_7, window_bounds = array<i64: 2, 3, 384, 128>}, {pipeline_mode = #tpu.pipeline_mode<synchronous>, transform_indices = @transform_8, window_bounds = array<i64: 2, 1, 128>}, {pipeline_mode = #tpu.pipeline_mode<synchronous>, transform_indices = @transform_9, window_bounds = array<i64: 2, 1, 128>}, {pipeline_mode = #tpu.pipeline_mode<synchronous>, transform_indices = @transform_10, window_bounds = array<i64: 256, 128>}, {pipeline_mode = #tpu.pipeline_mode<synchronous>, transform_indices = @transform_11, window_bounds = array<i64: 1, 128>}, {pipeline_mode = #tpu.pipeline_mode<synchronous>, transform_indices = @transform_12, window_bounds = array<i64: 1, 128>}, {transform_indices = @transform_13, window_bounds = array<i64: 1, 256, 128>}]} {
    %c0 = arith.constant 0 : index
    %c0_0 = arith.constant 0 : index
    %c0_1 = arith.constant 0 : index
    %c0_2 = arith.constant 0 : index
    %0 = vector.load %arg2[%c0, %c0_0, %c0_1, %c0_2] : memref<1x1x256x4xbf16, #tpu.memory_space<vmem>>, vector<1x1x256x4xbf16>
    %1 = vector.shape_cast %0 : vector<1x1x256x4xbf16> to vector<256x4xbf16>
    %c0_3 = arith.constant 0 : index
    %c0_4 = arith.constant 0 : index
    %2 = vector.load %arg3[%c0_3, %c0_4] : memref<4x256xbf16, #tpu.memory_space<vmem>>, vector<4x256xbf16>
    %cst = arith.constant dense<0.000000e+00> : vector<256x256xf32>
    %3 = tpu.matmul %1, %2, %cst {dimension_numbers = #tpu.dot_dimension_numbers<[1], [0], [0], [1], [0, 0, 1, 1], [], []>} : vector<256x4xbf16>, vector<4x256xbf16>, vector<256x256xf32> -> vector<256x256xf32>
    %c0_5 = arith.constant 0 : index
    %c0_6 = arith.constant 0 : index
    %4 = vector.load %arg4[%c0_5, %c0_6] : memref<1x256xf32, #tpu.memory_space<vmem>>, vector<1x256xf32>
    %5 = vector.broadcast %4 : vector<1x256xf32> to vector<256x256xf32>
    %6 = arith.mulf %3, %5 : vector<256x256xf32>
    %c0_7 = arith.constant 0 : index
    %c0_8 = arith.constant 0 : index
    %7 = vector.load %arg5[%c0_7, %c0_8] : memref<1x256xf32, #tpu.memory_space<vmem>>, vector<1x256xf32>
    %8 = vector.broadcast %7 : vector<1x256xf32> to vector<256x256xf32>
    %9 = arith.addf %6, %8 : vector<256x256xf32>
    %cst_9 = arith.constant 0.000000e+00 : f32
    %10 = vector.broadcast %cst_9 : f32 to vector<256x256xf32>
    %11 = arith.subf %10, %9 : vector<256x256xf32>
    %12 = math.exp %11 : vector<256x256xf32>
    %cst_10 = arith.constant 1.000000e+00 : f32
    %13 = vector.broadcast %cst_10 : f32 to vector<256x256xf32>
    %14 = arith.addf %13, %12 : vector<256x256xf32>
    %15 = tpu.reciprocal %14 {approx = true} : vector<256x256xf32> -> vector<256x256xf32>
    %16 = arith.mulf %9, %15 : vector<256x256xf32>
    %17 = vector.extract_strided_slice %16 {offsets = [0, 0], sizes = [256, 128], strides = [1, 1]} : vector<256x256xf32> to vector<256x128xf32>
    %18 = vector.extract_strided_slice %16 {offsets = [0, 128], sizes = [256, 128], strides = [1, 1]} : vector<256x256xf32> to vector<256x128xf32>
    %cst_11 = arith.constant 0.000000e+00 : bf16
    %19 = vector.broadcast %cst_11 : bf16 to vector<16x384xbf16>
    %c0_12 = arith.constant 0 : index
    %c0_13 = arith.constant 0 : index
    %20 = vector.load %arg16[%c0_12, %c0_13] : memref<288x384xbf16, #tpu.memory_space<vmem>>, vector<16x384xbf16>
    tpu.vector_store %arg16[%c0_12, %c0_13], %19 {strides = array<i32>} : memref<288x384xbf16, #tpu.memory_space<vmem>>, vector<16x384xbf16>,
    %cst_14 = arith.constant 0.000000e+00 : bf16
    %21 = vector.broadcast %cst_14 : bf16 to vector<16x384xbf16>
    %c272 = arith.constant 272 : index
    %c0_15 = arith.constant 0 : index
    %22 = vector.load %arg16[%c272, %c0_15] : memref<288x384xbf16, #tpu.memory_space<vmem>>, vector<16x384xbf16>
    tpu.vector_store %arg16[%c272, %c0_15], %21 {strides = array<i32>} : memref<288x384xbf16, #tpu.memory_space<vmem>>, vector<16x384xbf16>,
    %23 = tpu.iota {dimensions = array<i32: 0>} : vector<256x1xi32>
    %c16_i32 = arith.constant 16 : i32
    %c0_i32 = arith.constant 0 : i32
    %24 = arith.cmpi eq, %c16_i32, %c0_i32 : i32
    %c1_i32 = arith.constant 1 : i32
    %25 = arith.select %24, %c1_i32, %c16_i32 : i32
    %26 = vector.broadcast %25 : i32 to vector<256x1xi32>
    %27 = arith.remsi %23, %26 : vector<256x1xi32>
    %c0_i32_16 = arith.constant 0 : i32
    %28 = vector.broadcast %c0_i32_16 : i32 to vector<256x1xi32>
    %29 = arith.cmpi ne, %27, %28 : vector<256x1xi32>
    %c0_i32_17 = arith.constant 0 : i32
    %30 = vector.broadcast %c0_i32_17 : i32 to vector<256x1xi32>
    %31 = arith.cmpi slt, %27, %30 : vector<256x1xi32>
    %c0_i32_18 = arith.constant 0 : i32
    %32 = arith.cmpi slt, %25, %c0_i32_18 : i32
    %33 = vector.broadcast %32 : i1 to vector<256x1xi1>
    %34 = vector.broadcast %33 : vector<256x1xi1> to vector<256x1xi1>
    %35 = arith.xori %31, %34 : vector<256x1xi1>
    %36 = arith.andi %35, %29 : vector<256x1xi1>
    %37 = vector.broadcast %25 : i32 to vector<256x1xi32>
    %38 = arith.addi %27, %37 : vector<256x1xi32>
    %39 = arith.select %36, %38, %27 : vector<256x1xi1>, vector<256x1xi32>
    %c1_i32_19 = arith.constant 1 : i32
    %40 = vector.broadcast %c1_i32_19 : i32 to vector<256x1xi32>
    %41 = arith.cmpi sge, %39, %40 : vector<256x1xi32>
    %c14_i32 = arith.constant 14 : i32
    %42 = vector.broadcast %c14_i32 : i32 to vector<256x1xi32>
    %43 = arith.cmpi sle, %39, %42 : vector<256x1xi32>
    %cst_20 = arith.constant 0.000000e+00 : f32
    %44 = vector.broadcast %cst_20 : f32 to vector<1x128xf32>
    %c0_21 = arith.constant 0 : index
    %c0_22 = arith.constant 0 : index
    %c0_23 = arith.constant 0 : index
    %c0_24 = arith.constant 0 : index
    %45 = vector.load %arg9[%c0_21, %c0_22, %c0_23, %c0_24] : memref<2x3x384x128xbf16, #tpu.memory_space<vmem>>, vector<1x3x384x128xbf16>
    %46 = vector.shape_cast %45 : vector<1x3x384x128xbf16> to vector<3x384x128xbf16>
    %47 = arith.truncf %17 : vector<256x128xf32> to vector<256x128xbf16>
    %c0_25 = arith.constant 0 : index
    %c0_26 = arith.constant 0 : index
    %c0_27 = arith.constant 0 : index
    %48 = vector.load %arg6[%c0_25, %c0_26, %c0_27] : memref<2x128x128xbf16, #tpu.memory_space<vmem>>, vector<1x128x128xbf16>
    %49 = vector.shape_cast %48 : vector<1x128x128xbf16> to vector<128x128xbf16>
    %cst_28 = arith.constant dense<0.000000e+00> : vector<256x128xf32>
    %50 = tpu.matmul %47, %49, %cst_28 {dimension_numbers = #tpu.dot_dimension_numbers<[1], [0], [0], [1], [0, 0, 1, 1], [], []>} : vector<256x128xbf16>, vector<128x128xbf16>, vector<256x128xf32> -> vector<256x128xf32>
    %c0_29 = arith.constant 0 : index
    %c0_30 = arith.constant 0 : index
    %c0_31 = arith.constant 0 : index
    %51 = vector.load %arg7[%c0_29, %c0_30, %c0_31] : memref<2x1x128xf32, #tpu.memory_space<vmem>>, vector<1x1x128xf32>
    %52 = vector.shape_cast %51 : vector<1x1x128xf32> to vector<1x128xf32>
    %53 = vector.broadcast %52 : vector<1x128xf32> to vector<256x128xf32>
    %54 = arith.mulf %50, %53 : vector<256x128xf32>
    %c0_32 = arith.constant 0 : index
    %c0_33 = arith.constant 0 : index
    %c0_34 = arith.constant 0 : index
    %55 = vector.load %arg8[%c0_32, %c0_33, %c0_34] : memref<2x1x128xf32, #tpu.memory_space<vmem>>, vector<1x1x128xf32>
    %56 = vector.shape_cast %55 : vector<1x1x128xf32> to vector<1x128xf32>
    %57 = vector.broadcast %56 : vector<1x128xf32> to vector<256x128xf32>
    %58 = arith.addf %54, %57 : vector<256x128xf32>
    %cst_35 = arith.constant 0.000000e+00 : f32
    %59 = vector.broadcast %cst_35 : f32 to vector<256x128xf32>
    %60 = arith.subf %59, %58 : vector<256x128xf32>
    %61 = math.exp %60 : vector<256x128xf32>
    %cst_36 = arith.constant 1.000000e+00 : f32
    %62 = vector.broadcast %cst_36 : f32 to vector<256x128xf32>
    %63 = arith.addf %62, %61 : vector<256x128xf32>
    %64 = tpu.reciprocal %63 {approx = true} : vector<256x128xf32> -> vector<256x128xf32>
    %65 = arith.mulf %58, %64 : vector<256x128xf32>
    %66 = vector.extract_strided_slice %65 {offsets = [0, 0], sizes = [255, 128], strides = [1, 1]} : vector<256x128xf32> to vector<255x128xf32>
    %67 = tpu.concatenate %44, %66 in 0 : vector<1x128xf32>, vector<255x128xf32> -> vector<256x128xf32>
    %cst_37 = arith.constant 0.000000e+00 : f32
    %68 = vector.shape_cast %41 : vector<256x1xi1> to vector<256x1xi1>
    %69 = vector.broadcast %68 : vector<256x1xi1> to vector<256x128xi1>
    %70 = vector.broadcast %cst_37 : f32 to vector<256x128xf32>
    %71 = arith.select %69, %67, %70 : vector<256x128xi1>, vector<256x128xf32>
    %72 = vector.extract_strided_slice %65 {offsets = [1, 0], sizes = [255, 128], strides = [1, 1]} : vector<256x128xf32> to vector<255x128xf32>
    %73 = tpu.concatenate %72, %44 in 0 : vector<255x128xf32>, vector<1x128xf32> -> vector<256x128xf32>
    %cst_38 = arith.constant 0.000000e+00 : f32
    %74 = vector.shape_cast %43 : vector<256x1xi1> to vector<256x1xi1>
    %75 = vector.broadcast %74 : vector<256x1xi1> to vector<256x128xi1>
    %76 = vector.broadcast %cst_38 : f32 to vector<256x128xf32>
    %77 = arith.select %75, %73, %76 : vector<256x128xi1>, vector<256x128xf32>
    %78 = arith.truncf %71 : vector<256x128xf32> to vector<256x128xbf16>
    %79 = arith.truncf %65 : vector<256x128xf32> to vector<256x128xbf16>
    %80 = arith.truncf %77 : vector<256x128xf32> to vector<256x128xbf16>
    %81 = tpu.concatenate %78, %79, %80 in 1 : vector<256x128xbf16>, vector<256x128xbf16>, vector<256x128xbf16> -> vector<256x384xbf16>
    %c16 = arith.constant 16 : index
    %c0_39 = arith.constant 0 : index
    %82 = vector.load %arg16[%c16, %c0_39] : memref<288x384xbf16, #tpu.memory_space<vmem>>, vector<256x384xbf16>
    tpu.vector_store %arg16[%c16, %c0_39], %81 {strides = array<i32>} : memref<288x384xbf16, #tpu.memory_space<vmem>>, vector<256x384xbf16>,
    %c0_40 = arith.constant 0 : index
    %c0_41 = arith.constant 0 : index
    %83 = vector.load %arg16[%c0_40, %c0_41] : memref<288x384xbf16, #tpu.memory_space<vmem>>, vector<256x384xbf16>
    %84 = vector.extract_strided_slice %46 {offsets = [0, 0, 0], sizes = [1, 384, 128], strides = [1, 1, 1]} : vector<3x384x128xbf16> to vector<1x384x128xbf16>
    %85 = vector.shape_cast %84 : vector<1x384x128xbf16> to vector<384x128xbf16>
    %cst_42 = arith.constant dense<0.000000e+00> : vector<256x128xf32>
    %86 = tpu.matmul %83, %85, %cst_42 {dimension_numbers = #tpu.dot_dimension_numbers<[1], [0], [0], [1], [0, 0, 1, 1], [], []>} : vector<256x384xbf16>, vector<384x128xbf16>, vector<256x128xf32> -> vector<256x128xf32>
    %87 = vector.extract_strided_slice %46 {offsets = [1, 0, 0], sizes = [1, 384, 128], strides = [1, 1, 1]} : vector<3x384x128xbf16> to vector<1x384x128xbf16>
    %88 = vector.shape_cast %87 : vector<1x384x128xbf16> to vector<384x128xbf16>
    %cst_43 = arith.constant dense<0.000000e+00> : vector<256x128xf32>
    %89 = tpu.matmul %81, %88, %cst_43 {dimension_numbers = #tpu.dot_dimension_numbers<[1], [0], [0], [1], [0, 0, 1, 1], [], []>} : vector<256x384xbf16>, vector<384x128xbf16>, vector<256x128xf32> -> vector<256x128xf32>
    %90 = arith.addf %86, %89 : vector<256x128xf32>
    %c32 = arith.constant 32 : index
    %c0_44 = arith.constant 0 : index
    %91 = vector.load %arg16[%c32, %c0_44] : memref<288x384xbf16, #tpu.memory_space<vmem>>, vector<256x384xbf16>
    %92 = vector.extract_strided_slice %46 {offsets = [2, 0, 0], sizes = [1, 384, 128], strides = [1, 1, 1]} : vector<3x384x128xbf16> to vector<1x384x128xbf16>
    %93 = vector.shape_cast %92 : vector<1x384x128xbf16> to vector<384x128xbf16>
    %cst_45 = arith.constant dense<0.000000e+00> : vector<256x128xf32>
    %94 = tpu.matmul %91, %93, %cst_45 {dimension_numbers = #tpu.dot_dimension_numbers<[1], [0], [0], [1], [0, 0, 1, 1], [], []>} : vector<256x384xbf16>, vector<384x128xbf16>, vector<256x128xf32> -> vector<256x128xf32>
    %95 = arith.addf %90, %94 : vector<256x128xf32>
    %c0_46 = arith.constant 0 : index
    %c0_47 = arith.constant 0 : index
    %c0_48 = arith.constant 0 : index
    %96 = vector.load %arg10[%c0_46, %c0_47, %c0_48] : memref<2x1x128xf32, #tpu.memory_space<vmem>>, vector<1x1x128xf32>
    %97 = vector.shape_cast %96 : vector<1x1x128xf32> to vector<1x128xf32>
    %98 = vector.broadcast %97 : vector<1x128xf32> to vector<256x128xf32>
    %99 = arith.mulf %95, %98 : vector<256x128xf32>
    %c0_49 = arith.constant 0 : index
    %c0_50 = arith.constant 0 : index
    %c0_51 = arith.constant 0 : index
    %100 = vector.load %arg11[%c0_49, %c0_50, %c0_51] : memref<2x1x128xf32, #tpu.memory_space<vmem>>, vector<1x1x128xf32>
    %101 = vector.shape_cast %100 : vector<1x1x128xf32> to vector<1x128xf32>
    %102 = vector.broadcast %101 : vector<1x128xf32> to vector<256x128xf32>
    %103 = arith.addf %99, %102 : vector<256x128xf32>
    %cst_52 = arith.constant 0.000000e+00 : f32
    %104 = vector.broadcast %cst_52 : f32 to vector<256x128xf32>
    %105 = arith.subf %104, %103 : vector<256x128xf32>
    %106 = math.exp %105 : vector<256x128xf32>
    %cst_53 = arith.constant 1.000000e+00 : f32
    %107 = vector.broadcast %cst_53 : f32 to vector<256x128xf32>
    %108 = arith.addf %107, %106 : vector<256x128xf32>
    %109 = tpu.reciprocal %108 {approx = true} : vector<256x128xf32> -> vector<256x128xf32>
    %110 = arith.mulf %103, %109 : vector<256x128xf32>
    %111 = arith.addf %110, %17 : vector<256x128xf32>
    %c1 = arith.constant 1 : index
    %c0_54 = arith.constant 0 : index
    %c0_55 = arith.constant 0 : index
    %c0_56 = arith.constant 0 : index
    %112 = vector.load %arg9[%c1, %c0_54, %c0_55, %c0_56] : memref<2x3x384x128xbf16, #tpu.memory_space<vmem>>, vector<1x3x384x128xbf16>
    %113 = vector.shape_cast %112 : vector<1x3x384x128xbf16> to vector<3x384x128xbf16>
    %114 = arith.truncf %111 : vector<256x128xf32> to vector<256x128xbf16>
    %c1_57 = arith.constant 1 : index
    %c0_58 = arith.constant 0 : index
    %c0_59 = arith.constant 0 : index
    %115 = vector.load %arg6[%c1_57, %c0_58, %c0_59] : memref<2x128x128xbf16, #tpu.memory_space<vmem>>, vector<1x128x128xbf16>
    %116 = vector.shape_cast %115 : vector<1x128x128xbf16> to vector<128x128xbf16>
    %cst_60 = arith.constant dense<0.000000e+00> : vector<256x128xf32>
    %117 = tpu.matmul %114, %116, %cst_60 {dimension_numbers = #tpu.dot_dimension_numbers<[1], [0], [0], [1], [0, 0, 1, 1], [], []>} : vector<256x128xbf16>, vector<128x128xbf16>, vector<256x128xf32> -> vector<256x128xf32>
    %c1_61 = arith.constant 1 : index
    %c0_62 = arith.constant 0 : index
    %c0_63 = arith.constant 0 : index
    %118 = vector.load %arg7[%c1_61, %c0_62, %c0_63] : memref<2x1x128xf32, #tpu.memory_space<vmem>>, vector<1x1x128xf32>
    %119 = vector.shape_cast %118 : vector<1x1x128xf32> to vector<1x128xf32>
    %120 = vector.broadcast %119 : vector<1x128xf32> to vector<256x128xf32>
    %121 = arith.mulf %117, %120 : vector<256x128xf32>
    %c1_64 = arith.constant 1 : index
    %c0_65 = arith.constant 0 : index
    %c0_66 = arith.constant 0 : index
    %122 = vector.load %arg8[%c1_64, %c0_65, %c0_66] : memref<2x1x128xf32, #tpu.memory_space<vmem>>, vector<1x1x128xf32>
    %123 = vector.shape_cast %122 : vector<1x1x128xf32> to vector<1x128xf32>
    %124 = vector.broadcast %123 : vector<1x128xf32> to vector<256x128xf32>
    %125 = arith.addf %121, %124 : vector<256x128xf32>
    %cst_67 = arith.constant 0.000000e+00 : f32
    %126 = vector.broadcast %cst_67 : f32 to vector<256x128xf32>
    %127 = arith.subf %126, %125 : vector<256x128xf32>
    %128 = math.exp %127 : vector<256x128xf32>
    %cst_68 = arith.constant 1.000000e+00 : f32
    %129 = vector.broadcast %cst_68 : f32 to vector<256x128xf32>
    %130 = arith.addf %129, %128 : vector<256x128xf32>
    %131 = tpu.reciprocal %130 {approx = true} : vector<256x128xf32> -> vector<256x128xf32>
    %132 = arith.mulf %125, %131 : vector<256x128xf32>
    %133 = vector.extract_strided_slice %132 {offsets = [0, 0], sizes = [255, 128], strides = [1, 1]} : vector<256x128xf32> to vector<255x128xf32>
    %134 = tpu.concatenate %44, %133 in 0 : vector<1x128xf32>, vector<255x128xf32> -> vector<256x128xf32>
    %cst_69 = arith.constant 0.000000e+00 : f32
    %135 = vector.shape_cast %41 : vector<256x1xi1> to vector<256x1xi1>
    %136 = vector.broadcast %135 : vector<256x1xi1> to vector<256x128xi1>
    %137 = vector.broadcast %cst_69 : f32 to vector<256x128xf32>
    %138 = arith.select %136, %134, %137 : vector<256x128xi1>, vector<256x128xf32>
    %139 = vector.extract_strided_slice %132 {offsets = [1, 0], sizes = [255, 128], strides = [1, 1]} : vector<256x128xf32> to vector<255x128xf32>
    %140 = tpu.concatenate %139, %44 in 0 : vector<255x128xf32>, vector<1x128xf32> -> vector<256x128xf32>
    %cst_70 = arith.constant 0.000000e+00 : f32
    %141 = vector.shape_cast %43 : vector<256x1xi1> to vector<256x1xi1>
    %142 = vector.broadcast %141 : vector<256x1xi1> to vector<256x128xi1>
    %143 = vector.broadcast %cst_70 : f32 to vector<256x128xf32>
    %144 = arith.select %142, %140, %143 : vector<256x128xi1>, vector<256x128xf32>
    %145 = arith.truncf %138 : vector<256x128xf32> to vector<256x128xbf16>
    %146 = arith.truncf %132 : vector<256x128xf32> to vector<256x128xbf16>
    %147 = arith.truncf %144 : vector<256x128xf32> to vector<256x128xbf16>
    %148 = tpu.concatenate %145, %146, %147 in 1 : vector<256x128xbf16>, vector<256x128xbf16>, vector<256x128xbf16> -> vector<256x384xbf16>
    %c16_71 = arith.constant 16 : index
    %c0_72 = arith.constant 0 : index
    %149 = vector.load %arg16[%c16_71, %c0_72] : memref<288x384xbf16, #tpu.memory_space<vmem>>, vector<256x384xbf16>
    tpu.vector_store %arg16[%c16_71, %c0_72], %148 {strides = array<i32>} : memref<288x384xbf16, #tpu.memory_space<vmem>>, vector<256x384xbf16>,
    %c0_73 = arith.constant 0 : index
    %c0_74 = arith.constant 0 : index
    %150 = vector.load %arg16[%c0_73, %c0_74] : memref<288x384xbf16, #tpu.memory_space<vmem>>, vector<256x384xbf16>
    %151 = vector.extract_strided_slice %113 {offsets = [0, 0, 0], sizes = [1, 384, 128], strides = [1, 1, 1]} : vector<3x384x128xbf16> to vector<1x384x128xbf16>
    %152 = vector.shape_cast %151 : vector<1x384x128xbf16> to vector<384x128xbf16>
    %cst_75 = arith.constant dense<0.000000e+00> : vector<256x128xf32>
    %153 = tpu.matmul %150, %152, %cst_75 {dimension_numbers = #tpu.dot_dimension_numbers<[1], [0], [0], [1], [0, 0, 1, 1], [], []>} : vector<256x384xbf16>, vector<384x128xbf16>, vector<256x128xf32> -> vector<256x128xf32>
    %154 = vector.extract_strided_slice %113 {offsets = [1, 0, 0], sizes = [1, 384, 128], strides = [1, 1, 1]} : vector<3x384x128xbf16> to vector<1x384x128xbf16>
    %155 = vector.shape_cast %154 : vector<1x384x128xbf16> to vector<384x128xbf16>
    %cst_76 = arith.constant dense<0.000000e+00> : vector<256x128xf32>
    %156 = tpu.matmul %148, %155, %cst_76 {dimension_numbers = #tpu.dot_dimension_numbers<[1], [0], [0], [1], [0, 0, 1, 1], [], []>} : vector<256x384xbf16>, vector<384x128xbf16>, vector<256x128xf32> -> vector<256x128xf32>
    %157 = arith.addf %153, %156 : vector<256x128xf32>
    %c32_77 = arith.constant 32 : index
    %c0_78 = arith.constant 0 : index
    %158 = vector.load %arg16[%c32_77, %c0_78] : memref<288x384xbf16, #tpu.memory_space<vmem>>, vector<256x384xbf16>
    %159 = vector.extract_strided_slice %113 {offsets = [2, 0, 0], sizes = [1, 384, 128], strides = [1, 1, 1]} : vector<3x384x128xbf16> to vector<1x384x128xbf16>
    %160 = vector.shape_cast %159 : vector<1x384x128xbf16> to vector<384x128xbf16>
    %cst_79 = arith.constant dense<0.000000e+00> : vector<256x128xf32>
    %161 = tpu.matmul %158, %160, %cst_79 {dimension_numbers = #tpu.dot_dimension_numbers<[1], [0], [0], [1], [0, 0, 1, 1], [], []>} : vector<256x384xbf16>, vector<384x128xbf16>, vector<256x128xf32> -> vector<256x128xf32>
    %162 = arith.addf %157, %161 : vector<256x128xf32>
    %c1_80 = arith.constant 1 : index
    %c0_81 = arith.constant 0 : index
    %c0_82 = arith.constant 0 : index
    %163 = vector.load %arg10[%c1_80, %c0_81, %c0_82] : memref<2x1x128xf32, #tpu.memory_space<vmem>>, vector<1x1x128xf32>
    %164 = vector.shape_cast %163 : vector<1x1x128xf32> to vector<1x128xf32>
    %165 = vector.broadcast %164 : vector<1x128xf32> to vector<256x128xf32>
    %166 = arith.mulf %162, %165 : vector<256x128xf32>
    %c1_83 = arith.constant 1 : index
    %c0_84 = arith.constant 0 : index
    %c0_85 = arith.constant 0 : index
    %167 = vector.load %arg11[%c1_83, %c0_84, %c0_85] : memref<2x1x128xf32, #tpu.memory_space<vmem>>, vector<1x1x128xf32>
    %168 = vector.shape_cast %167 : vector<1x1x128xf32> to vector<1x128xf32>
    %169 = vector.broadcast %168 : vector<1x128xf32> to vector<256x128xf32>
    %170 = arith.addf %166, %169 : vector<256x128xf32>
    %cst_86 = arith.constant 0.000000e+00 : f32
    %171 = vector.broadcast %cst_86 : f32 to vector<256x128xf32>
    %172 = arith.subf %171, %170 : vector<256x128xf32>
    %173 = math.exp %172 : vector<256x128xf32>
    %cst_87 = arith.constant 1.000000e+00 : f32
    %174 = vector.broadcast %cst_87 : f32 to vector<256x128xf32>
    %175 = arith.addf %174, %173 : vector<256x128xf32>
    %176 = tpu.reciprocal %175 {approx = true} : vector<256x128xf32> -> vector<256x128xf32>
    %177 = arith.mulf %170, %176 : vector<256x128xf32>
    %178 = arith.addf %177, %111 : vector<256x128xf32>
    %179 = tpu.concatenate %178, %18 in 1 : vector<256x128xf32>, vector<256x128xf32> -> vector<256x256xf32>
    %180 = arith.truncf %179 : vector<256x256xf32> to vector<256x256xbf16>
    %c0_88 = arith.constant 0 : index
    %c0_89 = arith.constant 0 : index
    %181 = vector.load %arg12[%c0_88, %c0_89] : memref<256x128xbf16, #tpu.memory_space<vmem>>, vector<256x128xbf16>
    %cst_90 = arith.constant dense<0.000000e+00> : vector<256x128xf32>
    %182 = tpu.matmul %180, %181, %cst_90 {dimension_numbers = #tpu.dot_dimension_numbers<[1], [0], [0], [1], [0, 0, 1, 1], [], []>} : vector<256x256xbf16>, vector<256x128xbf16>, vector<256x128xf32> -> vector<256x128xf32>
    %c0_91 = arith.constant 0 : index
    %c0_92 = arith.constant 0 : index
    %183 = vector.load %arg13[%c0_91, %c0_92] : memref<1x128xf32, #tpu.memory_space<vmem>>, vector<1x128xf32>
    %184 = vector.broadcast %183 : vector<1x128xf32> to vector<256x128xf32>
    %185 = arith.mulf %182, %184 : vector<256x128xf32>
    %c0_93 = arith.constant 0 : index
    %c0_94 = arith.constant 0 : index
    %186 = vector.load %arg14[%c0_93, %c0_94] : memref<1x128xf32, #tpu.memory_space<vmem>>, vector<1x128xf32>
    %187 = vector.broadcast %186 : vector<1x128xf32> to vector<256x128xf32>
    %188 = arith.addf %185, %187 : vector<256x128xf32>
    %cst_95 = arith.constant 0.000000e+00 : f32
    %189 = vector.broadcast %cst_95 : f32 to vector<256x128xf32>
    %190 = arith.subf %189, %188 : vector<256x128xf32>
    %191 = math.exp %190 : vector<256x128xf32>
    %cst_96 = arith.constant 1.000000e+00 : f32
    %192 = vector.broadcast %cst_96 : f32 to vector<256x128xf32>
    %193 = arith.addf %192, %191 : vector<256x128xf32>
    %194 = tpu.reciprocal %193 {approx = true} : vector<256x128xf32> -> vector<256x128xf32>
    %195 = arith.mulf %188, %194 : vector<256x128xf32>
    %196 = arith.truncf %195 : vector<256x128xf32> to vector<256x128xbf16>
    %c0_97 = arith.constant 0 : index
    %c0_98 = arith.constant 0 : index
    %c0_99 = arith.constant 0 : index
    %197 = vector.load %arg15[%c0_97, %c0_98, %c0_99] : memref<1x256x128xbf16, #tpu.memory_space<vmem>>, vector<1x256x128xbf16>
    %198 = vector.shape_cast %197 : vector<1x256x128xbf16> to vector<256x128xbf16>
    %199 = vector.shape_cast %196 : vector<256x128xbf16> to vector<1x256x128xbf16>
    tpu.vector_store %arg15[%c0_97, %c0_98, %c0_99], %199 {strides = array<i32>} : memref<1x256x128xbf16, #tpu.memory_space<vmem>>, vector<1x256x128xbf16>,
    return
  }
  func.func @transform_0(%arg0: i32, %arg1: i32) -> (i32, i32, i32, i32) {
    %c0_i32 = arith.constant 0 : i32
    %c0_i32_0 = arith.constant 0 : i32
    %c0_i32_1 = arith.constant 0 : i32
    return %arg0, %arg1, %c0_i32, %c0_i32_0 : i32, i32, i32, i32
  }
  func.func @transform_1(%arg0: i32, %arg1: i32) -> (i32, i32) {
    %c0_i32 = arith.constant 0 : i32
    %c0_i32_0 = arith.constant 0 : i32
    %c0_i32_1 = arith.constant 0 : i32
    return %c0_i32, %c0_i32_0 : i32, i32
  }
  func.func @transform_2(%arg0: i32, %arg1: i32) -> (i32, i32) {
    %c0_i32 = arith.constant 0 : i32
    %c0_i32_0 = arith.constant 0 : i32
    %c0_i32_1 = arith.constant 0 : i32
    return %c0_i32, %c0_i32_0 : i32, i32
  }
  func.func @transform_3(%arg0: i32, %arg1: i32) -> (i32, i32) {
    %c0_i32 = arith.constant 0 : i32
    %c0_i32_0 = arith.constant 0 : i32
    %c0_i32_1 = arith.constant 0 : i32
    return %c0_i32, %c0_i32_0 : i32, i32
  }
  func.func @transform_4(%arg0: i32, %arg1: i32) -> (i32, i32, i32) {
    %c0_i32 = arith.constant 0 : i32
    %c0_i32_0 = arith.constant 0 : i32
    %c0_i32_1 = arith.constant 0 : i32
    %c0_i32_2 = arith.constant 0 : i32
    return %c0_i32, %c0_i32_0, %c0_i32_1 : i32, i32, i32
  }
  func.func @transform_5(%arg0: i32, %arg1: i32) -> (i32, i32, i32) {
    %c0_i32 = arith.constant 0 : i32
    %c0_i32_0 = arith.constant 0 : i32
    %c0_i32_1 = arith.constant 0 : i32
    %c0_i32_2 = arith.constant 0 : i32
    return %c0_i32, %c0_i32_0, %c0_i32_1 : i32, i32, i32
  }
  func.func @transform_6(%arg0: i32, %arg1: i32) -> (i32, i32, i32) {
    %c0_i32 = arith.constant 0 : i32
    %c0_i32_0 = arith.constant 0 : i32
    %c0_i32_1 = arith.constant 0 : i32
    %c0_i32_2 = arith.constant 0 : i32
    return %c0_i32, %c0_i32_0, %c0_i32_1 : i32, i32, i32
  }
  func.func @transform_7(%arg0: i32, %arg1: i32) -> (i32, i32, i32, i32) {
    %c0_i32 = arith.constant 0 : i32
    %c0_i32_0 = arith.constant 0 : i32
    %c0_i32_1 = arith.constant 0 : i32
    %c0_i32_2 = arith.constant 0 : i32
    %c0_i32_3 = arith.constant 0 : i32
    return %c0_i32, %c0_i32_0, %c0_i32_1, %c0_i32_2 : i32, i32, i32, i32
  }
  func.func @transform_8(%arg0: i32, %arg1: i32) -> (i32, i32, i32) {
    %c0_i32 = arith.constant 0 : i32
    %c0_i32_0 = arith.constant 0 : i32
    %c0_i32_1 = arith.constant 0 : i32
    %c0_i32_2 = arith.constant 0 : i32
    return %c0_i32, %c0_i32_0, %c0_i32_1 : i32, i32, i32
  }
  func.func @transform_9(%arg0: i32, %arg1: i32) -> (i32, i32, i32) {
    %c0_i32 = arith.constant 0 : i32
    %c0_i32_0 = arith.constant 0 : i32
    %c0_i32_1 = arith.constant 0 : i32
    %c0_i32_2 = arith.constant 0 : i32
    return %c0_i32, %c0_i32_0, %c0_i32_1 : i32, i32, i32
  }
  func.func @transform_10(%arg0: i32, %arg1: i32) -> (i32, i32) {
    %c0_i32 = arith.constant 0 : i32
    %c0_i32_0 = arith.constant 0 : i32
    %c0_i32_1 = arith.constant 0 : i32
    return %c0_i32, %c0_i32_0 : i32, i32
  }
  func.func @transform_11(%arg0: i32, %arg1: i32) -> (i32, i32) {
    %c0_i32 = arith.constant 0 : i32
    %c0_i32_0 = arith.constant 0 : i32
    %c0_i32_1 = arith.constant 0 : i32
    return %c0_i32, %c0_i32_0 : i32, i32
  }
  func.func @transform_12(%arg0: i32, %arg1: i32) -> (i32, i32) {
    %c0_i32 = arith.constant 0 : i32
    %c0_i32_0 = arith.constant 0 : i32
    %c0_i32_1 = arith.constant 0 : i32
    return %c0_i32, %c0_i32_0 : i32, i32
  }
  func.func @transform_13(%arg0: i32, %arg1: i32) -> (i32, i32, i32) {
    %c0_i32 = arith.constant 0 : i32
    %c0_i32_0 = arith.constant 0 : i32
    return %arg0, %arg1, %c0_i32 : i32, i32, i32
  }
}

</mosaic_0001>

<bundles_post_ra>
// kernel: tpu_custom_call.1
= control target key start
LH: loop header
LB: loop body
LE: loop exit
PB: predicated region body
PF: predicated region fallthrough
CT: control target
= control target key end

     0   :  { %s18278_s0 = inlined_call_operand.hbm [shape: bf16[2,1,256,4], index: 0, kind: input, shape index: {}]   ;;  %s18279_s1 = inlined_call_operand.hbm [shape: bf16[4,256], index: 1, kind: input, shape index: {}]   ;;  %s18280_s2 = inlined_call_operand.hbm [shape: f32[1,256], index: 2, kind: input, shape index: {}]   ;;  %s18281_s3 = inlined_call_operand.hbm [shape: f32[1,256], index: 3, kind: input, shape index: {}]   ;;  %s18282_s4 = inlined_call_operand.hbm [shape: bf16[2,128,128], index: 4, kind: input, shape index: {}]   ;;  %s18283_s5 = inlined_call_operand.hbm [shape: f32[2,1,128], index: 5, kind: input, shape index: {}]   ;;  %s18284_s6 = inlined_call_operand.hbm [shape: f32[2,1,128], index: 6, kind: input, shape index: {}]   ;;  %s18285_s7 = inlined_call_operand.hbm [shape: bf16[2,3,384,128], index: 7, kind: input, shape index: {}]   ;;  %s18286_s8 = inlined_call_operand.hbm [shape: f32[2,1,128], index: 8, kind: input, shape index: {}]   ;;  %s18287_s9 = inlined_call_operand.hbm [shape: f32[2,1,128], index: 9, kind: input, shape index: {}]   ;;  %s18288_s10 = inlined_call_operand.hbm [shape: bf16[256,128], index: 10, kind: input, shape index: {}]   ;;  %s18289_s11 = inlined_call_operand.hbm [shape: f32[1,128], index: 11, kind: input, shape index: {}]   ;;  %s18290_s12 = inlined_call_operand.hbm [shape: f32[1,128], index: 12, kind: input, shape index: {}]   ;;  %s18291_s13 = inlined_call_operand.hbm [shape: bf16[2,256,128], index: 13, kind: output, shape index: {}]  }
   0x1   :  { %18626 = sst [smem:[#allocation151_spill]] %s18278_s0 }
   0x2   :  { %18627 = sst [smem:[#allocation152_spill]] %s18279_s1 }
   0x3   :  { %18628 = sst [smem:[#allocation153_spill]] %s18280_s2 }
   0x4   :  { %18629 = sst [smem:[#allocation154_spill]] %s18281_s3 }
   0x5   :  { %18630 = sst [smem:[#allocation155_spill]] %s18291_s13 }
   0x6   :  { %18 = vsyncpa [#allocation4], 0 }
   0x7   :  { %20 = vsyncpa [#allocation4 + $0x1], 0 }
   0x8   :  { %21 = vsyncpa [#allocation7], 0 }
   0x9   :  { %22 = vsyncpa [#allocation10], 0 }
   0xa   :  { %23 = vsyncpa [#allocation13], 0 }
   0xb   :  { %24 = vsyncpa [#allocation16], 0 }
   0xc   :  { %25 = vsyncpa [#allocation19], 0 }
   0xd   :  { %26 = vsyncpa [#allocation22], 0 }
   0xe   :  { %27 = vsyncpa [#allocation5], 0 }
   0xf   :  { %29 = vsyncpa [#allocation5 + $0x1], 0  ;;  %s13390_s25 = smov 0   ;;  %s13392_s26 = smov 0  }
  0x10   :  { %s13394_s27 = smov 0   ;;  %s13396_s28 = smov 0  }
  0x11   :  { %s13398_s29 = smov 0   ;;  %s13400_s30 = smov 0  }
  0x12 LB: > { %18631 = sst [smem:[#allocation33_spill]] %s13276_s25  ;;  %s18292_s14 = sadd.s32 4294967295, %s13296_s30   ;;  %s13296_s30 = sphi %s13400_s30, %s35_s30   ;;  %s13292_s29 = sphi %s13398_s29, %s19424_s29   ;;  %s13288_s28 = sphi %s13396_s28, %s19423_s28   ;;  %s13284_s27 = sphi %s13394_s27, %s19422_s27   ;;  %s13280_s26 = sphi %s13392_s26, %s19421_s26   ;;  %s13276_s25 = sphi %s13390_s25, %s19420_s25  }
  0x13   : > { %18632 = sst [smem:[#allocation34_spill]] %s13280_s26  ;;  %p8877_p0 = scmp.ge.s32.totalorder %s13296_s30, 1 }
  0x14   : > { %18633 = sst [smem:[#allocation35_spill]] %s13288_s28  ;;  %p13424_p1 = scmp.eq.s32.totalorder %s18292_s14, 0 }
  0x15   : > { %p360_p2 = scmp.lt.s32.totalorder %s13296_s30, 3  ;;  %s13298_s17 = smov [#allocation6]  }
  0x16   : > { %s18634_s15 = scalar_select %p13424_p1, 1, 0 }
  0x17   : > { %p13429_p3 = pnand %p8877_p0, %p360_p2  ;;  %s373_s18 = sshll.u32 %s13298_s17, 4  ;;  %s374_s18 = int_to_ptr.vmem [resolvable:$true] %s373_s18 }
  0x18   : > { %18635 = sst [smem:[#allocation36_spill]] %s18634_s15  ;;  %s13299_s19 = smov [#allocation9]  }
  0x19   : > { %s18636_s16 = scalar_select %p13429_p3, 1, 0 }
  0x1a   : > { %p11595_p5 = pneg %p13429_p3  ;;  %s395_s20 = sshll.u32 %s13299_s19, 4  ;;  %s13442_s20 = int_to_ptr.vmem [resolvable:$true] %s395_s20 }
  0x1b   : > { %18637 = sst [smem:[#allocation37_spill]] %s18636_s16  ;;  %s13300_s22 = smov [#allocation12]  }
  0x1c   : > { %p13438_p6 = pnand %p11595_p5, %p13424_p1  ;;  %s418_s23 = sshll.u32 %s13300_s22, 4  ;;  %s13444_s23 = int_to_ptr.vmem [resolvable:$true] %s418_s23 }
  0x1d   : > { %s18639_s1 = sld [smem:[#allocation152_spill]] }
  0x1e   : > { %p13454_p8 = pneg %p13438_p6 }
  0x23   : > { %s12824_s14 = scalar_lea.hbm %s18639_s1, 64 }
  0x24   : > { %p12825_p7 = scmp.ne.s32.totalorder %s18639_s1, %s12824_s14  ;;  %p12831_p11 = scmp.lt.u32.totalorder %s12824_s14, %s18639_s1 }
  0x26   : > { %p12827_p9 = pnand %p13454_p8, %p12825_p7 }
  0x28   : > { %p12828_p10 = pneg %p12827_p9 }
  0x2a   : > { %p12833_p12 = pnand %p12831_p11, %p12828_p10 }
  0x2c   : > { %12836 = shalt.err (!%p12833_p12)
}
  0x2d   : > { %s12837_s24 = scalar_lea.vmem %s374_s18, 64  ;;  %p12845_p5 = scmp.lt.s32.totalorder %s374_s18, %s374_s18 }
  0x2e   : > { %p12838_p13 = scmp.ne.s32.totalorder %s374_s18, %s12837_s24  ;;  %p12846_p4 = scmp.lt.s32.totalorder %s12837_s24, %s12837_s24 }
  0x30   : > { %p12840_p0 = pnand %p12838_p13, %p13454_p8  ;;  %p12847_p3 = por %p12846_p4, %p12845_p5 }
  0x32   : > { %p12841_p2 = pneg %p12840_p0 }
  0x34   : > { %p12848_p1 = pnand %p12847_p3, %p12841_p2 }
  0x36   : > { %12851 = shalt.err (!%p12848_p1)
}
  0x37   : > { %11598 = dma.hbm_to_vmem [thread:$0]  (!%p13438_p6), %s18639_s1, 64, %s374_s18, [#allocation7]  }
  0x38   : > { %s18641_s3 = sld [smem:[#allocation154_spill]] }
  0x3e   : > { %s12852_s17 = scalar_lea.hbm %s18641_s3, 32 }
  0x3f   : > { %p12853_p7 = scmp.ne.s32.totalorder %s18641_s3, %s12852_s17  ;;  %p12859_p1 = scmp.lt.u32.totalorder %s12852_s17, %s18641_s3 }
  0x41   : > { %p12855_p9 = pnand %p12853_p7, %p13454_p8 }
  0x43   : > { %p12856_p4 = pneg %p12855_p9 }
  0x45   : > { %p12861_p3 = pnand %p12859_p1, %p12856_p4 }
  0x47   : > { %12864 = shalt.err (!%p12861_p3)
}
  0x48   : > { %s12865_s18 = scalar_lea.vmem %s13442_s20, 32  ;;  %p12873_p13 = scmp.lt.s32.totalorder %s13442_s20, %s13442_s20 }
  0x49   : > { %p12866_p10 = scmp.ne.s32.totalorder %s13442_s20, %s12865_s18  ;;  %p12874_p0 = scmp.lt.s32.totalorder %s12865_s18, %s12865_s18 }
  0x4b   : > { %p12868_p11 = pnand %p12866_p10, %p13454_p8  ;;  %p12875_p2 = por %p12874_p0, %p12873_p13 }
  0x4d   : > { %p12869_p12 = pneg %p12868_p11 }
  0x4f   : > { %p12876_p5 = pnand %p12875_p2, %p12869_p12 }
  0x51   : > { %12879 = shalt.err (!%p12876_p5)
}
  0x52   : > { %11604 = dma.hbm_to_vmem [thread:$0]  (!%p13438_p6), %s18641_s3, 32, %s13442_s20, [#allocation10]  }
  0x53   : > { %s12880_s14 = scalar_lea.hbm %s18283_s5, 32 }
  0x54   : > { %p12881_p7 = scmp.ne.s32.totalorder %s18283_s5, %s12880_s14  ;;  %p12887_p1 = scmp.lt.u32.totalorder %s12880_s14, %s18283_s5 }
  0x56   : > { %p12883_p9 = pnand %p12881_p7, %p13454_p8 }
  0x58   : > { %p12884_p4 = pneg %p12883_p9 }
  0x5a   : > { %p12889_p3 = pnand %p12887_p1, %p12884_p4 }
  0x5c   : > { %12892 = shalt.err (!%p12889_p3)
}
  0x5d   : > { %s12893_s20 = scalar_lea.vmem %s13444_s23, 32  ;;  %p12901_p13 = scmp.lt.s32.totalorder %s13444_s23, %s13444_s23 }
  0x5e   : > { %p12894_p10 = scmp.ne.s32.totalorder %s13444_s23, %s12893_s20  ;;  %p12902_p0 = scmp.lt.s32.totalorder %s12893_s20, %s12893_s20 }
  0x60   : > { %p12896_p11 = pnand %p12894_p10, %p13454_p8  ;;  %p12903_p2 = por %p12902_p0, %p12901_p13 }
  0x62   : > { %p12897_p12 = pneg %p12896_p11 }
  0x64   : > { %p12904_p5 = pnand %p12903_p2, %p12897_p12 }
  0x66   : > { %12907 = shalt.err (!%p12904_p5)
}
  0x67   : > { %s13301_s18 = smov 16   ;;  %s13302_s0 = smov 1  }
  0x68   : > { %11610 = dma.hbm_to_vmem [thread:$0]  (!%p13438_p6), %s18283_s5, 32, %s13444_s23, [#allocation13], %s13301_s18, %s13301_s18, %s13302_s0  }
  0x69   : > { %s13303_s28 = smov [#allocation15]   ;;  %s13304_s16 = smov [#allocation18]  }
  0x6a   : > { %s444_s14 = sshll.u32 %s13303_s28, 4  ;;  %s470_s17 = sshll.u32 %s13304_s16, 4  ;;  %s445_s14 = int_to_ptr.vmem [resolvable:$true] %s444_s14  ;;  %s471_s17 = int_to_ptr.vmem [resolvable:$true] %s470_s17 }
  0x6b   : > { %s12908_s20 = scalar_lea.hbm %s18285_s7, 18432 }
  0x6c   : > { %p12909_p7 = scmp.ne.s32.totalorder %s18285_s7, %s12908_s20  ;;  %p12915_p1 = scmp.lt.u32.totalorder %s12908_s20, %s18285_s7 }
  0x6e   : > { %p12911_p9 = pnand %p12909_p7, %p13454_p8 }
  0x70   : > { %p12912_p4 = pneg %p12911_p9 }
  0x72   : > { %p12917_p3 = pnand %p12915_p1, %p12912_p4 }
  0x74   : > { %12920 = shalt.err (!%p12917_p3)
}
  0x75   : > { %s12921_s23 = scalar_lea.vmem %s445_s14, 18432  ;;  %p12929_p13 = scmp.lt.s32.totalorder %s445_s14, %s445_s14 }
  0x76   : > { %p12922_p10 = scmp.ne.s32.totalorder %s445_s14, %s12921_s23  ;;  %p12930_p0 = scmp.lt.s32.totalorder %s12921_s23, %s12921_s23 }
  0x78   : > { %p12924_p11 = pnand %p12922_p10, %p13454_p8  ;;  %p12931_p2 = por %p12930_p0, %p12929_p13 }
  0x7a   : > { %p12925_p12 = pneg %p12924_p11 }
  0x7c   : > { %p12932_p5 = pnand %p12931_p2, %p12925_p12 }
  0x7e   : > { %12935 = shalt.err (!%p12932_p5)
}
  0x7f   : > { %s18302_s1 = smov 64   ;;  %s18304_s3 = smov 4  }
  0x80   : > { %11616 = dma.hbm_to_vmem [thread:$0]  (!%p13438_p6), %s18285_s7, 18432, %s445_s14, [#allocation16], %s18302_s1, %s18302_s1, %s18304_s3  }
  0x81   : > { %s12936_s28 = scalar_lea.hbm %s18287_s9, 32 }
  0x82   : > { %p12937_p7 = scmp.ne.s32.totalorder %s18287_s9, %s12936_s28  ;;  %p12943_p1 = scmp.lt.u32.totalorder %s12936_s28, %s18287_s9 }
  0x84   : > { %p12939_p9 = pnand %p12937_p7, %p13454_p8 }
  0x86   : > { %p12940_p4 = pneg %p12939_p9 }
  0x88   : > { %p12945_p3 = pnand %p12943_p1, %p12940_p4 }
  0x8a   : > { %12948 = shalt.err (!%p12945_p3)
}
  0x8b   : > { %s12949_s23 = scalar_lea.vmem %s471_s17, 32  ;;  %p12957_p13 = scmp.lt.s32.totalorder %s471_s17, %s471_s17 }
  0x8c   : > { %p12950_p10 = scmp.ne.s32.totalorder %s471_s17, %s12949_s23  ;;  %p12958_p0 = scmp.lt.s32.totalorder %s12949_s23, %s12949_s23 }
  0x8e   : > { %p12952_p11 = pnand %p12950_p10, %p13454_p8  ;;  %p12959_p2 = por %p12958_p0, %p12957_p13 }
  0x90   : > { %p12953_p12 = pneg %p12952_p11 }
  0x92   : > { %p12960_p5 = pnand %p12959_p2, %p12953_p12 }
  0x94   : > { %12963 = shalt.err (!%p12960_p5)
}
  0x95   : > { %11622 = dma.hbm_to_vmem [thread:$0]  (!%p13438_p6), %s18287_s9, 32, %s471_s17, [#allocation19], %s13301_s18, %s13301_s18, %s13302_s0  }
  0x96   : > { %s13307_s26 = smov [#allocation21]   ;;  %s13308_s13 = smov [#allocation8]  }
  0x97   : > { %s497_s15 = sshll.u32 %s13307_s26, 4  ;;  %s384_s28 = sshll.u32 %s13308_s13, 4  ;;  %s498_s15 = int_to_ptr.vmem [resolvable:$true] %s497_s15  ;;  %s385_s28 = int_to_ptr.vmem [resolvable:$true] %s384_s28 }
  0x98   : > { %s12964_s24 = scalar_lea.hbm %s18289_s11, 16 }
  0x99   : > { %p12965_p7 = scmp.ne.s32.totalorder %s18289_s11, %s12964_s24  ;;  %p12971_p1 = scmp.lt.u32.totalorder %s12964_s24, %s18289_s11 }
  0x9b   : > { %p12967_p9 = pnand %p12965_p7, %p13454_p8 }
  0x9d   : > { %p12968_p4 = pneg %p12967_p9 }
  0x9f   : > { %p12973_p3 = pnand %p12971_p1, %p12968_p4 }
  0xa1   : > { %12976 = shalt.err (!%p12973_p3)
}
  0xa2   : > { %s12977_s17 = scalar_lea.vmem %s498_s15, 16  ;;  %s12984_s25 = scalar_lea.vmem %s498_s15, 32 }
  0xa3   : > { %p12978_p10 = scmp.ne.s32.totalorder %s498_s15, %s12977_s17  ;;  %p12985_p13 = scmp.lt.s32.totalorder %s498_s15, %s498_s15 }
  0xa4   : > { %p12986_p0 = scmp.lt.s32.totalorder %s12984_s25, %s12977_s17 }
  0xa5   : > { %p12980_p11 = pnand %p12978_p10, %p13454_p8 }
  0xa6   : > { %p12987_p2 = por %p12986_p0, %p12985_p13 }
  0xa7   : > { %p12981_p12 = pneg %p12980_p11 }
  0xa9   : > { %p12988_p5 = pnand %p12987_p2, %p12981_p12 }
  0xab   : > { %12991 = shalt.err (!%p12988_p5)
}
  0xac   : > { %11628 = dma.hbm_to_vmem [thread:$0]  (!%p13438_p6), %s18289_s11, 16, %s498_s15, [#allocation22]  }
  0xad   : > { %s18642_s2 = sld [smem:[#allocation153_spill]] }
  0xb3   : > { %s12992_s22 = scalar_lea.hbm %s18642_s2, 32 }
  0xb4   : > { %p12993_p7 = scmp.ne.s32.totalorder %s18642_s2, %s12992_s22  ;;  %p12999_p1 = scmp.lt.u32.totalorder %s12992_s22, %s18642_s2 }
  0xb6   : > { %p12995_p9 = pnand %p12993_p7, %p13454_p8 }
  0xb8   : > { %p12996_p4 = pneg %p12995_p9 }
  0xba   : > { %p13001_p3 = pnand %p12999_p1, %p12996_p4 }
  0xbc   : > { %13004 = shalt.err (!%p13001_p3)
}
  0xbd   : > { %s13005_s17 = scalar_lea.vmem %s385_s28, 32  ;;  %p13013_p13 = scmp.lt.s32.totalorder %s385_s28, %s385_s28 }
  0xbe   : > { %p13006_p10 = scmp.ne.s32.totalorder %s385_s28, %s13005_s17  ;;  %p13014_p0 = scmp.lt.s32.totalorder %s13005_s17, %s13005_s17 }
  0xc0   : > { %p13008_p11 = pnand %p13006_p10, %p13454_p8  ;;  %p13015_p2 = por %p13014_p0, %p13013_p13 }
  0xc2   : > { %p13009_p12 = pneg %p13008_p11 }
  0xc4   : > { %p13016_p5 = pnand %p13015_p2, %p13009_p12 }
  0xc6   : > { %13019 = shalt.err (!%p13016_p5)
}
  0xc7   : > { %11601 = dma.hbm_to_vmem [thread:$0]  (!%p13438_p6), %s18642_s2, 32, %s385_s28, [#allocation7]  }
  0xc8   : > { %s13309_s26 = smov [#allocation11]   ;;  %s13310_s1 = smov [#allocation14]  }
  0xc9   : > { %s405_s13 = sshll.u32 %s13309_s26, 4  ;;  %s431_s16 = sshll.u32 %s13310_s1, 4  ;;  %s406_s13 = int_to_ptr.vmem [resolvable:$true] %s405_s13  ;;  %s432_s16 = int_to_ptr.vmem [resolvable:$true] %s431_s16 }
  0xca   : > { %s13020_s20 = scalar_lea.hbm %s18282_s4, 2048 }
  0xcb   : > { %p13021_p7 = scmp.ne.s32.totalorder %s18282_s4, %s13020_s20  ;;  %p13027_p1 = scmp.lt.u32.totalorder %s13020_s20, %s18282_s4 }
  0xcd   : > { %p13023_p9 = pnand %p13021_p7, %p13454_p8 }
  0xcf   : > { %p13024_p4 = pneg %p13023_p9 }
  0xd1   : > { %p13029_p3 = pnand %p13027_p1, %p13024_p4 }
  0xd3   : > { %13032 = shalt.err (!%p13029_p3)
}
  0xd4   : > { %s13033_s28 = scalar_lea.vmem %s406_s13, 2048  ;;  %p13041_p13 = scmp.lt.s32.totalorder %s406_s13, %s406_s13 }
  0xd5   : > { %p13034_p10 = scmp.ne.s32.totalorder %s406_s13, %s13033_s28  ;;  %p13042_p0 = scmp.lt.s32.totalorder %s13033_s28, %s13033_s28 }
  0xd7   : > { %p13036_p11 = pnand %p13034_p10, %p13454_p8  ;;  %p13043_p2 = por %p13042_p0, %p13041_p13 }
  0xd9   : > { %p13037_p12 = pneg %p13036_p11 }
  0xdb   : > { %p13044_p5 = pnand %p13043_p2, %p13037_p12 }
  0xdd   : > { %13047 = shalt.err (!%p13044_p5)
}
  0xde   : > { %s18643_s25 = smov 64   ;;  %s13048_s20 = scalar_lea.hbm %s18284_s6, 32 }
  0xdf   : > { %11607 = dma.hbm_to_vmem [thread:$0]  (!%p13438_p6), %s18282_s4, 2048, %s406_s13, [#allocation10], %s18643_s25, %s18643_s25, %s18304_s3  }
  0xe0   : > { %p13049_p7 = scmp.ne.s32.totalorder %s18284_s6, %s13048_s20  ;;  %p13055_p1 = scmp.lt.u32.totalorder %s13048_s20, %s18284_s6 }
  0xe2   : > { %p13051_p9 = pnand %p13049_p7, %p13454_p8 }
  0xe4   : > { %p13052_p4 = pneg %p13051_p9 }
  0xe6   : > { %p13057_p3 = pnand %p13055_p1, %p13052_p4 }
  0xe8   : > { %13060 = shalt.err (!%p13057_p3)
}
  0xe9   : > { %s13061_s28 = scalar_lea.vmem %s432_s16, 32  ;;  %p13069_p13 = scmp.lt.s32.totalorder %s432_s16, %s432_s16 }
  0xea   : > { %p13062_p10 = scmp.ne.s32.totalorder %s432_s16, %s13061_s28  ;;  %p13070_p0 = scmp.lt.s32.totalorder %s13061_s28, %s13061_s28 }
  0xec   : > { %p13064_p11 = pnand %p13062_p10, %p13454_p8  ;;  %p13071_p2 = por %p13070_p0, %p13069_p13 }
  0xee   : > { %p13065_p12 = pneg %p13064_p11 }
  0xf0   : > { %p13072_p5 = pnand %p13071_p2, %p13065_p12 }
  0xf2   : > { %13075 = shalt.err (!%p13072_p5)
}
  0xf3   : > { %11613 = dma.hbm_to_vmem [thread:$0]  (!%p13438_p6), %s18284_s6, 32, %s432_s16, [#allocation13], %s13301_s18, %s13301_s18, %s13302_s0  }
  0xf4   : > { %s13311_s1 = smov [#allocation17]   ;;  %s13312_s24 = smov [#allocation20]  }
  0xf5   : > { %s457_s22 = sshll.u32 %s13311_s1, 4  ;;  %s483_s20 = sshll.u32 %s13312_s24, 4  ;;  %s458_s22 = int_to_ptr.vmem [resolvable:$true] %s457_s22  ;;  %s484_s20 = int_to_ptr.vmem [resolvable:$true] %s483_s20 }
  0xf6   : > { %s13076_s17 = scalar_lea.hbm %s18286_s8, 32 }
  0xf7   : > { %p13077_p7 = scmp.ne.s32.totalorder %s18286_s8, %s13076_s17  ;;  %p13083_p1 = scmp.lt.u32.totalorder %s13076_s17, %s18286_s8 }
  0xf9   : > { %p13079_p9 = pnand %p13077_p7, %p13454_p8 }
  0xfb   : > { %p13080_p4 = pneg %p13079_p9 }
  0xfd   : > { %p13085_p3 = pnand %p13083_p1, %p13080_p4 }
  0xff   : > { %13088 = shalt.err (!%p13085_p3)
}
 0x100   : > { %s13089_s16 = scalar_lea.vmem %s458_s22, 32  ;;  %p13097_p13 = scmp.lt.s32.totalorder %s458_s22, %s458_s22 }
 0x101   : > { %p13090_p10 = scmp.ne.s32.totalorder %s458_s22, %s13089_s16  ;;  %p13098_p0 = scmp.lt.s32.totalorder %s13089_s16, %s13089_s16 }
 0x103   : > { %p13092_p11 = pnand %p13090_p10, %p13454_p8  ;;  %p13099_p2 = por %p13098_p0, %p13097_p13 }
 0x105   : > { %p13093_p12 = pneg %p13092_p11 }
 0x107   : > { %p13100_p5 = pnand %p13099_p2, %p13093_p12 }
 0x109   : > { %13103 = shalt.err (!%p13100_p5)
}
 0x10a   : > { %11619 = dma.hbm_to_vmem [thread:$0]  (!%p13438_p6), %s18286_s8, 32, %s458_s22, [#allocation16], %s13301_s18, %s13301_s18, %s13302_s0  }
 0x10b   : > { %s13104_s23 = scalar_lea.hbm %s18288_s10, 2048 }
 0x10c   : > { %p13105_p7 = scmp.ne.s32.totalorder %s18288_s10, %s13104_s23  ;;  %p13111_p1 = scmp.lt.u32.totalorder %s13104_s23, %s18288_s10 }
 0x10e   : > { %p13107_p9 = pnand %p13105_p7, %p13454_p8 }
 0x110   : > { %p13108_p4 = pneg %p13107_p9 }
 0x112   : > { %p13113_p3 = pnand %p13111_p1, %p13108_p4 }
 0x114   : > { %13116 = shalt.err (!%p13113_p3)
}
 0x115   : > { %s13117_s13 = scalar_lea.vmem %s484_s20, 2048  ;;  %p13125_p13 = scmp.lt.s32.totalorder %s484_s20, %s484_s20 }
 0x116   : > { %p13118_p10 = scmp.ne.s32.totalorder %s484_s20, %s13117_s13  ;;  %p13126_p0 = scmp.lt.s32.totalorder %s13117_s13, %s13117_s13 }
 0x118   : > { %p13120_p11 = pnand %p13118_p10, %p13454_p8  ;;  %p13127_p2 = por %p13126_p0, %p13125_p13 }
 0x11a   : > { %p13121_p12 = pneg %p13120_p11 }
 0x11c   : > { %p13128_p5 = pnand %p13127_p2, %p13121_p12 }
 0x11e   : > { %13131 = shalt.err (!%p13128_p5)
}
 0x11f   : > { %s18644_s18 = smov 4   ;;  %s13313_s16 = smov [#allocation23]  }
 0x120   : > { %11625 = dma.hbm_to_vmem [thread:$0]  (!%p13438_p6), %s18288_s10, 2048, %s484_s20, [#allocation19], %s18643_s25, %s18643_s25, %s18644_s18  }
 0x121   : > { %s508_s3 = sshll.u32 %s13313_s16, 4  ;;  %s13132_s24 = scalar_lea.hbm %s18290_s12, 16  ;;  %s509_s3 = int_to_ptr.vmem [resolvable:$true] %s508_s3 }
 0x122   : > { %p13133_p7 = scmp.ne.s32.totalorder %s18290_s12, %s13132_s24  ;;  %p13139_p1 = scmp.lt.u32.totalorder %s13132_s24, %s18290_s12 }
 0x124   : > { %p13135_p9 = pnand %p13133_p7, %p13454_p8 }
 0x126   : > { %p13136_p4 = pneg %p13135_p9 }
 0x128   : > { %p13141_p3 = pnand %p13139_p1, %p13136_p4 }
 0x12a   : > { %13144 = shalt.err (!%p13141_p3)
}
 0x12b   : > { %s13145_s20 = scalar_lea.vmem %s509_s3, 16  ;;  %s13152_s28 = scalar_lea.vmem %s509_s3, 32 }
 0x12c   : > { %p13146_p10 = scmp.ne.s32.totalorder %s509_s3, %s13145_s20  ;;  %p13153_p13 = scmp.lt.s32.totalorder %s509_s3, %s509_s3 }
 0x12d   : > { %p13154_p0 = scmp.lt.s32.totalorder %s13152_s28, %s13145_s20 }
 0x12e   : > { %p13148_p11 = pnand %p13146_p10, %p13454_p8 }
 0x12f   : > { %p13155_p2 = por %p13154_p0, %p13153_p13 }
 0x130   : > { %p13149_p12 = pneg %p13148_p11 }
 0x132   : > { %p13156_p5 = pnand %p13155_p2, %p13149_p12 }
 0x134   : > { %13159 = shalt.err (!%p13156_p5)
}
 0x135   : > { %s18645_s22 = sld [smem:[#allocation34_spill]]  ;;  %s18646_s19 = sld [smem:[#allocation33_spill]] }
 0x136   : > { %s18647_s16 = sld [smem:[#allocation36_spill]]  ;;  %s8876_s26 = sadd.s32 4294967294, %s13296_s30  }
 0x137   : > { %11631 = dma.hbm_to_vmem [thread:$0]  (!%p13438_p6), %s18290_s12, 16, %s509_s3, [#allocation22]  }
 0x138   : > { %s47_s1 = sadd.s32 1, %s13292_s29  ;;  %s56_s21 = sadd.s32 1, %s13284_s27 }
 0x139   : > { %p49_p8 = scmp.ge.s32.totalorder %s47_s1, 2  ;;  %p64_p9 = scmp.eq.s32.totalorder %s13296_s30, 0 }
 0x13a   : > { %s18649_s23 = sadd.s32 4294967295, %s13296_s30   ;;  %p353_p13 = scmp.eq.s32.totalorder %s8876_s26, 1 }
 0x13b   : > { %p63_p7 = scmp.ne.s32.totalorder %s13284_s27, %s18645_s22  ;;  %s19426_s1 = smov (%p49_p8, %s47_s1), 0 }
 0x13c   : > { %p69_p1 = scmp.ne.s32.totalorder %s18645_s22, %s18646_s19  ;;  %s51_s3 = ssub.s32 %s13292_s29, %s19426_s1 }
 0x13d   : > { %p13707_p4 = por %p64_p9, %p63_p7  ;;  %p347_p6 = scmp.eq.s32.totalorder %s18649_s23, 1 }
 0x13e   : > { %p54_p3 = scmp.eq.s32.totalorder %s51_s3, 0  ;;  %p18650_p10 = scmp.ne.s32.totalorder %s18647_s16, 0 }
 0x13f   : > { %p13723_p12 = por %p347_p6, %p63_p7  ;;  %p13730_p0 = por %p353_p13, %p69_p1 }
 0x140   : > { %p13719_p11 = por %p18650_p10, %p69_p1  ;;  %p11652_p2 = scmp.lt.s32.totalorder %s13296_s30, 2 }
 0x141   : > { %s18652_s17 = scalar_select %p13723_p12, 1, 0 }
 0x142   : > { %s13728_s15 = scalar_select %p54_p3, %s13284_s27, %s56_s21  }
 0x143   : > { %s18653_s20 = scalar_select %p13730_p0, 1, 0 }
 0x144   : > { %s519_s28 = sand.u32 1, %s13284_s27   ;;  %s9358_s13 = sshll.u32 %s13292_s29, 11 }
 0x145   : > { %s8891_s0 = sshll.u32 %s519_s28, 7  ;;  %s18654_s16 = sld [smem:[#allocation151_spill]] }
 0x146   : > { %s523_s26 = scalar_lea.vmem [#allocation3], %s8891_s0  ;;  %p13744_p5 = pnand %p11652_p2, %p13707_p4 }
 0x147   : > { %s532_s21 = sshll.u32 %s523_s26, 4  ;;  %s13750_s2 = scalar_lea.sflag [#allocation4], %s519_s28  ;;  %s13748_s21 = int_to_ptr.vmem [resolvable:$true] %s532_s21 }
 0x148   : > { %p13162_p7 = pneg %p13744_p5 }
 0x14b   : > { %s13740_s3 = scalar_lea.hbm %s18654_s16, %s9358_s13  ;;  %s13165_s0 = scalar_lea.hbm %s18654_s16, 4096 }
 0x14c   : > { %s13160_s22 = scalar_lea.hbm %s13740_s3, 2048  ;;  %p13166_p4 = scmp.lt.u32.totalorder %s13740_s3, %s18654_s16 }
 0x14d   : > { %p13161_p8 = scmp.ne.s32.totalorder %s13740_s3, %s13160_s22  ;;  %p13167_p6 = scmp.lt.u32.totalorder %s13165_s0, %s13160_s22 }
 0x14e   : > { %p13169_p10 = scmp.lt.u32.totalorder %s13160_s22, %s13740_s3 }
 0x14f   : > { %p13163_p9 = pnand %p13162_p7, %p13161_p8  ;;  %p13168_p3 = por %p13167_p6, %p13166_p4 }
 0x151   : > { %p13164_p1 = pneg %p13163_p9  ;;  %p13170_p13 = por %p13169_p10, %p13168_p3 }
 0x153   : > { %p13171_p2 = pnand %p13170_p13, %p13164_p1 }
 0x155   : > { %13174 = shalt.err (!%p13171_p2)
}
 0x156   : > { %s13175_s28 = scalar_lea.vmem %s13748_s21, 2048  ;;  %s13314_s13 = smov [#allocation3]  }
 0x157   : > { %p13176_p8 = scmp.ne.s32.totalorder %s13748_s21, %s13175_s28  ;;  %s13180_s24 = sshll.u32 %s13314_s13, 4  ;;  %s13181_s24 = int_to_ptr.vmem [resolvable:$false] %s13180_s24 }
 0x158   : > { %s13182_s19 = scalar_lea.vmem %s13181_s24, 4096  ;;  %p13183_p12 = scmp.lt.s32.totalorder %s13748_s21, %s13181_s24 }
 0x159   : > { %p13178_p9 = pnand %p13176_p8, %p13162_p7  ;;  %p13184_p4 = scmp.lt.s32.totalorder %s13182_s19, %s13175_s28 }
 0x15b   : > { %p13179_p0 = pneg %p13178_p9  ;;  %p13185_p6 = por %p13184_p4, %p13183_p12 }
 0x15d   : > { %p13186_p3 = pnand %p13185_p6, %p13179_p0 }
 0x15f   : > { %13189 = shalt.err (!%p13186_p3)
}
 0x160   : > { %11635 = dma.hbm_to_vmem [thread:$0]  (!%p13744_p5), %s13740_s3, 2048, %s13748_s21, %s13750_s2, %s18643_s25, %s18643_s25, %s18644_s18  }
 0x161   : > { %s18656_s22 = sld [smem:[#allocation37_spill]] }
 0x167   : > { %p18657_p7 = scmp.ne.s32.totalorder %s18656_s22, 0 }
 0x169   : > { %544 = sbr.rel (%p18657_p7) target bundleno = 2721 (0xaa1), region = 72 }
 0x170   : > { %s18658_s0 = sld [smem:[#allocation34_spill]] }
 0x176   : > { %s13784_s26 = sand.u32 1, %s18658_s0  }
 0x177   : > { %s8895_s28 = sshll.u32 %s13784_s26, 7  ;;  %s547_s13 = scalar_lea.sflag [#allocation4], %s13784_s26 }
 0x178   : > { %s13790_s23 = scalar_lea.vmem [#allocation3], %s8895_s28 }
 0x179   : > { %13243 = dma.done.wait (%p13719_p11), %s547_s13, 2048  }
 0x17a   : > { %13245 = vsyncadd (%p13719_p11), %s547_s13, 4294965248  ;;  %s18659_s2 = sld [smem:[#allocation36_spill]] }
 0x180   : > { %p18660_p12 = scmp.ne.s32.totalorder %s18659_s2, 0 }
 0x182   : > { %13247 = dma.done.wait (%p18660_p12), [#allocation7], 96  }
 0x183   : > { %13249 = vsyncadd (%p18660_p12), [#allocation7], 4294967200 }
 0x184   : > { %13251 = dma.done.wait (%p18660_p12), [#allocation10], 2080  }
 0x185   : > { %13253 = vsyncadd (%p18660_p12), [#allocation10], 4294965216 }
 0x186   : > { %13255 = dma.done.wait (%p18660_p12), [#allocation13], 64  }
 0x187   : > { %13257 = vsyncadd (%p18660_p12), [#allocation13], 4294967232 }
 0x188   : > { %13259 = dma.done.wait (%p18660_p12), [#allocation16], 18464  }
 0x189   : > { %13261 = vsyncadd (%p18660_p12), [#allocation16], 4294948832 }
 0x18a   : > { %13263 = dma.done.wait (%p18660_p12), [#allocation19], 2080  }
 0x18b   : > { %13265 = vsyncadd (%p18660_p12), [#allocation19], 4294965216 }
 0x18c   : > { %13267 = dma.done.wait (%p18660_p12), [#allocation22], 32  }
 0x18d   : > { %13269 = vsyncadd (%p18660_p12), [#allocation22], 4294967264  ;;  %v18307_v0 = vmov 0   ;;  %vm814_vm0 = vcmask 1041408   ;;  %v11734_v4 = vld [vmem:[%s13790_s23] sm:$0xff]   ;;  %vm765_vm1 = vcmask 31744   ;;  %v1016_v28 = vlaneseq }
 0x18e   : > { %853 = vmatprep.mubr.bf16.mxu0 %v18307_v0  ;;  %v8925_v1 = vld.sshfl [vmem:[#allocation6] sm:$0x33 pattern:$0x76325410]  ;;  %v11735_v5 = vld [vmem:[%s13790_s23 + $0x8] sm:$0xff]   ;;  %v11736_v6 = vld [vmem:[%s13790_s23 + $0x10] sm:$0xff]  }
 0x18f   : > { %v764_v2 = vcombine.high %v8925_v1, %v8925_v1  ;;  %v816_v3 = vsel %vm814_vm0, %v8925_v1, 0  ;;  %v11737_v7 = vld [vmem:[%s13790_s23 + $0x18] sm:$0xff]   ;;  %v11738_v8 = vld [vmem:[%s13790_s23 + $0x20] sm:$0xff]   ;;  %v11739_v9 = vld [vmem:[%s13790_s23 + $0x28] sm:$0xff]   ;;  %v13868_v29 = vshrl.u32 %v1016_v28, 7  ;;  %vm18380_vm2 = vcmask 1040384  }
 0x190   : > { %v11740_v10 = vld [vmem:[%s13790_s23 + $0x30] sm:$0xff]   ;;  %v11741_v11 = vld [vmem:[%s13790_s23 + $0x38] sm:$0xff]   ;;  %v11742_v12 = vld [vmem:[%s13790_s23 + $0x40] sm:$0xff]   ;;  %vm18383_vm3 = vcmask 1046528   ;;  %vm13316_vm6 = vmmov 1   ;;  %s18080_s25 = scalar_lea.vmem [#allocation24], %s8895_s28 }
 0x191   : > { %8926 = vmatprep.subr.msk.bf16.mxu0 %vm814_vm0, %v764_v2  ;;  %v11743_v13 = vld [vmem:[%s13790_s23 + $0x48] sm:$0xff]   ;;  %v11744_v14 = vld [vmem:[%s13790_s23 + $0x50] sm:$0xff]   ;;  %v11745_v15 = vld [vmem:[%s13790_s23 + $0x58] sm:$0xff]   ;;  %v1018_v30 = vsub.s32 0, %v13868_v29  ;;  %v1022_v32 = vsub.s32 1, %v13868_v29  ;;  %s19414_s18 = sld [smem:[#allocation35_spill]] }
 0x192   : > { %822 = vmatpush1.bf16.msra.mxu0 %v816_v3  ;;  %v11746_v16 = vld [vmem:[%s13790_s23 + $0x60] sm:$0xff]   ;;  %v11750_v17 = vld [vmem:[#allocation11] sm:$0xff]   ;;  %v11751_v19 = vld [vmem:[#allocation11 + $0x8] sm:$0xff]   ;;  %s8674_s3 = sshll.u32 %s18080_s25, 4  ;;  %s19415_s19 = sld [smem:[#allocation155_spill]]  ;;  %s18228_s3 = int_to_ptr.vmem [resolvable:$true] %s8674_s3 }
 0x193   : > { %v11747_v18 = vld [vmem:[%s13790_s23 + $0x68] sm:$0xff]   ;;  %10823 = vmatprep.subr.bf16.mxu1 %v11750_v17  ;;  %v11752_v20 = vld [vmem:[#allocation11 + $0x10] sm:$0xff]   ;;  %v11748_v21 = vld [vmem:[%s13790_s23 + $0x70] sm:$0xff]   ;;  %s8659_s0 = scalar_lea.sflag [#allocation5], %s13784_s26  ;;  %s13190_s28 = scalar_lea.vmem %s18228_s3, 2048 }
 0x194   : > { %10824 = vmatpush3.bf16.msra.mxu1 %v11750_v17  ;;  %v11753_v22 = vld [vmem:[#allocation11 + $0x18] sm:$0xff]   ;;  %v11754_v23 = vld [vmem:[#allocation11 + $0x20] sm:$0xff]   ;;  %v11749_v24 = vld [vmem:[%s13790_s23 + $0x78] sm:$0xff]   ;;  %p13191_p11 = scmp.ne.s32.totalorder %s18228_s3, %s13190_s28  ;;  %p19416_p0 = scmp.ne.s32.totalorder %s18652_s17, 0 }
 0x195   : > { %8927 = vmatmul.mubr.msk.bf16.vlgmr.msra.gmra.mrb[0].mxu0 %vm765_vm1, %v11734_v4  ;;  %10825 = vmatprep.subr.bf16.mxu1 %v11751_v19  ;;  %v11755_v25 = vld [vmem:[#allocation11 + $0x28] sm:$0xff]   ;;  %v11756_v26 = vld [vmem:[#allocation11 + $0x30] sm:$0xff]   ;;  %v11757_v27 = vld [vmem:[#allocation11 + $0x38] sm:$0xff]   ;;  %s13317_s13 = smov [#allocation24]  }
 0x196   : > { %863 = vmatprep.mubr.bf16.mxu0 %v18307_v0  ;;  %v1014_v31 = vld [vmem:[#allocation8] sm:$0x3]  ;;  %v1090_v33 = vld [vmem:[#allocation9] sm:$0x3]  ;;  %p13192_p5 = pnand %p13191_p11, %p19416_p0  ;;  %s13194_s23 = sshll.u32 %s13317_s13, 4  ;;  %s13195_s23 = int_to_ptr.vmem [resolvable:$false] %s13194_s23 }
 0x197   : > { %v13872_v34 = vrot.slane %v1014_v31, %v1018_v30  ;;  %v13874_v35 = vrot.slane %v1014_v31, %v1022_v32  ;;  %v13876_v36 = vrot.slane %v1090_v33, %v1018_v30  ;;  %v13878_v38 = vrot.slane %v1090_v33, %v1022_v32  ;;  %s9391_s14 = sshll.u32 %s19414_s18, 11  ;;  %s13196_s2 = scalar_lea.vmem %s13195_s23, 4096 }
 0x198   : > { %10826 = vmatpush3.bf16.msra.mxu1 %v11751_v19  ;;  %s18226_s22 = scalar_lea.hbm %s19415_s19, %s9391_s14  ;;  %p13193_p1 = pneg %p13192_p5 }
 0x199   : > { %10827 = vmatprep.subr.bf16.mxu1 %v11752_v20  ;;  %p13197_p10 = scmp.lt.s32.totalorder %s18228_s3, %s13195_s23  ;;  %p13198_p13 = scmp.lt.s32.totalorder %s13196_s2, %s13190_s28 }
 0x19b   : > { %p13199_p2 = por %p13198_p13, %p13197_p10 }
 0x19c   : > { %10828 = vmatpush3.bf16.msra.mxu1 %v11752_v20 }
 0x19d   : > { %8928 = vmatmul.mubr.msk.bf16.gmra.mrb[4].mxu0 %vm765_vm1, %v11735_v5  ;;  %10829 = vmatprep.subr.bf16.mxu1 %v11753_v22  ;;  %p13200_p8 = pnand %p13199_p2, %p13193_p1 }
 0x19e   : > { %873 = vmatprep.mubr.bf16.mxu0 %v18307_v0 }
 0x1a0   : > { %10830 = vmatpush3.bf16.msra.mxu1 %v11753_v22 }
 0x1a1   : > { %10831 = vmatprep.subr.bf16.mxu1 %v11754_v23 }
 0x1a4   : > { %10832 = vmatpush3.bf16.msra.mxu1 %v11754_v23 }
 0x1a5   : > { %8929 = vmatmul.mubr.msk.bf16.gmra.mrb[8].mxu0 %vm765_vm1, %v11736_v6  ;;  %10833 = vmatprep.subr.bf16.mxu1 %v11755_v25 }
 0x1a6   : > { %883 = vmatprep.mubr.bf16.mxu0 %v18307_v0 }
 0x1a8   : > { %10834 = vmatpush3.bf16.msra.mxu1 %v11755_v25 }
 0x1a9   : > { %10835 = vmatprep.subr.bf16.mxu1 %v11756_v26 }
 0x1ac   : > { %10836 = vmatpush3.bf16.msra.mxu1 %v11756_v26 }
 0x1ad   : > { %8930 = vmatmul.mubr.msk.bf16.gmra.mrb[12].mxu0 %vm765_vm1, %v11737_v7  ;;  %10837 = vmatprep.subr.bf16.mxu1 %v11757_v27 }
 0x1ae   : > { %893 = vmatprep.mubr.bf16.mxu0 %v18307_v0 }
 0x1b0   : > { %10838 = vmatpush3.bf16.msra.mxu1 %v11757_v27 }
 0x1b5   : > { %8931 = vmatmul.mubr.msk.bf16.gmra.mrb[16].mxu0 %vm765_vm1, %v11738_v8 }
 0x1b6   : > { %903 = vmatprep.mubr.bf16.mxu0 %v18307_v0 }
 0x1bd   : > { %8932 = vmatmul.mubr.msk.bf16.gmra.mrb[20].mxu0 %vm765_vm1, %v11739_v9 }
 0x1be   : > { %913 = vmatprep.mubr.bf16.mxu0 %v18307_v0 }
 0x1c5   : > { %8933 = vmatmul.mubr.msk.bf16.gmra.mrb[24].mxu0 %vm765_vm1, %v11740_v10 }
 0x1c6   : > { %923 = vmatprep.mubr.bf16.mxu0 %v18307_v0 }
 0x1cd   : > { %8934 = vmatmul.mubr.msk.bf16.gmra.mrb[28].mxu0 %vm765_vm1, %v11741_v11 }
 0x1ce   : > { %933 = vmatprep.mubr.bf16.mxu0 %v18307_v0 }
 0x1d5   : > { %8935 = vmatmul.mubr.msk.bf16.gmra.mrb[32].mxu0 %vm765_vm1, %v11742_v12 }
 0x1d6   : > { %943 = vmatprep.mubr.bf16.mxu0 %v18307_v0 }
 0x1dd   : > { %8936 = vmatmul.mubr.msk.bf16.gmra.mrb[36].mxu0 %vm765_vm1, %v11743_v13 }
 0x1de   : > { %953 = vmatprep.mubr.bf16.mxu0 %v18307_v0 }
 0x1e5   : > { %8937 = vmatmul.mubr.msk.bf16.gmra.mrb[40].mxu0 %vm765_vm1, %v11744_v14 }
 0x1e6   : > { %963 = vmatprep.mubr.bf16.mxu0 %v18307_v0 }
 0x1ed   : > { %8938 = vmatmul.mubr.msk.bf16.gmra.mrb[44].mxu0 %vm765_vm1, %v11745_v15 }
 0x1ee   : > { %973 = vmatprep.mubr.bf16.mxu0 %v18307_v0 }
 0x1f5   : > { %8939 = vmatmul.mubr.msk.bf16.gmra.mrb[48].mxu0 %vm765_vm1, %v11746_v16 }
 0x1f6   : > { %983 = vmatprep.mubr.bf16.mxu0 %v18307_v0 }
 0x1fd   : > { %8940 = vmatmul.mubr.msk.bf16.gmra.mrb[52].mxu0 %vm765_vm1, %v11747_v18 }
 0x1fe   : > { %993 = vmatprep.mubr.bf16.mxu0 %v18307_v0 }
 0x205   : > { %8941 = vmatmul.mubr.msk.bf16.gmra.mrb[56].mxu0 %vm765_vm1, %v11748_v21 }
 0x206   : > { %1003 = vmatprep.mubr.bf16.mxu0 %v18307_v0 }
 0x20d   : > { %8942 = vmatmul.mubr.msk.bf16.gmra.mrb[60].mxu0 %vm765_vm1, %v11749_v24 }
 0x268   : > { %v855_v37 = vpop.f32.mrb[0].mxu0 }
 0x269   : > { %v1026_v39 = vmul.f32 %v13872_v34, %v855_v37  ;;  %v857_v40 = vpop.f32.mrb[1].mxu0 }
 0x26a   : > { %v1027_v41 = vmul.f32 %v13874_v35, %v857_v40  ;;  %v859_v42 = vpop.f32.mrb[2].mxu0 }
 0x26b   : > { %v1028_v43 = vmul.f32 %v13872_v34, %v859_v42  ;;  %v861_v44 = vpop.f32.mrb[3].mxu0  ;;  %v13884_v45 = vadd.f32 %v13876_v36, %v1026_v39 }
 0x26c   : > { %v13887_v46 = vadd.f32 %v13878_v38, %v1027_v41  ;;  %v1029_v47 = vmul.f32 %v13874_v35, %v861_v44 }
 0x26d   : > { %v13891_v48 = vadd.f32 %v13876_v36, %v1028_v43  ;;  %v1166_v49 = vsub.f32 0.0, %v13884_v45 }
 0x26e   : > { %v1167_v50 = vsub.f32 0.0, %v13887_v46  ;;  %v13896_v51 = vadd.f32 %v13878_v38, %v1029_v47 }
 0x26f   : > { %v1168_v52 = vsub.f32 0.0, %v13891_v48  ;;  %v1230_v53 = vmul.f32 1.442695, %v1166_v49 }
 0x270   : > { %v1232_v54 = vmul.f32 1.442695, %v1167_v50  ;;  %v1169_v55 = vsub.f32 0.0, %v13896_v51  ;;  %v865_v56 = vpop.f32.mrb[4].mxu0 }
 0x271   : > { %v1030_v57 = vmul.f32 %v13872_v34, %v865_v56  ;;  %v867_v58 = vpop.f32.mrb[5].mxu0  ;;  %11926 = vpow2.f32 %v1230_v53  ;;  %v1234_v59 = vmul.f32 1.442695, %v1168_v52 }
 0x272   : > { %11928 = vpow2.f32 %v1232_v54  ;;  %v1236_v60 = vmul.f32 1.442695, %v1169_v55  ;;  %v1031_v61 = vmul.f32 %v13874_v35, %v867_v58  ;;  %v869_v62 = vpop.f32.mrb[6].mxu0 }
 0x273   : > { %v13903_v63 = vadd.f32 %v13876_v36, %v1030_v57  ;;  %v1032_v1 = vmul.f32 %v13872_v34, %v869_v62  ;;  %v871_v2 = vpop.f32.mrb[7].mxu0  ;;  %11930 = vpow2.f32 %v1234_v59 }
 0x274   : > { %11932 = vpow2.f32 %v1236_v60  ;;  %v13907_v3 = vadd.f32 %v13878_v38, %v1031_v61  ;;  %v1033_v4 = vmul.f32 %v13874_v35, %v871_v2 }
 0x275   : > { %v1170_v5 = vsub.f32 0.0, %v13903_v63  ;;  %v13912_v6 = vadd.f32 %v13876_v36, %v1032_v1 }
 0x276   : > { %v1171_v7 = vsub.f32 0.0, %v13907_v3  ;;  %v13916_v8 = vadd.f32 %v13878_v38, %v1033_v4 }
 0x277   : > { %v1238_v9 = vmul.f32 1.442695, %v1170_v5  ;;  %v1172_v10 = vsub.f32 0.0, %v13912_v6 }
 0x278   : > { %v1240_v11 = vmul.f32 1.442695, %v1171_v7  ;;  %v1173_v12 = vsub.f32 0.0, %v13916_v8  ;;  %v875_v13 = vpop.f32.mrb[8].mxu0 }
 0x279   : > { %11934 = vpow2.f32 %v1238_v9  ;;  %v1242_v14 = vmul.f32 1.442695, %v1172_v10  ;;  %v1034_v15 = vmul.f32 %v13872_v34, %v875_v13  ;;  %v877_v16 = vpop.f32.mrb[9].mxu0 }
 0x27a   : > { %11936 = vpow2.f32 %v1240_v11  ;;  %v1244_v17 = vmul.f32 1.442695, %v1173_v12  ;;  %v1035_v18 = vmul.f32 %v13874_v35, %v877_v16  ;;  %v879_v19 = vpop.f32.mrb[10].mxu0 }
 0x27b   : > { %v11927_v20 = vpop.eup %11926  ;;  %11938 = vpow2.f32 %v1242_v14  ;;  %v13923_v21 = vadd.f32 %v13876_v36, %v1034_v15  ;;  %v1036_v22 = vmul.f32 %v13872_v34, %v879_v19  ;;  %v881_v23 = vpop.f32.mrb[11].mxu0 }
 0x27c   : > { %v11929_v24 = vpop.eup %11928  ;;  %11940 = vpow2.f32 %v1244_v17  ;;  %v13927_v25 = vadd.f32 %v13878_v38, %v1035_v18  ;;  %v1037_v26 = vmul.f32 %v13874_v35, %v881_v23  ;;  %v1358_v27 = vadd.f32 1.0, %v11927_v20 }
 0x27d   : > { %v11931_v28 = vpop.eup %11930  ;;  %v1359_v30 = vadd.f32 1.0, %v11929_v24  ;;  %v1174_v31 = vsub.f32 0.0, %v13923_v21  ;;  %v13932_v32 = vadd.f32 %v13876_v36, %v1036_v22 }
 0x27e   : > { %v11933_v33 = vpop.eup %11932  ;;  %v1175_v37 = vsub.f32 0.0, %v13927_v25  ;;  %v13936_v39 = vadd.f32 %v13878_v38, %v1037_v26  ;;  %v1360_v40 = vadd.f32 1.0, %v11931_v28  ;;  %11942 = vrcp.f32 %v1358_v27 }
 0x27f   : > { %11944 = vrcp.f32 %v1359_v30  ;;  %v1361_v41 = vadd.f32 1.0, %v11933_v33  ;;  %v1246_v42 = vmul.f32 1.442695, %v1174_v31  ;;  %v1176_v43 = vsub.f32 0.0, %v13932_v32 }
 0x280   : > { %v1248_v44 = vmul.f32 1.442695, %v1175_v37  ;;  %v1177_v47 = vsub.f32 0.0, %v13936_v39  ;;  %v885_v49 = vpop.f32.mrb[12].mxu0  ;;  %11946 = vrcp.f32 %v1360_v40 }
 0x281   : > { %11948 = vrcp.f32 %v1361_v41  ;;  %v1250_v50 = vmul.f32 1.442695, %v1176_v43  ;;  %v1038_v52 = vmul.f32 %v13872_v34, %v885_v49  ;;  %v887_v53 = vpop.f32.mrb[13].mxu0 }
 0x282   : > { %11950 = vpow2.f32 %v1246_v42  ;;  %v1252_v54 = vmul.f32 1.442695, %v1177_v47  ;;  %v1039_v55 = vmul.f32 %v13874_v35, %v887_v53  ;;  %v889_v56 = vpop.f32.mrb[14].mxu0 }
 0x283   : > { %v11935_v57 = vpop.eup %11934  ;;  %11952 = vpow2.f32 %v1248_v44  ;;  %v13943_v58 = vadd.f32 %v13876_v36, %v1038_v52  ;;  %v1040_v59 = vmul.f32 %v13872_v34, %v889_v56  ;;  %v891_v60 = vpop.f32.mrb[15].mxu0 }
 0x284   : > { %v11937_v61 = vpop.eup %11936  ;;  %v1362_v62 = vadd.f32 1.0, %v11935_v57  ;;  %11954 = vpow2.f32 %v1250_v50  ;;  %v13947_v1 = vadd.f32 %v13878_v38, %v1039_v55  ;;  %v1041_v2 = vmul.f32 %v13874_v35, %v891_v60 }
 0x285   : > { %v11939_v4 = vpop.eup %11938  ;;  %v1363_v5 = vadd.f32 1.0, %v11937_v61  ;;  %11956 = vpow2.f32 %v1252_v54  ;;  %v1178_v7 = vsub.f32 0.0, %v13943_v58  ;;  %v13952_v9 = vadd.f32 %v13876_v36, %v1040_v59 }
 0x286   : > { %v11941_v10 = vpop.eup %11940  ;;  %11958 = vrcp.f32 %v1362_v62  ;;  %v1364_v11 = vadd.f32 1.0, %v11939_v4  ;;  %v1179_v12 = vsub.f32 0.0, %v13947_v1  ;;  %v13956_v13 = vadd.f32 %v13878_v38, %v1041_v2  ;;  %v11758_v2 = vld [vmem:[#allocation15 + $0x140] sm:$0xff]   ;;  %v11759_v4 = vld [vmem:[#allocation15 + $0x148] sm:$0xff]  }
 0x287   : > { %11960 = vrcp.f32 %v1363_v5  ;;  %v1365_v14 = vadd.f32 1.0, %v11941_v10  ;;  %v1254_v15 = vmul.f32 1.442695, %v1178_v7  ;;  %v1180_v16 = vsub.f32 0.0, %v13952_v9  ;;  %10871 = vmatprep.subr.bf16.mxu0 %v11758_v2 }
 0x288   : > { %v11943_v17 = vpop.eup %11942  ;;  %11962 = vrcp.f32 %v1364_v11  ;;  %v1256_v18 = vmul.f32 1.442695, %v1179_v12  ;;  %v1181_v19 = vsub.f32 0.0, %v13956_v13  ;;  %v895_v20 = vpop.f32.mrb[16].mxu0  ;;  %10872 = vmatpush3.bf16.msra.mxu0 %v11758_v2 }
 0x289   : > { %v11945_v22 = vpop.eup %11944  ;;  %11964 = vrcp.f32 %v1365_v14  ;;  %v1258_v23 = vmul.f32 1.442695, %v1180_v16  ;;  %v1042_v24 = vmul.f32 %v13872_v34, %v895_v20  ;;  %v897_v26 = vpop.f32.mrb[17].mxu0  ;;  %v13974_v49 = vmul.f32 %v11943_v17, %v13884_v45  ;;  %10873 = vmatprep.subr.bf16.mxu0 %v11759_v4 }
 0x28a   : > { %v11947_v27 = vpop.eup %11946  ;;  %11966 = vpow2.f32 %v1254_v15  ;;  %v1260_v28 = vmul.f32 1.442695, %v1181_v19  ;;  %v1043_v30 = vmul.f32 %v13874_v35, %v897_v26  ;;  %v899_v31 = vpop.f32.mrb[18].mxu0 }
 0x28b   : > { %v11949_v33 = vpop.eup %11948  ;;  %11968 = vpow2.f32 %v1256_v18  ;;  %v13963_v37 = vadd.f32 %v13876_v36, %v1042_v24  ;;  %v1044_v40 = vmul.f32 %v13872_v34, %v899_v31  ;;  %v901_v41 = vpop.f32.mrb[19].mxu0  ;;  %v13967_v42 = vmul.f32 %v11947_v27, %v13891_v48  ;;  %18662 = vst [vmem:[#allocation39_spill] sm:$0xff] %v13974_v49 }
 0x28c   : > { %v11951_v43 = vpop.eup %11950  ;;  %11970 = vpow2.f32 %v1258_v23  ;;  %v13970_v44 = vadd.f32 %v13878_v38, %v1043_v30  ;;  %v1045_v47 = vmul.f32 %v13874_v35, %v901_v41  ;;  %v13990_v18 = vmul.f32 %v11945_v22, %v13887_v46  ;;  %10874 = vmatpush3.bf16.msra.mxu0 %v11759_v4 }
 0x28d   : > { %18661 = vst [vmem:[#allocation38_spill] sm:$0xff] %v13967_v42  ;;  %v11953_v50 = vpop.eup %11952  ;;  %v1366_v52 = vadd.f32 1.0, %v11951_v43  ;;  %11972 = vpow2.f32 %v1260_v28  ;;  %v1182_v53 = vsub.f32 0.0, %v13963_v37  ;;  %v13978_v54 = vadd.f32 %v13876_v36, %v1044_v40 }
 0x28e   : > { %v11955_v48 = vpop.eup %11954  ;;  %v1367_v55 = vadd.f32 1.0, %v11953_v50  ;;  %v1183_v56 = vsub.f32 0.0, %v13970_v44  ;;  %v13982_v57 = vadd.f32 %v13878_v38, %v1045_v47  ;;  %v2181_v59 = vpack.c.bf16 %v13967_v42, %v13974_v49  ;;  %18663 = vst [vmem:[#allocation40_spill] sm:$0xff] %v13990_v18 }
 0x28f   : > { %v11957_v45 = vpop.eup %11956  ;;  %11974 = vrcp.f32 %v1366_v52  ;;  %v1368_v60 = vadd.f32 1.0, %v11955_v48  ;;  %v1262_v61 = vmul.f32 1.442695, %v1182_v53  ;;  %v1184_v62 = vsub.f32 0.0, %v13978_v54 }
 0x290   : > { %v11959_v5 = vpop.eup %11958  ;;  %11976 = vrcp.f32 %v1367_v55  ;;  %v1369_v7 = vadd.f32 1.0, %v11957_v45  ;;  %v1264_v10 = vmul.f32 1.442695, %v1183_v56  ;;  %v1185_v11 = vsub.f32 0.0, %v13982_v57  ;;  %10839 = vmatprep.mubr.bf16.mxu1 %v2181_v59  ;;  %v905_v12 = vpop.f32.mrb[20].mxu0 }
 0x291   : > { %v11961_v14 = vpop.eup %11960  ;;  %11978 = vrcp.f32 %v1368_v60  ;;  %v1266_v15 = vmul.f32 1.442695, %v1184_v62  ;;  %v1046_v16 = vmul.f32 %v13872_v34, %v905_v12  ;;  %v907_v17 = vpop.f32.mrb[21].mxu0  ;;  %v13994_v26 = vmul.f32 %v11949_v33, %v13896_v51 }
 0x292   : > { %v11963_v19 = vpop.eup %11962  ;;  %11980 = vrcp.f32 %v1369_v7  ;;  %v1268_v20 = vmul.f32 1.442695, %v1185_v11  ;;  %v1047_v23 = vmul.f32 %v13874_v35, %v907_v17  ;;  %v909_v24 = vpop.f32.mrb[22].mxu0  ;;  %v13997_v28 = vmul.f32 %v11959_v5, %v13903_v63 }
 0x293   : > { %18664 = vst [vmem:[#allocation41_spill] sm:$0xff] %v13994_v26  ;;  %v11965_v27 = vpop.eup %11964  ;;  %11982 = vpow2.f32 %v1262_v61  ;;  %v14000_v30 = vadd.f32 %v13876_v36, %v1046_v16  ;;  %v1048_v46 = vmul.f32 %v13872_v34, %v909_v24  ;;  %v911_v22 = vpop.f32.mrb[23].mxu0  ;;  %v14004_v40 = vmul.f32 %v11963_v19, %v13912_v6 }
 0x294   : > { %18665 = vst [vmem:[#allocation42_spill] sm:$0xff] %v13997_v28  ;;  %v11967_v31 = vpop.eup %11966  ;;  %11984 = vpow2.f32 %v1264_v10  ;;  %v14007_v51 = vadd.f32 %v13878_v38, %v1047_v23  ;;  %v1049_v33 = vmul.f32 %v13874_v35, %v911_v22  ;;  %v14024_v12 = vmul.f32 %v11961_v14, %v13907_v3 }
 0x295   : > { %18666 = vst [vmem:[#allocation43_spill] sm:$0xff] %v14004_v40  ;;  %v11969_v63 = vpop.eup %11968  ;;  %v1370_v41 = vadd.f32 1.0, %v11967_v31  ;;  %11986 = vpow2.f32 %v1266_v15  ;;  %v1186_v43 = vsub.f32 0.0, %v14000_v30  ;;  %v14012_v47 = vadd.f32 %v13876_v36, %v1048_v46 }
 0x296   : > { %v11971_v50 = vpop.eup %11970  ;;  %v1371_v52 = vadd.f32 1.0, %v11969_v63  ;;  %11988 = vpow2.f32 %v1268_v20  ;;  %v1187_v6 = vsub.f32 0.0, %v14007_v51  ;;  %v14016_v53 = vadd.f32 %v13878_v38, %v1049_v33  ;;  %18667 = vst [vmem:[#allocation44_spill] sm:$0xff] %v14024_v12 }
 0x297   : > { %v11973_v48 = vpop.eup %11972  ;;  %11990 = vrcp.f32 %v1370_v41  ;;  %v1372_v55 = vadd.f32 1.0, %v11971_v50  ;;  %v1270_v56 = vmul.f32 1.442695, %v1186_v43  ;;  %v1188_v59 = vsub.f32 0.0, %v14012_v47 }
 0x298   : > { %11992 = vrcp.f32 %v1371_v52  ;;  %v1373_v45 = vadd.f32 1.0, %v11973_v48  ;;  %v1272_v60 = vmul.f32 1.442695, %v1187_v6  ;;  %v1189_v61 = vsub.f32 0.0, %v14016_v53  ;;  %v915_v62 = vpop.f32.mrb[24].mxu0 }
 0x299   : > { %v11975_v2 = vpop.eup %11974  ;;  %11994 = vrcp.f32 %v1372_v55  ;;  %v1274_v5 = vmul.f32 1.442695, %v1188_v59  ;;  %v2182_v7 = vpack.c.bf16 %v14004_v40, %v13997_v28  ;;  %v1050_v4 = vmul.f32 %v13872_v34, %v915_v62  ;;  %v917_v10 = vpop.f32.mrb[25].mxu0 }
 0x29a   : > { %v11977_v11 = vpop.eup %11976  ;;  %11996 = vrcp.f32 %v1373_v45  ;;  %v1276_v15 = vmul.f32 1.442695, %v1189_v61  ;;  %v1051_v16 = vmul.f32 %v13874_v35, %v917_v10  ;;  %v919_v17 = vpop.f32.mrb[26].mxu0  ;;  %v14028_v20 = vmul.f32 %v11965_v27, %v13916_v8 }
 0x29b   : > { %v11979_v19 = vpop.eup %11978  ;;  %11998 = vpow2.f32 %v1270_v56  ;;  %10840 = vmatmul.mubr.bf16.vlgmr.msra.gmra.mrb[0].mxu1 %v2182_v7  ;;  %v14031_v23 = vadd.f32 %v13876_v36, %v1050_v4  ;;  %v1052_v24 = vmul.f32 %v13872_v34, %v919_v17  ;;  %v921_v46 = vpop.f32.mrb[27].mxu0  ;;  %v14042_v27 = vmul.f32 %v11975_v2, %v13923_v21 }
 0x29c   : > { %18668 = vst [vmem:[#allocation45_spill] sm:$0xff] %v14028_v20  ;;  %v11981_v22 = vpop.eup %11980  ;;  %v14035_v3 = vmul.f32 %v11979_v19, %v13932_v32  ;;  %12000 = vpow2.f32 %v1272_v60  ;;  %v14038_v14 = vadd.f32 %v13878_v38, %v1051_v16  ;;  %v1053_v31 = vmul.f32 %v13874_v35, %v921_v46 }
 0x29d   : > { %v11983_v8 = vpop.eup %11982  ;;  %18670 = vst [vmem:[#allocation47_spill] sm:$0xff] %v14042_v27  ;;  %12002 = vpow2.f32 %v1274_v5  ;;  %v1190_v33 = vsub.f32 0.0, %v14031_v23  ;;  %v14046_v63 = vadd.f32 %v13876_v36, %v1052_v24  ;;  %v14053_v6 = vmul.f32 %v11977_v11, %v13927_v25 }
 0x29e   : > { %18669 = vst [vmem:[#allocation46_spill] sm:$0xff] %v14035_v3  ;;  %v11985_v41 = vpop.eup %11984  ;;  %v1374_v43 = vadd.f32 1.0, %v11983_v8  ;;  %12004 = vpow2.f32 %v1276_v15  ;;  %v1191_v32 = vsub.f32 0.0, %v14038_v14  ;;  %v14050_v50 = vadd.f32 %v13878_v38, %v1053_v31 }
 0x29f   : > { %v11987_v52 = vpop.eup %11986  ;;  %18671 = vst [vmem:[#allocation48_spill] sm:$0xff] %v14053_v6  ;;  %v1375_v21 = vadd.f32 1.0, %v11985_v41  ;;  %v1192_v48 = vsub.f32 0.0, %v14046_v63  ;;  %v2183_v55 = vpack.c.bf16 %v14035_v3, %v14042_v27  ;;  %v1278_v45 = vmul.f32 1.442695, %v1190_v33 }
 0x2a0   : > { %v11989_v56 = vpop.eup %11988  ;;  %12006 = vrcp.f32 %v1374_v43  ;;  %v1376_v59 = vadd.f32 1.0, %v11987_v52  ;;  %v1193_v60 = vsub.f32 0.0, %v14050_v50  ;;  %v925_v61 = vpop.f32.mrb[28].mxu0  ;;  %v1280_v5 = vmul.f32 1.442695, %v1191_v32 }
 0x2a1   : > { %v11991_v62 = vpop.eup %11990  ;;  %12008 = vrcp.f32 %v1375_v21  ;;  %v1377_v2 = vadd.f32 1.0, %v11989_v56  ;;  %10843 = vmatprep.mubr.bf16.mxu1 %v2183_v55  ;;  %v1054_v25 = vmul.f32 %v13872_v34, %v925_v61  ;;  %v927_v7 = vpop.f32.mrb[29].mxu0  ;;  %v14061_v10 = vmul.f32 %v11981_v22, %v13936_v39 }
 0x2a2   : > { %v11993_v4 = vpop.eup %11992  ;;  %12010 = vrcp.f32 %v1376_v59  ;;  %v1282_v11 = vmul.f32 1.442695, %v1192_v48  ;;  %v1055_v15 = vmul.f32 %v13874_v35, %v927_v7  ;;  %v929_v16 = vpop.f32.mrb[30].mxu0  ;;  %v1284_v19 = vmul.f32 1.442695, %v1193_v60 }
 0x2a3   : > { %18672 = vst [vmem:[#allocation49_spill] sm:$0xff] %v14061_v10  ;;  %v11995_v17 = vpop.eup %11994  ;;  %12012 = vrcp.f32 %v1377_v2  ;;  %v14065_v24 = vadd.f32 %v13876_v36, %v1054_v25  ;;  %v1056_v46 = vmul.f32 %v13872_v34, %v929_v16  ;;  %v931_v31 = vpop.f32.mrb[31].mxu0  ;;  %v14069_v33 = vmul.f32 %v11991_v62, %v13943_v58 }
 0x2a4   : > { %v11997_v8 = vpop.eup %11996  ;;  %12014 = vpow2.f32 %v1278_v45  ;;  %v14072_v39 = vadd.f32 %v13878_v38, %v1055_v15  ;;  %v1057_v22 = vmul.f32 %v13874_v35, %v931_v31  ;;  %v14076_v43 = vmul.f32 %v11995_v17, %v13952_v9 }
 0x2a5   : > { %18673 = vst [vmem:[#allocation50_spill] sm:$0xff] %v14069_v33  ;;  %v11999_v41 = vpop.eup %11998  ;;  %12016 = vpow2.f32 %v1280_v5  ;;  %v1194_v32 = vsub.f32 0.0, %v14065_v24  ;;  %v14080_v52 = vadd.f32 %v13876_v36, %v1056_v46  ;;  %v14087_v59 = vmul.f32 %v11993_v4, %v13947_v1 }
 0x2a6   : > { %18674 = vst [vmem:[#allocation51_spill] sm:$0xff] %v14076_v43  ;;  %v12001_v21 = vpop.eup %12000  ;;  %v1378_v48 = vadd.f32 1.0, %v11999_v41  ;;  %12018 = vpow2.f32 %v1282_v11  ;;  %v1195_v58 = vsub.f32 0.0, %v14072_v39  ;;  %v14084_v55 = vadd.f32 %v13878_v38, %v1057_v22 }
 0x2a7   : > { %v12003_v56 = vpop.eup %12002  ;;  %18675 = vst [vmem:[#allocation52_spill] sm:$0xff] %v14087_v59  ;;  %v1379_v9 = vadd.f32 1.0, %v12001_v21  ;;  %12020 = vpow2.f32 %v1284_v19  ;;  %v1196_v45 = vsub.f32 0.0, %v14080_v52  ;;  %v1286_v62 = vmul.f32 1.442695, %v1194_v32 }
 0x2a8   : > { %v12005_v60 = vpop.eup %12004  ;;  %12022 = vrcp.f32 %v1378_v48  ;;  %v1380_v61 = vadd.f32 1.0, %v12003_v56  ;;  %v1197_v2 = vsub.f32 0.0, %v14084_v55  ;;  %v935_v5 = vpop.f32.mrb[32].mxu0  ;;  %v1288_v7 = vmul.f32 1.442695, %v1195_v58 }
 0x2a9   : > { %12024 = vrcp.f32 %v1379_v9  ;;  %v1381_v25 = vadd.f32 1.0, %v12005_v60  ;;  %v2184_v11 = vpack.c.bf16 %v14076_v43, %v14069_v33  ;;  %v937_v15 = vpop.f32.mrb[33].mxu0  ;;  %v1290_v4 = vmul.f32 1.442695, %v1196_v45 }
 0x2aa   : > { %v12007_v1 = vpop.eup %12006  ;;  %12026 = vrcp.f32 %v1380_v61  ;;  %v1058_v16 = vmul.f32 %v13872_v34, %v935_v5  ;;  %v1059_v17 = vmul.f32 %v13874_v35, %v937_v15  ;;  %v939_v19 = vpop.f32.mrb[34].mxu0  ;;  %v1292_v31 = vmul.f32 1.442695, %v1197_v2 }
 0x2ab   : > { %v12009_v46 = vpop.eup %12008  ;;  %12028 = vrcp.f32 %v1381_v25  ;;  %10844 = vmatmul.mubr.bf16.gmra.mrb[4].mxu1 %v2184_v11  ;;  %v1060_v22 = vmul.f32 %v13872_v34, %v939_v19  ;;  %v941_v41 = vpop.f32.mrb[35].mxu0  ;;  %v14099_v48 = vmul.f32 %v11997_v8, %v13956_v13  ;;  %v14115_v13 = vmul.f32 %v12007_v1, %v13963_v37 }
 0x2ac   : > { %v12011_v21 = vpop.eup %12010  ;;  %12030 = vpow2.f32 %v1286_v62  ;;  %v14102_v58 = vadd.f32 %v13876_v36, %v1058_v16  ;;  %v14105_v56 = vadd.f32 %v13878_v38, %v1059_v17  ;;  %v1061_v61 = vmul.f32 %v13874_v35, %v941_v41 }
 0x2ad   : > { %18676 = vst [vmem:[#allocation53_spill] sm:$0xff] %v14099_v48  ;;  %v12013_v9 = vpop.eup %12012  ;;  %v14108_v45 = vmul.f32 %v12011_v21, %v13978_v54  ;;  %12032 = vpow2.f32 %v1288_v7  ;;  %v14111_v60 = vadd.f32 %v13876_v36, %v1060_v22  ;;  %18678 = vst [vmem:[#allocation55_spill] sm:$0xff] %v14115_v13  ;;  %v14124_v15 = vmul.f32 %v12009_v46, %v13970_v44 }
 0x2ae   : > { %v12015_v2 = vpop.eup %12014  ;;  %12034 = vpow2.f32 %v1290_v4  ;;  %v1198_v8 = vsub.f32 0.0, %v14102_v58  ;;  %v1199_v62 = vsub.f32 0.0, %v14105_v56  ;;  %v14121_v7 = vadd.f32 %v13878_v38, %v1061_v61 }
 0x2af   : > { %18677 = vst [vmem:[#allocation54_spill] sm:$0xff] %v14108_v45  ;;  %v12017_v5 = vpop.eup %12016  ;;  %v1382_v25 = vadd.f32 1.0, %v12015_v2  ;;  %12036 = vpow2.f32 %v1292_v31  ;;  %v1200_v54 = vsub.f32 0.0, %v14111_v60  ;;  %18679 = vst [vmem:[#allocation56_spill] sm:$0xff] %v14124_v15  ;;  %v2185_v1 = vpack.c.bf16 %v14108_v45, %v14115_v13 }
 0x2b0   : > { %v12019_v11 = vpop.eup %12018  ;;  %v1383_v16 = vadd.f32 1.0, %v12017_v5  ;;  %v1294_v37 = vmul.f32 1.442695, %v1198_v8  ;;  %v945_v4 = vpop.f32.mrb[36].mxu0  ;;  %v1296_v22 = vmul.f32 1.442695, %v1199_v62  ;;  %v14132_v5 = vmul.f32 %v12013_v9, %v13982_v57 }
 0x2b1   : > { %v12021_v17 = vpop.eup %12020  ;;  %12038 = vrcp.f32 %v1382_v25  ;;  %v1384_v19 = vadd.f32 1.0, %v12019_v11  ;;  %v1201_v31 = vsub.f32 0.0, %v14121_v7  ;;  %v947_v41 = vpop.f32.mrb[37].mxu0  ;;  %10847 = vmatprep.mubr.bf16.mxu1 %v2185_v1  ;;  %v1062_v44 = vmul.f32 %v13872_v34, %v945_v4 }
 0x2b2   : > { %v12023_v21 = vpop.eup %12022  ;;  %12040 = vrcp.f32 %v1383_v16  ;;  %v1385_v61 = vadd.f32 1.0, %v12021_v17  ;;  %v1063_v46 = vmul.f32 %v13874_v35, %v947_v41  ;;  %v949_v2 = vpop.f32.mrb[38].mxu0  ;;  %18680 = vst [vmem:[#allocation57_spill] sm:$0xff] %v14132_v5  ;;  %v1298_v25 = vmul.f32 1.442695, %v1200_v54 }
 0x2b3   : > { %v12025_v8 = vpop.eup %12024  ;;  %12042 = vrcp.f32 %v1384_v19  ;;  %v1064_v62 = vmul.f32 %v13872_v34, %v949_v2  ;;  %v951_v11 = vpop.f32.mrb[39].mxu0  ;;  %v1300_v0 = vmul.f32 1.442695, %v1201_v31  ;;  %v14136_v16 = vadd.f32 %v13876_v36, %v1062_v44 }
 0x2b4   : > { %v12027_v32 = vpop.eup %12026  ;;  %12044 = vrcp.f32 %v1385_v61  ;;  %v14139_v1 = vadd.f32 %v13878_v38, %v1063_v46  ;;  %v14142_v17 = vmul.f32 %v12023_v21, %v14000_v30  ;;  %v1065_v9 = vmul.f32 %v13874_v35, %v951_v11 }
 0x2b5   : > { %v12029_v4 = vpop.eup %12028  ;;  %12046 = vpow2.f32 %v1294_v37  ;;  %v14145_v57 = vadd.f32 %v13876_v36, %v1064_v62  ;;  %v14149_v19 = vmul.f32 %v12027_v32, %v14012_v47  ;;  %v1202_v31 = vsub.f32 0.0, %v14136_v16 }
 0x2b6   : > { %18681 = vst [vmem:[#allocation58_spill] sm:$0xff] %v14142_v17  ;;  %v12031_v54 = vpop.eup %12030  ;;  %12048 = vpow2.f32 %v1296_v22  ;;  %v1203_v41 = vsub.f32 0.0, %v14139_v1  ;;  %v14155_v37 = vadd.f32 %v13878_v38, %v1065_v9  ;;  %v14158_v46 = vmul.f32 %v12025_v8, %v14007_v51 }
 0x2b7   : > { %18682 = vst [vmem:[#allocation59_spill] sm:$0xff] %v14149_v19  ;;  %v12033_v61 = vpop.eup %12032  ;;  %v1386_v44 = vadd.f32 1.0, %v12031_v54  ;;  %12050 = vpow2.f32 %v1298_v25  ;;  %v1204_v30 = vsub.f32 0.0, %v14145_v57  ;;  %v1302_v47 = vmul.f32 1.442695, %v1202_v31 }
 0x2b8   : > { %v12035_v21 = vpop.eup %12034  ;;  %18683 = vst [vmem:[#allocation60_spill] sm:$0xff] %v14158_v46  ;;  %v1387_v2 = vadd.f32 1.0, %v12033_v61  ;;  %12052 = vpow2.f32 %v1300_v0  ;;  %v955_v32 = vpop.f32.mrb[40].mxu0  ;;  %v1304_v11 = vmul.f32 1.442695, %v1203_v41  ;;  %v1205_v54 = vsub.f32 0.0, %v14155_v37 }
 0x2b9   : > { %v12037_v22 = vpop.eup %12036  ;;  %12054 = vrcp.f32 %v1386_v44  ;;  %v1388_v62 = vadd.f32 1.0, %v12035_v21  ;;  %v957_v25 = vpop.f32.mrb[41].mxu0  ;;  %v2186_v9 = vpack.c.bf16 %v14149_v19, %v14142_v17  ;;  %v1066_v20 = vmul.f32 %v13872_v34, %v955_v32 }
 0x2ba   : > { %12056 = vrcp.f32 %v1387_v2  ;;  %v1389_v12 = vadd.f32 1.0, %v12037_v22  ;;  %v959_v51 = vpop.f32.mrb[42].mxu0  ;;  %v1306_v0 = vmul.f32 1.442695, %v1204_v30  ;;  %v1067_v31 = vmul.f32 %v13874_v35, %v957_v25 }
 0x2bb   : > { %v12039_v8 = vpop.eup %12038  ;;  %12058 = vrcp.f32 %v1388_v62  ;;  %v1068_v61 = vmul.f32 %v13872_v34, %v959_v51  ;;  %v961_v44 = vpop.f32.mrb[43].mxu0  ;;  %v1308_v21 = vmul.f32 1.442695, %v1205_v54  ;;  %10848 = vmatmul.mubr.bf16.gmra.mrb[8].mxu1 %v2186_v9  ;;  %v14167_v2 = vadd.f32 %v13876_v36, %v1066_v20 }
 0x2bc   : > { %v12041_v41 = vpop.eup %12040  ;;  %12060 = vrcp.f32 %v1389_v12  ;;  %v1069_v22 = vmul.f32 %v13874_v35, %v961_v44  ;;  %v14171_v32 = vmul.f32 %v12029_v4, %v14016_v53  ;;  %v14174_v30 = vadd.f32 %v13878_v38, %v1067_v31 }
 0x2bd   : > { %v12043_v19 = vpop.eup %12042  ;;  %12062 = vpow2.f32 %v1302_v47  ;;  %v14177_v62 = vadd.f32 %v13876_v36, %v1068_v61  ;;  %v1206_v20 = vsub.f32 0.0, %v14167_v2  ;;  %v14187_v53 = vmul.f32 %v12039_v8, %v14031_v23 }
 0x2be   : > { %18684 = vst [vmem:[#allocation61_spill] sm:$0xff] %v14171_v32  ;;  %v12045_v25 = vpop.eup %12044  ;;  %v14180_v12 = vmul.f32 %v12043_v19, %v14046_v63  ;;  %12064 = vpow2.f32 %v1304_v11  ;;  %v14184_v54 = vadd.f32 %v13878_v38, %v1069_v22  ;;  %v14190_v4 = vmul.f32 %v12041_v41, %v14038_v14 }
 0x2bf   : > { %v12047_v9 = vpop.eup %12046  ;;  %18686 = vst [vmem:[#allocation63_spill] sm:$0xff] %v14187_v53  ;;  %12066 = vpow2.f32 %v1306_v0  ;;  %v1207_v47 = vsub.f32 0.0, %v14174_v30  ;;  %v14194_v63 = vmul.f32 %v12045_v25, %v14050_v50  ;;  %v1208_v11 = vsub.f32 0.0, %v14177_v62 }
 0x2c0   : > { %18685 = vst [vmem:[#allocation62_spill] sm:$0xff] %v14180_v12  ;;  %18687 = vst [vmem:[#allocation64_spill] sm:$0xff] %v14190_v4  ;;  %v12049_v51 = vpop.eup %12048  ;;  %v1390_v19 = vadd.f32 1.0, %v12047_v9  ;;  %12068 = vpow2.f32 %v1308_v21  ;;  %v965_v31 = vpop.f32.mrb[44].mxu0  ;;  %v1310_v22 = vmul.f32 1.442695, %v1206_v20  ;;  %v2187_v14 = vpack.c.bf16 %v14180_v12, %v14187_v53 }
 0x2c1   : > { %18688 = vst [vmem:[#allocation65_spill] sm:$0xff] %v14194_v63  ;;  %v12051_v61 = vpop.eup %12050  ;;  %v1391_v44 = vadd.f32 1.0, %v12049_v51  ;;  %v1209_v23 = vsub.f32 0.0, %v14184_v54  ;;  %v967_v8 = vpop.f32.mrb[45].mxu0  ;;  %v1312_v17 = vmul.f32 1.442695, %v1207_v47  ;;  %v1070_v50 = vmul.f32 %v13872_v34, %v965_v31 }
 0x2c2   : > { %v12053_v0 = vpop.eup %12052  ;;  %12070 = vrcp.f32 %v1390_v19  ;;  %v1392_v41 = vadd.f32 1.0, %v12051_v61  ;;  %v969_v25 = vpop.f32.mrb[46].mxu0  ;;  %10851 = vmatprep.mubr.bf16.mxu1 %v2187_v14  ;;  %v1071_v51 = vmul.f32 %v13874_v35, %v967_v8  ;;  %v1314_v12 = vmul.f32 1.442695, %v1208_v11 }
 0x2c3   : > { %v12055_v21 = vpop.eup %12054  ;;  %12072 = vrcp.f32 %v1391_v44  ;;  %v1393_v9 = vadd.f32 1.0, %v12053_v0  ;;  %v1072_v20 = vmul.f32 %v13872_v34, %v969_v25  ;;  %v971_v45 = vpop.f32.mrb[47].mxu0  ;;  %v14204_v53 = vadd.f32 %v13876_v36, %v1070_v50 }
 0x2c4   : > { %v12057_v13 = vpop.eup %12056  ;;  %12074 = vrcp.f32 %v1392_v41  ;;  %v1073_v47 = vmul.f32 %v13874_v35, %v971_v45  ;;  %v1316_v31 = vmul.f32 1.442695, %v1209_v23  ;;  %v14208_v61 = vadd.f32 %v13878_v38, %v1071_v51 }
 0x2c5   : > { %v12059_v19 = vpop.eup %12058  ;;  %12076 = vrcp.f32 %v1393_v9  ;;  %v14211_v44 = vadd.f32 %v13876_v36, %v1072_v20  ;;  %v1210_v11 = vsub.f32 0.0, %v14204_v53  ;;  %v14221_v41 = vmul.f32 %v12055_v21, %v14065_v24 }
 0x2c6   : > { %v12061_v14 = vpop.eup %12060  ;;  %v14214_v8 = vmul.f32 %v12059_v19, %v14080_v52  ;;  %12078 = vpow2.f32 %v1310_v22  ;;  %v14218_v0 = vadd.f32 %v13878_v38, %v1073_v47  ;;  %v1211_v23 = vsub.f32 0.0, %v14208_v61 }
 0x2c7   : > { %v12063_v45 = vpop.eup %12062  ;;  %18690 = vst [vmem:[#allocation67_spill] sm:$0xff] %v14221_v41  ;;  %12080 = vpow2.f32 %v1312_v17  ;;  %v1212_v50 = vsub.f32 0.0, %v14211_v44  ;;  %v14226_v9 = vmul.f32 %v12057_v13, %v14072_v39  ;;  %v1318_v22 = vmul.f32 1.442695, %v1210_v11 }
 0x2c8   : > { %18689 = vst [vmem:[#allocation66_spill] sm:$0xff] %v14214_v8  ;;  %v12065_v25 = vpop.eup %12064  ;;  %v1394_v52 = vadd.f32 1.0, %v12063_v45  ;;  %12082 = vpow2.f32 %v1314_v12  ;;  %v975_v51 = vpop.f32.mrb[48].mxu0  ;;  %v1320_v19 = vmul.f32 1.442695, %v1211_v23  ;;  %v1213_v24 = vsub.f32 0.0, %v14218_v0 }
 0x2c9   : > { %18691 = vst [vmem:[#allocation68_spill] sm:$0xff] %v14226_v9  ;;  %v12067_v20 = vpop.eup %12066  ;;  %v1395_v47 = vadd.f32 1.0, %v12065_v25  ;;  %12084 = vpow2.f32 %v1316_v31  ;;  %v977_v21 = vpop.f32.mrb[49].mxu0  ;;  %v1322_v33 = vmul.f32 1.442695, %v1212_v50  ;;  %v2188_v3 = vpack.c.bf16 %v14214_v8, %v14221_v41 }
 0x2ca   : > { %v12069_v17 = vpop.eup %12068  ;;  %12086 = vrcp.f32 %v1394_v52  ;;  %v1396_v43 = vadd.f32 1.0, %v12067_v20  ;;  %v979_v39 = vpop.f32.mrb[50].mxu0  ;;  %v1074_v12 = vmul.f32 %v13872_v34, %v975_v51  ;;  %v1075_v11 = vmul.f32 %v13874_v35, %v977_v21 }
 0x2cb   : > { %12088 = vrcp.f32 %v1395_v47  ;;  %v1397_v13 = vadd.f32 1.0, %v12069_v17  ;;  %v981_v45 = vpop.f32.mrb[51].mxu0  ;;  %10852 = vmatmul.mubr.bf16.gmra.mrb[12].mxu1 %v2188_v3  ;;  %v1076_v23 = vmul.f32 %v13872_v34, %v979_v39  ;;  %v1324_v20 = vmul.f32 1.442695, %v1213_v24 }
 0x2cc   : > { %v12071_v31 = vpop.eup %12070  ;;  %12090 = vrcp.f32 %v1396_v43  ;;  %v1077_v25 = vmul.f32 %v13874_v35, %v981_v45  ;;  %v14238_v47 = vadd.f32 %v13876_v36, %v1074_v12  ;;  %v14241_v51 = vadd.f32 %v13878_v38, %v1075_v11 }
 0x2cd   : > { %v12073_v52 = vpop.eup %12072  ;;  %12092 = vrcp.f32 %v1397_v13  ;;  %v14244_v43 = vmul.f32 %v12061_v14, %v14084_v55  ;;  %v14247_v3 = vadd.f32 %v13876_v36, %v1076_v23  ;;  %v14258_v55 = vmul.f32 %v12071_v31, %v14102_v58 }
 0x2ce   : > { %v12075_v21 = vpop.eup %12074  ;;  %12094 = vpow2.f32 %v1318_v22  ;;  %v14250_v17 = vadd.f32 %v13878_v38, %v1077_v25  ;;  %v1214_v13 = vsub.f32 0.0, %v14238_v47  ;;  %v1215_v12 = vsub.f32 0.0, %v14241_v51 }
 0x2cf   : > { %18692 = vst [vmem:[#allocation69_spill] sm:$0xff] %v14244_v43  ;;  %v12077_v39 = vpop.eup %12076  ;;  %v14253_v24 = vmul.f32 %v12075_v21, %v14111_v60  ;;  %12096 = vpow2.f32 %v1320_v19  ;;  %18694 = vst [vmem:[#allocation71_spill] sm:$0xff] %v14258_v55  ;;  %v14261_v14 = vmul.f32 %v12073_v52, %v14105_v56  ;;  %v1216_v19 = vsub.f32 0.0, %v14247_v3 }
 0x2d0   : > { %v12079_v11 = vpop.eup %12078  ;;  %v14264_v22 = vmul.f32 %v12077_v39, %v14121_v7  ;;  %12098 = vpow2.f32 %v1322_v33  ;;  %v985_v45 = vpop.f32.mrb[52].mxu0  ;;  %v1217_v25 = vsub.f32 0.0, %v14250_v17  ;;  %v1326_v58 = vmul.f32 1.442695, %v1214_v13 }
 0x2d1   : > { %18693 = vst [vmem:[#allocation70_spill] sm:$0xff] %v14253_v24  ;;  %18695 = vst [vmem:[#allocation72_spill] sm:$0xff] %v14261_v14  ;;  %v12081_v23 = vpop.eup %12080  ;;  %v1398_v60 = vadd.f32 1.0, %v12079_v11  ;;  %12100 = vpow2.f32 %v1324_v20  ;;  %v987_v21 = vpop.f32.mrb[53].mxu0  ;;  %v1328_v31 = vmul.f32 1.442695, %v1215_v12  ;;  %v2189_v56 = vpack.c.bf16 %v14253_v24, %v14258_v55 }
 0x2d2   : > { %18696 = vst [vmem:[#allocation73_spill] sm:$0xff] %v14264_v22  ;;  %v12083_v50 = vpop.eup %12082  ;;  %v1399_v18 = vadd.f32 1.0, %v12081_v23  ;;  %v989_v52 = vpop.f32.mrb[54].mxu0  ;;  %v1078_v39 = vmul.f32 %v13872_v34, %v985_v45  ;;  %v1079_v20 = vmul.f32 %v13874_v35, %v987_v21  ;;  %v1330_v55 = vmul.f32 1.442695, %v1216_v19 }
 0x2d3   : > { %v12085_v7 = vpop.eup %12084  ;;  %12102 = vrcp.f32 %v1398_v60  ;;  %v1400_v33 = vadd.f32 1.0, %v12083_v50  ;;  %v991_v11 = vpop.f32.mrb[55].mxu0  ;;  %10855 = vmatprep.mubr.bf16.mxu1 %v2189_v56  ;;  %v1080_v23 = vmul.f32 %v13872_v34, %v989_v52  ;;  %v1332_v60 = vmul.f32 1.442695, %v1217_v25 }
 0x2d4   : > { %v12087_v26 = vpop.eup %12086  ;;  %12104 = vrcp.f32 %v1399_v18  ;;  %v1401_v41 = vadd.f32 1.0, %v12085_v7  ;;  %v1081_v13 = vmul.f32 %v13874_v35, %v991_v11  ;;  %v14275_v24 = vadd.f32 %v13876_v36, %v1078_v39 }
 0x2d5   : > { %v12089_v12 = vpop.eup %12088  ;;  %12106 = vrcp.f32 %v1400_v33  ;;  %v14278_v50 = vadd.f32 %v13878_v38, %v1079_v20  ;;  %v14281_v18 = vadd.f32 %v13876_v36, %v1080_v23  ;;  %v14292_v39 = vmul.f32 %v12087_v26, %v14136_v16 }
 0x2d6   : > { %v12091_v45 = vpop.eup %12090  ;;  %12108 = vrcp.f32 %v1401_v41  ;;  %v14284_v21 = vadd.f32 %v13878_v38, %v1081_v13  ;;  %v1218_v19 = vsub.f32 0.0, %v14275_v24  ;;  %v14295_v41 = vmul.f32 %v12089_v12, %v14139_v1 }
 0x2d7   : > { %v12093_v56 = vpop.eup %12092  ;;  %v14287_v52 = vmul.f32 %v12091_v45, %v14145_v57  ;;  %12110 = vpow2.f32 %v1326_v58  ;;  %v1219_v7 = vsub.f32 0.0, %v14278_v50  ;;  %18698 = vst [vmem:[#allocation75_spill] sm:$0xff] %v14292_v39  ;;  %v1220_v25 = vsub.f32 0.0, %v14281_v18 }
 0x2d8   : > { %v12095_v33 = vpop.eup %12094  ;;  %18699 = vst [vmem:[#allocation76_spill] sm:$0xff] %v14295_v41  ;;  %12112 = vpow2.f32 %v1328_v31  ;;  %v995_v20 = vpop.f32.mrb[56].mxu0  ;;  %v1334_v57 = vmul.f32 1.442695, %v1218_v19  ;;  %v1221_v58 = vsub.f32 0.0, %v14284_v21 }
 0x2d9   : > { %18697 = vst [vmem:[#allocation74_spill] sm:$0xff] %v14287_v52  ;;  %v12097_v11 = vpop.eup %12096  ;;  %v1402_v23 = vadd.f32 1.0, %v12095_v33  ;;  %12114 = vpow2.f32 %v1330_v55  ;;  %v997_v13 = vpop.f32.mrb[57].mxu0  ;;  %v1336_v27 = vmul.f32 1.442695, %v1219_v7  ;;  %v2190_v31 = vpack.c.bf16 %v14287_v52, %v14292_v39 }
 0x2da   : > { %v12099_v45 = vpop.eup %12098  ;;  %v1403_v8 = vadd.f32 1.0, %v12097_v11  ;;  %12116 = vpow2.f32 %v1332_v60  ;;  %v1338_v26 = vmul.f32 1.442695, %v1220_v25  ;;  %v999_v16 = vpop.f32.mrb[58].mxu0  ;;  %v1082_v12 = vmul.f32 %v13872_v34, %v995_v20 }
 0x2db   : > { %v12101_v42 = vpop.eup %12100  ;;  %12118 = vrcp.f32 %v1402_v23  ;;  %v1404_v1 = vadd.f32 1.0, %v12099_v45  ;;  %v1001_v33 = vpop.f32.mrb[59].mxu0  ;;  %v1083_v19 = vmul.f32 %v13874_v35, %v997_v13  ;;  %v1084_v49 = vmul.f32 %v13872_v34, %v999_v16  ;;  %10856 = vmatmul.mubr.bf16.gmra.mrb[16].mxu1 %v2190_v31 }
 0x2dc   : > { %12120 = vrcp.f32 %v1403_v8  ;;  %v1405_v55 = vadd.f32 1.0, %v12101_v42  ;;  %v14305_v60 = vadd.f32 %v13876_v36, %v1082_v12  ;;  %v1085_v7 = vmul.f32 %v13874_v35, %v1001_v33 }
 0x2dd   : > { %v12103_v11 = vpop.eup %12102  ;;  %12122 = vrcp.f32 %v1404_v1  ;;  %v1340_v20 = vmul.f32 1.442695, %v1221_v58  ;;  %v14311_v42 = vadd.f32 %v13878_v38, %v1083_v19  ;;  %v14314_v8 = vadd.f32 %v13876_v36, %v1084_v49 }
 0x2de   : > { %v12105_v23 = vpop.eup %12104  ;;  %12124 = vrcp.f32 %v1405_v55  ;;  %v14317_v45 = vmul.f32 %v12093_v56, %v14155_v37  ;;  %v1222_v16 = vsub.f32 0.0, %v14305_v60  ;;  %v14321_v1 = vadd.f32 %v13878_v38, %v1085_v7 }
 0x2df   : > { %v12107_v13 = vpop.eup %12106  ;;  %12126 = vpow2.f32 %v1334_v57  ;;  %v1223_v58 = vsub.f32 0.0, %v14311_v42  ;;  %v1224_v49 = vsub.f32 0.0, %v14314_v8  ;;  %v14329_v37 = vmul.f32 %v12103_v11, %v14167_v2 }
 0x2e0   : > { %18700 = vst [vmem:[#allocation77_spill] sm:$0xff] %v14317_v45  ;;  %v12109_v31 = vpop.eup %12108  ;;  %v14324_v12 = vmul.f32 %v12107_v13, %v14177_v62  ;;  %12128 = vpow2.f32 %v1336_v27  ;;  %v1005_v33 = vpop.f32.mrb[60].mxu0  ;;  %v14332_v56 = vmul.f32 %v12105_v23, %v14174_v30  ;;  %v1342_v57 = vmul.f32 1.442695, %v1222_v16 }
 0x2e1   : > { %v12111_v55 = vpop.eup %12110  ;;  %18702 = vst [vmem:[#allocation79_spill] sm:$0xff] %v14329_v37  ;;  %12130 = vpow2.f32 %v1338_v26  ;;  %v1007_v19 = vpop.f32.mrb[61].mxu0  ;;  %v1344_v62 = vmul.f32 1.442695, %v1223_v58  ;;  %v1225_v27 = vsub.f32 0.0, %v14321_v1  ;;  %v1086_v23 = vmul.f32 %v13872_v34, %v1005_v33 }
 0x2e2   : > { %18701 = vst [vmem:[#allocation78_spill] sm:$0xff] %v14324_v12  ;;  %18703 = vst [vmem:[#allocation80_spill] sm:$0xff] %v14332_v56  ;;  %v12113_v7 = vpop.eup %12112  ;;  %v1406_v25 = vadd.f32 1.0, %v12111_v55  ;;  %12132 = vpow2.f32 %v1340_v20  ;;  %v1009_v13 = vpop.f32.mrb[62].mxu0  ;;  %v1346_v39 = vmul.f32 1.442695, %v1224_v49  ;;  %v2191_v2 = vpack.c.bf16 %v14324_v12, %v14329_v37 }
 0x2e3   : > { %v12115_v6 = vpop.eup %12114  ;;  %v1407_v10 = vadd.f32 1.0, %v12113_v7  ;;  %12134 = vpow2.f32 %v1342_v57  ;;  %v1011_v11 = vpop.f32.mrb[63].mxu0  ;;  %v1087_v16 = vmul.f32 %v13874_v35, %v1007_v19  ;;  %v1088_v55 = vmul.f32 %v13872_v34, %v1009_v13 }
 0x2e4   : > { %v12117_v30 = vpop.eup %12116  ;;  %12136 = vrcp.f32 %v1406_v25  ;;  %v1408_v26 = vadd.f32 1.0, %v12115_v6  ;;  %10859 = vmatprep.mubr.bf16.mxu1 %v2191_v2  ;;  %v1089_v57 = vmul.f32 %v13874_v35, %v1011_v11  ;;  %v1348_v7 = vmul.f32 1.442695, %v1225_v27 }
 0x2e5   : > { %v12119_v20 = vpop.eup %12118  ;;  %12138 = vrcp.f32 %v1407_v10  ;;  %v1409_v58 = vadd.f32 1.0, %v12117_v30  ;;  %v14342_v37 = vadd.f32 %v13876_v36, %v1086_v23  ;;  %v14345_v6 = vadd.f32 %v13878_v38, %v1087_v16 }
 0x2e6   : > { %v12121_v49 = vpop.eup %12120  ;;  %12140 = vrcp.f32 %v1408_v26  ;;  %v14348_v33 = vmul.f32 %v12109_v31, %v14184_v54  ;;  %v14351_v10 = vadd.f32 %v13876_v36, %v1088_v55  ;;  %v14354_v34 = vadd.f32 %v13878_v38, %v1089_v57 }
 0x2e7   : > { %v12123_v25 = vpop.eup %12122  ;;  %12142 = vrcp.f32 %v1409_v58  ;;  %v1226_v27 = vsub.f32 0.0, %v14342_v37  ;;  %v1227_v13 = vsub.f32 0.0, %v14345_v6  ;;  %v14362_v54 = vmul.f32 %v12119_v20, %v14204_v53 }
 0x2e8   : > { %18704 = vst [vmem:[#allocation81_spill] sm:$0xff] %v14348_v33  ;;  %v12125_v35 = vpop.eup %12124  ;;  %v14357_v19 = vmul.f32 %v12123_v25, %v14211_v44  ;;  %12144 = vpow2.f32 %v1344_v62  ;;  %v14365_v31 = vmul.f32 %v12121_v49, %v14208_v61  ;;  %v1228_v44 = vsub.f32 0.0, %v14351_v10 }
 0x2e9   : > { %v12127_v2 = vpop.eup %12126  ;;  %18706 = vst [vmem:[#allocation83_spill] sm:$0xff] %v14362_v54  ;;  %v14368_v36 = vmul.f32 %v12125_v35, %v14218_v0  ;;  %12146 = vpow2.f32 %v1346_v39  ;;  %v1229_v62 = vsub.f32 0.0, %v14354_v34  ;;  %v1350_v23 = vmul.f32 1.442695, %v1226_v27 }
 0x2ea   : > { %18705 = vst [vmem:[#allocation82_spill] sm:$0xff] %v14357_v19  ;;  %18707 = vst [vmem:[#allocation84_spill] sm:$0xff] %v14365_v31  ;;  %v12129_v38 = vpop.eup %12128  ;;  %v1410_v11 = vadd.f32 1.0, %v12127_v2  ;;  %12148 = vpow2.f32 %v1348_v7  ;;  %v1352_v16 = vmul.f32 1.442695, %v1227_v13  ;;  %v2192_v53 = vpack.c.bf16 %v14357_v19, %v14362_v54 }
 0x2eb   : > { %18708 = vst [vmem:[#allocation85_spill] sm:$0xff] %v14368_v36  ;;  %v12131_v30 = vpop.eup %12130  ;;  %v1411_v26 = vadd.f32 1.0, %v12129_v38  ;;  %v1354_v2 = vmul.f32 1.442695, %v1228_v44  ;;  %v11764_v38 = vld [vmem:[#allocation15 + $0xc8] sm:$0xff]  }
 0x2ec   : > { %v12133_v61 = vpop.eup %12132  ;;  %12150 = vrcp.f32 %v1410_v11  ;;  %v1412_v20 = vadd.f32 1.0, %v12131_v30  ;;  %10860 = vmatmul.mubr.bf16.gmra.mrb[20].mxu1 %v2192_v53 }
 0x2ed   : > { %v12135_v58 = vpop.eup %12134  ;;  %12152 = vrcp.f32 %v1411_v26  ;;  %v1413_v55 = vadd.f32 1.0, %v12133_v61  ;;  %v1356_v26 = vmul.f32 1.442695, %v1229_v62 }
 0x2ee   : > { %v12137_v7 = vpop.eup %12136  ;;  %12154 = vrcp.f32 %v1412_v20  ;;  %v1414_v25 = vadd.f32 1.0, %v12135_v58 }
 0x2ef   : > { %v12139_v13 = vpop.eup %12138  ;;  %12156 = vrcp.f32 %v1413_v55  ;;  %v14393_v20 = vmul.f32 %v12137_v7, %v14238_v47 }
 0x2f0   : > { %v12141_v30 = vpop.eup %12140  ;;  %12158 = vrcp.f32 %v1414_v25  ;;  %v14399_v55 = vmul.f32 %v12139_v13, %v14241_v51 }
 0x2f1   : > { %v12143_v61 = vpop.eup %12142  ;;  %18709 = vst [vmem:[#allocation86_spill] sm:$0xff] %v14393_v20  ;;  %v14396_v58 = vmul.f32 %v12141_v30, %v14247_v3  ;;  %12160 = vpow2.f32 %v1350_v23 }
 0x2f2   : > { %v12145_v44 = vpop.eup %12144  ;;  %18711 = vst [vmem:[#allocation88_spill] sm:$0xff] %v14399_v55  ;;  %v14402_v11 = vmul.f32 %v12143_v61, %v14250_v17  ;;  %12162 = vpow2.f32 %v1352_v16 }
 0x2f3   : > { %18710 = vst [vmem:[#allocation87_spill] sm:$0xff] %v14396_v58  ;;  %v12147_v62 = vpop.eup %12146  ;;  %v1415_v25 = vadd.f32 1.0, %v12145_v44  ;;  %12164 = vpow2.f32 %v1354_v2  ;;  %v2193_v53 = vpack.c.bf16 %v14396_v58, %v14393_v20 }
 0x2f4   : > { %18712 = vst [vmem:[#allocation89_spill] sm:$0xff] %v14402_v11  ;;  %v12149_v47 = vpop.eup %12148  ;;  %v1416_v7 = vadd.f32 1.0, %v12147_v62  ;;  %12166 = vpow2.f32 %v1356_v26 }
 0x2f5   : > { %12168 = vrcp.f32 %v1415_v25  ;;  %v1417_v23 = vadd.f32 1.0, %v12149_v47  ;;  %10863 = vmatprep.mubr.bf16.mxu1 %v2193_v53  ;;  %v11761_v25 = vld [vmem:[#allocation15 + $0x100] sm:$0xff]  }
 0x2f6   : > { %v12151_v51 = vpop.eup %12150  ;;  %12170 = vrcp.f32 %v1416_v7  ;;  %9871 = vmatprep.subr.bf16.mxu1 %v11761_v25 }
 0x2f7   : > { %v12153_v17 = vpop.eup %12152  ;;  %12172 = vrcp.f32 %v1417_v23  ;;  %v14409_v2 = vmul.f32 %v12151_v51, %v14275_v24  ;;  %v11762_v23 = vld [vmem:[#allocation15 + $0xc0] sm:$0xff]  }
 0x2f8   : > { %v12155_v16 = vpop.eup %12154  ;;  %v14415_v26 = vmul.f32 %v12153_v17, %v14278_v50  ;;  %9872 = vmatpush3.bf16.msra.mxu1 %v11762_v23  ;;  %v11766_v23 = vld [vmem:[#allocation15 + $0xd0] sm:$0xff]  }
 0x2f9   : > { %v12157_v13 = vpop.eup %12156  ;;  %18713 = vst [vmem:[#allocation90_spill] sm:$0xff] %v14409_v2  ;;  %v14412_v30 = vmul.f32 %v12155_v16, %v14281_v18 }
 0x2fa   : > { %v12159_v61 = vpop.eup %12158  ;;  %18715 = vst [vmem:[#allocation92_spill] sm:$0xff] %v14415_v26  ;;  %v14418_v44 = vmul.f32 %v12157_v13, %v14284_v21  ;;  %v11763_v13 = vld [vmem:[#allocation15 + $0x108] sm:$0xff]  }
 0x2fb   : > { %18714 = vst [vmem:[#allocation91_spill] sm:$0xff] %v14412_v30  ;;  %v12161_v53 = vpop.eup %12160  ;;  %v2194_v62 = vpack.c.bf16 %v14412_v30, %v14409_v2  ;;  %v14425_v27 = vmul.f32 %v12159_v61, %v14305_v60  ;;  %9873 = vmatprep.subr.bf16.mxu1 %v11763_v13  ;;  %v11768_v61 = vld [vmem:[#allocation15 + $0xd8] sm:$0xff]  }
 0x2fc   : > { %18716 = vst [vmem:[#allocation93_spill] sm:$0xff] %v14418_v44  ;;  %v12163_v47 = vpop.eup %12162  ;;  %v1418_v7 = vadd.f32 1.0, %v12161_v53  ;;  %9874 = vmatpush3.bf16.msra.mxu1 %v11764_v38  ;;  %v11812_v30 = vld [vmem:[#allocation15 + $0x1f8] sm:$0xff]  }
 0x2fd   : > { %v12165_v18 = vpop.eup %12164  ;;  %v1419_v51 = vadd.f32 1.0, %v12163_v47  ;;  %10864 = vmatmul.mubr.bf16.gmra.mrb[24].mxu1 %v2194_v62  ;;  %18717 = vst [vmem:[#allocation94_spill] sm:$0xff] %v14425_v27 }
 0x2fe   : > { %v12167_v50 = vpop.eup %12166  ;;  %12174 = vrcp.f32 %v1418_v7  ;;  %v1420_v17 = vadd.f32 1.0, %v12165_v18  ;;  %v11765_v7 = vld [vmem:[#allocation15 + $0x110] sm:$0xff]  }
 0x2ff   : > { %v12169_v21 = vpop.eup %12168  ;;  %12176 = vrcp.f32 %v1419_v51  ;;  %v1421_v16 = vadd.f32 1.0, %v12167_v50  ;;  %9875 = vmatprep.subr.bf16.mxu1 %v11765_v7  ;;  %v11770_v50 = vld [vmem:[#allocation15 + $0x120] sm:$0xff]   ;;  %v11775_v7 = vld [vmem:[#allocation15 + $0xf0] sm:$0xff]  }
 0x300   : > { %v12171_v3 = vpop.eup %12170  ;;  %12178 = vrcp.f32 %v1420_v17  ;;  %v14431_v62 = vmul.f32 %v12169_v21, %v14311_v42  ;;  %9876 = vmatpush3.bf16.msra.mxu1 %v11766_v23  ;;  %v11776_v23 = vld [vmem:[#allocation15 + $0x138] sm:$0xff]  }
 0x301   : > { %v12173_v53 = vpop.eup %12172  ;;  %v14428_v24 = vmul.f32 %v12171_v3, %v14314_v8  ;;  %12180 = vrcp.f32 %v1421_v16  ;;  %v11767_v8 = vld [vmem:[#allocation15 + $0x118] sm:$0xff]   ;;  %v11771_v16 = vld [vmem:[#allocation15 + $0xe0] sm:$0xff]  }
 0x302   : > { %18719 = vst [vmem:[#allocation96_spill] sm:$0xff] %v14431_v62  ;;  %v14434_v25 = vmul.f32 %v12173_v53, %v14321_v1  ;;  %9877 = vmatprep.subr.bf16.mxu1 %v11767_v8  ;;  %v11772_v53 = vld [vmem:[#allocation15 + $0x128] sm:$0xff]   ;;  %v11777_v8 = vld [vmem:[#allocation15 + $0xf8] sm:$0xff]  }
 0x303   : > { %18718 = vst [vmem:[#allocation95_spill] sm:$0xff] %v14428_v24  ;;  %v2195_v47 = vpack.c.bf16 %v14428_v24, %v14425_v27 }
 0x304   : > { %18720 = vst [vmem:[#allocation97_spill] sm:$0xff] %v14434_v25  ;;  %9878 = vmatpush3.bf16.msra.mxu1 %v11768_v61  ;;  %v11779_v61 = vld [vmem:[#allocation15 + $0x168] sm:$0xff]  }
 0x305   : > { %10867 = vmatprep.mubr.bf16.mxu1 %v2195_v47  ;;  %9879 = vmatprep.subr.bf16.mxu1 %v11770_v50  ;;  %v11760_v47 = vld [vmem:[#allocation15 + $0x150] sm:$0xff]  }
 0x306   : > { %10875 = vmatprep.subr.bf16.mxu0 %v11760_v47 }
 0x307   : > { %10876 = vmatpush3.bf16.msra.mxu0 %v11760_v47 }
 0x308   : > { %v12175_v3 = vpop.eup %12174  ;;  %9880 = vmatpush3.bf16.msra.mxu1 %v11771_v16  ;;  %v14458_v16 = vld [vmem:[#allocation14] ss:$0 sm:$0xff] }
 0x309   : > { %v12177_v42 = vpop.eup %12176  ;;  %v14441_v38 = vmul.f32 %v12175_v3, %v14342_v37  ;;  %9881 = vmatprep.subr.bf16.mxu1 %v11772_v53  ;;  %v11778_v3 = vld [vmem:[#allocation15 + $0x160] sm:$0xff]  }
 0x30a   : > { %v12179_v18 = vpop.eup %12178  ;;  %v14447_v17 = vmul.f32 %v12177_v42, %v14345_v6  ;;  %v11769_v6 = vld [vmem:[#allocation15 + $0x158] sm:$0xff]   ;;  %v11780_v42 = vld [vmem:[#allocation15 + $0x170] sm:$0xff]   ;;  %v11782_v37 = vld [vmem:[#allocation15 + $0x40] sm:$0xff]  }
 0x30b   : > { %v12181_v1 = vpop.eup %12180  ;;  %18721 = vst [vmem:[#allocation98_spill] sm:$0xff] %v14441_v38  ;;  %v14444_v51 = vmul.f32 %v12179_v18, %v14351_v10  ;;  %v11773_v10 = vld [vmem:[#allocation15 + $0xe8] sm:$0xff]   ;;  %10877 = vmatprep.subr.bf16.mxu0 %v11769_v6  ;;  %v11781_v18 = vld [vmem:[#allocation15 + $0x178] sm:$0xff]  }
 0x30c   : > { %18723 = vst [vmem:[#allocation100_spill] sm:$0xff] %v14447_v17  ;;  %v14450_v21 = vmul.f32 %v12181_v1, %v14354_v34  ;;  %9882 = vmatpush3.bf16.msra.mxu1 %v11773_v10  ;;  %v11774_v34 = vld [vmem:[#allocation15 + $0x130] sm:$0xff]   ;;  %10878 = vmatpush3.bf16.msra.mxu0 %v11769_v6  ;;  %v14456_v1 = vld [vmem:[#allocation12] ss:$0 sm:$0xff] }
 0x30d   : > { %18722 = vst [vmem:[#allocation99_spill] sm:$0xff] %v14444_v51  ;;  %v2196_v13 = vpack.c.bf16 %v14444_v51, %v14441_v38  ;;  %9883 = vmatprep.subr.bf16.mxu1 %v11774_v34  ;;  %10879 = vmatprep.subr.bf16.mxu0 %v11778_v3 }
 0x30e   : > { %18724 = vst [vmem:[#allocation101_spill] sm:$0xff] %v14450_v21 }
 0x30f   : > { %10868 = vmatmul.mubr.bf16.gmra.mrb[28].mxu1 %v2196_v13 }
 0x310   : > { %9884 = vmatpush3.bf16.msra.mxu1 %v11775_v7  ;;  %10880 = vmatpush3.bf16.msra.mxu0 %v11778_v3 }
 0x311   : > { %9885 = vmatprep.subr.bf16.mxu1 %v11776_v23  ;;  %10881 = vmatprep.subr.bf16.mxu0 %v11779_v61 }
 0x314   : > { %9886 = vmatpush3.bf16.msra.mxu1 %v11777_v8  ;;  %10882 = vmatpush3.bf16.msra.mxu0 %v11779_v61 }
 0x315   : > { %10883 = vmatprep.subr.bf16.mxu0 %v11780_v42 }
 0x318   : > { %10884 = vmatpush3.bf16.msra.mxu0 %v11780_v42 }
 0x319   : > { %10885 = vmatprep.subr.bf16.mxu0 %v11781_v18 }
 0x31c   : > { %10886 = vmatpush3.bf16.msra.mxu0 %v11781_v18 }
 0x31d   : > { %10007 = vmatprep.subr.bf16.mxu0 %v11782_v37 }
 0x36e   : > { %v10841_v50 = vpop.f32.mrb[0].mxu1 }
 0x36f   : > { %v2431_v13 = vmul.f32 %v10841_v50, %v14456_v1  ;;  %v2295_v53 = vpop.f32.mrb[1].mxu1 }
 0x370   : > { %v2429_v10 = vmul.f32 %v14456_v1, %v2295_v53  ;;  %v10842_v47 = vpop.f32.mrb[2].mxu1 }
 0x371   : > { %v14463_v6 = vadd.f32 %v14458_v16, %v2431_v13  ;;  %v2432_v34 = vmul.f32 %v10842_v47, %v14456_v1  ;;  %v2298_v7 = vpop.f32.mrb[3].mxu1 }
 0x372   : > { %v14467_v23 = vadd.f32 %v14458_v16, %v2429_v10  ;;  %v2430_v8 = vmul.f32 %v14456_v1, %v2298_v7 }
 0x373   : > { %v2502_v3 = vsub.f32 0.0, %v14463_v6  ;;  %v14472_v61 = vadd.f32 %v14458_v16, %v2432_v34 }
 0x374   : > { %v2500_v42 = vsub.f32 0.0, %v14467_v23  ;;  %v14476_v18 = vadd.f32 %v14458_v16, %v2430_v8 }
 0x375   : > { %v2536_v50 = vmul.f32 1.442695, %v2502_v3  ;;  %v2503_v13 = vsub.f32 0.0, %v14472_v61 }
 0x376   : > { %v2532_v53 = vmul.f32 1.442695, %v2500_v42  ;;  %v2501_v47 = vsub.f32 0.0, %v14476_v18 }
 0x377   : > { %12182 = vpow2.f32 %v2536_v50  ;;  %v2538_v10 = vmul.f32 1.442695, %v2503_v13 }
 0x378   : > { %12184 = vpow2.f32 %v2532_v53  ;;  %v2534_v7 = vmul.f32 1.442695, %v2501_v47 }
 0x379   : > { %12186 = vpow2.f32 %v2538_v10 }
 0x37a   : > { %12188 = vpow2.f32 %v2534_v7  ;;  %v11792_v7 = vld [vmem:[#allocation15 + $0x1c0] sm:$0xff]  }
 0x37b   : > { %10143 = vmatprep.subr.bf16.mxu1 %v11792_v7  ;;  %v14506_v7 = vadd.s32 24, %v13868_v29 }
 0x37e   : > { %v10845_v34 = vpop.f32.mrb[4].mxu1 }
 0x37f   : > { %v2435_v60 = vmul.f32 %v10845_v34, %v14456_v1  ;;  %v2311_v35 = vpop.f32.mrb[5].mxu1 }
 0x380   : > { %v2433_v8 = vmul.f32 %v14456_v1, %v2311_v35  ;;  %v10846_v3 = vpop.f32.mrb[6].mxu1 }
 0x381   : > { %v12183_v49 = vpop.eup %12182  ;;  %v14483_v42 = vadd.f32 %v14458_v16, %v2435_v60  ;;  %v2436_v50 = vmul.f32 %v10846_v3, %v14456_v1  ;;  %v2314_v13 = vpop.f32.mrb[7].mxu1 }
 0x382   : > { %v12185_v53 = vpop.eup %12184  ;;  %v2598_v47 = vadd.f32 1.0, %v12183_v49  ;;  %v14487_v10 = vadd.f32 %v14458_v16, %v2433_v8  ;;  %v2434_v37 = vmul.f32 %v14456_v1, %v2314_v13 }
 0x383   : > { %v12187_v34 = vpop.eup %12186  ;;  %v2596_v57 = vadd.f32 1.0, %v12185_v53  ;;  %v2506_v35 = vsub.f32 0.0, %v14483_v42  ;;  %v14492_v39 = vadd.f32 %v14458_v16, %v2436_v50 }
 0x384   : > { %v12189_v60 = vpop.eup %12188  ;;  %12190 = vrcp.f32 %v2598_v47  ;;  %v2599_v0 = vadd.f32 1.0, %v12187_v34  ;;  %v2504_v3 = vsub.f32 0.0, %v14487_v10  ;;  %v14496_v49 = vadd.f32 %v14458_v16, %v2434_v37 }
 0x385   : > { %12192 = vrcp.f32 %v2596_v57  ;;  %v2597_v8 = vadd.f32 1.0, %v12189_v60  ;;  %v2544_v13 = vmul.f32 1.442695, %v2506_v35  ;;  %v2507_v17 = vsub.f32 0.0, %v14492_v39 }
 0x386   : > { %12194 = vrcp.f32 %v2599_v0  ;;  %v2540_v53 = vmul.f32 1.442695, %v2504_v3  ;;  %v2505_v21 = vsub.f32 0.0, %v14496_v49  ;;  %v1558_v47 = vadd.s32 8, %v13868_v29 }
 0x387   : > { %12196 = vrcp.f32 %v2597_v8  ;;  %v2546_v50 = vmul.f32 1.442695, %v2507_v17  ;;  %v1593_v37 = vand.u32 15, %v13868_v29  ;;  %v14503_v57 = vadd.s32 16, %v13868_v29 }
 0x388   : > { %12198 = vpow2.f32 %v2544_v13  ;;  %v2542_v34 = vmul.f32 1.442695, %v2505_v21  ;;  %v1600_v0 = vand.u32 15, %v1558_v47  ;;  %v14509_v35 = vadd.s32 32, %v13868_v29 }
 0x389   : > { %12200 = vpow2.f32 %v2540_v53  ;;  %vm14511_vm4 = vcmp.ge.s32.totalorder %v1593_v37, 1  ;;  %v14518_v8 = vadd.s32 40, %v13868_v29  ;;  %v14529_v37 = vadd.s32 48, %v13868_v29 }
 0x38a   : > { %12202 = vpow2.f32 %v2546_v50  ;;  %vm14523_vm5 = vcmp.le.s32.totalorder %v1600_v0, 14  ;;  %v14532_v60 = vadd.s32 56, %v13868_v29  ;;  %v14540_v0 = vadd.s32 72, %v13868_v29  ;;  %vm14573_vm7 = vmpackc.low %vm13316_vm6, %vm14511_vm4 }
 0x38b   : > { %12204 = vpow2.f32 %v2542_v34  ;;  %vm14591_vm8 = vmpackc.low %vm14523_vm5, %vm13316_vm6  ;;  %v18732_v17 = vmov 0 }
 0x38c   : > { %v18733_v17 = vsel %vm14591_vm8, 4294967295, %v18732_v17 }
 0x38d   : > { %18734 = vst [vmem:[#allocation103_spill] sm:$0xff] %v18733_v17 }
 0x38e   : > { %v12191_v21 = vpop.eup %12190  ;;  %v10849_v50 = vpop.f32.mrb[8].mxu1 }
 0x38f   : > { %v12193_v13 = vpop.eup %12192  ;;  %v14521_v53 = vmul.f32 %v12191_v21, %v14463_v6  ;;  %v2439_v25 = vmul.f32 %v10849_v50, %v14456_v1  ;;  %v2327_v6 = vpop.f32.mrb[9].mxu1  ;;  %v14537_v21 = vadd.s32 64, %v13868_v29 }
 0x390   : > { %v12195_v3 = vpop.eup %12194  ;;  %v2660_v62 = vmul.f32 %v12193_v13, %v14467_v23  ;;  %v2437_v11 = vmul.f32 %v14456_v1, %v2327_v6  ;;  %v10850_v23 = vpop.f32.mrb[10].mxu1 }
 0x391   : > { %v12197_v26 = vpop.eup %12196  ;;  %v2728_v34 = vrot.slane %v14521_v53, 7  ;;  %v2921_v44 = vrot.slane %v14521_v53, 1  ;;  %v14545_v55 = vmul.f32 %v12195_v3, %v14472_v61  ;;  %v14550_v56 = vadd.f32 %v14458_v16, %v2439_v25  ;;  %v2330_v33 = vpop.f32.mrb[11].mxu1 }
 0x392   : > { %v12199_v13 = vpop.eup %12198  ;;  %v2725_v50 = vrot.slane %v2660_v62, 7  ;;  %v2918_v31 = vrot.slane %v2660_v62, 1  ;;  %v2661_v36 = vmul.f32 %v12197_v26, %v14476_v18  ;;  %v14555_v61 = vadd.f32 %v14458_v16, %v2437_v11 }
 0x393   : > { %v12201_v41 = vpop.eup %12200  ;;  %v18356_v14 = vrot.slane %v14545_v55, 1  ;;  %v2602_v22 = vadd.f32 1.0, %v12199_v13  ;;  %v2510_v45 = vsub.f32 0.0, %v14550_v56  ;;  %v2438_v32 = vmul.f32 %v14456_v1, %v2330_v33 }
 0x394   : > { %v12203_v3 = vpop.eup %12202  ;;  %v2820_v6 = vsel %vm18380_vm2, 0.0, %v2725_v50  ;;  %v2726_v9 = vrot.slane %v2661_v36, 7  ;;  %v2919_v43 = vrot.slane %v2661_v36, 1  ;;  %v2600_v4 = vadd.f32 1.0, %v12201_v41 }
 0x395   : > { %v12205_v26 = vpop.eup %12204  ;;  %v14561_v25 = vsel %vm18383_vm3, %v2921_v44, %v18356_v14  ;;  %12206 = vrcp.f32 %v2602_v22  ;;  %v2603_v18 = vadd.f32 1.0, %v12203_v3  ;;  %v2508_v63 = vsub.f32 0.0, %v14555_v61 }
 0x396   : > { %v2727_v13 = vsel %vm18380_vm2, %v2725_v50, %v2726_v9  ;;  %12208 = vrcp.f32 %v2600_v4  ;;  %v2601_v11 = vadd.f32 1.0, %v12205_v26  ;;  %v2552_v46 = vmul.f32 1.442695, %v2510_v45  ;;  %v11793_v50 = vld [vmem:[#allocation15 + $0x180] sm:$0xff]  }
 0x397   : > { %12210 = vrcp.f32 %v2603_v18  ;;  %v2440_v41 = vmul.f32 %v10850_v23, %v14456_v1  ;;  %v2548_v15 = vmul.f32 1.442695, %v2508_v63  ;;  %v14568_v14 = vpack.c.bf16 %v2661_v36, %v2660_v62  ;;  %v11794_v36 = vld [vmem:[#allocation15 + $0x1c8] sm:$0xff]  }
 0x398   : > { %12212 = vrcp.f32 %v2601_v11  ;;  %v18729_v22 = vmov 0  ;;  %v14577_v4 = vpack.c.bf16 %v2727_v13, %v2820_v6  ;;  %v14583_v33 = vadd.f32 %v14458_v16, %v2438_v32  ;;  %v11796_v23 = vld [vmem:[#allocation15 + $0x188] sm:$0xff]  }
 0x399   : > { %v18730_v22 = vsel %vm14573_vm7, 4294967295, %v18729_v22  ;;  %12214 = vpow2.f32 %v2552_v46  ;;  %v14580_v45 = vadd.f32 %v14458_v16, %v2440_v41  ;;  %v2920_v63 = vsel %vm18383_vm3, %v2918_v31, %v2919_v43  ;;  %3430 = vmatprep.mubr.bf16.mxu1 %v14568_v14 }
 0x39a   : > { %18731 = vst [vmem:[#allocation102_spill] sm:$0xff] %v18730_v22  ;;  %12216 = vpow2.f32 %v2548_v15  ;;  %v2922_v62 = vsel %vm18383_vm3, %v2919_v43, %v2921_v44  ;;  %v14597_v46 = vpack.c.bf16 %v14545_v55, %v14521_v53  ;;  %v2729_v32 = vsel %vm18380_vm2, %v2726_v9, %v2728_v34  ;;  %8979 = vmatmul.mubr.msk.bf16.vlgmr.msra.gmra.mrb[32].mxu1 %vm14573_vm7, %v14577_v4 }
 0x39b   : > { %v2511_v31 = vsub.f32 0.0, %v14580_v45  ;;  %v2509_v15 = vsub.f32 0.0, %v14583_v33  ;;  %v14605_v43 = vpack.c.bf16 %v2922_v62, %v2920_v63  ;;  %v18736_v44 = vrot.slane %v14545_v55, 7  ;;  %10144 = vmatpush3.bf16.msra.mxu1 %v11793_v50 }
 0x39c   : > { %3438 = vmatprep.mubr.bf16.mxu1 %v14597_v46  ;;  %v1628_v9 = vand.u32 15, %v14518_v8  ;;  %v18737_v26 = vand.u32 15, %v14503_v57  ;;  %10145 = vmatprep.subr.bf16.mxu1 %v11794_v36  ;;  %v18740_v13 = vand.u32 15, %v14506_v7  ;;  %v18743_v11 = vand.u32 15, %v14509_v35  ;;  %v11802_v36 = vld [vmem:[#allocation15 + $0x198] sm:$0xff]  }
 0x39d   : > { %18735 = vst [vmem:[#allocation104_spill] sm:$0xff] %v14605_v43  ;;  %v2731_v47 = vsel %vm18380_vm2, %v2728_v34, %v18736_v44  ;;  %v2554_v3 = vmul.f32 1.442695, %v2511_v31  ;;  %v2550_v6 = vmul.f32 1.442695, %v2509_v15  ;;  %10887 = vmatprep.mubr.msk.bf16.mxu0 %vm14591_vm8, %v14605_v43  ;;  %v11798_v34 = vld [vmem:[#allocation15 + $0x1d0] sm:$0xff]  }
 0x39e   : > { %v14611_v53 = vpack.c.bf16 %v2731_v47, %v2729_v32  ;;  %vm14619_vm9 = vcmp.ge.s32.totalorder %v18737_v26, 1  ;;  %vm14625_vm10 = vcmp.le.s32.totalorder %v18740_v13, 14  ;;  %vm14631_vm11 = vcmp.ge.s32.totalorder %v18743_v11, 1  ;;  %v10853_v63 = vpop.f32.mrb[12].mxu1 }
 0x39f   : > { %v12207_v50 = vpop.eup %12206  ;;  %12218 = vpow2.f32 %v2554_v3  ;;  %v2443_v35 = vmul.f32 %v10853_v63, %v14456_v1  ;;  %v2343_v15 = vpop.f32.mrb[13].mxu1  ;;  %vm14646_vm12 = vmpackc.low %vm13316_vm6, %vm14619_vm9  ;;  %v18746_v44 = vmov 0  ;;  %vm14650_vm13 = vcmp.le.s32.totalorder %v1628_v9, 14  ;;  %10146 = vmatpush3.bf16.msra.mxu1 %v11796_v23  ;;  %v11800_v9 = vld [vmem:[#allocation15 + $0x1d8] sm:$0xff]  }
 0x3a0   : > { %v12209_v32 = vpop.eup %12208  ;;  %v14640_v31 = vmul.f32 %v12207_v50, %v14483_v42  ;;  %12220 = vpow2.f32 %v2550_v6  ;;  %v18747_v44 = vsel %vm14646_vm12, 4294967295, %v18746_v44  ;;  %v14655_v3 = vadd.s32 80, %v13868_v29  ;;  %v11799_v42 = vld [vmem:[#allocation15 + $0x190] sm:$0xff]   ;;  %v10854_v18 = vpop.f32.mrb[14].mxu1  ;;  %10147 = vmatprep.subr.bf16.mxu1 %v11798_v34  ;;  %vm14697_vm14 = vmpackc.low %vm14625_vm10, %vm13316_vm6 }
 0x3a1   : > { %18748 = vst [vmem:[#allocation105_spill] sm:$0xff] %v18747_v44  ;;  %v12211_v6 = vpop.eup %12210  ;;  %v2664_v26 = vmul.f32 %v12209_v32, %v14487_v10  ;;  %v2441_v13 = vmul.f32 %v14456_v1, %v2343_v15  ;;  %v14660_v11 = vadd.s32 88, %v13868_v29  ;;  %v14663_v50 = vadd.s32 96, %v13868_v29  ;;  %v2346_v10 = vpop.f32.mrb[15].mxu1  ;;  %vm14726_vm15 = vmpackc.low %vm13316_vm6, %vm14631_vm11 }
 0x3a2   : > { %v12213_v63 = vpop.eup %12212  ;;  %v14667_v23 = vmul.f32 %v12211_v6, %v14492_v39  ;;  %v14670_v62 = vadd.f32 %v14458_v16, %v2443_v35  ;;  %v14673_v32 = vadd.s32 104, %v13868_v29  ;;  %8982 = vmatmul.mubr.msk.bf16.gmra.mrb[36].mxu1 %vm14646_vm12, %v14611_v53  ;;  %v18751_v48 = vrot.slane %v14545_v55, 1  ;;  %v11804_v6 = vld [vmem:[#allocation15 + $0x1e0] sm:$0xff]   ;;  %vm14741_vm0 = vmpackc.low %vm14650_vm13, %vm13316_vm6 }
 0x3a3   : > { %v12215_v15 = vpop.eup %12214  ;;  %v2925_v57 = vrot.slane %v2664_v26, 1  ;;  %v14677_v34 = vmul.f32 %v12213_v63, %v14496_v49  ;;  %v14680_v5 = vadd.f32 %v14458_v16, %v2441_v13  ;;  %v2732_v35 = vrot.slane %v2664_v26, 7  ;;  %10148 = vmatpush3.bf16.msra.mxu1 %v11799_v42 }
 0x3a4   : > { %v12217_v39 = vpop.eup %12216  ;;  %v2606_v7 = vadd.f32 1.0, %v12215_v15  ;;  %v2514_v59 = vsub.f32 0.0, %v14670_v62  ;;  %10149 = vmatprep.subr.bf16.mxu1 %v11800_v9  ;;  %v2444_v15 = vmul.f32 %v10854_v18, %v14456_v1  ;;  %v18752_v42 = vmov 0 }
 0x3a5   : > { %v2926_v49 = vsel %vm18383_vm3, %v18751_v48, %v2925_v57  ;;  %v2734_v13 = vrot.slane %v14677_v34, 7  ;;  %v2927_v63 = vrot.slane %v14677_v34, 1  ;;  %v2604_v38 = vadd.f32 1.0, %v12217_v39  ;;  %v11783_v48 = vld [vmem:[#allocation15] sm:$0xff]  }
 0x3a6   : > { %12222 = vrcp.f32 %v2606_v7  ;;  %v2560_v51 = vmul.f32 1.442695, %v2514_v59  ;;  %v2512_v24 = vsub.f32 0.0, %v14680_v5  ;;  %v18753_v42 = vsel %vm14697_vm14, 4294967295, %v18752_v42  ;;  %v11784_v7 = vld [vmem:[#allocation15 + $0x48] sm:$0xff]  }
 0x3a7   : > { %18754 = vst [vmem:[#allocation106_spill] sm:$0xff] %v18753_v42  ;;  %12224 = vrcp.f32 %v2604_v38  ;;  %v2442_v27 = vmul.f32 %v14456_v1, %v2346_v10  ;;  %v14703_v9 = vpack.c.bf16 %v14677_v34, %v2664_v26  ;;  %v14706_v59 = vpack.c.bf16 %v2926_v49, %v14561_v25  ;;  %10150 = vmatpush3.bf16.msra.mxu1 %v11802_v36  ;;  %v11805_v25 = vld [vmem:[#allocation15 + $0x1a0] sm:$0xff]  }
 0x3a8   : > { %12226 = vpow2.f32 %v2560_v51  ;;  %v2556_v18 = vmul.f32 1.442695, %v2512_v24  ;;  %v14709_v8 = vadd.f32 %v14458_v16, %v2444_v15  ;;  %v18756_v39 = vrot.slane %v14545_v55, 7  ;;  %v11785_v15 = vld [vmem:[#allocation15 + $0x8] sm:$0xff]   ;;  %10151 = vmatprep.subr.bf16.mxu1 %v11804_v6  ;;  %v11786_v6 = vld [vmem:[#allocation15 + $0x50] sm:$0xff]  }
 0x3a9   : > { %18755 = vst [vmem:[#allocation107_spill] sm:$0xff] %v14706_v59  ;;  %v12219_v38 = vpop.eup %12218  ;;  %v14716_v26 = vadd.f32 %v14458_v16, %v2442_v27  ;;  %3446 = vmatprep.mubr.bf16.mxu1 %v14703_v9  ;;  %10888 = vmatmul.mubr.msk.bf16.vlgmr.msra.gmra.mrb[64].mxu0 %vm14697_vm14, %v14706_v59  ;;  %v2735_v24 = vsel %vm18380_vm2, %v2732_v35, %v2734_v13  ;;  %v18757_v55 = vmov 0  ;;  %v18765_v47 = vrot.slane %v14640_v31, 7 }
 0x3aa   : > { %v2733_v2 = vsel %vm18380_vm2, %v18756_v39, %v2732_v35  ;;  %v18758_v55 = vsel %vm14726_vm15, 4294967295, %v18757_v55  ;;  %v2928_v51 = vsel %vm18383_vm3, %v2925_v57, %v2927_v63  ;;  %v12221_v27 = vpop.eup %12220  ;;  %v2607_v36 = vadd.f32 1.0, %v12219_v38  ;;  %10008 = vmatpush3.bf16.msra.mxu0 %v11783_v48  ;;  %v11806_v48 = vld [vmem:[#allocation15 + $0x1e8] sm:$0xff]  }
 0x3ab   : > { %18759 = vst [vmem:[#allocation108_spill] sm:$0xff] %v18758_v55  ;;  %12228 = vpow2.f32 %v2556_v18  ;;  %v2515_v34 = vsub.f32 0.0, %v14709_v8  ;;  %v14732_v49 = vpack.c.bf16 %v2735_v24, %v2733_v2  ;;  %v2605_v35 = vadd.f32 1.0, %v12221_v27  ;;  %10009 = vmatprep.subr.bf16.mxu0 %v11784_v7  ;;  %10152 = vmatpush3.bf16.msra.mxu1 %v11805_v25 }
 0x3ac   : > { %v2513_v41 = vsub.f32 0.0, %v14716_v26  ;;  %v18760_v39 = vrot.slane %v14640_v31, 1  ;;  %v18761_v57 = vmov 0  ;;  %v14747_v2 = vpack.c.bf16 %v14667_v23, %v14640_v31  ;;  %v11787_v31 = vld [vmem:[#allocation15 + $0x10] sm:$0xff]   ;;  %10153 = vmatprep.subr.bf16.mxu1 %v11806_v48 }
 0x3ad   : > { %v18762_v57 = vsel %vm14741_vm0, 4294967295, %v18761_v57  ;;  %12230 = vrcp.f32 %v2607_v36  ;;  %v2562_v18 = vmul.f32 1.442695, %v2515_v34  ;;  %8985 = vmatmul.mubr.msk.bf16.gmra.mrb[40].mxu1 %vm14726_vm15, %v14732_v49  ;;  %v2737_v38 = vsel %vm18380_vm2, %v2734_v13, %v18765_v47 }
 0x3ae   : > { %v2930_v10 = vsel %vm18383_vm3, %v2927_v63, %v18760_v39  ;;  %18763 = vst [vmem:[#allocation109_spill] sm:$0xff] %v18762_v57  ;;  %12232 = vrcp.f32 %v2605_v35  ;;  %v2558_v24 = vmul.f32 1.442695, %v2513_v41  ;;  %3454 = vmatprep.mubr.bf16.mxu1 %v14747_v2  ;;  %v18766_v7 = vrot.slane %v14667_v23, 7  ;;  %10010 = vmatpush3.bf16.msra.mxu0 %v11785_v15  ;;  %v11789_v15 = vld [vmem:[#allocation15 + $0x18] sm:$0xff]  }
 0x3af   : > { %v14752_v63 = vpack.c.bf16 %v2930_v10, %v2928_v51  ;;  %v18767_v27 = vmov %v18765_v47  ;;  %v18768_v34 = vrot.slane %v14667_v23, 1  ;;  %v11808_v51 = vld [vmem:[#allocation15 + $0x1a8] sm:$0xff]   ;;  %12234 = vpow2.f32 %v2562_v18  ;;  %v11810_v47 = vld [vmem:[#allocation15 + $0x1f0] sm:$0xff]   ;;  %10011 = vmatprep.subr.bf16.mxu0 %v11786_v6 }
 0x3b0   : > { %v2739_v36 = vsel %vm18380_vm2, %v18767_v27, %v18766_v7  ;;  %v18769_v13 = vand.u32 15, %v14529_v37  ;;  %12236 = vpow2.f32 %v2558_v24  ;;  %v18772_v25 = vand.u32 15, %v14532_v60  ;;  %v11788_v7 = vld [vmem:[#allocation15 + $0x58] sm:$0xff]   ;;  %v12223_v37 = vpop.eup %12222  ;;  %v10857_v27 = vpop.f32.mrb[16].mxu1  ;;  %10154 = vmatpush3.bf16.msra.mxu1 %v11808_v51 }
 0x3b1   : > { %18764 = vst [vmem:[#allocation110_spill] sm:$0xff] %v14752_v63  ;;  %v14768_v10 = vsel %vm18383_vm3, %v18760_v39, %v18768_v34  ;;  %10891 = vmatprep.mubr.msk.bf16.mxu0 %vm14741_vm0, %v14752_v63  ;;  %v14779_v41 = vpack.c.bf16 %v2739_v36, %v2737_v38  ;;  %v18775_v34 = vand.u32 15, %v14537_v21  ;;  %v12225_v39 = vpop.eup %12224  ;;  %v14798_v6 = vmul.f32 %v12223_v37, %v14550_v56  ;;  %v11811_v37 = vld [vmem:[#allocation15 + $0x1b0] sm:$0xff]   ;;  %v11814_v51 = vld [vmem:[#allocation15 + $0x1b8] sm:$0xff]  }
 0x3b2   : > { %vm14775_vm1 = vcmp.ge.s32.totalorder %v18769_v13, 1  ;;  %vm14783_vm4 = vcmp.le.s32.totalorder %v18772_v25, 14  ;;  %v2447_v48 = vmul.f32 %v10857_v27, %v14456_v1  ;;  %v2359_v13 = vpop.f32.mrb[17].mxu1  ;;  %v18778_v21 = vmov 0  ;;  %v12227_v35 = vpop.eup %12226  ;;  %10012 = vmatpush3.bf16.msra.mxu0 %v11787_v31  ;;  %10155 = vmatprep.subr.bf16.mxu1 %v11810_v47 }
 0x3b3   : > { %vm14789_vm5 = vcmp.ge.s32.totalorder %v18775_v34, 1  ;;  %vm14804_vm9 = vmpackc.low %vm13316_vm6, %vm14775_vm1  ;;  %v18781_v25 = vand.u32 15, %v14540_v0  ;;  %v14815_v36 = vadd.s32 112, %v13868_v29  ;;  %v14818_v56 = vadd.s32 120, %v13868_v29  ;;  %v10858_v24 = vpop.f32.mrb[18].mxu1  ;;  %10013 = vmatprep.subr.bf16.mxu0 %v11788_v7 }
 0x3b4   : > { %v18779_v21 = vsel %vm14804_vm9, 4294967295, %v18778_v21  ;;  %v14821_v27 = vmul.f32 %v12225_v39, %v14555_v61  ;;  %v2445_v60 = vmul.f32 %v14456_v1, %v2359_v13  ;;  %v14825_v0 = vadd.s32 128, %v13868_v29  ;;  %v2362_v39 = vpop.f32.mrb[19].mxu1  ;;  %v11790_v13 = vld [vmem:[#allocation15 + $0x60] sm:$0xff]   ;;  %10156 = vmatpush3.bf16.msra.mxu1 %v11811_v37  ;;  %vm14865_vm11 = vmpackc.low %vm14783_vm4, %vm13316_vm6 }
 0x3b5   : > { %18780 = vst [vmem:[#allocation111_spill] sm:$0xff] %v18779_v21  ;;  %vm14810_vm10 = vcmp.le.s32.totalorder %v18781_v25, 14  ;;  %v14828_v25 = vadd.s32 136, %v13868_v29  ;;  %v2610_v20 = vadd.f32 1.0, %v12227_v35  ;;  %v14833_v61 = vadd.f32 %v14458_v16, %v2447_v48  ;;  %v12229_v54 = vpop.eup %12228  ;;  %8988 = vmatmul.mubr.msk.bf16.gmra.mrb[44].mxu1 %vm14804_vm9, %v14779_v41  ;;  %10157 = vmatprep.subr.bf16.mxu1 %v11812_v30  ;;  %vm14886_vm13 = vmpackc.low %vm13316_vm6, %vm14789_vm5 }
 0x3b6   : > { %v2740_v19 = vrot.slane %v14821_v27, 7  ;;  %v2933_v12 = vrot.slane %v14821_v27, 1  ;;  %v14838_v31 = vadd.f32 %v14458_v16, %v2445_v60  ;;  %v2448_v47 = vmul.f32 %v10858_v24, %v14456_v1  ;;  %10014 = vmatpush3.bf16.msra.mxu0 %v11789_v15  ;;  %vm14898_vm1 = vmpackc.low %vm14810_vm10, %vm13316_vm6 }
 0x3b7   : > { %12238 = vrcp.f32 %v2610_v20  ;;  %v2608_v48 = vadd.f32 1.0, %v12229_v54  ;;  %v2518_v35 = vsub.f32 0.0, %v14833_v61  ;;  %v2446_v7 = vmul.f32 %v14456_v1, %v2362_v39  ;;  %v12231_v58 = vpop.eup %12230  ;;  %10015 = vmatprep.subr.bf16.mxu0 %v11790_v13 }
 0x3b8   : > { %v2516_v52 = vsub.f32 0.0, %v14838_v31  ;;  %v14848_v60 = vadd.f32 %v14458_v16, %v2448_v47  ;;  %v18784_v24 = vrot.slane %v14667_v23, 1  ;;  %v18785_v40 = vrot.slane %v14667_v23, 7  ;;  %v12233_v20 = vpop.eup %12232  ;;  %10158 = vmatpush3.bf16.msra.mxu1 %v11814_v51 }
 0x3b9   : > { %v14857_v37 = vmul.f32 %v12231_v58, %v14580_v45  ;;  %12240 = vrcp.f32 %v2608_v48  ;;  %v2568_v39 = vmul.f32 1.442695, %v2518_v35  ;;  %v14860_v57 = vadd.f32 %v14458_v16, %v2446_v7  ;;  %v12235_v23 = vpop.eup %12234  ;;  %v11795_v48 = vld [vmem:[#allocation15 + $0x68] sm:$0xff]  }
 0x3ba   : > { %v2934_v28 = vsel %vm18383_vm3, %v18784_v24, %v2933_v12  ;;  %v2741_v54 = vsel %vm18380_vm2, %v18785_v40, %v2740_v19  ;;  %v18786_v47 = vmov 0  ;;  %v11791_v40 = vld [vmem:[#allocation15 + $0x20] sm:$0xff]   ;;  %v2669_v30 = vmul.f32 %v12233_v20, %v14583_v33  ;;  %v12237_v35 = vpop.eup %12236 }
 0x3bb   : > { %v18787_v47 = vsel %vm14865_vm11, 4294967295, %v18786_v47  ;;  %v2564_v15 = vmul.f32 1.442695, %v2516_v52  ;;  %v2519_v58 = vsub.f32 0.0, %v14848_v60  ;;  %v14872_v45 = vpack.c.bf16 %v2934_v28, %v14768_v10  ;;  %10016 = vmatpush3.bf16.msra.mxu0 %v11791_v40 }
 0x3bc   : > { %18788 = vst [vmem:[#allocation112_spill] sm:$0xff] %v18787_v47  ;;  %v18381_v7 = vrot.slane %v14857_v37, 7  ;;  %v18382_v18 = vrot.slane %v14857_v37, 1  ;;  %v2611_v24 = vadd.f32 1.0, %v12235_v23  ;;  %12242 = vpow2.f32 %v2568_v39  ;;  %10017 = vmatprep.subr.bf16.mxu0 %v11795_v48 }
 0x3bd   : > { %18789 = vst [vmem:[#allocation113_spill] sm:$0xff] %v14872_v45  ;;  %v2742_v13 = vrot.slane %v2669_v30, 7  ;;  %v2935_v63 = vrot.slane %v2669_v30, 1  ;;  %v2609_v42 = vadd.f32 1.0, %v12237_v35  ;;  %12244 = vpow2.f32 %v2564_v15  ;;  %10892 = vmatmul.mubr.msk.bf16.gmra.mrb[68].mxu0 %vm14865_vm11, %v14872_v45 }
 0x3be   : > { %12246 = vrcp.f32 %v2611_v24  ;;  %v2570_v28 = vmul.f32 1.442695, %v2519_v58  ;;  %v2517_v52 = vsub.f32 0.0, %v14860_v57  ;;  %v14881_v33 = vpack.c.bf16 %v2669_v30, %v14821_v27  ;;  %v11797_v27 = vld [vmem:[#allocation15 + $0x28] sm:$0xff]  }
 0x3bf   : > { %v18790_v10 = vmov 0  ;;  %12248 = vrcp.f32 %v2609_v42  ;;  %v2743_v51 = vsel %vm18380_vm2, %v2740_v19, %v2742_v13  ;;  %v2936_v20 = vsel %vm18383_vm3, %v2933_v12, %v2935_v63  ;;  %v11801_v42 = vld [vmem:[#allocation15 + $0x70] sm:$0xff]   ;;  %10018 = vmatpush3.bf16.msra.mxu0 %v11797_v27  ;;  %v11807_v27 = vld [vmem:[#allocation15 + $0x78] sm:$0xff]  }
 0x3c0   : > { %v18791_v10 = vsel %vm14886_vm13, 4294967295, %v18790_v10  ;;  %v18793_v39 = vrot.slane %v14798_v6, 1  ;;  %v18794_v38 = vmov 0  ;;  %12250 = vpow2.f32 %v2570_v28  ;;  %3462 = vmatprep.mubr.bf16.mxu1 %v14881_v33  ;;  %10019 = vmatprep.subr.bf16.mxu0 %v11801_v42 }
 0x3c1   : > { %18792 = vst [vmem:[#allocation114_spill] sm:$0xff] %v18791_v10  ;;  %v18795_v38 = vsel %vm14898_vm1, 4294967295, %v18794_v38  ;;  %v2566_v40 = vmul.f32 1.442695, %v2517_v52  ;;  %v14903_v19 = vpack.c.bf16 %v2743_v51, %v2741_v54  ;;  %v18799_v34 = vrot.slane %v14798_v6, 7  ;;  %v12239_v35 = vpop.eup %12238  ;;  %v10861_v52 = vpop.f32.mrb[20].mxu1 }
 0x3c2   : > { %v2938_v23 = vsel %vm18383_vm3, %v2935_v63, %v18793_v39  ;;  %18796 = vst [vmem:[#allocation115_spill] sm:$0xff] %v18795_v38  ;;  %v14909_v63 = vpack.c.bf16 %v14857_v37, %v14798_v6  ;;  %v18801_v54 = vmov %v18793_v39  ;;  %v18802_v24 = vand.u32 15, %v14655_v3 }
 0x3c3   : > { %v14905_v12 = vpack.c.bf16 %v2938_v23, %v2936_v20  ;;  %v2745_v30 = vsel %vm18380_vm2, %v2742_v13, %v18799_v34  ;;  %v18800_v15 = vmov %v18799_v34  ;;  %v14924_v48 = vsel %vm18383_vm3, %v18801_v54, %v18382_v18  ;;  %8991 = vmatmul.mubr.msk.bf16.gmra.mrb[48].mxu1 %vm14886_vm13, %v14903_v19  ;;  %v11803_v23 = vld [vmem:[#allocation15 + $0x30] sm:$0xff]  }
 0x3c4   : > { %18798 = vst [vmem:[#allocation117_spill] sm:$0xff] %v14909_v63  ;;  %v2747_v58 = vsel %vm18380_vm2, %v18800_v15, %v18381_v7  ;;  %12252 = vpow2.f32 %v2566_v40  ;;  %vm14934_vm4 = vcmp.ge.s32.totalorder %v18802_v24, 1  ;;  %v14941_v28 = vmul.f32 %v12239_v35, %v14670_v62  ;;  %3470 = vmatprep.mubr.bf16.mxu1 %v14909_v63  ;;  %v12241_v40 = vpop.eup %12240  ;;  %v2375_v62 = vpop.f32.mrb[21].mxu1  ;;  %10020 = vmatpush3.bf16.msra.mxu0 %v11803_v23 }
 0x3c5   : > { %18797 = vst [vmem:[#allocation116_spill] sm:$0xff] %v14905_v12  ;;  %10895 = vmatprep.mubr.msk.bf16.mxu0 %vm14898_vm1, %v14905_v12  ;;  %v14938_v6 = vpack.c.bf16 %v2747_v58, %v2745_v30  ;;  %v18806_v51 = vand.u32 15, %v14660_v11  ;;  %v2451_v34 = vmul.f32 %v10861_v52, %v14456_v1  ;;  %v18809_v30 = vand.u32 15, %v14663_v50  ;;  %v10862_v52 = vpop.f32.mrb[22].mxu1  ;;  %vm14994_vm3 = vmpackc.low %vm13316_vm6, %vm14934_vm4  ;;  %10021 = vmatprep.subr.bf16.mxu0 %v11807_v27 }
 0x3c6   : > { %v14962_v54 = vadd.s32 144, %v13868_v29  ;;  %v14965_v35 = vmul.f32 %v12241_v40, %v14680_v5  ;;  %v2449_v24 = vmul.f32 %v14456_v1, %v2375_v62  ;;  %v18812_v50 = vand.u32 15, %v14673_v32  ;;  %v12243_v42 = vpop.eup %12242  ;;  %v2378_v62 = vpop.f32.mrb[23].mxu1 }
 0x3c7   : > { %18805 = vst [vmem:[#allocation118_spill] sm:$0xff] %v14938_v6  ;;  %vm14946_vm5 = vcmp.le.s32.totalorder %v18806_v51, 14  ;;  %vm14955_vm10 = vcmp.ge.s32.totalorder %v18809_v30, 1  ;;  %v14975_v30 = vadd.s32 152, %v13868_v29  ;;  %v14978_v58 = vadd.s32 160, %v13868_v29 }
 0x3c8   : > { %vm14970_vm2 = vcmp.le.s32.totalorder %v18812_v50, 14  ;;  %v14983_v40 = vadd.f32 %v14458_v16, %v2451_v34  ;;  %v2452_v32 = vmul.f32 %v10862_v52, %v14456_v1  ;;  %v12245_v50 = vpop.eup %12244  ;;  %v2748_v39 = vrot.slane %v14965_v35, 7  ;;  %v11809_v34 = vld [vmem:[#allocation15 + $0x38] sm:$0xff]  }
 0x3c9   : > { %v2941_v3 = vrot.slane %v14965_v35, 1  ;;  %v2614_v7 = vadd.f32 1.0, %v12243_v42  ;;  %v14989_v18 = vadd.f32 %v14458_v16, %v2449_v24  ;;  %v18815_v11 = vmov 0  ;;  %v12247_v52 = vpop.eup %12246  ;;  %v15003_v24 = vld [vmem:[#allocation15 + $0x80] sm:$0xff]   ;;  %10022 = vmatpush3.bf16.msra.mxu0 %v11809_v34 }
 0x3ca   : > { %v18816_v11 = vsel %vm14994_vm3, 4294967295, %v18815_v11  ;;  %v2612_v5 = vadd.f32 1.0, %v12245_v50  ;;  %v2522_v38 = vsub.f32 0.0, %v14983_v40  ;;  %v15000_v12 = vadd.f32 %v14458_v16, %v2452_v32  ;;  %v12249_v13 = vpop.eup %12248  ;;  %10919 = vmatprep.subr.bf16.mxu0 %v15003_v24 }
 0x3cb   : > { %18817 = vst [vmem:[#allocation119_spill] sm:$0xff] %v18816_v11  ;;  %v2450_v42 = vmul.f32 %v14456_v1, %v2378_v62  ;;  %v15006_v47 = vmul.f32 %v12247_v52, %v14709_v8  ;;  %12254 = vrcp.f32 %v2614_v7  ;;  %v2520_v23 = vsub.f32 0.0, %v14989_v18  ;;  %v12251_v59 = vpop.eup %12250  ;;  %8994 = vmatmul.mubr.msk.bf16.gmra.mrb[52].mxu1 %vm14994_vm3, %v14938_v6 }
 0x3cc   : > { %v18818_v45 = vrot.slane %v14857_v37, 1  ;;  %vm18819_vm4 = vcmask 1046528   ;;  %v2673_v32 = vmul.f32 %v12249_v13, %v14716_v26  ;;  %12256 = vrcp.f32 %v2612_v5 }
 0x3cd   : > { %v2576_v17 = vmul.f32 1.442695, %v2522_v38  ;;  %v2523_v27 = vsub.f32 0.0, %v15000_v12  ;;  %v18405_v8 = vrot.slane %v15006_v47, 7  ;;  %v18406_v7 = vrot.slane %v15006_v47, 1 }
 0x3ce   : > { %v2942_v50 = vsel %vm18819_vm4, %v18818_v45, %v2941_v3  ;;  %v2615_v62 = vadd.f32 1.0, %v12251_v59  ;;  %v2572_v52 = vmul.f32 1.442695, %v2520_v23  ;;  %v12253_v43 = vpop.eup %12252  ;;  %v2750_v45 = vrot.slane %v2673_v32, 7  ;;  %vm15029_vm4 = vmpackc.low %vm14946_vm5, %vm13316_vm6 }
 0x3cf   : > { %v2943_v63 = vrot.slane %v2673_v32, 1  ;;  %12258 = vpow2.f32 %v2576_v17  ;;  %v2578_v26 = vmul.f32 1.442695, %v2523_v27  ;;  %v2613_v38 = vadd.f32 1.0, %v12253_v43  ;;  %vm15045_vm5 = vmpackc.low %vm13316_vm6, %vm14955_vm10 }
 0x3d0   : > { %12260 = vrcp.f32 %v2615_v62  ;;  %v15021_v5 = vadd.f32 %v14458_v16, %v2450_v42  ;;  %v15024_v13 = vpack.c.bf16 %v2673_v32, %v14965_v35  ;;  %v18821_v59 = vmov 0 }
 0x3d1   : > { %v18822_v59 = vsel %vm15029_vm4, 4294967295, %v18821_v59  ;;  %12262 = vpow2.f32 %v2572_v52  ;;  %v15034_v17 = vpack.c.bf16 %v2942_v50, %v14924_v48  ;;  %v18825_v34 = vrot.slane %v14857_v37, 7 }
 0x3d2   : > { %18820 = vst [vmem:[#allocation120_spill] sm:$0xff] %v15024_v13  ;;  %18823 = vst [vmem:[#allocation121_spill] sm:$0xff] %v18822_v59  ;;  %vm18826_vm1 = vcmask 1040384   ;;  %12264 = vrcp.f32 %v2613_v38  ;;  %v2521_v35 = vsub.f32 0.0, %v15021_v5  ;;  %3478 = vmatprep.mubr.bf16.mxu1 %v15024_v13  ;;  %v18828_v20 = vmov 0 }
 0x3d3   : > { %18824 = vst [vmem:[#allocation122_spill] sm:$0xff] %v15034_v17  ;;  %v2749_v43 = vsel %vm18826_vm1, %v18825_v34, %v2748_v39  ;;  %vm18827_vm11 = vmmov %vm18826_vm1  ;;  %v18829_v20 = vsel %vm15045_vm5, 4294967295, %v18828_v20  ;;  %vm18832_vm0 = vcmask 1046528   ;;  %12266 = vpow2.f32 %v2578_v26  ;;  %10896 = vmatmul.mubr.msk.bf16.gmra.mrb[72].mxu0 %vm15029_vm4, %v15034_v17 }
 0x3d4   : > { %v2751_v42 = vsel %vm18827_vm11, %v2748_v39, %v2750_v45  ;;  %18830 = vst [vmem:[#allocation123_spill] sm:$0xff] %v18829_v20  ;;  %v2944_v37 = vsel %vm18832_vm0, %v2941_v3, %v2943_v63  ;;  %v18833_v39 = vrot.slane %v14941_v28, 1  ;;  %vm18834_vm11 = vmmov %vm18832_vm0  ;;  %v18835_v15 = vmov 0 }
 0x3d5   : > { %v15049_v48 = vpack.c.bf16 %v2751_v42, %v2749_v43  ;;  %vm15061_vm1 = vmpackc.low %vm14970_vm2, %vm13316_vm6  ;;  %v15067_v50 = vpack.c.bf16 %v15006_v47, %v14941_v28  ;;  %v18839_v3 = vrot.slane %v14941_v28, 7  ;;  %vm18840_vm0 = vcmask 1040384   ;;  %v12255_v28 = vpop.eup %12254 }
 0x3d6   : > { %v2946_v23 = vsel %vm18834_vm11, %v2943_v63, %v18833_v39  ;;  %v18836_v15 = vsel %vm15061_vm1, 4294967295, %v18835_v15  ;;  %v2574_v27 = vmul.f32 1.442695, %v2521_v35  ;;  %vm18843_vm10 = vmmov %vm18840_vm0  ;;  %v18844_v52 = vmov %v18833_v39 }
 0x3d7   : > { %18831 = vst [vmem:[#allocation124_spill] sm:$0xff] %v15049_v48  ;;  %18837 = vst [vmem:[#allocation125_spill] sm:$0xff] %v18836_v15  ;;  %v2753_v32 = vsel %vm18840_vm0, %v2750_v45, %v18839_v3  ;;  %v15072_v62 = vpack.c.bf16 %v2946_v23, %v2944_v37  ;;  %v18842_v63 = vmov %v18839_v3  ;;  %8997 = vmatmul.mubr.msk.bf16.gmra.mrb[56].mxu1 %vm15045_vm5, %v15049_v48  ;;  %v18846_v45 = vand.u32 15, %v14815_v36  ;;  %v10865_v36 = vpop.f32.mrb[24].mxu1  ;;  %v12257_v23 = vpop.eup %12256 }
 0x3d8   : > { %18838 = vst [vmem:[#allocation126_spill] sm:$0xff] %v15067_v50  ;;  %v2755_v51 = vsel %vm18843_vm10, %v18842_v63, %v18405_v8  ;;  %vm18845_vm2 = vmmov %vm18834_vm11  ;;  %v18849_v43 = vand.u32 15, %v14818_v56  ;;  %12268 = vpow2.f32 %v2574_v27  ;;  %3486 = vmatprep.mubr.bf16.mxu1 %v15067_v50  ;;  %v18852_v35 = vand.u32 15, %v14825_v0  ;;  %v2391_v27 = vpop.f32.mrb[25].mxu1 }
 0x3d9   : > { %18841 = vst [vmem:[#allocation127_spill] sm:$0xff] %v15072_v62  ;;  %v15084_v26 = vsel %vm18845_vm2, %v18844_v52, %v18406_v7  ;;  %vm15091_vm11 = vcmp.ge.s32.totalorder %v18846_v45, 1  ;;  %v15095_v34 = vpack.c.bf16 %v2755_v51, %v2753_v32  ;;  %10899 = vmatprep.mubr.msk.bf16.mxu0 %vm15061_vm1, %v15072_v62  ;;  %v15116_v3 = vmul.f32 %v12255_v28, %v14833_v61  ;;  %v10866_v61 = vpop.f32.mrb[26].mxu1 }
 0x3da   : > { %vm15099_vm0 = vcmp.le.s32.totalorder %v18849_v43, 14  ;;  %vm15109_vm10 = vcmp.ge.s32.totalorder %v18852_v35, 1  ;;  %v2455_v32 = vmul.f32 %v10865_v36, %v14456_v1  ;;  %v18855_v63 = vand.u32 15, %v14828_v25  ;;  %v12259_v25 = vpop.eup %12258  ;;  %vm15149_vm1 = vmpackc.low %vm13316_vm6, %vm15091_vm11 }
 0x3db   : > { %v15127_v52 = vadd.s32 168, %v13868_v29  ;;  %v2676_v45 = vmul.f32 %v12257_v23, %v14838_v31  ;;  %v2453_v43 = vmul.f32 %v14456_v1, %v2391_v27  ;;  %v15132_v28 = vadd.s32 176, %v13868_v29  ;;  %v2394_v31 = vpop.f32.mrb[27].mxu1  ;;  %v12261_v23 = vpop.eup %12260 }
 0x3dc   : > { %vm15121_vm2 = vcmp.le.s32.totalorder %v18855_v63, 14  ;;  %v15135_v36 = vadd.s32 184, %v13868_v29  ;;  %v2760_v35 = vrot.slane %v15116_v3, 7  ;;  %v2953_v63 = vrot.slane %v15116_v3, 1  ;;  %v12263_v62 = vpop.eup %12262 }
 0x3dd   : > { %v15140_v0 = vadd.f32 %v14458_v16, %v2455_v32  ;;  %v2456_v39 = vmul.f32 %v10866_v61, %v14456_v1  ;;  %v2756_v27 = vrot.slane %v2676_v45, 7  ;;  %v2949_v56 = vrot.slane %v2676_v45, 1  ;;  %v15157_v61 = vld [vmem:[#allocation14] ss:$0 sm:$0xff] }
 0x3de   : > { %v2618_v8 = vadd.f32 1.0, %v12259_v25  ;;  %v15144_v7 = vadd.f32 %v14458_v16, %v2453_v43  ;;  %v18858_v15 = vmov 0  ;;  %v15154_v32 = vmul.f32 %v12261_v23, %v14848_v60  ;;  %v15162_v16 = vld [vmem:[#allocation12] ss:$0 sm:$0xff]  ;;  %v12265_v43 = vpop.eup %12264 }
 0x3df   : > { %v18859_v15 = vsel %vm15149_vm1, 4294967295, %v18858_v15  ;;  %v2526_v1 = vsub.f32 0.0, %v15140_v0  ;;  %v15160_v25 = vadd.f32 %v15157_v61, %v2456_v39  ;;  %v2454_v38 = vmul.f32 %v15162_v16, %v2394_v31  ;;  %v12267_v23 = vpop.eup %12266  ;;  %9000 = vmatmul.mubr.msk.bf16.gmra.mrb[60].mxu1 %vm15149_vm1, %v15095_v34 }
 0x3e0   : > { %18860 = vst [vmem:[#allocation128_spill] sm:$0xff] %v18859_v15  ;;  %12270 = vrcp.f32 %v2618_v8  ;;  %v2616_v59 = vadd.f32 1.0, %v12263_v62  ;;  %v2524_v17 = vsub.f32 0.0, %v15144_v7  ;;  %v18861_v50 = vrot.slane %v15006_v47, 1 }
 0x3e1   : > { %vm18862_vm11 = vcmask 1046528   ;;  %v18437_v20 = vrot.slane %v15154_v32, 7  ;;  %v2677_v39 = vmul.f32 %v12265_v43, %v14860_v57  ;;  %v2584_v13 = vmul.f32 1.442695, %v2526_v1 }
 0x3e2   : > { %v2950_v60 = vsel %vm18862_vm11, %v18861_v50, %v2949_v56  ;;  %12272 = vrcp.f32 %v2616_v59  ;;  %v2619_v8 = vadd.f32 1.0, %v12267_v23  ;;  %v2580_v62 = vmul.f32 1.442695, %v2524_v17  ;;  %vm15182_vm11 = vmpackc.low %vm15099_vm0, %vm13316_vm6  ;;  %v12269_v1 = vpop.eup %12268 }
 0x3e3   : > { %v2527_v31 = vsub.f32 0.0, %v15160_v25  ;;  %v2758_v11 = vrot.slane %v2677_v39, 7  ;;  %v2951_v6 = vrot.slane %v2677_v39, 1  ;;  %12274 = vpow2.f32 %v2584_v13  ;;  %vm15198_vm0 = vmpackc.low %vm13316_vm6, %vm15109_vm10 }
 0x3e4   : > { %v15177_v50 = vadd.f32 %v15157_v61, %v2454_v38  ;;  %v18863_v57 = vmov 0  ;;  %12276 = vrcp.f32 %v2619_v8  ;;  %v15186_v43 = vpack.c.bf16 %v2677_v39, %v2676_v45 }
 0x3e5   : > { %v18864_v57 = vsel %vm15182_vm11, 4294967295, %v18863_v57  ;;  %v2586_v59 = vmul.f32 1.442695, %v2527_v31  ;;  %v15189_v17 = vpack.c.bf16 %v2950_v60, %v15084_v26  ;;  %v2617_v23 = vadd.f32 1.0, %v12269_v1 }
 0x3e6   : > { %18865 = vst [vmem:[#allocation129_spill] sm:$0xff] %v18864_v57  ;;  %12278 = vpow2.f32 %v2580_v62  ;;  %v2525_v13 = vsub.f32 0.0, %v15177_v50  ;;  %v18867_v38 = vrot.slane %v15006_v47, 7  ;;  %vm18868_vm4 = vcmask 1040384   ;;  %3494 = vmatprep.mubr.bf16.mxu1 %v15186_v43 }
 0x3e7   : > { %18866 = vst [vmem:[#allocation130_spill] sm:$0xff] %v15189_v17  ;;  %v18869_v48 = vmov 0  ;;  %12280 = vpow2.f32 %v2586_v59  ;;  %10900 = vmatmul.mubr.msk.bf16.gmra.mrb[76].mxu0 %vm15182_vm11, %v15189_v17  ;;  %vm18872_vm14 = vmmov %vm18868_vm4  ;;  %vm18873_vm8 = vcmask 1046528   ;;  %v18875_v37 = vmov 0 }
 0x3e8   : > { %v2757_v42 = vsel %vm18868_vm4, %v18867_v38, %v2756_v27  ;;  %v18870_v48 = vsel %vm15198_vm0, 4294967295, %v18869_v48  ;;  %v2759_v26 = vsel %vm18872_vm14, %v2756_v27, %v2758_v11  ;;  %v2952_v47 = vsel %vm18873_vm8, %v2949_v56, %v2951_v6  ;;  %vm18874_vm1 = vmmov %vm18873_vm8 }
 0x3e9   : > { %18871 = vst [vmem:[#allocation131_spill] sm:$0xff] %v18870_v48  ;;  %v2954_v45 = vsel %vm18874_vm1, %v2951_v6, %v2953_v63  ;;  %vm15212_vm4 = vmpackc.low %vm15121_vm2, %vm13316_vm6  ;;  %12282 = vrcp.f32 %v2617_v23  ;;  %v2582_v60 = vmul.f32 1.442695, %v2525_v13  ;;  %v15216_v39 = vpack.c.bf16 %v2759_v26, %v2757_v42  ;;  %v10869_v23 = vpop.f32.mrb[28].mxu1 }
 0x3ea   : > { %v18876_v37 = vsel %vm15212_vm4, 4294967295, %v18875_v37  ;;  %v15218_v8 = vpack.c.bf16 %v2954_v45, %v2952_v47  ;;  %v15222_v27 = vpack.c.bf16 %v15154_v32, %v15116_v3  ;;  %vm18880_vm8 = vmmov %vm18872_vm14  ;;  %v18882_v51 = vrot.slane %v15154_v32, 1  ;;  %v12271_v31 = vpop.eup %12270 }
 0x3eb   : > { %18877 = vst [vmem:[#allocation132_spill] sm:$0xff] %v18876_v37  ;;  %v2761_v56 = vsel %vm18880_vm8, %v2758_v11, %v2760_v35  ;;  %vm18881_vm14 = vmmov %vm18880_vm8  ;;  %12284 = vpow2.f32 %v2582_v60  ;;  %9003 = vmatmul.mubr.msk.bf16.gmra.mrb[64].mxu1 %vm15198_vm0, %v15216_v39  ;;  %v1740_v11 = vand.u32 15, %v15127_v52  ;;  %v18887_v13 = vand.u32 15, %v14975_v30  ;;  %v2407_v30 = vpop.f32.mrb[29].mxu1 }
 0x3ec   : > { %18878 = vst [vmem:[#allocation133_spill] sm:$0xff] %v15218_v8  ;;  %18879 = vst [vmem:[#allocation134_spill] sm:$0xff] %v15222_v27  ;;  %v2763_v6 = vsel %vm18881_vm14, %v2760_v35, %v18437_v20  ;;  %v15231_v62 = vsel %vm18874_vm1, %v2953_v63, %v18882_v51  ;;  %10903 = vmatprep.mubr.msk.bf16.mxu0 %vm15212_vm4, %v15218_v8  ;;  %3502 = vmatprep.mubr.bf16.mxu1 %v15222_v27  ;;  %v18884_v63 = vand.u32 15, %v14962_v54  ;;  %v12273_v59 = vpop.eup %12272 }
 0x3ed   : > { %v15239_v3 = vpack.c.bf16 %v2763_v6, %v2761_v56  ;;  %v15244_v35 = vmul.f32 %v12271_v31, %v14983_v40  ;;  %vm15254_vm2 = vcmp.le.s32.totalorder %v18887_v13, 14  ;;  %v18890_v52 = vand.u32 15, %v14978_v58  ;;  %v12275_v26 = vpop.eup %12274 }
 0x3ee   : > { %vm15248_vm10 = vcmp.ge.s32.totalorder %v18884_v63, 1  ;;  %v2680_v47 = vmul.f32 %v12273_v59, %v14989_v18  ;;  %v2459_v45 = vmul.f32 %v15162_v16, %v10869_v23  ;;  %vm15268_vm14 = vcmp.le.s32.totalorder %v1740_v11, 14  ;;  %v12277_v6 = vpop.eup %12276  ;;  %v10870_v59 = vpop.f32.mrb[30].mxu1  ;;  %vm15322_vm4 = vmpackc.low %vm15254_vm2, %vm13316_vm6 }
 0x3ef   : > { %18883 = vst [vmem:[#allocation135_spill] sm:$0xff] %v15239_v3  ;;  %vm15260_vm8 = vcmp.ge.s32.totalorder %v18890_v52, 1  ;;  %v15273_v58 = vadd.s32 192, %v13868_v29  ;;  %v15276_v56 = vadd.s32 200, %v13868_v29  ;;  %v2768_v51 = vrot.slane %v15244_v35, 7  ;;  %vm15284_vm1 = vmpackc.low %vm13316_vm6, %vm15248_vm10 }
 0x3f0   : > { %v2622_v63 = vadd.f32 1.0, %v12275_v26  ;;  %v2457_v18 = vmul.f32 %v15162_v16, %v2407_v30  ;;  %v18895_v11 = vmov 0  ;;  %v12279_v23 = vpop.eup %12278  ;;  %v2764_v13 = vrot.slane %v2680_v47, 7  ;;  %v2410_v26 = vpop.f32.mrb[31].mxu1 }
 0x3f1   : > { %v18896_v11 = vsel %vm15284_vm1, 4294967295, %v18895_v11  ;;  %v2957_v52 = vrot.slane %v2680_v47, 1  ;;  %v15289_v40 = vmul.f32 %v12277_v6, %v15000_v12  ;;  %v15292_v54 = vadd.f32 %v15157_v61, %v2459_v45  ;;  %v12281_v31 = vpop.eup %12280 }
 0x3f2   : > { %18897 = vst [vmem:[#allocation136_spill] sm:$0xff] %v18896_v11  ;;  %12286 = vrcp.f32 %v2622_v63  ;;  %v2620_v30 = vadd.f32 1.0, %v12279_v23  ;;  %v15295_v1 = vadd.f32 %v15157_v61, %v2457_v18  ;;  %v2460_v20 = vmul.f32 %v15162_v16, %v10870_v59 }
 0x3f3   : > { %v12283_v37 = vpop.eup %12282  ;;  %v2623_v17 = vadd.f32 1.0, %v12281_v31  ;;  %v2530_v12 = vsub.f32 0.0, %v15292_v54  ;;  %9006 = vmatmul.mubr.msk.bf16.gmra.mrb[68].mxu1 %vm15284_vm1, %v15239_v3  ;;  %v2458_v23 = vmul.f32 %v15162_v16, %v2410_v26  ;;  %v18898_v31 = vrot.slane %v15154_v32, 1  ;;  %vm15336_vm1 = vmpackc.low %vm13316_vm6, %vm15260_vm8 }
 0x3f4   : > { %v2681_v45 = vmul.f32 %v12283_v37, %v15021_v5  ;;  %12288 = vrcp.f32 %v2620_v30  ;;  %v2528_v6 = vsub.f32 0.0, %v15295_v1  ;;  %v15307_v63 = vadd.f32 %v15157_v61, %v2460_v20  ;;  %vm15354_vm8 = vmpackc.low %vm15268_vm14, %vm13316_vm6 }
 0x3f5   : > { %v12285_v18 = vpop.eup %12284  ;;  %12290 = vrcp.f32 %v2623_v17  ;;  %v2592_v59 = vmul.f32 1.442695, %v2530_v12  ;;  %vm18899_vm10 = vcmask 1046528   ;;  %v15315_v37 = vadd.f32 %v15157_v61, %v2458_v23 }
 0x3f6   : > { %v2958_v57 = vsel %vm18899_vm10, %v18898_v31, %v2957_v52  ;;  %v2766_v8 = vrot.slane %v2681_v45, 7  ;;  %v2959_v11 = vrot.slane %v2681_v45, 1  ;;  %v2621_v3 = vadd.f32 1.0, %v12285_v18 }
 0x3f7   : > { %v2588_v27 = vmul.f32 1.442695, %v2528_v6  ;;  %12292 = vpow2.f32 %v2592_v59  ;;  %v2531_v5 = vsub.f32 0.0, %v15307_v63  ;;  %v15317_v20 = vpack.c.bf16 %v2681_v45, %v2680_v47 }
 0x3f8   : > { %v18900_v16 = vmov 0  ;;  %12294 = vrcp.f32 %v2621_v3  ;;  %v15327_v17 = vpack.c.bf16 %v2958_v57, %v15231_v62  ;;  %v18903_v26 = vrot.slane %v15154_v32, 7 }
 0x3f9   : > { %v18901_v16 = vsel %vm15322_vm4, 4294967295, %v18900_v16  ;;  %vm18904_vm10 = vcmask 1040384   ;;  %v18906_v47 = vmov 0  ;;  %12296 = vpow2.f32 %v2588_v27  ;;  %3510 = vmatprep.mubr.bf16.mxu1 %v15317_v20 }
 0x3fa   : > { %18902 = vst [vmem:[#allocation137_spill] sm:$0xff] %v18901_v16  ;;  %v2765_v30 = vsel %vm18904_vm10, %v18903_v26, %v2764_v13  ;;  %vm18905_vm11 = vmmov %vm18904_vm10  ;;  %v18907_v47 = vsel %vm15336_vm1, 4294967295, %v18906_v47  ;;  %v2594_v38 = vmul.f32 1.442695, %v2531_v5  ;;  %v2529_v3 = vsub.f32 0.0, %v15315_v37  ;;  %10904 = vmatmul.mubr.msk.bf16.gmra.mrb[80].mxu0 %vm15322_vm4, %v15327_v17 }
 0x3fb   : > { %v2767_v61 = vsel %vm18905_vm11, %v2764_v13, %v2766_v8  ;;  %18908 = vst [vmem:[#allocation138_spill] sm:$0xff] %v18907_v47  ;;  %vm18909_vm11 = vcmask 1046528   ;;  %v18910_v62 = vrot.slane %v15244_v35, 1  ;;  %v18912_v27 = vmov 0  ;;  %vm18916_vm14 = vmmov %vm18904_vm10 }
 0x3fc   : > { %v15342_v57 = vpack.c.bf16 %v2767_v61, %v2765_v30  ;;  %v2960_v32 = vsel %vm18909_vm11, %v2957_v52, %v2959_v11  ;;  %vm18911_vm2 = vmmov %vm18909_vm11  ;;  %v18913_v27 = vsel %vm15354_vm8, 4294967295, %v18912_v27  ;;  %v15360_v13 = vpack.c.bf16 %v15289_v40, %v15244_v35  ;;  %v12287_v6 = vpop.eup %12286 }
 0x3fd   : > { %v2962_v42 = vsel %vm18911_vm2, %v2959_v11, %v18910_v62  ;;  %18914 = vst [vmem:[#allocation139_spill] sm:$0xff] %v18913_v27  ;;  %v2769_v12 = vsel %vm18904_vm10, %v2766_v8, %v2768_v51  ;;  %12298 = vpow2.f32 %v2594_v38  ;;  %v2590_v45 = vmul.f32 1.442695, %v2529_v3  ;;  %vm18919_vm11 = vmmov %vm18911_vm2 }
 0x3fe   : > { %9009 = vmatmul.mubr.msk.bf16.gmra.mrb[72].mxu1 %vm15336_vm1, %v15342_v57  ;;  %v15366_v11 = vpack.c.bf16 %v2962_v42, %v2960_v32  ;;  %v18915_v60 = vrot.slane %v15289_v40, 7  ;;  %v18917_v59 = vrot.slane %v15289_v40, 1  ;;  %v18918_v8 = vmov %v18910_v62  ;;  %v12289_v30 = vpop.eup %12288 }
 0x3ff   : > { %3518 = vmatprep.mubr.bf16.mxu1 %v15360_v13  ;;  %v1761_v31 = vand.u32 15, %v15273_v58  ;;  %v1768_v5 = vand.u32 15, %v15276_v56  ;;  %v2686_v26 = vmul.f32 %v12287_v6, %v15140_v0  ;;  %12300 = vpow2.f32 %v2590_v45  ;;  %v12291_v61 = vpop.eup %12290 }
 0x400   : > { %v2771_v52 = vsel %vm18916_vm14, %v2768_v51, %v18915_v60  ;;  %v2964_v23 = vsel %vm18919_vm11, %v18918_v8, %v18917_v59  ;;  %10907 = vmatprep.mubr.msk.bf16.mxu0 %vm15354_vm8, %v15366_v11  ;;  %v18920_v51 = vand.u32 15, %v15132_v28  ;;  %v2684_v35 = vmul.f32 %v12289_v30, %v15144_v7 }
 0x401   : > { %v15372_v18 = vpack.c.bf16 %v2771_v52, %v2769_v12  ;;  %v15389_v38 = vmul.f32 %v12291_v61, %v15160_v25  ;;  %v18921_v58 = vmov 0  ;;  %v18924_v0 = vand.u32 15, %v15135_v36  ;;  %v12293_v25 = vpop.eup %12292 }
 0x402   : > { %vm1995_vm2 = vcmp.ge.s32.totalorder %v18920_v51, 1  ;;  %vm15402_vm11 = vcmp.ge.s32.totalorder %v1761_v31, 1  ;;  %vm15406_vm8 = vcmp.le.s32.totalorder %v1768_v5, 14  ;;  %v2776_v3 = vrot.slane %v2686_v26, 7  ;;  %v12295_v12 = vpop.eup %12294 }
 0x403   : > { %vm15392_vm10 = vmpackc.low %vm13316_vm6, %vm1995_vm2  ;;  %vm15398_vm14 = vcmp.le.s32.totalorder %v18924_v0, 14  ;;  %v2772_v32 = vrot.slane %v2684_v35, 7  ;;  %v2965_v62 = vrot.slane %v2684_v35, 1  ;;  %v1583_v42 = vadd.s32 208, %v13868_v29  ;;  %v12297_v6 = vpop.eup %12296 }
 0x404   : > { %v18922_v58 = vsel %vm15392_vm10, 4294967295, %v18921_v58  ;;  %v2778_v36 = vrot.slane %v15389_v38, 7  ;;  %v2971_v45 = vrot.slane %v15389_v38, 1  ;;  %v2626_v60 = vadd.f32 1.0, %v12293_v25  ;;  %vm15426_vm4 = vmpackc.low %vm15398_vm14, %vm13316_vm6 }
 0x405   : > { %18923 = vst [vmem:[#allocation140_spill] sm:$0xff] %v18922_v58  ;;  %v15414_v52 = vpack.c.bf16 %v15389_v38, %v2686_v26  ;;  %v2969_v59 = vrot.slane %v2686_v26, 1  ;;  %v2685_v8 = vmul.f32 %v12295_v12, %v15177_v50  ;;  %v18931_v31 = vrot.slane %v15289_v40, 1  ;;  %vm15453_vm0 = vmpackc.low %vm15406_vm8, %vm13316_vm6 }
 0x406   : > { %9012 = vmatmul.mubr.msk.bf16.gmra.mrb[76].mxu1 %vm15392_vm10, %v15372_v18  ;;  %vm18932_vm2 = vcmask 1046528   ;;  %v18933_v51 = vmov 0  ;;  %v18936_v30 = vrot.slane %v15289_v40, 7  ;;  %vm18937_vm1 = vcmask 1040384  }
 0x407   : > { %v2966_v5 = vsel %vm18932_vm2, %v18931_v31, %v2965_v62  ;;  %v18934_v51 = vsel %vm15426_vm4, 4294967295, %v18933_v51  ;;  %12302 = vrcp.f32 %v2626_v60  ;;  %v2624_v50 = vadd.f32 1.0, %v12297_v6  ;;  %vm18938_vm10 = vmmov %vm18937_vm1  ;;  %v12299_v25 = vpop.eup %12298 }
 0x408   : > { %18935 = vst [vmem:[#allocation141_spill] sm:$0xff] %v18934_v51  ;;  %v2773_v26 = vsel %vm18937_vm1, %v18936_v30, %v2772_v32  ;;  %v15433_v61 = vpack.c.bf16 %v2966_v5, %v2964_v23  ;;  %v2779_v0 = vsel %vm18938_vm10, %v2776_v3, %v2778_v36  ;;  %v2774_v12 = vrot.slane %v2685_v8, 7  ;;  %vm18939_vm14 = vmmov %vm18932_vm2 }
 0x409   : > { %v2967_v31 = vrot.slane %v2685_v8, 1  ;;  %v15438_v56 = vpack.c.bf16 %v2685_v8, %v2684_v35  ;;  %v2972_v27 = vsel %vm18939_vm14, %v2969_v59, %v2971_v45  ;;  %12304 = vrcp.f32 %v2624_v50  ;;  %v12301_v23 = vpop.eup %12300  ;;  %vm18940_vm10 = vmmov %vm18932_vm2 }
 0x40a   : > { %v2627_v40 = vadd.f32 1.0, %v12299_v25  ;;  %10908 = vmatmul.mubr.msk.bf16.gmra.mrb[84].mxu0 %vm15426_vm4, %v15433_v61  ;;  %v2775_v60 = vsel %vm18937_vm1, %v2772_v32, %v2774_v12  ;;  %v18941_v8 = vmov 0  ;;  %vm18944_vm14 = vmmov %vm18937_vm1  ;;  %v2625_v30 = vadd.f32 1.0, %v12301_v23 }
 0x40b   : > { %3526 = vmatprep.mubr.bf16.mxu1 %v15438_v56  ;;  %v2968_v6 = vsel %vm18940_vm10, %v2965_v62, %v2967_v31  ;;  %v2970_v35 = vsel %vm18932_vm2, %v2967_v31, %v2969_v59  ;;  %v18942_v8 = vsel %vm15453_vm0, 4294967295, %v18941_v8  ;;  %v2777_v5 = vsel %vm18944_vm14, %v2774_v12, %v2776_v3  ;;  %vm15461_vm4 = vmpackc.low %vm13316_vm6, %vm15402_vm11 }
 0x40c   : > { %18943 = vst [vmem:[#allocation142_spill] sm:$0xff] %v18942_v8  ;;  %12306 = vrcp.f32 %v2627_v40  ;;  %v18945_v32 = vmov 0  ;;  %v15465_v62 = vpack.c.bf16 %v2775_v60, %v2773_v26  ;;  %v15467_v59 = vpack.c.bf16 %v2970_v35, %v2968_v6 }
 0x40d   : > { %v18946_v32 = vsel %vm15461_vm4, 4294967295, %v18945_v32  ;;  %v1775_v7 = vand.u32 15, %v1583_v42  ;;  %v15469_v50 = vpack.c.bf16 %v2779_v0, %v2777_v5  ;;  %12308 = vrcp.f32 %v2625_v30 }
 0x40e   : > { %18947 = vst [vmem:[#allocation143_spill] sm:$0xff] %v18946_v32  ;;  %18948 = vst [vmem:[#allocation144_spill] sm:$0xff] %v15467_v59  ;;  %10911 = vmatprep.mubr.msk.bf16.mxu0 %vm15453_vm0, %v15467_v59  ;;  %v1584_v3 = vadd.s32 216, %v13868_v29  ;;  %9015 = vmatmul.mubr.msk.bf16.gmra.mrb[80].mxu1 %vm15461_vm4, %v15465_v62  ;;  %v1585_v28 = vadd.s32 224, %v13868_v29  ;;  %v1586_v26 = vadd.s32 232, %v13868_v29  ;;  %v18949_v40 = vmov 0 }
 0x40f   : > { %3534 = vmatprep.mubr.bf16.mxu1 %v15414_v52  ;;  %vm1999_vm8 = vcmp.ge.s32.totalorder %v1775_v7, 1  ;;  %v1588_v60 = vadd.s32 248, %v13868_v29  ;;  %vm18956_vm14 = vcmask 1046528   ;;  %vm18960_vm0 = vcmask 1040384  }
 0x410   : > { %v1782_v0 = vand.u32 15, %v1584_v3  ;;  %v1789_v25 = vand.u32 15, %v1585_v28  ;;  %vm15483_vm11 = vmpackc.low %vm13316_vm6, %vm1999_vm8  ;;  %v1796_v23 = vand.u32 15, %v1586_v26  ;;  %v18962_v38 = vmov 0 }
 0x411   : > { %v12303_v42 = vpop.eup %12302  ;;  %v18950_v40 = vsel %vm15483_vm11, 4294967295, %v18949_v40  ;;  %v18980_v26 = vmov 0  }
 0x412   : > { %v2690_v31 = vmul.f32 %v12303_v42, %v15292_v54  ;;  %18951 = vst [vmem:[#allocation145_spill] sm:$0xff] %v18950_v40  ;;  %vm2032_vm1 = vcmp.le.s32.totalorder %v1782_v0, 14  ;;  %vm15493_vm10 = vcmp.ge.s32.totalorder %v1789_v25, 1  ;;  %vm15497_vm2 = vcmp.le.s32.totalorder %v1796_v23, 14 }
 0x413   : > { %v12305_v12 = vpop.eup %12304  ;;  %v1587_v42 = vadd.s32 240, %v13868_v29  ;;  %vm15507_vm8 = vmpackc.low %vm2032_vm1, %vm13316_vm6  ;;  %v18957_v25 = vmov 0  ;;  %vm18965_vm1 = vcmask 1046528   ;;  %v18970_v54 = vmov 0 }
 0x414   : > { %v2688_v6 = vmul.f32 %v12305_v12, %v15295_v1  ;;  %v2784_v28 = vrot.slane %v2690_v31, 7  ;;  %v1810_v1 = vand.u32 15, %v1588_v60  ;;  %v18958_v25 = vsel %vm15507_vm8, 4294967295, %v18957_v25  ;;  %vm18969_vm5 = vmmov %vm18965_vm1 }
 0x415   : > { %18959 = vst [vmem:[#allocation146_spill] sm:$0xff] %v18958_v25  ;;  %v19031_v21 = vld [vmem:[#allocation144_spill] sm:$0xff] }
 0x416   : > { %v12307_v35 = vpop.eup %12306  ;;  %v2780_v5 = vrot.slane %v2688_v6, 7  ;;  %v2973_v30 = vrot.slane %v2688_v6, 1  ;;  %9018 = vmatmul.mubr.msk.bf16.gmra.mrb[84].mxu1 %vm15483_vm11, %v15469_v50  ;;  %vm18966_vm11 = vmmov %vm18965_vm1 }
 0x417   : > { %v2691_v7 = vmul.f32 %v12307_v35, %v15307_v63  ;;  %v12309_v3 = vpop.eup %12308  ;;  %v2977_v35 = vrot.slane %v2690_v31, 1 }
 0x418   : > { %v2689_v63 = vmul.f32 %v12309_v3, %v15315_v37  ;;  %v2974_v12 = vsel %vm18956_vm14, %v2971_v45, %v2973_v30  ;;  %v2781_v23 = vsel %vm18960_vm0, %v2778_v36, %v2780_v5  ;;  %vm18961_vm14 = vmmov %vm18960_vm0 }
 0x419   : > { %v2786_v0 = vrot.slane %v2691_v7, 7  ;;  %v15514_v60 = vpack.c.bf16 %v2974_v12, %v2972_v27  ;;  %v15516_v29 = vpack.c.bf16 %v2691_v7, %v2690_v31  ;;  %v2979_v8 = vrot.slane %v2691_v7, 1  ;;  %vm15527_vm0 = vmpackc.low %vm13316_vm6, %vm15493_vm10 }
 0x41a   : > { %v2782_v37 = vrot.slane %v2689_v63, 7  ;;  %v2975_v3 = vrot.slane %v2689_v63, 1  ;;  %v15518_v59 = vpack.c.bf16 %v2689_v63, %v2688_v6  ;;  %v18963_v38 = vsel %vm15527_vm0, 4294967295, %v18962_v38  ;;  %vm18967_vm4 = vmmov %vm18961_vm14 }
 0x41b   : > { %v2787_v45 = vsel %vm18961_vm14, %v2784_v28, %v2786_v0  ;;  %10912 = vmatmul.mubr.msk.bf16.gmra.mrb[88].mxu0 %vm15507_vm8, %v15514_v60  ;;  %18964 = vst [vmem:[#allocation147_spill] sm:$0xff] %v18963_v38  ;;  %v2980_v27 = vsel %vm18965_vm1, %v2977_v35, %v2979_v8  ;;  %v3013_v36 = vsel %vm18966_vm11, %v2979_v8, 0.0  ;;  %v1803_v31 = vand.u32 15, %v1587_v42  ;;  %vm18968_vm14 = vmmov %vm18965_vm1  ;;  %v19017_v38 = vld [vmem:[#allocation127_spill] sm:$0xff] }
 0x41c   : > { %3542 = vmatprep.mubr.bf16.mxu1 %v15518_v59  ;;  %v2783_v6 = vsel %vm18967_vm4, %v2780_v5, %v2782_v37  ;;  %v2976_v7 = vsel %vm18968_vm14, %v2973_v30, %v2975_v3  ;;  %v2978_v0 = vsel %vm18969_vm5, %v2975_v3, %v2977_v35  ;;  %vm15540_vm10 = vmpackc.low %vm15497_vm2, %vm13316_vm6  ;;  %v15544_v63 = vpack.c.bf16 %v3013_v36, %v2980_v27  ;;  %v11817_v35 = vld [vmem:[#allocation15 + $0x98] sm:$0xff]   ;;  %v18988_v27 = vld [vmem:[#allocation126_spill] sm:$0xff] }
 0x41d   : > { %v18971_v54 = vsel %vm15540_vm10, 4294967295, %v18970_v54  ;;  %v15546_v12 = vpack.c.bf16 %v2783_v6, %v2781_v23  ;;  %v15548_v8 = vpack.c.bf16 %v2978_v0, %v2976_v7  ;;  %vm2036_vm11 = vcmp.le.s32.totalorder %v1810_v1, 14  ;;  %vm18973_vm1 = vmmov %vm18967_vm4  ;;  %v11815_v1 = vld [vmem:[#allocation15 + $0x88] sm:$0xff]   ;;  %v11816_v23 = vld [vmem:[#allocation15 + $0x90] sm:$0xff]  }
 0x41e   : > { %18972 = vst [vmem:[#allocation148_spill] sm:$0xff] %v18971_v54  ;;  %v2785_v5 = vsel %vm18973_vm1, %v2782_v37, %v2784_v28  ;;  %vm15561_vm5 = vmpackc.low %vm2036_vm11, %vm13316_vm6  ;;  %v18974_v30 = vmov 0  ;;  %vm2003_vm4 = vcmp.ge.s32.totalorder %v1803_v31, 1  ;;  %v18977_v28 = vmov 0  ;;  %v18984_v37 = vld [vmem:[#allocation120_spill] sm:$0xff] }
 0x41f   : > { %v15551_v42 = vpack.c.bf16 %v2787_v45, %v2785_v5  ;;  %9021 = vmatmul.mubr.msk.bf16.gmra.mrb[88].mxu1 %vm15527_vm0, %v15546_v12  ;;  %10915 = vmatprep.mubr.msk.bf16.mxu0 %vm15540_vm10, %v15548_v8  ;;  %v18975_v30 = vsel %vm15561_vm5, 4294967295, %v18974_v30  ;;  %vm15569_vm2 = vmpackc.low %vm13316_vm6, %vm2003_vm4  ;;  %v18985_v3 = vld [vmem:[#allocation124_spill] sm:$0xff]  ;;  %v18986_v45 = vld [vmem:[#allocation123_spill] sm:$0xff]  ;;  %vm18989_vm14 = vnez %v18859_v15  ;;  %vm18990_vm11 = vnez %v18870_v48 }
 0x420   : > { %3550 = vmatprep.mubr.bf16.mxu1 %v15516_v29  ;;  %18976 = vst [vmem:[#allocation149_spill] sm:$0xff] %v18975_v30  ;;  %v18978_v28 = vsel %vm15569_vm2, 4294967295, %v18977_v28  ;;  %vm18987_vm6 = vnez %v18986_v45  ;;  %vm18995_vm4 = vnez %v18907_v47  ;;  %v19021_v47 = vld [vmem:[#allocation129_spill] sm:$0xff] }
 0x421   : > { %18979 = vst [vmem:[#allocation150_spill] sm:$0xff] %v18978_v28 }
 0x423   : > { %10916 = vmatmul.mubr.msk.bf16.gmra.mrb[92].mxu0 %vm15561_vm5, %v15544_v63 }
 0x424   : > { %3896 = vmatprep.mubr.bf16.mxu0 %v18980_v26 }
 0x427   : > { %9024 = vmatmul.mubr.msk.bf16.gmra.mrb[92].mxu1 %vm15569_vm2, %v15551_v42 }
 0x428   : > { %4410 = vmatprep.mubr.bf16.mxu1 %v14597_v46 }
 0x42b   : > { %3897 = vmatmul.mubr.bf16.vlgmr.msra.gmra.mrb[96].mxu0 %v18980_v26 }
 0x42c   : > { %10920 = vmatpush3.bf16.msra.mxu0 %v15003_v24  ;;  %3904 = vmatprep.mubr.bf16.mxu0 %v14568_v14  ;;  %v11818_v14 = vld [vmem:[#allocation15 + $0xa0] sm:$0xff]   ;;  %v11819_v24 = vld [vmem:[#allocation15 + $0xa8] sm:$0xff]  }
 0x42d   : > { %10921 = vmatprep.subr.bf16.mxu0 %v11815_v1 }
 0x42f   : > { %9579 = vmatmul.mubr.msk.bf16.vlgmr.msra.gmra.mrb[96].mxu1 %vm14646_vm12, %v14611_v53 }
 0x430   : > { %4418 = vmatprep.mubr.bf16.mxu1 %v14703_v9  ;;  %10922 = vmatpush3.bf16.msra.mxu0 %v11815_v1 }
 0x431   : > { %10923 = vmatprep.subr.bf16.mxu0 %v11816_v23 }
 0x433   : > { %9489 = vmatmul.mubr.msk.bf16.gmra.mrb[100].mxu0 %vm14573_vm7, %v14577_v4  ;;  %v11820_v4 = vld [vmem:[#allocation15 + $0xb0] sm:$0xff]  }
 0x434   : > { %3912 = vmatprep.mubr.bf16.mxu0 %v14597_v46  ;;  %10924 = vmatpush3.bf16.msra.mxu0 %v11816_v23  ;;  %v11821_v46 = vld [vmem:[#allocation15 + $0xb8] sm:$0xff]  }
 0x435   : > { %10925 = vmatprep.subr.bf16.mxu0 %v11817_v35 }
 0x437   : > { %9582 = vmatmul.mubr.msk.bf16.gmra.mrb[100].mxu1 %vm14726_vm15, %v14732_v49 }
 0x438   : > { %4426 = vmatprep.mubr.bf16.mxu1 %v14747_v2  ;;  %10926 = vmatpush3.bf16.msra.mxu0 %v11817_v35 }
 0x439   : > { %10927 = vmatprep.subr.bf16.mxu0 %v11818_v14 }
 0x43b   : > { %9492 = vmatmul.mubr.msk.bf16.gmra.mrb[104].mxu0 %vm14646_vm12, %v14611_v53  ;;  %v15605_v53 = vld [vmem:[#allocation15 + $0x200] sm:$0xff]   ;;  %vm19029_vm12 = vnez %v18934_v51 }
 0x43c   : > { %3920 = vmatprep.mubr.bf16.mxu0 %v14703_v9  ;;  %10928 = vmatpush3.bf16.msra.mxu0 %v11818_v14  ;;  %v18981_v9 = vld [vmem:[#allocation117_spill] sm:$0xff] }
 0x43d   : > { %10929 = vmatprep.subr.bf16.mxu0 %v11819_v24 }
 0x43f   : > { %9585 = vmatmul.mubr.msk.bf16.gmra.mrb[104].mxu1 %vm14804_vm9, %v14779_v41 }
 0x440   : > { %4434 = vmatprep.mubr.bf16.mxu1 %v14881_v33  ;;  %10930 = vmatpush3.bf16.msra.mxu0 %v11819_v24 }
 0x441   : > { %10931 = vmatprep.subr.bf16.mxu0 %v11820_v4 }
 0x443   : > { %9495 = vmatmul.mubr.msk.bf16.gmra.mrb[108].mxu0 %vm14726_vm15, %v14732_v49  ;;  %v18982_v49 = vld [vmem:[#allocation118_spill] sm:$0xff] }
 0x444   : > { %3928 = vmatprep.mubr.bf16.mxu0 %v14747_v2  ;;  %10932 = vmatpush3.bf16.msra.mxu0 %v11820_v4 }
 0x445   : > { %10933 = vmatprep.subr.bf16.mxu0 %v11821_v46 }
 0x447   : > { %9588 = vmatmul.mubr.msk.bf16.gmra.mrb[108].mxu1 %vm14886_vm13, %v14903_v19 }
 0x448   : > { %4442 = vmatprep.mubr.bf16.mxu1 %v18981_v9  ;;  %10934 = vmatpush3.bf16.msra.mxu0 %v11821_v46 }
 0x449   : > { %10967 = vmatprep.subr.bf16.mxu0 %v15605_v53 }
 0x44b   : > { %9498 = vmatmul.mubr.msk.bf16.gmra.mrb[112].mxu0 %vm14804_vm9, %v14779_v41  ;;  %v18991_v41 = vld [vmem:[#allocation134_spill] sm:$0xff]  ;;  %vm19026_vm9 = vnez %v18901_v16 }
 0x44c   : > { %3936 = vmatprep.mubr.bf16.mxu0 %v14881_v33  ;;  %v18992_v33 = vld [vmem:[#allocation135_spill] sm:$0xff] }
 0x44f   : > { %9591 = vmatmul.mubr.msk.bf16.gmra.mrb[112].mxu1 %vm14994_vm3, %v18982_v49 }
 0x450   : > { %4450 = vmatprep.mubr.bf16.mxu1 %v18984_v37 }
 0x453   : > { %9501 = vmatmul.mubr.msk.bf16.gmra.mrb[116].mxu0 %vm14886_vm13, %v14903_v19  ;;  %v18993_v19 = vld [vmem:[#allocation136_spill] sm:$0xff] }
 0x454   : > { %3944 = vmatprep.mubr.bf16.mxu0 %v18981_v9  ;;  %vm18994_vm1 = vnez %v18993_v19  ;;  %v19024_v19 = vld [vmem:[#allocation132_spill] sm:$0xff] }
 0x455   : > { %vm19025_vm13 = vnez %v19024_v19 }
 0x457   : > { %9594 = vmatmul.mubr.msk.bf16.gmra.mrb[116].mxu1 %vm18987_vm6, %v18985_v3 }
 0x458   : > { %4458 = vmatprep.mubr.bf16.mxu1 %v18988_v27 }
 0x45b   : > { %9504 = vmatmul.mubr.msk.bf16.gmra.mrb[120].mxu0 %vm14994_vm3, %v18982_v49  ;;  %vm19022_vm3 = vnez %v19021_v47 }
 0x45c   : > { %3952 = vmatprep.mubr.bf16.mxu0 %v18984_v37 }
 0x45f   : > { %9597 = vmatmul.mubr.msk.bf16.gmra.mrb[120].mxu1 %vm18989_vm14, %v15095_v34 }
 0x460   : > { %4466 = vmatprep.mubr.bf16.mxu1 %v15186_v43 }
 0x463   : > { %9507 = vmatmul.mubr.msk.bf16.gmra.mrb[124].mxu0 %vm18987_vm6, %v18985_v3 }
 0x464   : > { %3960 = vmatprep.mubr.bf16.mxu0 %v18988_v27 }
 0x467   : > { %9600 = vmatmul.mubr.msk.bf16.gmra.mrb[124].mxu1 %vm18990_vm11, %v15216_v39 }
 0x468   : > { %4474 = vmatprep.mubr.bf16.mxu1 %v18991_v41 }
 0x46b   : > { %9510 = vmatmul.mubr.msk.bf16.gmra.mrb[128].mxu0 %vm18989_vm14, %v15095_v34  ;;  %vm18996_vm14 = vnez %v18922_v58  ;;  %v19020_v58 = vld [vmem:[#allocation130_spill] sm:$0xff] }
 0x46c   : > { %3968 = vmatprep.mubr.bf16.mxu0 %v15186_v43 }
 0x46d   : > { %v9887_v34 = vpop.f32.mrb[32].mxu1 }
 0x46e   : > { %v9888_v43 = vpop.f32.mrb[33].mxu1 }
 0x46f   : > { %9603 = vmatmul.mubr.msk.bf16.gmra.mrb[128].mxu1 %vm18994_vm1, %v18992_v33  ;;  %v9890_v36 = vpop.f32.mrb[34].mxu1 }
 0x470   : > { %4482 = vmatprep.mubr.bf16.mxu1 %v15317_v20  ;;  %v9891_v31 = vpop.f32.mrb[35].mxu1 }
 0x471   : > { %v15670_v6 = vadd.f32 %v9891_v31, %v9890_v36  ;;  %v19000_v36 = vld [vmem:[#allocation103_spill] sm:$0xff] }
 0x473   : > { %9513 = vmatmul.mubr.msk.bf16.gmra.mrb[132].mxu0 %vm18990_vm11, %v15216_v39  ;;  %v15667_v39 = vadd.f32 %v9888_v43, %v9887_v34  ;;  %v18999_v43 = vld [vmem:[#allocation104_spill] sm:$0xff] }
 0x474   : > { %3976 = vmatprep.mubr.bf16.mxu0 %v18991_v41 }
 0x477   : > { %9606 = vmatmul.mubr.msk.bf16.gmra.mrb[132].mxu1 %vm18995_vm4, %v15342_v57 }
 0x478   : > { %4490 = vmatprep.mubr.bf16.mxu1 %v15360_v13 }
 0x47b   : > { %9516 = vmatmul.mubr.msk.bf16.gmra.mrb[136].mxu0 %vm18994_vm1, %v18992_v33  ;;  %vm18997_vm1 = vnez %v18946_v32 }
 0x47c   : > { %3984 = vmatprep.mubr.bf16.mxu0 %v15317_v20  ;;  %v9893_v20 = vpop.f32.mrb[36].mxu1 }
 0x47d   : > { %v9894_v7 = vpop.f32.mrb[37].mxu1 }
 0x47e   : > { %v15679_v0 = vadd.f32 %v9894_v7, %v9893_v20  ;;  %v9896_v5 = vpop.f32.mrb[38].mxu1  ;;  %v19003_v20 = vld [vmem:[#allocation106_spill] sm:$0xff] }
 0x47f   : > { %9609 = vmatmul.mubr.msk.bf16.gmra.mrb[136].mxu1 %vm18996_vm14, %v15372_v18  ;;  %v9897_v1 = vpop.f32.mrb[39].mxu1 }
 0x480   : > { %4498 = vmatprep.mubr.bf16.mxu1 %v15438_v56  ;;  %v15682_v23 = vadd.f32 %v9897_v1, %v9896_v5  ;;  %v11824_v5 = vld [vmem:[#allocation15 + $0x210] sm:$0xff]  }
 0x483   : > { %9519 = vmatmul.mubr.msk.bf16.gmra.mrb[140].mxu0 %vm18995_vm4, %v15342_v57  ;;  %v9899_v57 = vpop.f32.mrb[40].mxu1  ;;  %vm18998_vm4 = vnez %v18950_v40  ;;  %v19018_v40 = vld [vmem:[#allocation125_spill] sm:$0xff] }
 0x484   : > { %3992 = vmatprep.mubr.bf16.mxu0 %v15360_v13  ;;  %v9900_v13 = vpop.f32.mrb[41].mxu1  ;;  %vm19019_vm6 = vnez %v19018_v40 }
 0x485   : > { %v15692_v35 = vadd.f32 %v9900_v13, %v9899_v57  ;;  %v9902_v14 = vpop.f32.mrb[42].mxu1  ;;  %v11825_v57 = vld [vmem:[#allocation15 + $0x218] sm:$0xff]  }
 0x486   : > { %v9903_v24 = vpop.f32.mrb[43].mxu1 }
 0x487   : > { %9612 = vmatmul.mubr.msk.bf16.gmra.mrb[140].mxu1 %vm18997_vm1, %v15465_v62  ;;  %v15694_v4 = vadd.f32 %v9903_v24, %v9902_v14 }
 0x488   : > { %4506 = vmatprep.mubr.bf16.mxu1 %v15414_v52 }
 0x48b   : > { %9522 = vmatmul.mubr.msk.bf16.gmra.mrb[144].mxu0 %vm18996_vm14, %v15372_v18  ;;  %v9905_v18 = vpop.f32.mrb[44].mxu1 }
 0x48c   : > { %4000 = vmatprep.mubr.bf16.mxu0 %v15438_v56  ;;  %v9906_v56 = vpop.f32.mrb[45].mxu1 }
 0x48d   : > { %v15704_v46 = vadd.f32 %v9906_v56, %v9905_v18  ;;  %v9908_v9 = vpop.f32.mrb[46].mxu1  ;;  %v19005_v18 = vld [vmem:[#allocation110_spill] sm:$0xff]  ;;  %v19006_v56 = vld [vmem:[#allocation109_spill] sm:$0xff] }
 0x48e   : > { %v9909_v49 = vpop.f32.mrb[47].mxu1 }
 0x48f   : > { %9615 = vmatmul.mubr.msk.bf16.gmra.mrb[144].mxu1 %vm18998_vm4, %v15469_v50  ;;  %v15706_v37 = vadd.f32 %v9909_v49, %v9908_v9  ;;  %v19008_v9 = vld [vmem:[#allocation113_spill] sm:$0xff]  ;;  %v19009_v49 = vld [vmem:[#allocation112_spill] sm:$0xff] }
 0x490   : > { %4514 = vmatprep.mubr.bf16.mxu1 %v15518_v59 }
 0x493   : > { %9525 = vmatmul.mubr.msk.bf16.gmra.mrb[148].mxu0 %vm18997_vm1, %v15465_v62  ;;  %vm19010_vm1 = vnez %v19009_v49 }
 0x494   : > { %4008 = vmatprep.mubr.bf16.mxu0 %v15414_v52 }
 0x496   : > { %v9911_v52 = vpop.f32.mrb[48].mxu1 }
 0x497   : > { %9618 = vmatmul.mubr.msk.bf16.gmra.mrb[148].mxu1 %vm15527_vm0, %v15546_v12  ;;  %v9912_v62 = vpop.f32.mrb[49].mxu1 }
 0x498   : > { %4522 = vmatprep.mubr.bf16.mxu1 %v15516_v29  ;;  %v15716_v29 = vadd.f32 %v9912_v62, %v9911_v52  ;;  %v9914_v3 = vpop.f32.mrb[50].mxu1  ;;  %v11826_v62 = vld [vmem:[#allocation15 + $0x220] sm:$0xff]  }
 0x499   : > { %v9915_v27 = vpop.f32.mrb[51].mxu1 }
 0x49b   : > { %9528 = vmatmul.mubr.msk.bf16.gmra.mrb[152].mxu0 %vm18998_vm4, %v15469_v50  ;;  %v15722_v50 = vadd.f32 %v9915_v27, %v9914_v3  ;;  %vm19007_vm4 = vnez %v19006_v56  ;;  %v11827_v27 = vld [vmem:[#allocation15 + $0x228] sm:$0xff]   ;;  %v11871_v56 = vld [vmem:[#allocation15 + $0x260] sm:$0xff]  }
 0x49c   : > { %4016 = vmatprep.mubr.bf16.mxu0 %v15518_v59 }
 0x49e   : > { %v9917_v59 = vpop.f32.mrb[52].mxu1 }
 0x49f   : > { %9621 = vmatmul.mubr.msk.bf16.gmra.mrb[152].mxu1 %vm15569_vm2, %v15551_v42  ;;  %v11823_v42 = vld [vmem:[#allocation15 + $0x208] sm:$0xff]   ;;  %v9918_v41 = vpop.f32.mrb[53].mxu1  ;;  %vm19001_vm2 = vnez %v19000_v36 }
 0x4a0   : > { %4530 = vmatprep.mubr.bf16.mxu1 %v18980_v26  ;;  %v15725_v33 = vadd.f32 %v9918_v41, %v9917_v59  ;;  %v9920_v34 = vpop.f32.mrb[54].mxu1 }
 0x4a1   : > { %v9921_v31 = vpop.f32.mrb[55].mxu1 }
 0x4a2   : > { %v15734_v7 = vadd.f32 %v9921_v31, %v9920_v34  ;;  %v19011_v34 = vld [vmem:[#allocation116_spill] sm:$0xff] }
 0x4a3   : > { %9531 = vmatmul.mubr.msk.bf16.gmra.mrb[156].mxu0 %vm15527_vm0, %v15546_v12  ;;  %v19002_v12 = vld [vmem:[#allocation107_spill] sm:$0xff]  ;;  %vm19004_vm0 = vnez %v19003_v20 }
 0x4a4   : > { %10935 = vmatprep.mubr.bf16.mxu0 %v18980_v26 }
 0x4a7   : > { %4531 = vmatmul.mubr.bf16.gmra.mrb[156].mxu1 %v18980_v26 }
 0x4aa   : > { %v9923_v1 = vpop.f32.mrb[56].mxu1 }
 0x4ab   : > { %10936 = vmatmul.mubr.msk.bf16.vlgmr.msra.gmra.mrb[64].mxu0 %vm19001_vm2, %v18999_v43  ;;  %v9924_v13 = vpop.f32.mrb[57].mxu1  ;;  %v19012_v43 = vld [vmem:[#allocation115_spill] sm:$0xff] }
 0x4ac   : > { %10968 = vmatpush3.bf16.msra.mxu0 %v15605_v53  ;;  %10939 = vmatprep.mubr.msk.bf16.mxu0 %vm19004_vm0, %v19002_v12  ;;  %v15736_v14 = vadd.f32 %v9924_v13, %v9923_v1  ;;  %v9926_v24 = vpop.f32.mrb[58].mxu1  ;;  %vm19013_vm14 = vnez %v19012_v43  ;;  %v19014_v1 = vld [vmem:[#allocation122_spill] sm:$0xff]  ;;  %v19015_v13 = vld [vmem:[#allocation121_spill] sm:$0xff] }
 0x4ad   : > { %10969 = vmatprep.subr.bf16.mxu0 %v11823_v42  ;;  %v9927_v53 = vpop.f32.mrb[59].mxu1  ;;  %vm19016_vm11 = vnez %v19015_v13 }
 0x4ae   : > { %v15744_v52 = vadd.f32 %v9927_v53, %v9926_v24  ;;  %v11829_v53 = vld [vmem:[#allocation15 + $0x238] sm:$0xff]  }
 0x4b0   : > { %10970 = vmatpush3.bf16.msra.mxu0 %v11823_v42 }
 0x4b1   : > { %10971 = vmatprep.subr.bf16.mxu0 %v11824_v5 }
 0x4b2   : > { %v9929_v3 = vpop.f32.mrb[60].mxu1 }
 0x4b3   : > { %10940 = vmatmul.mubr.msk.bf16.gmra.mrb[68].mxu0 %vm19007_vm4, %v19005_v18  ;;  %v9930_v59 = vpop.f32.mrb[61].mxu1 }
 0x4b4   : > { %10943 = vmatprep.mubr.msk.bf16.mxu0 %vm19010_vm1, %v19008_v9  ;;  %10972 = vmatpush3.bf16.msra.mxu0 %v11824_v5  ;;  %v15746_v42 = vadd.f32 %v9930_v59, %v9929_v3  ;;  %v9932_v41 = vpop.f32.mrb[62].mxu1 }
 0x4b5   : > { %10973 = vmatprep.subr.bf16.mxu0 %v11825_v57  ;;  %v9933_v31 = vpop.f32.mrb[63].mxu1 }
 0x4b6   : > { %v15754_v5 = vadd.f32 %v9933_v31, %v9932_v41 }
 0x4b8   : > { %10974 = vmatpush3.bf16.msra.mxu0 %v11825_v57  ;;  %v11828_v57 = vld [vmem:[#allocation15 + $0x230] sm:$0xff]  }
 0x4b9   : > { %10975 = vmatprep.subr.bf16.mxu0 %v11826_v62 }
 0x4bb   : > { %10944 = vmatmul.mubr.msk.bf16.gmra.mrb[72].mxu0 %vm19013_vm14, %v19011_v34 }
 0x4bc   : > { %10947 = vmatprep.mubr.msk.bf16.mxu0 %vm19016_vm11, %v19014_v1  ;;  %10976 = vmatpush3.bf16.msra.mxu0 %v11826_v62 }
 0x4bd   : > { %10977 = vmatprep.subr.bf16.mxu0 %v11827_v27 }
 0x4be   : > { %v9935_v24 = vpop.f32.mrb[64].mxu1 }
 0x4bf   : > { %v9936_v3 = vpop.f32.mrb[65].mxu1 }
 0x4c0   : > { %10978 = vmatpush3.bf16.msra.mxu0 %v11827_v27  ;;  %v15756_v59 = vadd.f32 %v9936_v3, %v9935_v24  ;;  %v9938_v28 = vpop.f32.mrb[66].mxu1  ;;  %v19023_v3 = vld [vmem:[#allocation133_spill] sm:$0xff] }
 0x4c1   : > { %10979 = vmatprep.subr.bf16.mxu0 %v11828_v57  ;;  %v9939_v32 = vpop.f32.mrb[67].mxu1 }
 0x4c2   : > { %v15764_v62 = vadd.f32 %v9939_v32, %v9938_v28 }
 0x4c3   : > { %10948 = vmatmul.mubr.msk.bf16.gmra.mrb[76].mxu0 %vm19019_vm6, %v19017_v38 }
 0x4c4   : > { %10951 = vmatprep.mubr.msk.bf16.mxu0 %vm19022_vm3, %v19020_v58  ;;  %10980 = vmatpush3.bf16.msra.mxu0 %v11828_v57 }
 0x4c5   : > { %10981 = vmatprep.subr.bf16.mxu0 %v11829_v53 }
 0x4c6   : > { %v9941_v27 = vpop.f32.mrb[68].mxu1 }
 0x4c7   : > { %v9942_v41 = vpop.f32.mrb[69].mxu1 }
 0x4c8   : > { %10982 = vmatpush3.bf16.msra.mxu0 %v11829_v53  ;;  %v15766_v31 = vadd.f32 %v9942_v41, %v9941_v27  ;;  %v9944_v24 = vpop.f32.mrb[70].mxu1  ;;  %v19027_v27 = vld [vmem:[#allocation139_spill] sm:$0xff] }
 0x4c9   : > { %v9945_v48 = vpop.f32.mrb[71].mxu1  ;;  %vm19028_vm15 = vnez %v19027_v27 }
 0x4ca   : > { %v15774_v15 = vadd.f32 %v9945_v48, %v9944_v24 }
 0x4cb   : > { %10952 = vmatmul.mubr.msk.bf16.gmra.mrb[80].mxu0 %vm19025_vm13, %v19023_v3 }
 0x4cc   : > { %10955 = vmatprep.mubr.msk.bf16.mxu0 %vm19026_vm9, %v15327_v17 }
 0x4d1   : > { %v9947_v32 = vpop.f32.mrb[72].mxu1 }
 0x4d2   : > { %v9948_v28 = vpop.f32.mrb[73].mxu1 }
 0x4d3   : > { %v15776_v57 = vadd.f32 %v9948_v28, %v9947_v32  ;;  %v9950_v53 = vpop.f32.mrb[74].mxu1  ;;  %10956 = vmatmul.mubr.msk.bf16.gmra.mrb[84].mxu0 %vm19028_vm15, %v15366_v11  ;;  %v19032_v32 = vld [vmem:[#allocation142_spill] sm:$0xff] }
 0x4d4   : > { %v9951_v41 = vpop.f32.mrb[75].mxu1  ;;  %10959 = vmatprep.mubr.msk.bf16.mxu0 %vm19029_vm12, %v15433_v61  ;;  %vm19033_vm2 = vnez %v19032_v32 }
 0x4d5   : > { %v15784_v45 = vadd.f32 %v9951_v41, %v9950_v53 }
 0x4d9   : > { %v9953_v2 = vpop.f32.mrb[76].mxu1 }
 0x4da   : > { %v9954_v10 = vpop.f32.mrb[77].mxu1 }
 0x4db   : > { %v15786_v48 = vadd.f32 %v9954_v10, %v9953_v2  ;;  %v9956_v24 = vpop.f32.mrb[78].mxu1  ;;  %10960 = vmatmul.mubr.msk.bf16.gmra.mrb[88].mxu0 %vm19033_vm2, %v19031_v21 }
 0x4dc   : > { %v9957_v28 = vpop.f32.mrb[79].mxu1  ;;  %10963 = vmatprep.mubr.msk.bf16.mxu0 %vm15507_vm8, %v15514_v60 }
 0x4dd   : > { %19030 = vst [vmem:[#allocation117_spill] sm:$0xff] %v15786_v48  ;;  %v15794_v55 = vadd.f32 %v9957_v28, %v9956_v24 }
 0x4e1   : > { %v9959_v44 = vpop.f32.mrb[80].mxu1 }
 0x4e2   : > { %v9960_v36 = vpop.f32.mrb[81].mxu1 }
 0x4e3   : > { %v15796_v53 = vadd.f32 %v9960_v36, %v9959_v44  ;;  %v9962_v41 = vpop.f32.mrb[82].mxu1  ;;  %10964 = vmatmul.mubr.msk.bf16.gmra.mrb[92].mxu0 %vm15540_vm10, %v15548_v8  ;;  %v11830_v36 = vld [vmem:[#allocation11 + $0x40] sm:$0xff]  }
 0x4e4   : > { %v9963_v10 = vpop.f32.mrb[83].mxu1  ;;  %10983 = vmatprep.mubr.msk.bf16.mxu0 %vm19004_vm0, %v19002_v12  ;;  %11015 = vmatprep.subr.bf16.mxu1 %v11830_v36 }
 0x4e5   : > { %19034 = vst [vmem:[#allocation118_spill] sm:$0xff] %v15796_v53  ;;  %v15804_v2 = vadd.f32 %v9963_v10, %v9962_v41  ;;  %11016 = vmatpush3.bf16.msra.mxu1 %v11830_v36 }
 0x4e9   : > { %v9965_v22 = vpop.f32.mrb[84].mxu1 }
 0x4ea   : > { %v9966_v48 = vpop.f32.mrb[85].mxu1 }
 0x4eb   : > { %v15806_v24 = vadd.f32 %v9966_v48, %v9965_v22  ;;  %v9968_v28 = vpop.f32.mrb[86].mxu1  ;;  %10984 = vmatmul.mubr.msk.bf16.vlgmr.msra.gmra.mrb[64].mxu0 %vm19007_vm4, %v19005_v18 }
 0x4ec   : > { %v9969_v44 = vpop.f32.mrb[87].mxu1  ;;  %10987 = vmatprep.mubr.msk.bf16.mxu0 %vm19010_vm1, %v19008_v9 }
 0x4ed   : > { %v15814_v53 = vadd.f32 %v9969_v44, %v9968_v28 }
 0x4f2   : > { %v9971_v12 = vpop.f32.mrb[88].mxu1 }
 0x4f3   : > { %v9972_v41 = vpop.f32.mrb[89].mxu1  ;;  %10988 = vmatmul.mubr.msk.bf16.gmra.mrb[68].mxu0 %vm19013_vm14, %v19011_v34  ;;  %v11831_v34 = vld [vmem:[#allocation11 + $0x48] sm:$0xff]  }
 0x4f4   : > { %v15819_v22 = vadd.f32 %v9972_v41, %v9971_v12  ;;  %v9974_v48 = vpop.f32.mrb[90].mxu1  ;;  %10991 = vmatprep.mubr.msk.bf16.mxu0 %vm19016_vm11, %v19014_v1  ;;  %11017 = vmatprep.subr.bf16.mxu1 %v11831_v34 }
 0x4f5   : > { %v9975_v18 = vpop.f32.mrb[91].mxu1  ;;  %11018 = vmatpush3.bf16.msra.mxu1 %v11831_v34  ;;  %v11834_v34 = vld [vmem:[#allocation11 + $0x60] sm:$0xff]  }
 0x4f6   : > { %v15824_v9 = vadd.f32 %v9975_v18, %v9974_v48  ;;  %v11832_v48 = vld [vmem:[#allocation11 + $0x50] sm:$0xff]  }
 0x4f7   : > { %11019 = vmatprep.subr.bf16.mxu1 %v11832_v48 }
 0x4f9   : > { %11020 = vmatpush3.bf16.msra.mxu1 %v11832_v48  ;;  %v11835_v48 = vld [vmem:[#allocation11 + $0x68] sm:$0xff]  }
 0x4fa   : > { %v9977_v10 = vpop.f32.mrb[92].mxu1 }
 0x4fb   : > { %v9978_v28 = vpop.f32.mrb[93].mxu1  ;;  %10992 = vmatmul.mubr.msk.bf16.gmra.mrb[72].mxu0 %vm19019_vm6, %v19017_v38  ;;  %v11833_v38 = vld [vmem:[#allocation11 + $0x58] sm:$0xff]  }
 0x4fc   : > { %v15829_v44 = vadd.f32 %v9978_v28, %v9977_v10  ;;  %v9980_v36 = vpop.f32.mrb[94].mxu1  ;;  %10995 = vmatprep.mubr.msk.bf16.mxu0 %vm19022_vm3, %v19020_v58  ;;  %11021 = vmatprep.subr.bf16.mxu1 %v11833_v38 }
 0x4fd   : > { %v9981_v12 = vpop.f32.mrb[95].mxu1  ;;  %11022 = vmatpush3.bf16.msra.mxu1 %v11833_v38 }
 0x4fe   : > { %v15834_v41 = vadd.f32 %v9981_v12, %v9980_v36  ;;  %v10023_v1 = vpop.f32.mrb[96].mxu0  ;;  %11023 = vmatprep.subr.bf16.mxu1 %v11834_v34 }
 0x4ff   : > { %v10024_v18 = vpop.f32.mrb[97].mxu0 }
 0x500   : > { %v10025_v13 = vadd.f32 %v10024_v18, %v10023_v1  ;;  %v10026_v43 = vpop.f32.mrb[98].mxu0 }
 0x501   : > { %v10027_v10 = vpop.f32.mrb[99].mxu0  ;;  %11024 = vmatpush3.bf16.msra.mxu1 %v11834_v34 }
 0x502   : > { %v11226_v28 = vadd.f32 %v10025_v13, %v15667_v39  ;;  %v10159_v40 = vpop.f32.mrb[96].mxu1  ;;  %v10028_v49 = vadd.f32 %v10027_v10, %v10026_v43  ;;  %11025 = vmatprep.subr.bf16.mxu1 %v11835_v48 }
 0x503   : > { %v10160_v47 = vpop.f32.mrb[97].mxu1  ;;  %10996 = vmatmul.mubr.msk.bf16.gmra.mrb[76].mxu0 %vm19025_vm13, %v19023_v3 }
 0x504   : > { %v11232_v58 = vadd.f32 %v10028_v49, %v15670_v6  ;;  %v10161_v36 = vadd.f32 %v10160_v47, %v10159_v40  ;;  %v10162_v12 = vpop.f32.mrb[98].mxu1  ;;  %10999 = vmatprep.mubr.msk.bf16.mxu0 %vm19026_vm9, %v15327_v17 }
 0x505   : > { %v10163_v1 = vpop.f32.mrb[99].mxu1  ;;  %11026 = vmatpush3.bf16.msra.mxu1 %v11835_v48 }
 0x506   : > { %v10164_v39 = vadd.f32 %v10163_v1, %v10162_v12  ;;  %v10029_v13 = vpop.f32.mrb[100].mxu0  ;;  %v15844_v43 = vadd.f32 %v11226_v28, %v10161_v36 }
 0x507   : > { %v10030_v18 = vpop.f32.mrb[101].mxu0 }
 0x508   : > { %v10031_v10 = vadd.f32 %v10030_v18, %v10029_v13  ;;  %v10032_v3 = vpop.f32.mrb[102].mxu0  ;;  %v15846_v6 = vadd.f32 %v11232_v58, %v10164_v39 }
 0x509   : > { %v10033_v47 = vpop.f32.mrb[103].mxu0 }
 0x50a   : > { %v11223_v40 = vadd.f32 %v10031_v10, %v15679_v0  ;;  %v10165_v49 = vpop.f32.mrb[100].mxu1  ;;  %v10034_v17 = vadd.f32 %v10033_v47, %v10032_v3 }
 0x50b   : > { %v10166_v16 = vpop.f32.mrb[101].mxu1  ;;  %11000 = vmatmul.mubr.msk.bf16.gmra.mrb[80].mxu0 %vm19028_vm15, %v15366_v11 }
 0x50c   : > { %v11229_v28 = vadd.f32 %v10034_v17, %v15682_v23  ;;  %v10167_v38 = vadd.f32 %v10166_v16, %v10165_v49  ;;  %v10168_v36 = vpop.f32.mrb[102].mxu1  ;;  %11003 = vmatprep.mubr.msk.bf16.mxu0 %vm19029_vm12, %v15433_v61 }
 0x50d   : > { %v10169_v58 = vpop.f32.mrb[103].mxu1 }
 0x50e   : > { %v10170_v12 = vadd.f32 %v10169_v58, %v10168_v36  ;;  %v10035_v0 = vpop.f32.mrb[104].mxu0  ;;  %v15856_v1 = vadd.f32 %v11223_v40, %v10167_v38 }
 0x50f   : > { %v10036_v39 = vpop.f32.mrb[105].mxu0 }
 0x510   : > { %v10037_v13 = vadd.f32 %v10036_v39, %v10035_v0  ;;  %v10038_v18 = vpop.f32.mrb[106].mxu0  ;;  %v15858_v11 = vadd.f32 %v11229_v28, %v10170_v12 }
 0x511   : > { %v10039_v34 = vpop.f32.mrb[107].mxu0 }
 0x512   : > { %v11238_v16 = vadd.f32 %v10037_v13, %v15692_v35  ;;  %v10171_v23 = vpop.f32.mrb[104].mxu1  ;;  %v10040_v10 = vadd.f32 %v10039_v34, %v10038_v18 }
 0x513   : > { %v10172_v3 = vpop.f32.mrb[105].mxu1  ;;  %11004 = vmatmul.mubr.msk.bf16.gmra.mrb[84].mxu0 %vm19033_vm2, %v19031_v21 }
 0x514   : > { %v11244_v61 = vadd.f32 %v10040_v10, %v15694_v4  ;;  %v10173_v47 = vadd.f32 %v10172_v3, %v10171_v23  ;;  %v10174_v40 = vpop.f32.mrb[106].mxu1  ;;  %11007 = vmatprep.mubr.msk.bf16.mxu0 %vm15507_vm8, %v15514_v60 }
 0x515   : > { %v10175_v48 = vpop.f32.mrb[107].mxu1 }
 0x516   : > { %v10176_v49 = vadd.f32 %v10175_v48, %v10174_v40  ;;  %v10041_v17 = vpop.f32.mrb[108].mxu0  ;;  %v15868_v28 = vadd.f32 %v11238_v16, %v10173_v47 }
 0x517   : > { %v10042_v35 = vpop.f32.mrb[109].mxu0 }
 0x518   : > { %v10043_v38 = vadd.f32 %v10042_v35, %v10041_v17  ;;  %v10044_v36 = vpop.f32.mrb[110].mxu0  ;;  %v15870_v58 = vadd.f32 %v11244_v61, %v10176_v49 }
 0x519   : > { %v10045_v12 = vpop.f32.mrb[111].mxu0 }
 0x51a   : > { %v11235_v21 = vadd.f32 %v10043_v38, %v15704_v46  ;;  %v10177_v4 = vpop.f32.mrb[108].mxu1  ;;  %v10046_v0 = vadd.f32 %v10045_v12, %v10044_v36 }
 0x51b   : > { %v10178_v39 = vpop.f32.mrb[109].mxu1  ;;  %11008 = vmatmul.mubr.msk.bf16.gmra.mrb[88].mxu0 %vm15540_vm10, %v15548_v8  ;;  %vm19104_vm10 = vcmask 1046528  }
 0x51c   : > { %v11241_v60 = vadd.f32 %v10046_v0, %v15706_v37  ;;  %v10179_v13 = vadd.f32 %v10178_v39, %v10177_v4  ;;  %v10180_v18 = vpop.f32.mrb[110].mxu1  ;;  %11011 = vmatprep.mubr.msk.bf16.mxu0 %vm15561_vm5, %v15544_v63  ;;  %vm19102_vm5 = vcmask 1040384  }
 0x51d   : > { %v10181_v34 = vpop.f32.mrb[111].mxu1 }
 0x51e   : > { %v10182_v16 = vadd.f32 %v10181_v34, %v10180_v18  ;;  %v10047_v23 = vpop.f32.mrb[112].mxu0  ;;  %v15880_v10 = vadd.f32 %v11235_v21, %v10179_v13 }
 0x51f   : > { %v10048_v46 = vpop.f32.mrb[113].mxu0 }
 0x520   : > { %v10049_v3 = vadd.f32 %v10048_v46, %v10047_v23  ;;  %v10050_v61 = vpop.f32.mrb[114].mxu0  ;;  %v15882_v47 = vadd.f32 %v11241_v60, %v10182_v16 }
 0x521   : > { %v10051_v40 = vpop.f32.mrb[115].mxu0 }
 0x522   : > { %v11250_v8 = vadd.f32 %v10049_v3, %v15716_v29  ;;  %v10183_v37 = vpop.f32.mrb[112].mxu1  ;;  %v10052_v48 = vadd.f32 %v10051_v40, %v10050_v61 }
 0x523   : > { %v10184_v49 = vpop.f32.mrb[113].mxu1  ;;  %11012 = vmatmul.mubr.bf16.gmra.mrb[92].mxu0 %v18980_v26 }
 0x524   : > { %v11256_v63 = vadd.f32 %v10052_v48, %v15722_v50  ;;  %v10185_v17 = vadd.f32 %v10184_v49, %v10183_v37  ;;  %v10186_v35 = vpop.f32.mrb[114].mxu1 }
 0x525   : > { %v10187_v38 = vpop.f32.mrb[115].mxu1 }
 0x526   : > { %v10188_v36 = vadd.f32 %v10187_v38, %v10186_v35  ;;  %v10053_v12 = vpop.f32.mrb[116].mxu0  ;;  %v15887_v21 = vadd.f32 %v11250_v8, %v10185_v17 }
 0x527   : > { %v10054_v4 = vpop.f32.mrb[117].mxu0 }
 0x528   : > { %v10055_v0 = vadd.f32 %v10054_v4, %v10053_v12  ;;  %v10056_v39 = vpop.f32.mrb[118].mxu0  ;;  %v15889_v60 = vadd.f32 %v11256_v63, %v10188_v36 }
 0x529   : > { %v10057_v29 = vpop.f32.mrb[119].mxu0 }
 0x52a   : > { %v11247_v13 = vadd.f32 %v10055_v0, %v15725_v33  ;;  %v10189_v18 = vpop.f32.mrb[116].mxu1  ;;  %v10058_v34 = vadd.f32 %v10057_v29, %v10056_v39 }
 0x52b   : > { %v10190_v16 = vpop.f32.mrb[117].mxu1 }
 0x52c   : > { %v11253_v50 = vadd.f32 %v10058_v34, %v15734_v7  ;;  %v10191_v23 = vadd.f32 %v10190_v16, %v10189_v18  ;;  %v10192_v46 = vpop.f32.mrb[118].mxu1 }
 0x52d   : > { %v10193_v3 = vpop.f32.mrb[119].mxu1 }
 0x52e   : > { %v10194_v61 = vadd.f32 %v10193_v3, %v10192_v46  ;;  %v10059_v40 = vpop.f32.mrb[120].mxu0  ;;  %v15893_v8 = vadd.f32 %v11247_v13, %v10191_v23 }
 0x52f   : > { %v10060_v37 = vpop.f32.mrb[121].mxu0 }
 0x530   : > { %v10061_v48 = vadd.f32 %v10060_v37, %v10059_v40  ;;  %v10062_v49 = vpop.f32.mrb[122].mxu0  ;;  %v15895_v63 = vadd.f32 %v11253_v50, %v10194_v61 }
 0x531   : > { %v10063_v17 = vpop.f32.mrb[123].mxu0 }
 0x532   : > { %v11262_v33 = vadd.f32 %v10061_v48, %v15736_v14  ;;  %v10195_v35 = vpop.f32.mrb[120].mxu1  ;;  %v10064_v38 = vadd.f32 %v10063_v17, %v10062_v49 }
 0x533   : > { %v10196_v36 = vpop.f32.mrb[121].mxu1 }
 0x534   : > { %v11268_v7 = vadd.f32 %v10064_v38, %v15744_v52  ;;  %v10197_v12 = vadd.f32 %v10196_v36, %v10195_v35  ;;  %v10198_v4 = vpop.f32.mrb[122].mxu1 }
 0x535   : > { %v10199_v0 = vpop.f32.mrb[123].mxu1 }
 0x536   : > { %v10200_v39 = vadd.f32 %v10199_v0, %v10198_v4  ;;  %v10065_v29 = vpop.f32.mrb[124].mxu0  ;;  %v15899_v13 = vadd.f32 %v11262_v33, %v10197_v12 }
 0x537   : > { %v10066_v18 = vpop.f32.mrb[125].mxu0 }
 0x538   : > { %v10067_v34 = vadd.f32 %v10066_v18, %v10065_v29  ;;  %v10068_v16 = vpop.f32.mrb[126].mxu0  ;;  %v15901_v50 = vadd.f32 %v11268_v7, %v10200_v39 }
 0x539   : > { %v10069_v23 = vpop.f32.mrb[127].mxu0 }
 0x53a   : > { %v11259_v14 = vadd.f32 %v10067_v34, %v15746_v42  ;;  %v10201_v46 = vpop.f32.mrb[124].mxu1  ;;  %v10070_v3 = vadd.f32 %v10069_v23, %v10068_v16 }
 0x53b   : > { %v10202_v61 = vpop.f32.mrb[125].mxu1 }
 0x53c   : > { %v11265_v52 = vadd.f32 %v10070_v3, %v15754_v5  ;;  %v10203_v40 = vadd.f32 %v10202_v61, %v10201_v46  ;;  %v10204_v37 = vpop.f32.mrb[126].mxu1 }
 0x53d   : > { %v10205_v48 = vpop.f32.mrb[127].mxu1 }
 0x53e   : > { %v10206_v49 = vadd.f32 %v10205_v48, %v10204_v37  ;;  %v10071_v17 = vpop.f32.mrb[128].mxu0  ;;  %v15905_v33 = vadd.f32 %v11259_v14, %v10203_v40 }
 0x53f   : > { %v10072_v35 = vpop.f32.mrb[129].mxu0 }
 0x540   : > { %v10073_v38 = vadd.f32 %v10072_v35, %v10071_v17  ;;  %v10074_v36 = vpop.f32.mrb[130].mxu0  ;;  %v15907_v7 = vadd.f32 %v11265_v52, %v10206_v49 }
 0x541   : > { %v10075_v12 = vpop.f32.mrb[131].mxu0 }
 0x542   : > { %v11274_v42 = vadd.f32 %v10073_v38, %v15756_v59  ;;  %v10207_v4 = vpop.f32.mrb[128].mxu1  ;;  %v10076_v0 = vadd.f32 %v10075_v12, %v10074_v36 }
 0x543   : > { %v10208_v39 = vpop.f32.mrb[129].mxu1 }
 0x544   : > { %v11280_v5 = vadd.f32 %v10076_v0, %v15764_v62  ;;  %v10209_v29 = vadd.f32 %v10208_v39, %v10207_v4  ;;  %v10210_v18 = vpop.f32.mrb[130].mxu1 }
 0x545   : > { %v10211_v34 = vpop.f32.mrb[131].mxu1 }
 0x546   : > { %v10212_v16 = vadd.f32 %v10211_v34, %v10210_v18  ;;  %v10077_v23 = vpop.f32.mrb[132].mxu0  ;;  %v15911_v14 = vadd.f32 %v11274_v42, %v10209_v29 }
 0x547   : > { %v10078_v46 = vpop.f32.mrb[133].mxu0 }
 0x548   : > { %v10079_v3 = vadd.f32 %v10078_v46, %v10077_v23  ;;  %v10080_v61 = vpop.f32.mrb[134].mxu0  ;;  %v15913_v52 = vadd.f32 %v11280_v5, %v10212_v16 }
 0x549   : > { %v10081_v40 = vpop.f32.mrb[135].mxu0 }
 0x54a   : > { %v11271_v59 = vadd.f32 %v10079_v3, %v15766_v31  ;;  %v10213_v37 = vpop.f32.mrb[132].mxu1  ;;  %v10082_v48 = vadd.f32 %v10081_v40, %v10080_v61 }
 0x54b   : > { %v10214_v49 = vpop.f32.mrb[133].mxu1 }
 0x54c   : > { %v11277_v62 = vadd.f32 %v10082_v48, %v15774_v15  ;;  %v10215_v17 = vadd.f32 %v10214_v49, %v10213_v37  ;;  %v10216_v35 = vpop.f32.mrb[134].mxu1 }
 0x54d   : > { %v10217_v38 = vpop.f32.mrb[135].mxu1 }
 0x54e   : > { %v10218_v36 = vadd.f32 %v10217_v38, %v10216_v35  ;;  %v10083_v12 = vpop.f32.mrb[136].mxu0  ;;  %v15917_v42 = vadd.f32 %v11271_v59, %v10215_v17  ;;  %v19035_v35 = vld [vmem:[#allocation117_spill] sm:$0xff] }
 0x54f   : > { %v10084_v4 = vpop.f32.mrb[137].mxu0 }
 0x550   : > { %v10085_v0 = vadd.f32 %v10084_v4, %v10083_v12  ;;  %v10086_v39 = vpop.f32.mrb[138].mxu0  ;;  %v15919_v5 = vadd.f32 %v11277_v62, %v10218_v36 }
 0x551   : > { %v10087_v29 = vpop.f32.mrb[139].mxu0 }
 0x552   : > { %v11286_v31 = vadd.f32 %v10085_v0, %v15776_v57  ;;  %v10219_v18 = vpop.f32.mrb[136].mxu1  ;;  %v10088_v34 = vadd.f32 %v10087_v29, %v10086_v39 }
 0x553   : > { %v10220_v16 = vpop.f32.mrb[137].mxu1 }
 0x554   : > { %v11292_v15 = vadd.f32 %v10088_v34, %v15784_v45  ;;  %v10221_v23 = vadd.f32 %v10220_v16, %v10219_v18  ;;  %v10222_v46 = vpop.f32.mrb[138].mxu1 }
 0x555   : > { %v10223_v3 = vpop.f32.mrb[139].mxu1 }
 0x556   : > { %v10224_v61 = vadd.f32 %v10223_v3, %v10222_v46  ;;  %v10089_v40 = vpop.f32.mrb[140].mxu0  ;;  %v15923_v59 = vadd.f32 %v11286_v31, %v10221_v23  ;;  %v19036_v3 = vld [vmem:[#allocation118_spill] sm:$0xff] }
 0x557   : > { %v10090_v37 = vpop.f32.mrb[141].mxu0 }
 0x558   : > { %v10091_v48 = vadd.f32 %v10090_v37, %v10089_v40  ;;  %v10092_v49 = vpop.f32.mrb[142].mxu0  ;;  %v15925_v62 = vadd.f32 %v11292_v15, %v10224_v61 }
 0x559   : > { %v10093_v17 = vpop.f32.mrb[143].mxu0 }
 0x55a   : > { %v11283_v57 = vadd.f32 %v10091_v48, %v19035_v35  ;;  %v10225_v38 = vpop.f32.mrb[140].mxu1  ;;  %v10094_v36 = vadd.f32 %v10093_v17, %v10092_v49 }
 0x55b   : > { %v10226_v12 = vpop.f32.mrb[141].mxu1 }
 0x55c   : > { %v11289_v45 = vadd.f32 %v10094_v36, %v15794_v55  ;;  %v10227_v4 = vadd.f32 %v10226_v12, %v10225_v38  ;;  %v10228_v0 = vpop.f32.mrb[142].mxu1 }
 0x55d   : > { %v10229_v39 = vpop.f32.mrb[143].mxu1 }
 0x55e   : > { %v10230_v29 = vadd.f32 %v10229_v39, %v10228_v0  ;;  %v10095_v18 = vpop.f32.mrb[144].mxu0  ;;  %v15929_v31 = vadd.f32 %v11283_v57, %v10227_v4  ;;  %v11836_v4 = vld [vmem:[#allocation11 + $0x70] sm:$0xff]  }
 0x55f   : > { %v10096_v34 = vpop.f32.mrb[145].mxu0  ;;  %11027 = vmatprep.subr.bf16.mxu1 %v11836_v4 }
 0x560   : > { %v10097_v16 = vadd.f32 %v10096_v34, %v10095_v18  ;;  %v10098_v23 = vpop.f32.mrb[146].mxu0  ;;  %v15931_v15 = vadd.f32 %v11289_v45, %v10230_v29  ;;  %11028 = vmatpush3.bf16.msra.mxu1 %v11836_v4 }
 0x561   : > { %v10099_v46 = vpop.f32.mrb[147].mxu0 }
 0x562   : > { %v11298_v61 = vadd.f32 %v10097_v16, %v19036_v3  ;;  %v10231_v40 = vpop.f32.mrb[144].mxu1  ;;  %v10100_v37 = vadd.f32 %v10099_v46, %v10098_v23  ;;  %v11837_v23 = vld [vmem:[#allocation11 + $0x78] sm:$0xff]  }
 0x563   : > { %v10232_v48 = vpop.f32.mrb[145].mxu1  ;;  %11029 = vmatprep.subr.bf16.mxu1 %v11837_v23 }
 0x564   : > { %v11304_v55 = vadd.f32 %v10100_v37, %v15804_v2  ;;  %v10233_v49 = vadd.f32 %v10232_v48, %v10231_v40  ;;  %v10234_v17 = vpop.f32.mrb[146].mxu1  ;;  %11030 = vmatpush3.bf16.msra.mxu1 %v11837_v23 }
 0x565   : > { %v10235_v35 = vpop.f32.mrb[147].mxu1 }
 0x566   : > { %v10236_v38 = vadd.f32 %v10235_v35, %v10234_v17  ;;  %v10101_v36 = vpop.f32.mrb[148].mxu0  ;;  %v15935_v57 = vadd.f32 %v11298_v61, %v10233_v49 }
 0x567   : > { %v10102_v12 = vpop.f32.mrb[149].mxu0 }
 0x568   : > { %v10103_v0 = vadd.f32 %v10102_v12, %v10101_v36  ;;  %v10104_v45 = vpop.f32.mrb[150].mxu0  ;;  %v15937_v39 = vadd.f32 %v11304_v55, %v10236_v38 }
 0x569   : > { %v10105_v29 = vpop.f32.mrb[151].mxu0 }
 0x56a   : > { %v11295_v18 = vadd.f32 %v10103_v0, %v15806_v24  ;;  %v10237_v34 = vpop.f32.mrb[148].mxu1  ;;  %v10106_v16 = vadd.f32 %v10105_v29, %v10104_v45 }
 0x56b   : > { %v10238_v2 = vpop.f32.mrb[149].mxu1 }
 0x56c   : > { %v11301_v46 = vadd.f32 %v10106_v16, %v15814_v53  ;;  %v10239_v3 = vadd.f32 %v10238_v2, %v10237_v34  ;;  %v10240_v61 = vpop.f32.mrb[150].mxu1 }
 0x56d   : > { %v10241_v40 = vpop.f32.mrb[151].mxu1 }
 0x56e   : > { %v10242_v37 = vadd.f32 %v10241_v40, %v10240_v61  ;;  %v10107_v48 = vpop.f32.mrb[152].mxu0  ;;  %v15941_v55 = vadd.f32 %v11295_v18, %v10239_v3 }
 0x56f   : > { %v10108_v49 = vpop.f32.mrb[153].mxu0 }
 0x570   : > { %v10109_v17 = vadd.f32 %v10108_v49, %v10107_v48  ;;  %v10110_v35 = vpop.f32.mrb[154].mxu0  ;;  %v15943_v24 = vadd.f32 %v11301_v46, %v10242_v37 }
 0x571   : > { %v10111_v38 = vpop.f32.mrb[155].mxu0 }
 0x572   : > { %v11310_v36 = vadd.f32 %v10109_v17, %v15819_v22  ;;  %v10243_v12 = vpop.f32.mrb[152].mxu1  ;;  %v10112_v4 = vadd.f32 %v10111_v38, %v10110_v35 }
 0x573   : > { %v10244_v53 = vpop.f32.mrb[153].mxu1 }
 0x574   : > { %v11316_v0 = vadd.f32 %v10112_v4, %v15824_v9  ;;  %v10245_v45 = vadd.f32 %v10244_v53, %v10243_v12  ;;  %v10246_v29 = vpop.f32.mrb[154].mxu1  ;;  %v11838_v53 = vld [vmem:[#allocation15 + $0x380] sm:$0xff]  }
 0x575   : > { %v10247_v34 = vpop.f32.mrb[155].mxu1  ;;  %11063 = vmatprep.subr.bf16.mxu0 %v11838_v53 }
 0x576   : > { %v10248_v16 = vadd.f32 %v10247_v34, %v10246_v29  ;;  %v10113_v2 = vpop.f32.mrb[156].mxu0  ;;  %v15947_v18 = vadd.f32 %v11310_v36, %v10245_v45  ;;  %v11839_v45 = vld [vmem:[#allocation15 + $0x388] sm:$0xff]   ;;  %11064 = vmatpush3.bf16.msra.mxu0 %v11838_v53  ;;  %v15960_v34 = vld [vmem:[#allocation18] ss:$0 sm:$0xff] }
 0x577   : > { %v10114_v23 = vpop.f32.mrb[157].mxu0  ;;  %11065 = vmatprep.subr.bf16.mxu0 %v11839_v45 }
 0x578   : > { %v10115_v3 = vadd.f32 %v10114_v23, %v10113_v2  ;;  %v10116_v61 = vpop.f32.mrb[158].mxu0  ;;  %v15949_v46 = vadd.f32 %v11316_v0, %v10248_v16  ;;  %v15957_v0 = vld [vmem:[#allocation17] ss:$0 sm:$0xff] }
 0x579   : > { %v10117_v40 = vpop.f32.mrb[159].mxu0 }
 0x57a   : > { %v11307_v22 = vadd.f32 %v10115_v3, %v15829_v44  ;;  %v10249_v37 = vpop.f32.mrb[156].mxu1  ;;  %v10118_v48 = vadd.f32 %v10117_v40, %v10116_v61  ;;  %11066 = vmatpush3.bf16.msra.mxu0 %v11839_v45 }
 0x57b   : > { %v10250_v49 = vpop.f32.mrb[157].mxu1 }
 0x57c   : > { %v11313_v9 = vadd.f32 %v10118_v48, %v15834_v41  ;;  %v10251_v17 = vadd.f32 %v10250_v49, %v10249_v37  ;;  %v10252_v35 = vpop.f32.mrb[158].mxu1 }
 0x57d   : > { %v10253_v38 = vpop.f32.mrb[159].mxu1 }
 0x57e   : > { %v10254_v12 = vadd.f32 %v10253_v38, %v10252_v35  ;;  %v15953_v4 = vadd.f32 %v11307_v22, %v10251_v17 }
 0x580   : > { %v15955_v36 = vadd.f32 %v11313_v9, %v10254_v12 }
 0x5be   : > { %v10985_v44 = vpop.f32.mrb[64].mxu0 }
 0x5bf   : > { %v11225_v29 = vadd.f32 %v15856_v1, %v10985_v44  ;;  %v4573_v41 = vpop.f32.mrb[65].mxu0 }
 0x5c0   : > { %v11228_v16 = vadd.f32 %v15844_v43, %v4573_v41  ;;  %v10986_v2 = vpop.f32.mrb[66].mxu0 }
 0x5c1   : > { %v4741_v23 = vmul.f32 %v11225_v29, %v15957_v0  ;;  %v11231_v3 = vadd.f32 %v15858_v11, %v10986_v2  ;;  %v4576_v61 = vpop.f32.mrb[67].mxu0 }
 0x5c2   : > { %v4739_v40 = vmul.f32 %v11228_v16, %v15957_v0  ;;  %v11234_v22 = vadd.f32 %v15846_v6, %v4576_v61 }
 0x5c3   : > { %v15968_v37 = vadd.f32 %v15960_v34, %v4741_v23  ;;  %v4742_v1 = vmul.f32 %v11231_v3, %v15957_v0 }
 0x5c4   : > { %v15972_v48 = vadd.f32 %v15960_v34, %v4739_v40  ;;  %v4740_v43 = vmul.f32 %v11234_v22, %v15957_v0 }
 0x5c5   : > { %v4812_v49 = vsub.f32 0.0, %v15968_v37  ;;  %v15977_v9 = vadd.f32 %v15960_v34, %v4742_v1 }
 0x5c6   : > { %v4810_v11 = vsub.f32 0.0, %v15972_v48  ;;  %v15981_v17 = vadd.f32 %v15960_v34, %v4740_v43  ;;  %v10989_v6 = vpop.f32.mrb[68].mxu0 }
 0x5c7   : > { %v4846_v35 = vmul.f32 1.442695, %v4812_v49  ;;  %v4813_v38 = vsub.f32 0.0, %v15977_v9  ;;  %v11237_v12 = vadd.f32 %v15880_v10, %v10989_v6  ;;  %v4589_v53 = vpop.f32.mrb[69].mxu0 }
 0x5c8   : > { %v4842_v45 = vmul.f32 1.442695, %v4810_v11  ;;  %v4811_v44 = vsub.f32 0.0, %v15981_v17  ;;  %v11240_v29 = vadd.f32 %v15868_v28, %v4589_v53  ;;  %v10990_v41 = vpop.f32.mrb[70].mxu0 }
 0x5c9   : > { %12310 = vpow2.f32 %v4846_v35  ;;  %v4848_v16 = vmul.f32 1.442695, %v4813_v38  ;;  %v4745_v2 = vmul.f32 %v11237_v12, %v15957_v0  ;;  %v11243_v23 = vadd.f32 %v15882_v47, %v10990_v41  ;;  %v4592_v3 = vpop.f32.mrb[71].mxu0 }
 0x5ca   : > { %12312 = vpow2.f32 %v4842_v45  ;;  %v4844_v61 = vmul.f32 1.442695, %v4811_v44  ;;  %v4743_v40 = vmul.f32 %v11240_v29, %v15957_v0  ;;  %v11246_v10 = vadd.f32 %v15870_v58, %v4592_v3 }
 0x5cb   : > { %12314 = vpow2.f32 %v4848_v16  ;;  %v15992_v22 = vadd.f32 %v15960_v34, %v4745_v2  ;;  %v4746_v28 = vmul.f32 %v11243_v23, %v15957_v0 }
 0x5cc   : > { %12316 = vpow2.f32 %v4844_v61  ;;  %v15996_v1 = vadd.f32 %v15960_v34, %v4743_v40  ;;  %v4744_v43 = vmul.f32 %v11246_v10, %v15957_v0 }
 0x5cd   : > { %v4816_v47 = vsub.f32 0.0, %v15992_v22  ;;  %v16001_v49 = vadd.f32 %v15960_v34, %v4746_v28 }
 0x5ce   : > { %v4814_v11 = vsub.f32 0.0, %v15996_v1  ;;  %v16005_v58 = vadd.f32 %v15960_v34, %v4744_v43  ;;  %v10993_v6 = vpop.f32.mrb[72].mxu0 }
 0x5cf   : > { %v4854_v35 = vmul.f32 1.442695, %v4816_v47  ;;  %v4817_v38 = vsub.f32 0.0, %v16001_v49  ;;  %v11249_v12 = vadd.f32 %v15893_v8, %v10993_v6  ;;  %v4605_v53 = vpop.f32.mrb[73].mxu0 }
 0x5d0   : > { %v4850_v45 = vmul.f32 1.442695, %v4814_v11  ;;  %v4815_v44 = vsub.f32 0.0, %v16005_v58  ;;  %v11252_v29 = vadd.f32 %v15887_v21, %v4605_v53  ;;  %v10994_v41 = vpop.f32.mrb[74].mxu0 }
 0x5d1   : > { %12318 = vpow2.f32 %v4854_v35  ;;  %v4856_v16 = vmul.f32 1.442695, %v4817_v38  ;;  %v4749_v2 = vmul.f32 %v11249_v12, %v15957_v0  ;;  %v11255_v23 = vadd.f32 %v15895_v63, %v10994_v41  ;;  %v4608_v3 = vpop.f32.mrb[75].mxu0 }
 0x5d2   : > { %12320 = vpow2.f32 %v4850_v45  ;;  %v4852_v61 = vmul.f32 1.442695, %v4815_v44  ;;  %v4747_v40 = vmul.f32 %v11252_v29, %v15957_v0  ;;  %v11258_v8 = vadd.f32 %v15889_v60, %v4608_v3 }
 0x5d3   : > { %v12311_v10 = vpop.eup %12310  ;;  %12322 = vpow2.f32 %v4856_v16  ;;  %v16016_v28 = vadd.f32 %v15960_v34, %v4749_v2  ;;  %v4750_v21 = vmul.f32 %v11255_v23, %v15957_v0 }
 0x5d4   : > { %v12313_v43 = vpop.eup %12312  ;;  %v4908_v47 = vadd.f32 1.0, %v12311_v10  ;;  %12324 = vpow2.f32 %v4852_v61  ;;  %v16020_v11 = vadd.f32 %v15960_v34, %v4747_v40  ;;  %v4748_v63 = vmul.f32 %v11258_v8, %v15957_v0 }
 0x5d5   : > { %v12315_v6 = vpop.eup %12314  ;;  %v4906_v35 = vadd.f32 1.0, %v12313_v43  ;;  %v4820_v38 = vsub.f32 0.0, %v16016_v28  ;;  %v16025_v60 = vadd.f32 %v15960_v34, %v4750_v21 }
 0x5d6   : > { %v12317_v12 = vpop.eup %12316  ;;  %12326 = vrcp.f32 %v4908_v47  ;;  %v4909_v53 = vadd.f32 1.0, %v12315_v6  ;;  %v4818_v45 = vsub.f32 0.0, %v16020_v11  ;;  %v16029_v44 = vadd.f32 %v15960_v34, %v4748_v63  ;;  %v10997_v29 = vpop.f32.mrb[76].mxu0 }
 0x5d7   : > { %12328 = vrcp.f32 %v4906_v35  ;;  %v4907_v41 = vadd.f32 1.0, %v12317_v12  ;;  %v4862_v16 = vmul.f32 1.442695, %v4820_v38  ;;  %v4821_v2 = vsub.f32 0.0, %v16025_v60  ;;  %v4621_v23 = vpop.f32.mrb[77].mxu0 }
 0x5d8   : > { %12330 = vrcp.f32 %v4909_v53  ;;  %v4858_v3 = vmul.f32 1.442695, %v4818_v45  ;;  %v4819_v61 = vsub.f32 0.0, %v16029_v44  ;;  %v11261_v40 = vadd.f32 %v15905_v33, %v10997_v29  ;;  %v10998_v8 = vpop.f32.mrb[78].mxu0 }
 0x5d9   : > { %12332 = vrcp.f32 %v4907_v41  ;;  %v4864_v10 = vmul.f32 1.442695, %v4821_v2  ;;  %v11264_v21 = vadd.f32 %v15899_v13, %v4621_v23  ;;  %v11267_v43 = vadd.f32 %v15907_v7, %v10998_v8  ;;  %v4624_v47 = vpop.f32.mrb[79].mxu0 }
 0x5da   : > { %12334 = vpow2.f32 %v4862_v16  ;;  %v4860_v63 = vmul.f32 1.442695, %v4819_v61  ;;  %v4753_v6 = vmul.f32 %v11261_v40, %v15957_v0  ;;  %v11270_v35 = vadd.f32 %v15901_v50, %v4624_v47 }
 0x5db   : > { %v12319_v38 = vpop.eup %12318  ;;  %12336 = vpow2.f32 %v4858_v3  ;;  %v4751_v12 = vmul.f32 %v11264_v21, %v15957_v0  ;;  %v4754_v33 = vmul.f32 %v11267_v43, %v15957_v0 }
 0x5dc   : > { %v12321_v53 = vpop.eup %12320  ;;  %v4912_v45 = vadd.f32 1.0, %v12319_v38  ;;  %12338 = vpow2.f32 %v4864_v10  ;;  %v16041_v13 = vadd.f32 %v15960_v34, %v4753_v6  ;;  %v4752_v7 = vmul.f32 %v11270_v35, %v15957_v0 }
 0x5dd   : > { %v12323_v29 = vpop.eup %12322  ;;  %v4910_v41 = vadd.f32 1.0, %v12321_v53  ;;  %12340 = vpow2.f32 %v4860_v63  ;;  %v16045_v16 = vadd.f32 %v15960_v34, %v4751_v12  ;;  %v16048_v50 = vadd.f32 %v15960_v34, %v4754_v33 }
 0x5de   : > { %v12325_v2 = vpop.eup %12324  ;;  %12342 = vrcp.f32 %v4912_v45  ;;  %v4913_v23 = vadd.f32 1.0, %v12323_v29  ;;  %v4824_v3 = vsub.f32 0.0, %v16041_v13  ;;  %v16052_v61 = vadd.f32 %v15960_v34, %v4752_v7  ;;  %v11001_v40 = vpop.f32.mrb[80].mxu0 }
 0x5df   : > { %12344 = vrcp.f32 %v4910_v41  ;;  %v4911_v8 = vadd.f32 1.0, %v12325_v2  ;;  %v4822_v10 = vsub.f32 0.0, %v16045_v16  ;;  %v4825_v21 = vsub.f32 0.0, %v16048_v50  ;;  %v4637_v43 = vpop.f32.mrb[81].mxu0 }
 0x5e0   : > { %v12327_v47 = vpop.eup %12326  ;;  %12346 = vrcp.f32 %v4913_v23  ;;  %v4870_v63 = vmul.f32 1.442695, %v4824_v3  ;;  %v4823_v6 = vsub.f32 0.0, %v16052_v61  ;;  %v11273_v35 = vadd.f32 %v15917_v42, %v11001_v40  ;;  %v11002_v38 = vpop.f32.mrb[82].mxu0 }
 0x5e1   : > { %v12329_v12 = vpop.eup %12328  ;;  %12348 = vrcp.f32 %v4911_v8  ;;  %v4866_v33 = vmul.f32 1.442695, %v4822_v10  ;;  %v4872_v53 = vmul.f32 1.442695, %v4825_v21  ;;  %v4640_v45 = vpop.f32.mrb[83].mxu0  ;;  %v4972_v26 = vmul.f32 %v12327_v47, %v15968_v37  ;;  %v19037_v21 = vld [vmem:[#allocation43_spill] sm:$0xff] }
 0x5e2   : > { %v12331_v7 = vpop.eup %12330  ;;  %12350 = vpow2.f32 %v4870_v63  ;;  %v4868_v29 = vmul.f32 1.442695, %v4823_v6  ;;  %v4757_v41 = vmul.f32 %v11273_v35, %v15957_v0  ;;  %v11276_v3 = vadd.f32 %v15911_v14, %v4637_v43 }
 0x5e3   : > { %v12333_v2 = vpop.eup %12332  ;;  %v4973_v23 = vmul.f32 %v12331_v7, %v15977_v9  ;;  %12352 = vpow2.f32 %v4866_v33  ;;  %v11279_v8 = vadd.f32 %v15919_v5, %v11002_v38  ;;  %v11282_v43 = vadd.f32 %v15913_v52, %v4640_v45  ;;  %v19039_v7 = vld [vmem:[#allocation42_spill] sm:$0xff] }
 0x5e4   : > { %v12335_v42 = vpop.eup %12334  ;;  %12354 = vpow2.f32 %v4872_v53  ;;  %v16063_v40 = vadd.f32 %v15960_v34, %v4757_v41  ;;  %v4755_v37 = vmul.f32 %v11276_v3, %v15957_v0  ;;  %v16074_v5 = vadd.f32 %v4972_v26, %v19039_v7 }
 0x5e5   : > { %v12337_v10 = vpop.eup %12336  ;;  %v16067_v63 = vadd.f32 %v4973_v23, %v19037_v21  ;;  %v4916_v6 = vadd.f32 1.0, %v12335_v42  ;;  %12356 = vpow2.f32 %v4868_v29  ;;  %v4758_v14 = vmul.f32 %v11279_v8, %v15957_v0 }
 0x5e6   : > { %v12339_v47 = vpop.eup %12338  ;;  %v4914_v9 = vadd.f32 1.0, %v12337_v10  ;;  %v4828_v35 = vsub.f32 0.0, %v16063_v40  ;;  %v11005_v33 = vpop.f32.mrb[84].mxu0  ;;  %19040 = vst [vmem:[#allocation124_spill] sm:$0xff] %v16074_v5  ;;  %v16077_v38 = vadd.f32 %v15960_v34, %v4755_v37  ;;  %v16080_v23 = vmul.f32 %v12329_v12, %v15972_v48 }
 0x5e7   : > { %19038 = vst [vmem:[#allocation120_spill] sm:$0xff] %v16067_v63  ;;  %v12341_v53 = vpop.eup %12340  ;;  %v4653_v41 = vpop.f32.mrb[85].mxu0  ;;  %v16083_v3 = vmul.f32 %v12333_v2, %v15981_v17  ;;  %v16086_v8 = vadd.f32 %v15960_v34, %v4758_v14  ;;  %12358 = vrcp.f32 %v4916_v6  ;;  %v4756_v21 = vmul.f32 %v11282_v43, %v15957_v0 }
 0x5e8   : > { %v12343_v29 = vpop.eup %12342  ;;  %v4878_v42 = vmul.f32 1.442695, %v4828_v35  ;;  %v11006_v52 = vpop.f32.mrb[86].mxu0  ;;  %v4826_v10 = vsub.f32 0.0, %v16077_v38  ;;  %12360 = vrcp.f32 %v4914_v9  ;;  %v4917_v12 = vadd.f32 1.0, %v12339_v47 }
 0x5e9   : > { %v12345_v45 = vpop.eup %12344  ;;  %v4656_v37 = vpop.f32.mrb[87].mxu0  ;;  %v4829_v17 = vsub.f32 0.0, %v16086_v8  ;;  %v11285_v2 = vadd.f32 %v15929_v31, %v11005_v33  ;;  %v4915_v14 = vadd.f32 1.0, %v12341_v53  ;;  %v16095_v30 = vadd.f32 %v15960_v34, %v4756_v21 }
 0x5ea   : > { %v12347_v48 = vpop.eup %12346  ;;  %12362 = vpow2.f32 %v4878_v42  ;;  %v4874_v7 = vmul.f32 1.442695, %v4826_v10  ;;  %v16098_v26 = vmul.f32 %v12343_v29, %v15992_v22  ;;  %v11288_v47 = vadd.f32 %v15923_v59, %v4653_v41 }
 0x5eb   : > { %v12349_v35 = vpop.eup %12348  ;;  %v4880_v43 = vmul.f32 1.442695, %v4829_v17  ;;  %v4761_v54 = vmul.f32 %v11285_v2, %v15957_v0  ;;  %v4827_v31 = vsub.f32 0.0, %v16095_v30  ;;  %v11291_v33 = vadd.f32 %v15931_v15, %v11006_v52 }
 0x5ec   : > { %v12351_v6 = vpop.eup %12350  ;;  %12364 = vpow2.f32 %v4874_v7  ;;  %v4759_v22 = vmul.f32 %v11288_v47, %v15957_v0  ;;  %v16109_v17 = vmul.f32 %v12345_v45, %v15996_v1  ;;  %v16113_v15 = vmul.f32 %v12347_v48, %v16001_v49 }
 0x5ed   : > { %v12353_v9 = vpop.eup %12352  ;;  %v4920_v25 = vadd.f32 1.0, %v12351_v6  ;;  %12366 = vpow2.f32 %v4880_v43  ;;  %v16105_v10 = vadd.f32 %v15960_v34, %v4761_v54  ;;  %v4876_v59 = vmul.f32 1.442695, %v4827_v31 }
 0x5ee   : > { %v12355_v53 = vpop.eup %12354  ;;  %v4918_v42 = vadd.f32 1.0, %v12353_v9  ;;  %v11009_v29 = vpop.f32.mrb[88].mxu0  ;;  %12368 = vrcp.f32 %v4917_v12  ;;  %v4762_v41 = vmul.f32 %v11291_v33, %v15957_v0  ;;  %v16117_v54 = vadd.f32 %v15960_v34, %v4759_v22 }
 0x5ef   : > { %v12357_v21 = vpop.eup %12356  ;;  %v4669_v2 = vpop.f32.mrb[89].mxu0  ;;  %12370 = vrcp.f32 %v4915_v14  ;;  %v4832_v52 = vsub.f32 0.0, %v16105_v10  ;;  %v4921_v6 = vadd.f32 1.0, %v12355_v53  ;;  %v11294_v45 = vadd.f32 %v15925_v62, %v4656_v37  ;;  %v19041_v53 = vld [vmem:[#allocation39_spill] sm:$0xff] }
 0x5f0   : > { %v11010_v7 = vpop.f32.mrb[90].mxu0  ;;  %12372 = vrcp.f32 %v4920_v25  ;;  %v16120_v1 = vadd.f32 %v15960_v34, %v4762_v41  ;;  %v16124_v43 = vmul.f32 %v12349_v35, %v16005_v58  ;;  %v4830_v48 = vsub.f32 0.0, %v16117_v54  ;;  %v19043_v58 = vld [vmem:[#allocation38_spill] sm:$0xff] }
 0x5f1   : > { %v4672_v12 = vpop.f32.mrb[91].mxu0  ;;  %12374 = vrcp.f32 %v4918_v42  ;;  %v4886_v49 = vmul.f32 1.442695, %v4832_v52  ;;  %v12359_v14 = vpop.eup %12358  ;;  %v4919_v47 = vadd.f32 1.0, %v12357_v21  ;;  %v4760_v25 = vmul.f32 %v11294_v45, %v15957_v0 }
 0x5f2   : > { %12376 = vpow2.f32 %v4876_v59  ;;  %v4833_v9 = vsub.f32 0.0, %v16120_v1  ;;  %v12361_v31 = vpop.eup %12360  ;;  %v4882_v33 = vmul.f32 1.442695, %v4830_v48  ;;  %v16131_v62 = vadd.f32 %v16080_v23, %v19041_v53 }
 0x5f3   : > { %12378 = vpow2.f32 %v4886_v49  ;;  %v16135_v37 = vadd.f32 %v16083_v3, %v19043_v58  ;;  %v16138_v22 = vadd.f32 %v15960_v34, %v4760_v25  ;;  %v11297_v21 = vadd.f32 %v15941_v55, %v11009_v29 }
 0x5f4   : > { %19042 = vst [vmem:[#allocation126_spill] sm:$0xff] %v16131_v62  ;;  %v12363_v35 = vpop.eup %12362  ;;  %12380 = vrcp.f32 %v4921_v6  ;;  %v4888_v42 = vmul.f32 1.442695, %v4833_v9  ;;  %v11300_v23 = vadd.f32 %v15935_v57, %v4669_v2  ;;  %v11303_v49 = vadd.f32 %v15943_v24, %v11010_v7 }
 0x5f5   : > { %19044 = vst [vmem:[#allocation134_spill] sm:$0xff] %v16135_v37  ;;  %v4924_v59 = vadd.f32 1.0, %v12363_v35  ;;  %12382 = vpow2.f32 %v4882_v33  ;;  %v5179_v41 = vpack.c.bf16 %v16135_v37, %v16131_v62  ;;  %v4831_v3 = vsub.f32 0.0, %v16138_v22 }
 0x5f6   : > { %v11013_v52 = vpop.f32.mrb[92].mxu0  ;;  %v12365_v45 = vpop.eup %12364  ;;  %12384 = vrcp.f32 %v4919_v47  ;;  %v4765_v6 = vmul.f32 %v11297_v21, %v15957_v0  ;;  %v4763_v55 = vmul.f32 %v11300_v23, %v15957_v0  ;;  %v11306_v29 = vadd.f32 %v15937_v39, %v4672_v12 }
 0x5f7   : > { %v4685_v48 = vpop.f32.mrb[93].mxu0  ;;  %v12367_v9 = vpop.eup %12366  ;;  %v4922_v25 = vadd.f32 1.0, %v12365_v45  ;;  %12386 = vpow2.f32 %v4888_v42  ;;  %11031 = vmatprep.mubr.bf16.mxu1 %v5179_v41  ;;  %v4884_v53 = vmul.f32 1.442695, %v4831_v3  ;;  %v19045_v47 = vpack.c.bf16 %v16067_v63, %v16074_v5  ;;  %v19114_v63 = vld [vmem:[#allocation103_spill] sm:$0xff] }
 0x5f8   : > { %v11014_v33 = vpop.f32.mrb[94].mxu0  ;;  %v12369_v57 = vpop.eup %12368  ;;  %v4925_v2 = vadd.f32 1.0, %v12367_v9  ;;  %v16153_v58 = vadd.f32 %v15960_v34, %v4765_v6  ;;  %v4766_v24 = vmul.f32 %v11303_v49, %v15957_v0  ;;  %v16157_v42 = vmul.f32 %v12359_v14, %v16016_v28 }
 0x5f9   : > { %11032 = vmatmul.mubr.bf16.vlgmr.msra.gmra.mrb[160].mxu1 %v19045_v47  ;;  %v4688_v7 = vpop.f32.mrb[95].mxu0  ;;  %v12371_v35 = vpop.eup %12370  ;;  %12388 = vrcp.f32 %v4924_v59  ;;  %v16160_v39 = vadd.f32 %v15960_v34, %v4763_v55  ;;  %v4764_v12 = vmul.f32 %v11306_v29, %v15957_v0  ;;  %v4978_v41 = vmul.f32 %v12361_v31, %v16020_v11  ;;  %v19046_v31 = vld [vmem:[#allocation47_spill] sm:$0xff] }
 0x5fa   : > { %v16163_v21 = vpop.eup %12372  ;;  %12390 = vrcp.f32 %v4922_v25  ;;  %v4836_v23 = vsub.f32 0.0, %v16153_v58  ;;  %v16168_v45 = vadd.f32 %v15960_v34, %v4766_v24  ;;  %v16171_v28 = vmul.f32 %v12369_v57, %v16025_v60  ;;  %v19048_v57 = vld [vmem:[#allocation46_spill] sm:$0xff] }
 0x5fb   : > { %v12375_v3 = vpop.eup %12374  ;;  %12392 = vpow2.f32 %v4884_v53  ;;  %v4834_v14 = vsub.f32 0.0, %v16160_v39  ;;  %v16175_v59 = vadd.f32 %v15960_v34, %v4764_v12  ;;  %v16180_v9 = vadd.f32 %v16109_v17, %v19046_v31  ;;  %v19052_v31 = vld [vmem:[#allocation51_spill] sm:$0xff] }
 0x5fc   : > { %v12377_v6 = vpop.eup %12376  ;;  %12394 = vrcp.f32 %v4925_v2  ;;  %v4894_v49 = vmul.f32 1.442695, %v4836_v23  ;;  %v4837_v11 = vsub.f32 0.0, %v16168_v45  ;;  %v16185_v53 = vadd.f32 %v16124_v43, %v19048_v57 }
 0x5fd   : > { %19047 = vst [vmem:[#allocation135_spill] sm:$0xff] %v16180_v9  ;;  %v12379_v25 = vpop.eup %12378  ;;  %v4923_v55 = vadd.f32 1.0, %v12377_v6  ;;  %v4890_v29 = vmul.f32 1.442695, %v4834_v14  ;;  %v4835_v60 = vsub.f32 0.0, %v16175_v59  ;;  %v4979_v24 = vmul.f32 %v12371_v35, %v16029_v44  ;;  %v19050_v6 = vld [vmem:[#allocation50_spill] sm:$0xff] }
 0x5fe   : > { %19049 = vst [vmem:[#allocation104_spill] sm:$0xff] %v16185_v53  ;;  %v12381_v47 = vpop.eup %12380  ;;  %v4982_v2 = vmul.f32 %v12375_v3, %v16045_v16  ;;  %v4928_v12 = vadd.f32 1.0, %v12379_v25  ;;  %12396 = vpow2.f32 %v4894_v49  ;;  %v5181_v17 = vpack.c.bf16 %v16185_v53, %v16180_v9 }
 0x5ff   : > { %v12383_v23 = vpop.eup %12382  ;;  %12398 = vrcp.f32 %v4923_v55  ;;  %v16193_v14 = vadd.f32 %v16098_v26, %v19050_v6  ;;  %v16197_v43 = vadd.f32 %v16113_v15, %v19052_v31  ;;  %v4896_v44 = vmul.f32 1.442695, %v4837_v11  ;;  %v19056_v6 = vld [vmem:[#allocation54_spill] sm:$0xff] }
 0x600   : > { %v12385_v57 = vpop.eup %12384  ;;  %v4926_v37 = vadd.f32 1.0, %v12383_v23  ;;  %v11309_v16 = vadd.f32 %v15953_v4, %v11013_v52  ;;  %v11312_v35 = vadd.f32 %v15947_v18, %v4685_v48  ;;  %12400 = vpow2.f32 %v4890_v29  ;;  %11035 = vmatprep.mubr.bf16.mxu1 %v5181_v17 }
 0x601   : > { %19051 = vst [vmem:[#allocation107_spill] sm:$0xff] %v16193_v14  ;;  %19053 = vst [vmem:[#allocation110_spill] sm:$0xff] %v16197_v43  ;;  %v12387_v3 = vpop.eup %12386  ;;  %v4892_v49 = vmul.f32 1.442695, %v4835_v60  ;;  %v5182_v25 = vpack.c.bf16 %v16197_v43, %v16193_v14  ;;  %v11315_v26 = vadd.f32 %v15955_v36, %v11014_v33  ;;  %v4985_v55 = vmul.f32 %v12381_v47, %v16048_v50 }
 0x602   : > { %12402 = vrcp.f32 %v4928_v12  ;;  %v4769_v15 = vmul.f32 %v11309_v16, %v15957_v0  ;;  %v4767_v11 = vmul.f32 %v11312_v35, %v15957_v0  ;;  %v4983_v18 = vmul.f32 %v12385_v57, %v16052_v61  ;;  %v19058_v16 = vld [vmem:[#allocation58_spill] sm:$0xff] }
 0x603   : > { %v16207_v23 = vpop.eup %12388  ;;  %12404 = vrcp.f32 %v4926_v37  ;;  %11036 = vmatmul.mubr.bf16.gmra.mrb[164].mxu1 %v5182_v25  ;;  %v4770_v4 = vmul.f32 %v11315_v26, %v15957_v0  ;;  %v11318_v52 = vadd.f32 %v15949_v46, %v4688_v7  ;;  %v4929_v29 = vadd.f32 1.0, %v12387_v3  ;;  %v19054_v37 = vld [vmem:[#allocation55_spill] sm:$0xff] }
 0x604   : > { %v12391_v48 = vpop.eup %12390  ;;  %12406 = vpow2.f32 %v4896_v44  ;;  %v16213_v36 = vadd.f32 %v15960_v34, %v4769_v15  ;;  %v16216_v50 = vadd.f32 %v15960_v34, %v4767_v11  ;;  %v16223_v47 = vadd.f32 %v4978_v41, %v19054_v37  ;;  %v19060_v41 = vld [vmem:[#allocation59_spill] sm:$0xff] }
 0x605   : > { %v12393_v33 = vpop.eup %12392  ;;  %12408 = vpow2.f32 %v4892_v49  ;;  %v16219_v60 = vadd.f32 %v15960_v34, %v4770_v4  ;;  %v4768_v61 = vmul.f32 %v11318_v52, %v15957_v0  ;;  %v16228_v31 = vadd.f32 %v4979_v24, %v19056_v6  ;;  %v19062_v4 = vld [vmem:[#allocation63_spill] sm:$0xff] }
 0x606   : > { %19055 = vst [vmem:[#allocation113_spill] sm:$0xff] %v16223_v47  ;;  %v12395_v46 = vpop.eup %12394  ;;  %v4927_v7 = vadd.f32 1.0, %v12393_v33  ;;  %v4840_v12 = vsub.f32 0.0, %v16213_v36  ;;  %v4838_v17 = vsub.f32 0.0, %v16216_v50  ;;  %v16236_v0 = vadd.f32 %v16157_v42, %v19058_v16  ;;  %v19064_v33 = vld [vmem:[#allocation62_spill] sm:$0xff] }
 0x607   : > { %19057 = vst [vmem:[#allocation116_spill] sm:$0xff] %v16228_v31  ;;  %v4841_v57 = vsub.f32 0.0, %v16219_v60  ;;  %v16232_v44 = vadd.f32 %v15960_v34, %v4768_v61  ;;  %v16240_v35 = vadd.f32 %v16171_v28, %v19060_v41  ;;  %v5183_v24 = vpack.c.bf16 %v16228_v31, %v16223_v47  ;;  %v19072_v41 = vld [vmem:[#allocation67_spill] sm:$0xff] }
 0x608   : > { %19059 = vst [vmem:[#allocation122_spill] sm:$0xff] %v16236_v0  ;;  %v12397_v3 = vpop.eup %12396  ;;  %12410 = vrcp.f32 %v4927_v7  ;;  %v4902_v49 = vmul.f32 1.442695, %v4840_v12  ;;  %v4898_v25 = vmul.f32 1.442695, %v4838_v17  ;;  %v4986_v11 = vmul.f32 %v12391_v48, %v16077_v38 }
 0x609   : > { %19061 = vst [vmem:[#allocation127_spill] sm:$0xff] %v16240_v35  ;;  %v12399_v26 = vpop.eup %12398  ;;  %12412 = vrcp.f32 %v4929_v29  ;;  %v4904_v15 = vmul.f32 1.442695, %v4841_v57  ;;  %v4839_v34 = vsub.f32 0.0, %v16232_v44  ;;  %v5184_v42 = vpack.c.bf16 %v16240_v35, %v16236_v0  ;;  %11039 = vmatprep.mubr.bf16.mxu1 %v5183_v24 }
 0x60a   : > { %v4987_v28 = vmul.f32 %v12399_v26, %v16095_v30  ;;  %v16250_v52 = vadd.f32 %v4982_v2, %v19062_v4  ;;  %v16253_v61 = vadd.f32 %v4983_v18, %v19064_v33  ;;  %v12401_v37 = vpop.eup %12400  ;;  %v4984_v29 = vmul.f32 %v16163_v21, %v16041_v13  ;;  %v19066_v2 = vld [vmem:[#allocation66_spill] sm:$0xff]  ;;  %v19070_v13 = vld [vmem:[#allocation71_spill] sm:$0xff] }
 0x60b   : > { %12414 = vpow2.f32 %v4902_v49  ;;  %v4900_v7 = vmul.f32 1.442695, %v4839_v34  ;;  %11040 = vmatmul.mubr.bf16.gmra.mrb[168].mxu1 %v5184_v42  ;;  %v4930_v17 = vadd.f32 1.0, %v12401_v37  ;;  %v16260_v48 = vadd.f32 %v4985_v55, %v19066_v2  ;;  %v19068_v18 = vld [vmem:[#allocation70_spill] sm:$0xff] }
 0x60c   : > { %19063 = vst [vmem:[#allocation130_spill] sm:$0xff] %v16250_v52  ;;  %19065 = vst [vmem:[#allocation133_spill] sm:$0xff] %v16253_v61  ;;  %v12403_v12 = vpop.eup %12402  ;;  %12416 = vpow2.f32 %v4898_v25  ;;  %v5185_v30 = vpack.c.bf16 %v16253_v61, %v16250_v52  ;;  %v16263_v6 = vadd.f32 %v4987_v28, %v19068_v18  ;;  %v16266_v21 = vadd.f32 %v4986_v11, %v19070_v13 }
 0x60d   : > { %v12405_v38 = vpop.eup %12404  ;;  %12418 = vpow2.f32 %v4904_v15  ;;  %19067 = vst [vmem:[#allocation144_spill] sm:$0xff] %v16260_v48  ;;  %v16269_v49 = vadd.f32 %v4984_v29, %v19072_v41  ;;  %v4989_v26 = vmul.f32 %v12395_v46, %v16086_v8  ;;  %v4932_v11 = vadd.f32 1.0, %v12397_v3  ;;  %v19074_v29 = vld [vmem:[#allocation74_spill] sm:$0xff] }
 0x60e   : > { %19069 = vst [vmem:[#allocation117_spill] sm:$0xff] %v16263_v6  ;;  %v12407_v57 = vpop.eup %12406  ;;  %12420 = vrcp.f32 %v4930_v17  ;;  %11043 = vmatprep.mubr.bf16.mxu1 %v5185_v30  ;;  %19071 = vst [vmem:[#allocation118_spill] sm:$0xff] %v16266_v21  ;;  %v5187_v55 = vpack.c.bf16 %v16263_v6, %v16266_v21  ;;  %v4990_v42 = vmul.f32 %v12405_v38, %v16117_v54  ;;  %v19076_v46 = vld [vmem:[#allocation78_spill] sm:$0xff]  ;;  %v19078_v54 = vld [vmem:[#allocation79_spill] sm:$0xff] }
 0x60f   : > { %v12409_v16 = vpop.eup %12408  ;;  %12422 = vpow2.f32 %v4900_v7  ;;  %19073 = vst [vmem:[#allocation43_spill] sm:$0xff] %v16269_v49  ;;  %v4933_v25 = vadd.f32 1.0, %v12407_v57  ;;  %v5186_v15 = vpack.c.bf16 %v16260_v48, %v16269_v49  ;;  %v4988_v4 = vmul.f32 %v16207_v23, %v16063_v40  ;;  %v19080_v40 = vld [vmem:[#allocation75_spill] sm:$0xff]  ;;  %v11882_v48 = vld [vmem:[#allocation15 + $0x408] sm:$0xff]  }
 0x610   : > { %v4931_v24 = vadd.f32 1.0, %v12409_v16  ;;  %v16281_v8 = vadd.f32 %v4989_v26, %v19074_v29  ;;  %v16287_v3 = vadd.f32 %v4990_v42, %v19078_v54 }
 0x611   : > { %v16290_v23 = vadd.f32 %v4988_v4, %v19080_v40  ;;  %v19086_v4 = vld [vmem:[#allocation86_spill] sm:$0xff] }
 0x612   : > { %v12411_v34 = vpop.eup %12410  ;;  %12424 = vrcp.f32 %v4931_v24  ;;  %19075 = vst [vmem:[#allocation42_spill] sm:$0xff] %v16281_v8  ;;  %19079 = vst [vmem:[#allocation38_spill] sm:$0xff] %v16287_v3  ;;  %v4992_v24 = vmul.f32 %v12403_v12, %v16105_v10  ;;  %v19088_v10 = vld [vmem:[#allocation87_spill] sm:$0xff] }
 0x613   : > { %v12413_v28 = vpop.eup %12412  ;;  %v4991_v33 = vmul.f32 %v12411_v34, %v16138_v22  ;;  %11044 = vmatmul.mubr.bf16.gmra.mrb[172].mxu1 %v5186_v15  ;;  %12426 = vrcp.f32 %v4933_v25  ;;  %19081 = vst [vmem:[#allocation47_spill] sm:$0xff] %v16290_v23  ;;  %v5188_v16 = vpack.c.bf16 %v16281_v8, %v16290_v23  ;;  %v19082_v34 = vld [vmem:[#allocation82_spill] sm:$0xff] }
 0x614   : > { %11047 = vmatprep.mubr.bf16.mxu1 %v5187_v55  ;;  %12428 = vrcp.f32 %v4932_v11  ;;  %v4993_v13 = vmul.f32 %v12413_v28, %v16120_v1  ;;  %v19084_v11 = vld [vmem:[#allocation83_spill] sm:$0xff] }
 0x615   : > { %v12415_v37 = vpop.eup %12414  ;;  %v16284_v7 = vadd.f32 %v4991_v33, %v19076_v46  ;;  %v16304_v28 = vadd.f32 %v4992_v24, %v19084_v11  ;;  %v11843_v11 = vld [vmem:[#allocation15 + $0x300] sm:$0xff]  }
 0x616   : > { %v12417_v17 = vpop.eup %12416  ;;  %v4936_v41 = vadd.f32 1.0, %v12415_v37  ;;  %v16301_v42 = vadd.f32 %v4993_v13, %v19082_v34 }
 0x617   : > { %19077 = vst [vmem:[#allocation39_spill] sm:$0xff] %v16284_v7  ;;  %v12419_v30 = vpop.eup %12418  ;;  %v4934_v38 = vadd.f32 1.0, %v12417_v17  ;;  %v5189_v18 = vpack.c.bf16 %v16284_v7, %v16287_v3  ;;  %19085 = vst [vmem:[#allocation50_spill] sm:$0xff] %v16304_v28 }
 0x618   : > { %v12421_v22 = vpop.eup %12420  ;;  %v4937_v2 = vadd.f32 1.0, %v12419_v30  ;;  %19083 = vst [vmem:[#allocation46_spill] sm:$0xff] %v16301_v42 }
 0x619   : > { %v12423_v57 = vpop.eup %12422  ;;  %12430 = vrcp.f32 %v4934_v38  ;;  %v4994_v55 = vmul.f32 %v12421_v22, %v16160_v39  ;;  %v19090_v38 = vld [vmem:[#allocation91_spill] sm:$0xff] }
 0x61a   : > { %v4935_v25 = vadd.f32 1.0, %v12423_v57  ;;  %12432 = vrcp.f32 %v4937_v2  ;;  %v19092_v2 = vld [vmem:[#allocation90_spill] sm:$0xff] }
 0x61b   : > { %11048 = vmatmul.mubr.bf16.gmra.mrb[176].mxu1 %v5188_v16  ;;  %v16307_v33 = vadd.f32 %v4994_v55, %v19086_v4  ;;  %v19094_v16 = vld [vmem:[#allocation94_spill] sm:$0xff]  ;;  %v19098_v55 = vld [vmem:[#allocation99_spill] sm:$0xff] }
 0x61c   : > { %v12425_v26 = vpop.eup %12424  ;;  %12434 = vrcp.f32 %v4935_v25  ;;  %11051 = vmatprep.mubr.bf16.mxu1 %v5189_v18  ;;  %v19096_v25 = vld [vmem:[#allocation95_spill] sm:$0xff]  ;;  %v11845_v4 = vld [vmem:[#allocation15 + $0x308] sm:$0xff]  }
 0x61d   : > { %v4995_v15 = vmul.f32 %v12425_v26, %v16175_v59  ;;  %v12427_v1 = vpop.eup %12426  ;;  %12436 = vrcp.f32 %v4936_v41  ;;  %19087 = vst [vmem:[#allocation51_spill] sm:$0xff] %v16307_v33  ;;  %v5190_v59 = vpack.c.bf16 %v16301_v42, %v16304_v28 }
 0x61e   : > { %v12429_v12 = vpop.eup %12428  ;;  %v4997_v37 = vmul.f32 %v12427_v1, %v16168_v45  ;;  %v11842_v1 = vld [vmem:[#allocation15 + $0x340] sm:$0xff]  }
 0x61f   : > { %v16310_v39 = vadd.f32 %v4995_v15, %v19088_v10  ;;  %v4996_v17 = vmul.f32 %v12429_v12, %v16153_v58  ;;  %10303 = vmatprep.subr.bf16.mxu1 %v11842_v1  ;;  %v11847_v10 = vld [vmem:[#allocation15 + $0x350] sm:$0xff]  }
 0x620   : > { %v16320_v40 = vadd.f32 %v4997_v37, %v19090_v38  ;;  %10304 = vmatpush3.bf16.msra.mxu1 %v11843_v11  ;;  %v11848_v12 = vld [vmem:[#allocation15 + $0x310] sm:$0xff]   ;;  %v11849_v37 = vld [vmem:[#allocation15 + $0x358] sm:$0xff]   ;;  %v11854_v38 = vld [vmem:[#allocation15 + $0x368] sm:$0xff]  }
 0x621   : > { %19089 = vst [vmem:[#allocation55_spill] sm:$0xff] %v16310_v39  ;;  %v5191_v29 = vpack.c.bf16 %v16310_v39, %v16307_v33  ;;  %v16324_v18 = vadd.f32 %v4996_v17, %v19092_v2  ;;  %v11852_v17 = vld [vmem:[#allocation15 + $0x360] sm:$0xff]   ;;  %v11857_v2 = vld [vmem:[#allocation15 + $0x370] sm:$0xff]  }
 0x622   : > { %19091 = vst [vmem:[#allocation54_spill] sm:$0xff] %v16320_v40 }
 0x623   : > { %v12431_v46 = vpop.eup %12430  ;;  %11052 = vmatmul.mubr.bf16.gmra.mrb[180].mxu1 %v5190_v59  ;;  %19093 = vst [vmem:[#allocation58_spill] sm:$0xff] %v16324_v18  ;;  %v5192_v58 = vpack.c.bf16 %v16320_v40, %v16324_v18  ;;  %v11850_v59 = vld [vmem:[#allocation15 + $0x318] sm:$0xff]  }
 0x624   : > { %11055 = vmatprep.mubr.bf16.mxu1 %v5191_v29  ;;  %v12433_v54 = vpop.eup %12432  ;;  %v4998_v30 = vmul.f32 %v12431_v46, %v16216_v50  ;;  %v11840_v29 = vld [vmem:[#allocation15 + $0x390] sm:$0xff]   ;;  %v11841_v46 = vld [vmem:[#allocation15 + $0x398] sm:$0xff]  }
 0x625   : > { %v5001_v13 = vmul.f32 %v12433_v54, %v16219_v60  ;;  %v19100_v60 = vld [vmem:[#allocation98_spill] sm:$0xff]  ;;  %11067 = vmatprep.subr.bf16.mxu0 %v11840_v29  ;;  %v11853_v54 = vld [vmem:[#allocation15 + $0x320] sm:$0xff]  }
 0x626   : > { %v12435_v22 = vpop.eup %12434  ;;  %v16330_v41 = vadd.f32 %v4998_v30, %v19094_v16  ;;  %11068 = vmatpush3.bf16.msra.mxu0 %v11840_v29  ;;  %v11846_v30 = vld [vmem:[#allocation15 + $0x3a0] sm:$0xff]   ;;  %v11860_v16 = vld [vmem:[#allocation15 + $0x338] sm:$0xff]  }
 0x627   : > { %v4999_v45 = vmul.f32 %v12435_v22, %v16232_v44  ;;  %v12437_v57 = vpop.eup %12436  ;;  %v16339_v26 = vadd.f32 %v5001_v13, %v19098_v55  ;;  %11069 = vmatprep.subr.bf16.mxu0 %v11841_v46  ;;  %v11855_v22 = vld [vmem:[#allocation15 + $0x328] sm:$0xff]   ;;  %v11856_v13 = vld [vmem:[#allocation15 + $0x3b0] sm:$0xff]  }
 0x628   : > { %19095 = vst [vmem:[#allocation59_spill] sm:$0xff] %v16330_v41  ;;  %v5000_v24 = vmul.f32 %v12437_v57, %v16213_v36  ;;  %v11844_v36 = vld [vmem:[#allocation15 + $0x348] sm:$0xff]   ;;  %v11858_v57 = vld [vmem:[#allocation15 + $0x330] sm:$0xff]  }
 0x629   : > { %v16333_v50 = vadd.f32 %v4999_v45, %v19096_v25  ;;  %19099 = vst [vmem:[#allocation62_spill] sm:$0xff] %v16339_v26  ;;  %10305 = vmatprep.subr.bf16.mxu1 %v11844_v36  ;;  %v11851_v45 = vld [vmem:[#allocation15 + $0x3a8] sm:$0xff]   ;;  %v11861_v25 = vld [vmem:[#allocation15 + $0x3b8] sm:$0xff]  }
 0x62a   : > { %v16342_v15 = vadd.f32 %v5000_v24, %v19100_v60  ;;  %10306 = vmatpush3.bf16.msra.mxu1 %v11845_v4  ;;  %11070 = vmatpush3.bf16.msra.mxu0 %v11841_v46  ;;  %v11862_v24 = vld [vmem:[#allocation15 + $0x280] sm:$0xff]   ;;  %v16348_v60 = vld [vmem:[#allocation14 + $0x1] ss:$0 sm:$0xff] }
 0x62b   : > { %19097 = vst [vmem:[#allocation63_spill] sm:$0xff] %v16333_v50  ;;  %11056 = vmatmul.mubr.bf16.gmra.mrb[184].mxu1 %v5192_v58  ;;  %v5193_v44 = vpack.c.bf16 %v16333_v50, %v16330_v41  ;;  %10307 = vmatprep.subr.bf16.mxu1 %v11847_v10  ;;  %v11859_v58 = vld [vmem:[#allocation15 + $0x378] sm:$0xff]  }
 0x62c   : > { %19101 = vst [vmem:[#allocation66_spill] sm:$0xff] %v16342_v15  ;;  %v5194_v34 = vpack.c.bf16 %v16339_v26, %v16342_v15  ;;  %11071 = vmatprep.subr.bf16.mxu0 %v11846_v30 }
 0x62d   : > { %11059 = vmatprep.mubr.bf16.mxu1 %v5193_v44  ;;  %v16346_v44 = vld [vmem:[#allocation12 + $0x1] ss:$0 sm:$0xff] }
 0x62e   : > { %10308 = vmatpush3.bf16.msra.mxu1 %v11848_v12  ;;  %11072 = vmatpush3.bf16.msra.mxu0 %v11846_v30 }
 0x62f   : > { %10309 = vmatprep.subr.bf16.mxu1 %v11849_v37  ;;  %11073 = vmatprep.subr.bf16.mxu0 %v11851_v45 }
 0x632   : > { %10310 = vmatpush3.bf16.msra.mxu1 %v11850_v59  ;;  %11074 = vmatpush3.bf16.msra.mxu0 %v11851_v45 }
 0x633   : > { %11060 = vmatmul.mubr.bf16.gmra.mrb[188].mxu1 %v5194_v34  ;;  %10311 = vmatprep.subr.bf16.mxu1 %v11852_v17 }
 0x634   : > { %11075 = vmatprep.subr.bf16.mxu0 %v11856_v13 }
 0x636   : > { %10312 = vmatpush3.bf16.msra.mxu1 %v11853_v54  ;;  %11076 = vmatpush3.bf16.msra.mxu0 %v11856_v13 }
 0x637   : > { %10313 = vmatprep.subr.bf16.mxu1 %v11854_v38  ;;  %11077 = vmatprep.subr.bf16.mxu0 %v11861_v25 }
 0x63a   : > { %10314 = vmatpush3.bf16.msra.mxu1 %v11855_v22  ;;  %11078 = vmatpush3.bf16.msra.mxu0 %v11861_v25 }
 0x63b   : > { %10315 = vmatprep.subr.bf16.mxu1 %v11857_v2  ;;  %10439 = vmatprep.subr.bf16.mxu0 %v11862_v24 }
 0x63e   : > { %10316 = vmatpush3.bf16.msra.mxu1 %v11858_v57 }
 0x63f   : > { %10317 = vmatprep.subr.bf16.mxu1 %v11859_v58 }
 0x642   : > { %10318 = vmatpush3.bf16.msra.mxu1 %v11860_v16 }
 0x6cc   : > { %v11033_v55 = vpop.f32.mrb[160].mxu1 }
 0x6cd   : > { %v5431_v34 = vmul.f32 %v11033_v55, %v16346_v44  ;;  %v5294_v1 = vpop.f32.mrb[161].mxu1 }
 0x6ce   : > { %v5429_v11 = vmul.f32 %v16346_v44, %v5294_v1  ;;  %v11034_v36 = vpop.f32.mrb[162].mxu1 }
 0x6cf   : > { %v16353_v4 = vadd.f32 %v16348_v60, %v5431_v34  ;;  %v5432_v10 = vmul.f32 %v11034_v36, %v16346_v44  ;;  %v5297_v12 = vpop.f32.mrb[163].mxu1 }
 0x6d0   : > { %v16357_v37 = vadd.f32 %v16348_v60, %v5429_v11  ;;  %v5430_v59 = vmul.f32 %v16346_v44, %v5297_v12 }
 0x6d1   : > { %v5503_v29 = vsub.f32 0.0, %v16353_v4  ;;  %v16362_v46 = vadd.f32 %v16348_v60, %v5432_v10 }
 0x6d2   : > { %v5501_v17 = vsub.f32 0.0, %v16357_v37  ;;  %v16366_v54 = vadd.f32 %v16348_v60, %v5430_v59 }
 0x6d3   : > { %v5537_v30 = vmul.f32 1.442695, %v5503_v29  ;;  %v5504_v38 = vsub.f32 0.0, %v16362_v46 }
 0x6d4   : > { %v5533_v22 = vmul.f32 1.442695, %v5501_v17  ;;  %v5502_v45 = vsub.f32 0.0, %v16366_v54 }
 0x6d5   : > { %12438 = vpow2.f32 %v5537_v30  ;;  %v5539_v2 = vmul.f32 1.442695, %v5504_v38 }
 0x6d6   : > { %12440 = vpow2.f32 %v5533_v22  ;;  %v5535_v57 = vmul.f32 1.442695, %v5502_v45  ;;  %v11037_v13 = vpop.f32.mrb[164].mxu1 }
 0x6d7   : > { %12442 = vpow2.f32 %v5539_v2  ;;  %v5435_v58 = vmul.f32 %v11037_v13, %v16346_v44  ;;  %v5310_v16 = vpop.f32.mrb[165].mxu1 }
 0x6d8   : > { %12444 = vpow2.f32 %v5535_v57  ;;  %v5433_v25 = vmul.f32 %v16346_v44, %v5310_v16  ;;  %v11038_v24 = vpop.f32.mrb[166].mxu1 }
 0x6d9   : > { %v16373_v55 = vadd.f32 %v16348_v60, %v5435_v58  ;;  %v5436_v34 = vmul.f32 %v11038_v24, %v16346_v44  ;;  %v5313_v1 = vpop.f32.mrb[167].mxu1 }
 0x6da   : > { %v16377_v11 = vadd.f32 %v16348_v60, %v5433_v25  ;;  %v5434_v36 = vmul.f32 %v16346_v44, %v5313_v1 }
 0x6db   : > { %v5507_v10 = vsub.f32 0.0, %v16373_v55  ;;  %v16382_v12 = vadd.f32 %v16348_v60, %v5436_v34 }
 0x6dc   : > { %v5505_v59 = vsub.f32 0.0, %v16377_v11  ;;  %v16386_v29 = vadd.f32 %v16348_v60, %v5434_v36 }
 0x6dd   : > { %v5545_v17 = vmul.f32 1.442695, %v5507_v10  ;;  %v5508_v30 = vsub.f32 0.0, %v16382_v12 }
 0x6de   : > { %v5541_v22 = vmul.f32 1.442695, %v5505_v59  ;;  %v5506_v45 = vsub.f32 0.0, %v16386_v29  ;;  %v11041_v2 = vpop.f32.mrb[168].mxu1 }
 0x6df   : > { %v12439_v38 = vpop.eup %12438  ;;  %12446 = vpow2.f32 %v5545_v17  ;;  %v5547_v58 = vmul.f32 1.442695, %v5508_v30  ;;  %v5439_v16 = vmul.f32 %v11041_v2, %v16346_v44  ;;  %v5326_v25 = vpop.f32.mrb[169].mxu1 }
 0x6e0   : > { %v12441_v57 = vpop.eup %12440  ;;  %v5599_v13 = vadd.f32 1.0, %v12439_v38  ;;  %12448 = vpow2.f32 %v5541_v22  ;;  %v5543_v1 = vmul.f32 1.442695, %v5506_v45  ;;  %v5437_v36 = vmul.f32 %v16346_v44, %v5326_v25  ;;  %v11042_v10 = vpop.f32.mrb[170].mxu1 }
 0x6e1   : > { %v12443_v24 = vpop.eup %12442  ;;  %v5597_v34 = vadd.f32 1.0, %v12441_v57  ;;  %v16393_v41 = vadd.f32 %v16348_v60, %v5439_v16  ;;  %v5440_v38 = vmul.f32 %v11042_v10, %v16346_v44  ;;  %v5329_v17 = vpop.f32.mrb[171].mxu1 }
 0x6e2   : > { %v12445_v50 = vpop.eup %12444  ;;  %12450 = vrcp.f32 %v5599_v13  ;;  %v5600_v59 = vadd.f32 1.0, %v12443_v24  ;;  %v16397_v2 = vadd.f32 %v16348_v60, %v5437_v36  ;;  %v5438_v22 = vmul.f32 %v16346_v44, %v5329_v17 }
 0x6e3   : > { %12452 = vrcp.f32 %v5597_v34  ;;  %v5598_v30 = vadd.f32 1.0, %v12445_v50  ;;  %v5511_v45 = vsub.f32 0.0, %v16393_v41  ;;  %v16402_v57 = vadd.f32 %v16348_v60, %v5440_v38 }
 0x6e4   : > { %12454 = vrcp.f32 %v5600_v59  ;;  %v5509_v13 = vsub.f32 0.0, %v16397_v2  ;;  %v16406_v16 = vadd.f32 %v16348_v60, %v5438_v22 }
 0x6e5   : > { %12456 = vrcp.f32 %v5598_v30  ;;  %v5553_v25 = vmul.f32 1.442695, %v5511_v45  ;;  %v5512_v50 = vsub.f32 0.0, %v16402_v57 }
 0x6e6   : > { %12458 = vpow2.f32 %v5547_v58  ;;  %v5549_v24 = vmul.f32 1.442695, %v5509_v13  ;;  %v5510_v34 = vsub.f32 0.0, %v16406_v16  ;;  %v11045_v36 = vpop.f32.mrb[172].mxu1 }
 0x6e7   : > { %12460 = vpow2.f32 %v5543_v1  ;;  %v5555_v10 = vmul.f32 1.442695, %v5512_v50  ;;  %v5443_v59 = vmul.f32 %v11045_v36, %v16346_v44  ;;  %v5342_v38 = vpop.f32.mrb[173].mxu1 }
 0x6e8   : > { %12462 = vpow2.f32 %v5553_v25  ;;  %v5551_v17 = vmul.f32 1.442695, %v5510_v34  ;;  %v5441_v30 = vmul.f32 %v16346_v44, %v5342_v38  ;;  %v11046_v22 = vpop.f32.mrb[174].mxu1 }
 0x6e9   : > { %12464 = vpow2.f32 %v5549_v24  ;;  %v12447_v26 = vpop.eup %12446  ;;  %v16413_v58 = vadd.f32 %v16348_v60, %v5443_v59  ;;  %v5444_v1 = vmul.f32 %v11046_v22, %v16346_v44  ;;  %v5345_v45 = vpop.f32.mrb[175].mxu1 }
 0x6ea   : > { %12466 = vpow2.f32 %v5555_v10  ;;  %v12449_v13 = vpop.eup %12448  ;;  %v5603_v15 = vadd.f32 1.0, %v12447_v26  ;;  %v16417_v25 = vadd.f32 %v16348_v60, %v5441_v30  ;;  %v5442_v50 = vmul.f32 %v16346_v44, %v5345_v45 }
 0x6eb   : > { %12468 = vpow2.f32 %v5551_v17  ;;  %v5601_v34 = vadd.f32 1.0, %v12449_v13  ;;  %v5515_v36 = vsub.f32 0.0, %v16413_v58  ;;  %v16422_v10 = vadd.f32 %v16348_v60, %v5444_v1 }
 0x6ec   : > { %v12451_v24 = vpop.eup %12450  ;;  %12470 = vrcp.f32 %v5603_v15  ;;  %v5513_v26 = vsub.f32 0.0, %v16417_v25  ;;  %v16432_v45 = vadd.f32 %v16348_v60, %v5442_v50 }
 0x6ed   : > { %v12453_v59 = vpop.eup %12452  ;;  %v16425_v38 = vmul.f32 %v12451_v24, %v16353_v4  ;;  %12472 = vrcp.f32 %v5601_v34  ;;  %v5561_v22 = vmul.f32 1.442695, %v5515_v36  ;;  %v5516_v15 = vsub.f32 0.0, %v16422_v10 }
 0x6ee   : > { %v12455_v17 = vpop.eup %12454  ;;  %v16429_v30 = vmul.f32 %v12453_v59, %v16357_v37  ;;  %v5557_v4 = vmul.f32 1.442695, %v5513_v26  ;;  %v11049_v24 = vpop.f32.mrb[176].mxu1 }
 0x6ef   : > { %v12457_v13 = vpop.eup %12456  ;;  %v16436_v39 = vmul.f32 %v12455_v17, %v16362_v46  ;;  %12474 = vpow2.f32 %v5561_v22  ;;  %v5358_v50 = vpop.f32.mrb[177].mxu1  ;;  %v19103_v22 = vrot.slane %v16425_v38, 1  ;;  %v5447_v23 = vmul.f32 %v11049_v24, %v16346_v44 }
 0x6f0   : > { %v12459_v33 = vpop.eup %12458  ;;  %v5725_v37 = vrot.slane %v16429_v30, 7  ;;  %v16442_v34 = vmul.f32 %v12457_v13, %v16366_v54  ;;  %12476 = vpow2.f32 %v5557_v4  ;;  %v11050_v26 = vpop.f32.mrb[178].mxu1  ;;  %v5563_v4 = vmul.f32 1.442695, %v5516_v15 }
 0x6f1   : > { %v12461_v36 = vpop.eup %12460  ;;  %v18570_v46 = vrot.slane %v16436_v39, 1  ;;  %v5604_v17 = vadd.f32 1.0, %v12459_v33  ;;  %v5361_v54 = vpop.f32.mrb[179].mxu1 }
 0x6f2   : > { %v12463_v1 = vpop.eup %12462  ;;  %v5820_v18 = vsel %vm19102_vm5, 0.0, %v5725_v37  ;;  %v18571_v7 = vrot.slane %v16442_v34, 7  ;;  %v5602_v3 = vadd.f32 1.0, %v12461_v36  ;;  %v5514_v36 = vsub.f32 0.0, %v16432_v45 }
 0x6f3   : > { %v12465_v13 = vpop.eup %12464  ;;  %v5859_v59 = vsel %vm19104_vm10, %v19103_v22, %v18570_v46  ;;  %12478 = vrcp.f32 %v5604_v17  ;;  %v5607_v33 = vadd.f32 1.0, %v12463_v1  ;;  %v11880_v22 = vld [vmem:[#allocation15 + $0x400] sm:$0xff]   ;;  %v5445_v17 = vmul.f32 %v16346_v44, %v5358_v50 }
 0x6f4   : > { %v12467_v42 = vpop.eup %12466  ;;  %v5727_v28 = vsel %vm19102_vm5, %v5725_v37, %v18571_v7  ;;  %12480 = vrcp.f32 %v5602_v3  ;;  %v5605_v40 = vadd.f32 1.0, %v12465_v13  ;;  %v5559_v15 = vmul.f32 1.442695, %v5514_v36  ;;  %10575 = vmatprep.subr.bf16.mxu1 %v11880_v22  ;;  %vm19110_vm5 = vmmov %vm19104_vm10 }
 0x6f5   : > { %v12469_v6 = vpop.eup %12468  ;;  %v16458_v21 = vpack.c.bf16 %v5727_v28, %v5820_v18  ;;  %12482 = vrcp.f32 %v5607_v33  ;;  %v5608_v8 = vadd.f32 1.0, %v12467_v42  ;;  %v16463_v3 = vadd.f32 %v16348_v60, %v5447_v23 }
 0x6f6   : > { %12484 = vrcp.f32 %v5605_v40  ;;  %v5606_v1 = vadd.f32 1.0, %v12469_v6  ;;  %v12471_v46 = vpop.eup %12470  ;;  %v5448_v37 = vmul.f32 %v11050_v26, %v16346_v44  ;;  %v5446_v28 = vmul.f32 %v16346_v44, %v5361_v54  ;;  %v11053_v18 = vpop.f32.mrb[180].mxu1 }
 0x6f7   : > { %12486 = vrcp.f32 %v5608_v8  ;;  %v12473_v42 = vpop.eup %12472  ;;  %v16468_v24 = vmul.f32 %v12471_v46, %v16373_v55  ;;  %v16471_v6 = vadd.f32 %v16348_v60, %v5445_v17  ;;  %v5451_v40 = vmul.f32 %v11053_v18, %v16346_v44  ;;  %v16474_v8 = vpop.f32.mrb[181].mxu1 }
 0x6f8   : > { %12488 = vrcp.f32 %v5606_v1  ;;  %v16477_v23 = vmul.f32 %v12473_v42, %v16377_v11  ;;  %v5519_v50 = vsub.f32 0.0, %v16463_v3  ;;  %v16481_v26 = vadd.f32 %v16348_v60, %v5448_v37  ;;  %v16483_v54 = vpop.f32.mrb[182].mxu1 }
 0x6f9   : > { %12490 = vpow2.f32 %v5563_v4  ;;  %v12475_v55 = vpop.eup %12474  ;;  %v5517_v33 = vsub.f32 0.0, %v16471_v6  ;;  %v16488_v36 = vpop.f32.mrb[183].mxu1  ;;  %v16494_v7 = vadd.f32 %v16348_v60, %v5446_v28  ;;  %v16502_v4 = vadd.f32 %v16348_v60, %v5451_v40 }
 0x6fa   : > { %12492 = vpow2.f32 %v5559_v15  ;;  %v12477_v11 = vpop.eup %12476  ;;  %v18575_v22 = vrot.slane %v16477_v23, 1  ;;  %v5611_v1 = vadd.f32 1.0, %v12475_v55  ;;  %v5569_v17 = vmul.f32 1.442695, %v5519_v50  ;;  %v11881_v55 = vld [vmem:[#allocation15 + $0x3c0] sm:$0xff]  }
 0x6fb   : > { %v5609_v37 = vadd.f32 1.0, %v12477_v11  ;;  %v5565_v18 = vmul.f32 1.442695, %v5517_v33  ;;  %v5520_v42 = vsub.f32 0.0, %v16481_v26  ;;  %v19105_v15 = vrot.slane %v16436_v39, 1 }
 0x6fc   : > { %12494 = vrcp.f32 %v5611_v1  ;;  %v16506_v50 = vpack.c.bf16 %v16442_v34, %v16429_v30  ;;  %v5518_v40 = vsub.f32 0.0, %v16494_v7 }
 0x6fd   : > { %v12479_v13 = vpop.eup %12478  ;;  %v5861_v46 = vsel %vm19104_vm10, %v19105_v15, %v18575_v22  ;;  %12496 = vrcp.f32 %v5609_v37  ;;  %v5571_v61 = vmul.f32 1.442695, %v5520_v42  ;;  %v5523_v15 = vsub.f32 0.0, %v16502_v4  ;;  %vm19113_vm10 = vmmov %vm19110_vm5 }
 0x6fe   : > { %v12481_v33 = vpop.eup %12480  ;;  %v16508_v11 = vpack.c.bf16 %v5861_v46, %v5859_v59  ;;  %v16511_v28 = vmul.f32 %v12479_v13, %v16382_v12  ;;  %12498 = vpow2.f32 %v5569_v17  ;;  %6301 = vmatprep.mubr.bf16.mxu1 %v16506_v50  ;;  %v11057_v22 = vpop.f32.mrb[184].mxu1  ;;  %v5567_v35 = vmul.f32 1.442695, %v5518_v40 }
 0x6ff   : > { %v12483_v52 = vpop.eup %12482  ;;  %v16514_v1 = vmul.f32 %v12481_v33, %v16386_v29  ;;  %12500 = vpow2.f32 %v5565_v18  ;;  %9159 = vmatmul.mubr.msk.bf16.vlgmr.msra.gmra.mrb[192].mxu1 %vm14573_vm7, %v16458_v21  ;;  %v5390_v17 = vpop.f32.mrb[185].mxu1  ;;  %v11885_v33 = vld [vmem:[#allocation15 + $0x410] sm:$0xff]   ;;  %v5577_v47 = vmul.f32 1.442695, %v5523_v15  ;;  %v5452_v15 = vmul.f32 %v16483_v54, %v16346_v44  ;;  %v19288_v29 = vld [vmem:[#allocation140_spill] sm:$0xff] }
 0x700   : > { %19106 = vst [vmem:[#allocation70_spill] sm:$0xff] %v16508_v11  ;;  %v12485_v59 = vpop.eup %12484  ;;  %v16522_v13 = vmul.f32 %v12483_v52, %v16393_v41  ;;  %12502 = vpow2.f32 %v5571_v61  ;;  %v16532_v46 = vpop.f32.mrb[186].mxu1  ;;  %10576 = vmatpush3.bf16.msra.mxu1 %v11881_v55  ;;  %v11884_v52 = vld [vmem:[#allocation15 + $0x3c8] sm:$0xff]   ;;  %v16568_v54 = vpack.c.bf16 %v16436_v39, %v16425_v38 }
 0x701   : > { %v12487_v37 = vpop.eup %12486  ;;  %v16530_v49 = vmul.f32 %v12485_v59, %v16397_v2  ;;  %v16539_v42 = vpop.f32.mrb[187].mxu1  ;;  %10577 = vmatprep.subr.bf16.mxu1 %v11882_v48  ;;  %12504 = vpow2.f32 %v5567_v35 }
 0x702   : > { %v12489_v41 = vpop.eup %12488  ;;  %v16537_v31 = vmul.f32 %v12487_v37, %v16402_v57  ;;  %12506 = vpow2.f32 %v5577_v47  ;;  %v19108_v57 = vrot.slane %v16442_v34, 1  ;;  %6309 = vmatprep.mubr.bf16.mxu1 %v16568_v54 }
 0x703   : > { %v12491_v2 = vpop.eup %12490  ;;  %v16544_v55 = vmul.f32 %v12489_v41, %v16406_v16  ;;  %v5449_v16 = vmul.f32 %v16346_v44, %v16474_v8  ;;  %v5450_v41 = vmul.f32 %v16346_v44, %v16488_v36 }
 0x704   : > { %v12493_v18 = vpop.eup %12492  ;;  %v5612_v37 = vadd.f32 1.0, %v12491_v2  ;;  %10578 = vmatpush3.bf16.msra.mxu1 %v11884_v52  ;;  %v11886_v2 = vld [vmem:[#allocation15 + $0x3d0] sm:$0xff]   ;;  %v19111_v52 = vrot.slane %v16425_v38, 1  ;;  %v19112_v8 = vmov %v19108_v57 }
 0x705   : > { %v5610_v0 = vadd.f32 1.0, %v12493_v18  ;;  %10579 = vmatprep.subr.bf16.mxu1 %v11885_v33  ;;  %v19109_v18 = vrot.slane %v16429_v30, 1  ;;  %v11887_v33 = vld [vmem:[#allocation15 + $0x418] sm:$0xff]   ;;  %v16576_v30 = vadd.f32 %v16348_v60, %v5449_v16  ;;  %v5453_v16 = vmul.f32 %v16346_v44, %v5390_v17 }
 0x706   : > { %12508 = vrcp.f32 %v5612_v37  ;;  %v12495_v35 = vpop.eup %12494  ;;  %v5857_v37 = vsel %vm19113_vm10, %v19112_v8, %v19111_v52  ;;  %v16570_v36 = vpop.f32.mrb[188].mxu1  ;;  %vm19118_vm10 = vcmask 1040384  }
 0x707   : > { %12510 = vrcp.f32 %v5610_v0  ;;  %v5855_v47 = vsel %vm19110_vm5, %v19109_v18, %v19108_v57  ;;  %v12497_v0 = vpop.eup %12496  ;;  %v16573_v48 = vmul.f32 %v12495_v35, %v16413_v58  ;;  %v16579_v57 = vadd.f32 %v16348_v60, %v5452_v15  ;;  %v16584_v52 = vpop.f32.mrb[189].mxu1  ;;  %v11863_v35 = vld [vmem:[#allocation15 + $0x240] sm:$0xff]   ;;  %v11864_v15 = vld [vmem:[#allocation15 + $0x288] sm:$0xff]  }
 0x708   : > { %v16582_v18 = vadd.f32 %v16348_v60, %v5450_v41  ;;  %v12499_v8 = vpop.eup %12498  ;;  %v16587_v59 = vmul.f32 %v12497_v0, %v16417_v25  ;;  %v16589_v40 = vpack.c.bf16 %v5857_v37, %v5855_v47  ;;  %v5455_v58 = vmul.f32 %v11057_v22, %v16346_v44  ;;  %v16594_v61 = vpop.f32.mrb[190].mxu1  ;;  %10580 = vmatpush3.bf16.msra.mxu1 %v11886_v2  ;;  %v11888_v37 = vld [vmem:[#allocation15 + $0x3d8] sm:$0xff]  }
 0x709   : > { %v12501_v41 = vpop.eup %12500  ;;  %v5615_v43 = vadd.f32 1.0, %v12499_v8  ;;  %v5521_v25 = vsub.f32 0.0, %v16576_v30  ;;  %v16599_v47 = vpop.f32.mrb[191].mxu1  ;;  %v5524_v14 = vsub.f32 0.0, %v16579_v57  ;;  %vm19115_vm5 = vnez %v19114_v63  ;;  %10581 = vmatprep.subr.bf16.mxu1 %v11887_v33  ;;  %v11889_v8 = vld [vmem:[#allocation15 + $0x420] sm:$0xff]   ;;  %v11865_v33 = vld [vmem:[#allocation15 + $0x248] sm:$0xff]  }
 0x70a   : > { %v12503_v0 = vpop.eup %12502  ;;  %v5613_v9 = vadd.f32 1.0, %v12501_v41  ;;  %11079 = vmatprep.mubr.msk.bf16.mxu0 %vm19115_vm5, %v16589_v40  ;;  %v5522_v2 = vsub.f32 0.0, %v16582_v18  ;;  %v16612_v41 = vadd.f32 %v16348_v60, %v5455_v58  ;;  %v16615_v22 = vadd.f32 %v16348_v60, %v5453_v16 }
 0x70b   : > { %12512 = vrcp.f32 %v5615_v43  ;;  %v5616_v53 = vadd.f32 1.0, %v12503_v0  ;;  %v5573_v12 = vmul.f32 1.442695, %v5521_v25  ;;  %11080 = vmatmul.mubr.msk.bf16.vlgmr.msra.gmra.mrb[160].mxu0 %vm19004_vm0, %v16508_v11  ;;  %v5579_v17 = vmul.f32 1.442695, %v5524_v14  ;;  %v12505_v62 = vpop.eup %12504  ;;  %v11890_v14 = vld [vmem:[#allocation15 + $0x3e0] sm:$0xff]   ;;  %vm19121_vm0 = vmmov %vm19118_vm10 }
 0x70c   : > { %12514 = vrcp.f32 %v5613_v9  ;;  %10440 = vmatpush3.bf16.msra.mxu0 %v11863_v35  ;;  %v5575_v43 = vmul.f32 1.442695, %v5522_v2  ;;  %v5456_v25 = vmul.f32 %v16532_v46, %v16346_v44  ;;  %v5454_v0 = vmul.f32 %v16346_v44, %v16539_v42  ;;  %v11866_v9 = vld [vmem:[#allocation15 + $0x290] sm:$0xff]   ;;  %10582 = vmatpush3.bf16.msra.mxu1 %v11888_v37  ;;  %v12507_v58 = vpop.eup %12506 }
 0x70d   : > { %12516 = vrcp.f32 %v5616_v53  ;;  %10441 = vmatprep.subr.bf16.mxu0 %v11864_v15  ;;  %v5614_v5 = vadd.f32 1.0, %v12505_v62  ;;  %v5527_v16 = vsub.f32 0.0, %v16612_v41  ;;  %v5525_v35 = vsub.f32 0.0, %v16615_v22  ;;  %10583 = vmatprep.subr.bf16.mxu1 %v11889_v8  ;;  %v11891_v53 = vld [vmem:[#allocation15 + $0x428] sm:$0xff]   ;;  %v11867_v11 = vld [vmem:[#allocation15 + $0x250] sm:$0xff]  }
 0x70e   : > { %12518 = vpow2.f32 %v5573_v12  ;;  %v5619_v20 = vadd.f32 1.0, %v12507_v58  ;;  %v16624_v46 = vadd.f32 %v16348_v60, %v5456_v25  ;;  %v16627_v42 = vadd.f32 %v16348_v60, %v5454_v0  ;;  %v11868_v0 = vld [vmem:[#allocation15 + $0x298] sm:$0xff]   ;;  %v11893_v58 = vld [vmem:[#allocation15 + $0x3e8] sm:$0xff]  }
 0x70f   : > { %12520 = vpow2.f32 %v5579_v17  ;;  %v5585_v62 = vmul.f32 1.442695, %v5527_v16  ;;  %v5581_v12 = vmul.f32 1.442695, %v5525_v35  ;;  %v19117_v16 = vrot.slane %v16442_v34, 7 }
 0x710   : > { %v12509_v2 = vpop.eup %12508  ;;  %12522 = vrcp.f32 %v5614_v5  ;;  %10442 = vmatpush3.bf16.msra.mxu0 %v11865_v33  ;;  %v5528_v17 = vsub.f32 0.0, %v16624_v46  ;;  %v5526_v25 = vsub.f32 0.0, %v16627_v42  ;;  %10584 = vmatpush3.bf16.msra.mxu1 %v11890_v14  ;;  %v19116_v33 = vrot.slane %v16425_v38, 7 }
 0x711   : > { %v12511_v15 = vpop.eup %12510  ;;  %v16630_v37 = vmul.f32 %v12509_v2, %v16422_v10  ;;  %12524 = vrcp.f32 %v5619_v20  ;;  %10443 = vmatprep.subr.bf16.mxu0 %v11866_v9  ;;  %10585 = vmatprep.subr.bf16.mxu1 %v11891_v53  ;;  %v11894_v20 = vld [vmem:[#allocation15 + $0x430] sm:$0xff]   ;;  %v19122_v34 = vrot.slane %v16514_v1, 1  ;;  %v16665_v38 = vpack.c.bf16 %v16514_v1, %v16477_v23 }
 0x712   : > { %v16633_v8 = vmul.f32 %v12511_v15, %v16432_v45  ;;  %12526 = vpow2.f32 %v5575_v43  ;;  %v5729_v45 = vsel %vm19118_vm10, %v19117_v16, %v19116_v33  ;;  %v5587_v14 = vmul.f32 1.442695, %v5528_v17 }
 0x713   : > { %12528 = vpow2.f32 %v5585_v62  ;;  %v5583_v2 = vmul.f32 1.442695, %v5526_v25  ;;  %v19119_v15 = vrot.slane %v16436_v39, 7  ;;  %v19120_v43 = vmov %v19116_v33  ;;  %v11869_v25 = vld [vmem:[#allocation15 + $0x258] sm:$0xff]  }
 0x714   : > { %12530 = vpow2.f32 %v5581_v12  ;;  %v19123_v33 = vrot.slane %v16477_v23, 1  ;;  %vm19124_vm10 = vcmask 1046528   ;;  %10444 = vmatpush3.bf16.msra.mxu0 %v11867_v11  ;;  %v19125_v62 = vrot.slane %v16468_v24, 1  ;;  %10586 = vmatpush3.bf16.msra.mxu1 %v11893_v58 }
 0x715   : > { %v5731_v5 = vsel %vm19121_vm0, %v19120_v43, %v19119_v15  ;;  %v12513_v16 = vpop.eup %12512  ;;  %12532 = vpow2.f32 %v5587_v14  ;;  %v19126_v12 = vmov %v19122_v34  ;;  %vm19127_vm5 = vmmov %vm19124_vm10  ;;  %10445 = vmatprep.subr.bf16.mxu0 %v11868_v0  ;;  %v11895_v15 = vld [vmem:[#allocation15 + $0x3f0] sm:$0xff]   ;;  %v11870_v14 = vld [vmem:[#allocation15 + $0x2a0] sm:$0xff]   ;;  %10587 = vmatprep.subr.bf16.mxu1 %v11894_v20  ;;  %v19131_v58 = vrot.slane %v16511_v28, 1 }
 0x716   : > { %v5863_v53 = vsel %vm19124_vm10, %v19123_v33, %v19122_v34  ;;  %v16656_v9 = vpack.c.bf16 %v5731_v5, %v5729_v45  ;;  %v5865_v17 = vsel %vm19127_vm5, %v19126_v12, %v19125_v62  ;;  %v12515_v43 = vpop.eup %12514  ;;  %v16668_v11 = vmul.f32 %v12513_v16, %v16463_v3  ;;  %v11896_v34 = vld [vmem:[#allocation15 + $0x438] sm:$0xff]   ;;  %v19129_v0 = vld [vmem:[#allocation105_spill] sm:$0xff]  ;;  %vm19135_vm10 = vmmov %vm19127_vm5 }
 0x717   : > { %12534 = vpow2.f32 %v5583_v2  ;;  %v16670_v5 = vpack.c.bf16 %v5865_v17, %v5863_v53  ;;  %v5459_v45 = vmul.f32 %v16570_v36, %v16346_v44  ;;  %v12517_v33 = vpop.eup %12516  ;;  %v16675_v62 = vmul.f32 %v12515_v43, %v16471_v6 }
 0x718   : > { %vm19130_vm0 = vnez %v19129_v0  ;;  %v5457_v3 = vmul.f32 %v16346_v44, %v16584_v52  ;;  %v19132_v2 = vrot.slane %v16468_v24, 1  ;;  %v19133_v20 = vrot.slane %v16530_v49, 1  ;;  %v12519_v16 = vpop.eup %12518  ;;  %10446 = vmatpush3.bf16.msra.mxu0 %v11869_v25  ;;  %10588 = vmatpush3.bf16.msra.mxu1 %v11895_v15  ;;  %v11903_v0 = vld [vmem:[#allocation15 + $0x448] sm:$0xff]  }
 0x719   : > { %19128 = vst [vmem:[#allocation71_spill] sm:$0xff] %v16670_v5  ;;  %9162 = vmatmul.mubr.msk.bf16.gmra.mrb[196].mxu1 %vm19130_vm0, %v16656_v9  ;;  %v19134_v53 = vmov %v19131_v58  ;;  %v16695_v43 = vmul.f32 %v12517_v33, %v16481_v26  ;;  %11083 = vmatprep.mubr.msk.bf16.mxu0 %vm19007_vm4, %v16670_v5  ;;  %v16702_v52 = vadd.f32 %v16348_v60, %v5459_v45  ;;  %v11897_v26 = vld [vmem:[#allocation15 + $0x3f8] sm:$0xff]   ;;  %v19200_v5 = vrot.slane %v16522_v13, 7 }
 0x71a   : > { %v5867_v36 = vsel %vm19127_vm5, %v19132_v2, %v19131_v58  ;;  %v5869_v6 = vsel %vm19135_vm10, %v19134_v53, %v19133_v20  ;;  %6317 = vmatprep.mubr.bf16.mxu1 %v16665_v38  ;;  %v12521_v58 = vpop.eup %12520  ;;  %v5617_v53 = vadd.f32 1.0, %v12519_v16  ;;  %v16707_v17 = vadd.f32 %v16348_v60, %v5457_v3  ;;  %10447 = vmatprep.subr.bf16.mxu0 %v11870_v14  ;;  %v11872_v3 = vld [vmem:[#allocation15 + $0x2a8] sm:$0xff]  }
 0x71b   : > { %v12523_v33 = vpop.eup %12522  ;;  %v5620_v10 = vadd.f32 1.0, %v12521_v58  ;;  %v5531_v45 = vsub.f32 0.0, %v16702_v52  ;;  %10589 = vmatprep.subr.bf16.mxu1 %v11896_v34  ;;  %v16716_v15 = vpack.c.bf16 %v5869_v6, %v5867_v36  ;;  %v5460_v14 = vmul.f32 %v16594_v61, %v16346_v44  ;;  %v11873_v61 = vld [vmem:[#allocation15 + $0x268] sm:$0xff]  }
 0x71c   : > { %v12525_v2 = vpop.eup %12524  ;;  %v16713_v16 = vmul.f32 %v12523_v33, %v16494_v7  ;;  %12536 = vrcp.f32 %v5617_v53  ;;  %v5529_v25 = vsub.f32 0.0, %v16707_v17  ;;  %10590 = vmatpush3.bf16.msra.mxu1 %v11897_v26  ;;  %10448 = vmatpush3.bf16.msra.mxu0 %v11871_v56  ;;  %v11874_v53 = vld [vmem:[#allocation15 + $0x2b0] sm:$0xff]   ;;  %vm19140_vm5 = vcmask 1040384  }
 0x71d   : > { %19136 = vst [vmem:[#allocation67_spill] sm:$0xff] %v16716_v15  ;;  %v12527_v20 = vpop.eup %12526  ;;  %v16719_v35 = vmul.f32 %v12525_v2, %v16502_v4  ;;  %12538 = vrcp.f32 %v5620_v10  ;;  %v5593_v58 = vmul.f32 1.442695, %v5531_v45  ;;  %11084 = vmatmul.mubr.msk.bf16.gmra.mrb[164].mxu0 %vm19010_vm1, %v16716_v15  ;;  %v16731_v7 = vadd.f32 %v16348_v60, %v5460_v14  ;;  %10449 = vmatprep.subr.bf16.mxu0 %v11872_v3  ;;  %vm19143_vm10 = vmmov %vm19140_vm5 }
 0x71e   : > { %v12529_v34 = vpop.eup %12528  ;;  %v5618_v33 = vadd.f32 1.0, %v12527_v20  ;;  %v5589_v2 = vmul.f32 1.442695, %v5529_v25  ;;  %v5458_v20 = vmul.f32 %v16346_v44, %v16599_v47  ;;  %v19139_v25 = vrot.slane %v16436_v39, 7 }
 0x71f   : > { %v12531_v4 = vpop.eup %12530  ;;  %v5623_v6 = vadd.f32 1.0, %v12529_v34  ;;  %12540 = vpow2.f32 %v5593_v58  ;;  %v19138_v34 = vrot.slane %v16477_v23, 7  ;;  %v19141_v58 = vrot.slane %v16514_v1, 7 }
 0x720   : > { %v12533_v45 = vpop.eup %12532  ;;  %12542 = vrcp.f32 %v5618_v33  ;;  %v5621_v12 = vadd.f32 1.0, %v12531_v4  ;;  %v5532_v44 = vsub.f32 0.0, %v16731_v7  ;;  %v16747_v47 = vadd.f32 %v16348_v60, %v5458_v20  ;;  %10450 = vmatpush3.bf16.msra.mxu0 %v11873_v61  ;;  %v19151_v20 = vld [vmem:[#allocation108_spill] sm:$0xff] }
 0x721   : > { %v12535_v26 = vpop.eup %12534  ;;  %12544 = vrcp.f32 %v5623_v6  ;;  %v5624_v36 = vadd.f32 1.0, %v12533_v45  ;;  %v5733_v56 = vsel %vm19140_vm5, %v19139_v25, %v19138_v34  ;;  %v19142_v33 = vmov %v19138_v34  ;;  %10451 = vmatprep.subr.bf16.mxu0 %v11874_v53 }
 0x722   : > { %v5735_v14 = vsel %vm19143_vm10, %v19142_v33, %v19141_v58  ;;  %12546 = vrcp.f32 %v5621_v12  ;;  %v5622_v4 = vadd.f32 1.0, %v12535_v26  ;;  %v19144_v39 = vrot.slane %v16544_v55, 1 }
 0x723   : > { %12548 = vrcp.f32 %v5624_v36  ;;  %v16749_v3 = vpack.c.bf16 %v5735_v14, %v5733_v56  ;;  %v19145_v6 = vrot.slane %v16530_v49, 1  ;;  %vm19146_vm5 = vcmask 1046528  }
 0x724   : > { %v19147_v23 = vrot.slane %v16522_v13, 1  ;;  %v19148_v34 = vmov %v19144_v39  ;;  %vm19149_vm10 = vmmov %vm19146_vm5  ;;  %12550 = vrcp.f32 %v5622_v4  ;;  %v5595_v26 = vmul.f32 1.442695, %v5532_v44 }
 0x725   : > { %v5871_v45 = vsel %vm19146_vm5, %v19145_v6, %v19144_v39  ;;  %v5530_v60 = vsub.f32 0.0, %v16747_v47  ;;  %12552 = vpow2.f32 %v5589_v2  ;;  %vm19152_vm1 = vnez %v19151_v20  ;;  %v11875_v2 = vld [vmem:[#allocation15 + $0x270] sm:$0xff]  }
 0x726   : > { %v5873_v12 = vsel %vm19149_vm10, %v19148_v34, %v19147_v23  ;;  %9165 = vmatmul.mubr.msk.bf16.gmra.mrb[200].mxu1 %vm19152_vm1, %v16749_v3  ;;  %v16769_v25 = vpack.c.bf16 %v16511_v28, %v16468_v24  ;;  %v19153_v56 = vrot.slane %v16537_v31, 1  ;;  %v19154_v61 = vmov %v19147_v23  ;;  %vm19157_vm10 = vmmov %vm19146_vm5  ;;  %v12537_v4 = vpop.eup %12536  ;;  %10452 = vmatpush3.bf16.msra.mxu0 %v11875_v2 }
 0x727   : > { %v16762_v36 = vpack.c.bf16 %v5873_v12, %v5871_v45  ;;  %v19155_v33 = vrot.slane %v16587_v59, 1  ;;  %12554 = vpow2.f32 %v5595_v26  ;;  %v5591_v44 = vmul.f32 1.442695, %v5530_v60  ;;  %v11876_v12 = vld [vmem:[#allocation15 + $0x2b8] sm:$0xff]  }
 0x728   : > { %v5875_v58 = vsel %vm19146_vm5, %v19154_v61, %v19153_v56  ;;  %v19156_v14 = vmov %v19153_v56  ;;  %v19160_v45 = vrot.slane %v16468_v24, 7  ;;  %v19161_v23 = vrot.slane %v16514_v1, 7  ;;  %v12539_v56 = vpop.eup %12538  ;;  %6325 = vmatprep.mubr.bf16.mxu1 %v16769_v25  ;;  %10453 = vmatprep.subr.bf16.mxu0 %v11876_v12 }
 0x729   : > { %19150 = vst [vmem:[#allocation74_spill] sm:$0xff] %v16762_v36  ;;  %v5877_v53 = vsel %vm19157_vm10, %v19156_v14, %v19155_v33  ;;  %11087 = vmatprep.mubr.msk.bf16.mxu0 %vm19013_vm14, %v16762_v36  ;;  %vm19162_vm5 = vcmask 1040384   ;;  %v16792_v61 = vmul.f32 %v12537_v4, %v16576_v30  ;;  %v19163_v26 = vrot.slane %v16511_v28, 7 }
 0x72a   : > { %v16784_v6 = vpack.c.bf16 %v5877_v53, %v5875_v58  ;;  %v5737_v34 = vsel %vm19162_vm5, %v19161_v23, %v19160_v45  ;;  %v19164_v60 = vmov %v19160_v45  ;;  %vm19165_vm10 = vmmov %vm19162_vm5  ;;  %v19166_v33 = vrot.slane %v16633_v8, 1 }
 0x72b   : > { %v5739_v58 = vsel %vm19165_vm10, %v19164_v60, %v19163_v26  ;;  %v19167_v14 = vrot.slane %v16587_v59, 1  ;;  %vm19168_vm14 = vcmask 1046528   ;;  %v19169_v53 = vrot.slane %v16573_v48, 1  ;;  %v12541_v60 = vpop.eup %12540 }
 0x72c   : > { %19159 = vst [vmem:[#allocation78_spill] sm:$0xff] %v16784_v6  ;;  %v19170_v45 = vmov %v19166_v33  ;;  %vm19171_vm5 = vmmov %vm19168_vm14  ;;  %v16811_v4 = vmul.f32 %v12539_v56, %v16579_v57  ;;  %12556 = vpow2.f32 %v5591_v44  ;;  %11088 = vmatmul.mubr.msk.bf16.gmra.mrb[168].mxu0 %vm19016_vm11, %v16784_v6  ;;  %v16816_v23 = vpack.c.bf16 %v5739_v58, %v5737_v34  ;;  %v11877_v34 = vld [vmem:[#allocation15 + $0x278] sm:$0xff]   ;;  %v12543_v58 = vpop.eup %12542 }
 0x72d   : > { %v5879_v1 = vsel %vm19168_vm14, %v19167_v14, %v19166_v33  ;;  %v5881_v30 = vsel %vm19171_vm5, %v19170_v45, %v19169_v53  ;;  %v16824_v53 = vpack.c.bf16 %v16544_v55, %v16530_v49  ;;  %v19174_v57 = vrot.slane %v16630_v37, 1  ;;  %vm19176_vm14 = vmmov %vm19171_vm5  ;;  %v12545_v2 = vpop.eup %12544  ;;  %10454 = vmatpush3.bf16.msra.mxu0 %v11877_v34 }
 0x72e   : > { %v16818_v26 = vpack.c.bf16 %v5881_v30, %v5879_v1  ;;  %v19175_v44 = vrot.slane %v16573_v48, 1  ;;  %v5892_v1 = vrot.slane %v16792_v61, 1  ;;  %v5627_v30 = vadd.f32 1.0, %v12541_v60  ;;  %vm19180_vm10 = vmmov %vm19171_vm5 }
 0x72f   : > { %v19178_v14 = vrot.slane %v16675_v62, 1  ;;  %v19179_v33 = vmov %v19174_v57  ;;  %v19182_v60 = vrot.slane %v16530_v49, 7  ;;  %v19183_v45 = vrot.slane %v16511_v28, 7 }
 0x730   : > { %19173 = vst [vmem:[#allocation79_spill] sm:$0xff] %v16818_v26  ;;  %v5883_v56 = vsel %vm19176_vm14, %v19175_v44, %v19174_v57  ;;  %11091 = vmatprep.mubr.msk.bf16.mxu0 %vm19019_vm6, %v16818_v26  ;;  %v16841_v57 = vld [vmem:[#allocation15 + $0x2c0] sm:$0xff]   ;;  %v16844_v44 = vmul.f32 %v12543_v58, %v16582_v18  ;;  %vm19184_vm5 = vcmask 1040384   ;;  %v19185_v26 = vrot.slane %v16544_v55, 7 }
 0x731   : > { %v5885_v24 = vsel %vm19180_vm10, %v19179_v33, %v19178_v14  ;;  %v5741_v10 = vsel %vm19184_vm5, %v19183_v45, %v19182_v60  ;;  %v19186_v39 = vmov %v19182_v60  ;;  %vm19187_vm14 = vmmov %vm19184_vm5  ;;  %v12547_v33 = vpop.eup %12546  ;;  %v16859_v14 = vmul.f32 %v12545_v2, %v16612_v41  ;;  %v19190_v41 = vld [vmem:[#allocation111_spill] sm:$0xff]  ;;  %11111 = vmatprep.subr.bf16.mxu0 %v16841_v57 }
 0x732   : > { %v16846_v6 = vpack.c.bf16 %v5885_v24, %v5883_v56  ;;  %v5743_v12 = vsel %vm19187_vm14, %v19186_v39, %v19185_v26  ;;  %12558 = vrcp.f32 %v5627_v30  ;;  %v19188_v24 = vrot.slane %v16713_v16, 1  ;;  %v12549_v58 = vpop.eup %12548  ;;  %vm19194_vm14 = vmmov %vm19180_vm10 }
 0x733   : > { %v16861_v18 = vpack.c.bf16 %v5743_v12, %v5741_v10  ;;  %v19189_v56 = vrot.slane %v16675_v62, 1  ;;  %v5898_v45 = vrot.slane %v16811_v4, 1  ;;  %v16871_v39 = vmul.f32 %v12547_v33, %v16615_v22  ;;  %v12551_v2 = vpop.eup %12550 }
 0x734   : > { %19181 = vst [vmem:[#allocation75_spill] sm:$0xff] %v16846_v6  ;;  %vm19191_vm5 = vnez %v19190_v41  ;;  %v19192_v10 = vrot.slane %v16668_v11, 1  ;;  %v19193_v26 = vmov %v19188_v24  ;;  %v5894_v60 = vrot.slane %v16844_v44, 1  ;;  %v12553_v33 = vpop.eup %12552  ;;  %11092 = vmatmul.mubr.msk.bf16.gmra.mrb[172].mxu0 %vm19022_vm3, %v16846_v6  ;;  %v11905_v41 = vld [vmem:[#allocation15 + $0x458] sm:$0xff]  }
 0x735   : > { %v5887_v28 = vsel %vm19180_vm10, %v19189_v56, %v19188_v24  ;;  %9168 = vmatmul.mubr.msk.bf16.gmra.mrb[204].mxu1 %vm19191_vm5, %v16816_v23  ;;  %v16884_v24 = vmul.f32 %v12549_v58, %v16624_v46  ;;  %v5904_v56 = vrot.slane %v16859_v14, 1  ;;  %v16893_v34 = vmul.f32 %v12551_v2, %v16627_v42  ;;  %v12555_v46 = vpop.eup %12554 }
 0x736   : > { %v5889_v30 = vsel %vm19194_vm14, %v19193_v26, %v19192_v10  ;;  %6333 = vmatprep.mubr.bf16.mxu1 %v16824_v53  ;;  %v16897_v26 = vpack.c.bf16 %v16537_v31, %v16522_v13  ;;  %v5900_v58 = vrot.slane %v16871_v39, 1  ;;  %v19197_v49 = vrot.slane %v16695_v43, 1  ;;  %vm19199_vm14 = vmmov %vm19180_vm10  ;;  %v12557_v12 = vpop.eup %12556 }
 0x737   : > { %v16887_v22 = vpack.c.bf16 %v5889_v30, %v5887_v28  ;;  %v5625_v30 = vadd.f32 1.0, %v12553_v33  ;;  %v5902_v36 = vrot.slane %v16893_v34, 1  ;;  %v5628_v15 = vadd.f32 1.0, %v12555_v46 }
 0x738   : > { %v5891_v42 = vsel %vm19180_vm10, %v19192_v10, %v19197_v49  ;;  %v19198_v33 = vmov %v19197_v49  ;;  %v19201_v49 = vrot.slane %v16544_v55, 7  ;;  %vm19202_vm10 = vcmask 1040384  }
 0x739   : > { %19195 = vst [vmem:[#allocation82_spill] sm:$0xff] %v16887_v22  ;;  %11095 = vmatprep.mubr.msk.bf16.mxu0 %vm19025_vm13, %v16887_v22  ;;  %v5893_v28 = vsel %vm19199_vm14, %v19198_v33, %v5892_v1  ;;  %12560 = vrcp.f32 %v5625_v30  ;;  %v19203_v46 = vrot.slane %v16537_v31, 7  ;;  %v19204_v2 = vmov %v19200_v5  ;;  %vm19205_vm3 = vmmov %vm19202_vm10 }
 0x73a   : > { %v16917_v6 = vpack.c.bf16 %v5893_v28, %v5891_v42  ;;  %v5745_v10 = vsel %vm19202_vm10, %v19201_v49, %v19200_v5  ;;  %12562 = vrcp.f32 %v5628_v15  ;;  %v5626_v22 = vadd.f32 1.0, %v12557_v12  ;;  %vm19207_vm13 = vmmov %vm19199_vm14 }
 0x73b   : > { %v5747_v19 = vsel %vm19205_vm3, %v19204_v2, %v19203_v46  ;;  %v5895_v30 = vsel %vm19199_vm14, %v5892_v1, %v5894_v60  ;;  %v19206_v28 = vrot.slane %v16719_v35, 1  ;;  %v16937_v55 = vpack.c.bf16 %v16633_v8, %v16587_v59  ;;  %vm19209_vm10 = vmmov %vm19207_vm13 }
 0x73c   : > { %v16929_v63 = vpack.c.bf16 %v5747_v19, %v5745_v10  ;;  %vm19210_vm6 = vmmov %vm19209_vm10  ;;  %12564 = vrcp.f32 %v5626_v22  ;;  %v19211_v19 = vld [vmem:[#allocation114_spill] sm:$0xff]  ;;  %v19214_v12 = vmov %v19203_v46  ;;  %v12559_v49 = vpop.eup %12558  ;;  %11096 = vmatmul.mubr.msk.bf16.gmra.mrb[176].mxu0 %vm19026_vm9, %v16917_v6 }
 0x73d   : > { %v5897_v42 = vsel %vm19207_vm13, %v5894_v60, %v19206_v28  ;;  %v19208_v5 = vmov %v19206_v28  ;;  %v5901_v2 = vsel %vm19210_vm6, %v5898_v45, %v5900_v58  ;;  %vm19212_vm3 = vnez %v19211_v19  ;;  %vm19219_vm14 = vmmov %vm19209_vm10  ;;  %v19306_v19 = vld [vmem:[#allocation112_spill] sm:$0xff] }
 0x73e   : > { %v5899_v13 = vsel %vm19209_vm10, %v19208_v5, %v5898_v45  ;;  %9171 = vmatmul.mubr.msk.bf16.gmra.mrb[208].mxu1 %vm19212_vm3, %v16861_v18  ;;  %v16946_v15 = vpack.c.bf16 %v5897_v42, %v5895_v30  ;;  %v19213_v60 = vrot.slane %v16587_v59, 7  ;;  %vm19215_vm13 = vcmask 1040384  }
 0x73f   : > { %v16948_v1 = vpack.c.bf16 %v5901_v2, %v5899_v13  ;;  %6341 = vmatprep.mubr.bf16.mxu1 %v16897_v26  ;;  %v19216_v45 = vrot.slane %v16633_v8, 7  ;;  %vm19218_vm6 = vmmov %vm19215_vm13  ;;  %v5903_v46 = vsel %vm19219_vm14, %v5900_v58, %v5902_v36  ;;  %v5905_v30 = vsel %vm19209_vm10, %v5902_v36, %v5904_v56  ;;  %v19223_v2 = vld [vmem:[#allocation137_spill] sm:$0xff] }
 0x740   : > { %v5749_v33 = vsel %vm19215_vm13, %v19214_v12, %v19213_v60  ;;  %v19217_v22 = vmov %v19213_v60  ;;  %v16965_v28 = vpack.c.bf16 %v16630_v37, %v16573_v48  ;;  %v16968_v31 = vmul.f32 %v12559_v49, %v16702_v52  ;;  %vm19222_vm13 = vmmov %vm19209_vm10  ;;  %11099 = vmatprep.mubr.msk.bf16.mxu0 %vm19028_vm15, %v16946_v15 }
 0x741   : > { %v5751_v10 = vsel %vm19218_vm6, %v19217_v22, %v19216_v45  ;;  %v16972_v5 = vpack.c.bf16 %v5905_v30, %v5903_v46  ;;  %v19221_v13 = vrot.slane %v16884_v24, 1  ;;  %v19224_v36 = vrot.slane %v16573_v48, 7  ;;  %vm19228_vm14 = vmmov %vm19218_vm6 }
 0x742   : > { %v16970_v42 = vpack.c.bf16 %v5751_v10, %v5749_v33  ;;  %v19225_v58 = vmov %v19216_v45  ;;  %v19226_v52 = vrot.slane %v16630_v37, 7  ;;  %v16992_v49 = vpack.c.bf16 %v16713_v16, %v16675_v62  ;;  %vm19231_vm10 = vmmov %vm19218_vm6 }
 0x743   : > { %19220 = vst [vmem:[#allocation83_spill] sm:$0xff] %v16972_v5  ;;  %v5907_v59 = vsel %vm19222_vm13, %v5904_v56, %v19221_v13  ;;  %v5753_v60 = vsel %vm19218_vm6, %v19225_v58, %v19224_v36  ;;  %v19227_v12 = vmov %v19224_v36  ;;  %v19229_v56 = vrot.slane %v16675_v62, 7  ;;  %vm19234_vm13 = vmmov %vm19218_vm6 }
 0x744   : > { %v5755_v33 = vsel %vm19228_vm14, %v19227_v12, %v19226_v52  ;;  %v19230_v45 = vmov %v19226_v52  ;;  %v5774_v8 = vrot.slane %v16893_v34, 7  ;;  %v5912_v10 = vrot.slane %v16968_v31, 1  ;;  %vm19239_vm14 = vmmov %vm19218_vm6  ;;  %11100 = vmatmul.mubr.msk.bf16.gmra.mrb[180].mxu0 %vm19029_vm12, %v16948_v1 }
 0x745   : > { %v5757_v22 = vsel %vm19231_vm10, %v19230_v45, %v19229_v56  ;;  %v17004_v48 = vpack.c.bf16 %v5755_v33, %v5753_v60  ;;  %v19232_v46 = vrot.slane %v16713_v16, 7  ;;  %v19233_v30 = vmov %v19229_v56  ;;  %vm19242_vm10 = vmmov %vm19218_vm6  ;;  %11103 = vmatprep.mubr.msk.bf16.mxu0 %vm19033_vm2, %v16972_v5 }
 0x746   : > { %v17015_v37 = vpack.c.bf16 %v16695_v43, %v16668_v11  ;;  %v19235_v58 = vrot.slane %v16668_v11, 7  ;;  %v19237_v60 = vrot.slane %v16695_v43, 7  ;;  %v17031_v45 = vpack.c.bf16 %v16844_v44, %v16792_v61 }
 0x747   : > { %v5759_v13 = vsel %vm19234_vm13, %v19233_v30, %v19232_v46  ;;  %v19236_v52 = vmov %v19232_v46  ;;  %v19243_v30 = vrot.slane %v16844_v44, 7  ;;  %vm19245_vm13 = vmmov %vm19218_vm6  ;;  %v17067_v44 = vpack.c.bf16 %v16893_v34, %v16871_v39 }
 0x748   : > { %v17011_v36 = vpack.c.bf16 %v5759_v13, %v5757_v22  ;;  %v5761_v12 = vsel %vm19218_vm6, %v19236_v52, %v19235_v58  ;;  %v19238_v33 = vmov %v19235_v58  ;;  %v19240_v22 = vrot.slane %v16792_v61, 7  ;;  %v12561_v58 = vpop.eup %12560 }
 0x749   : > { %v5763_v62 = vsel %vm19239_vm14, %v19238_v33, %v19237_v60  ;;  %v19241_v46 = vmov %v19237_v60  ;;  %v19246_v60 = vrot.slane %v16719_v35, 7  ;;  %v19247_v33 = vmov %v19243_v30  ;;  %vm19250_vm14 = vmmov %vm19218_vm6 }
 0x74a   : > { %v17027_v56 = vpack.c.bf16 %v5763_v62, %v5761_v12  ;;  %v5765_v16 = vsel %vm19242_vm10, %v19241_v46, %v19240_v22  ;;  %v19244_v13 = vmov %v19240_v22  ;;  %v17047_v12 = vpack.c.bf16 %v16811_v4, %v16719_v35  ;;  %v12563_v46 = vpop.eup %12562 }
 0x74b   : > { %v5767_v11 = vsel %vm19245_vm13, %v19244_v13, %v19243_v30  ;;  %v5769_v43 = vsel %vm19218_vm6, %v19247_v33, %v19246_v60  ;;  %v19248_v62 = vrot.slane %v16811_v4, 7  ;;  %v19249_v22 = vmov %v19246_v60  ;;  %v19251_v30 = vld [vmem:[#allocation119_spill] sm:$0xff]  ;;  %vm19255_vm13 = vmmov %vm19218_vm6 }
 0x74c   : > { %v17043_v52 = vpack.c.bf16 %v5767_v11, %v5765_v16  ;;  %v5689_v16 = vmul.f32 %v12561_v58, %v16707_v17  ;;  %vm19252_vm10 = vnez %v19251_v30  ;;  %v19253_v11 = vrot.slane %v16871_v39, 7 }
 0x74d   : > { %v5771_v61 = vsel %vm19250_vm14, %v19249_v22, %v19248_v62  ;;  %9174 = vmatmul.mubr.msk.bf16.gmra.mrb[212].mxu1 %vm19252_vm10, %v16929_v63  ;;  %v19254_v60 = vmov %v19248_v62  ;;  %v5692_v33 = vmul.f32 %v12563_v46, %v16731_v7  ;;  %v19257_v34 = vrot.slane %v16859_v14, 7  ;;  %vm19258_vm14 = vmmov %vm19218_vm6  ;;  %v12565_v22 = vpop.eup %12564 }
 0x74e   : > { %v17063_v13 = vpack.c.bf16 %v5771_v61, %v5769_v43  ;;  %v5773_v35 = vsel %vm19255_vm13, %v19254_v60, %v19253_v11  ;;  %6349 = vmatprep.mubr.bf16.mxu1 %v16937_v55  ;;  %v19256_v17 = vmov %v19253_v11  ;;  %v17081_v43 = vpack.c.bf16 %v16884_v24, %v16859_v14  ;;  %vm19261_vm13 = vmmov %vm19218_vm6 }
 0x74f   : > { %v5775_v58 = vsel %vm19218_vm6, %v19256_v17, %v5774_v8  ;;  %v5777_v62 = vsel %vm19258_vm14, %v5774_v8, %v19257_v34  ;;  %v5780_v4 = vrot.slane %v5689_v16, 7  ;;  %v5908_v61 = vrot.slane %v5689_v16, 1  ;;  %vm19265_vm14 = vmmov %vm19261_vm13 }
 0x750   : > { %v17086_v11 = vpack.c.bf16 %v5775_v58, %v5773_v35  ;;  %v19259_v7 = vrot.slane %v16884_v24, 7  ;;  %v19260_v46 = vmov %v19257_v34  ;;  %v5786_v60 = vrot.slane %v5692_v33, 7  ;;  %vm19268_vm2 = vmmov %vm19265_vm14 }
 0x751   : > { %v5914_v17 = vrot.slane %v5692_v33, 1  ;;  %v5690_v27 = vmul.f32 %v12565_v22, %v16747_v47  ;;  %v5784_v34 = vrot.slane %v16968_v31, 7  ;;  %v19262_v14 = vrot.slane %v16884_v24, 1 }
 0x752   : > { %v5779_v39 = vsel %vm19261_vm13, %v19260_v46, %v19259_v7  ;;  %vm19263_vm6 = vcmask 1046528   ;;  %v19264_v58 = vmov %v19259_v7  ;;  %v17110_v22 = vpack.c.bf16 %v5692_v33, %v16968_v31  ;;  %v19271_v33 = vld [vmem:[#allocation123_spill] sm:$0xff] }
 0x753   : > { %v17097_v8 = vpack.c.bf16 %v5779_v39, %v5777_v62  ;;  %v5909_v35 = vsel %vm19263_vm6, %v19262_v14, %v5908_v61  ;;  %v5781_v47 = vsel %vm19265_vm14, %v19264_v58, %v5780_v4  ;;  %v5782_v7 = vrot.slane %v5690_v27, 7  ;;  %vm19266_vm13 = vmmov %vm19263_vm6 }
 0x754   : > { %v5910_v62 = vrot.slane %v5690_v27, 1  ;;  %v17112_v46 = vpack.c.bf16 %v5909_v35, %v5907_v59  ;;  %v5915_v39 = vsel %vm19266_vm13, %v5912_v10, %v5914_v17  ;;  %vm19267_vm12 = vmmov %vm19263_vm6  ;;  %v17116_v5 = vpack.c.bf16 %v5690_v27, %v5689_v16 }
 0x755   : > { %v5948_v32 = vsel %vm19267_vm12, %v5914_v17, 0.0  ;;  %v5787_v51 = vsel %vm19268_vm2, %v5784_v34, %v5786_v60  ;;  %vm19269_vm15 = vmmov %vm19263_vm6  ;;  %vm19272_vm9 = vnez %v19271_v33  ;;  %v19282_v60 = vld [vmem:[#allocation131_spill] sm:$0xff]  ;;  %v11879_v17 = vld [vmem:[#allocation15 + $0x2c8] sm:$0xff]  }
 0x756   : > { %v5911_v14 = vsel %vm19263_vm6, %v5908_v61, %v5910_v62  ;;  %v5913_v24 = vsel %vm19269_vm15, %v5910_v62, %v5912_v10  ;;  %v17121_v58 = vpack.c.bf16 %v5948_v32, %v5915_v39  ;;  %vm19270_vm14 = vmmov %vm19268_vm2  ;;  %9177 = vmatmul.mubr.msk.bf16.gmra.mrb[216].mxu1 %vm19272_vm9, %v16970_v42  ;;  %v19274_v10 = vld [vmem:[#allocation146_spill] sm:$0xff]  ;;  %11104 = vmatmul.mubr.msk.bf16.gmra.mrb[184].mxu0 %vm15507_vm8, %v17112_v46  ;;  %v19275_v32 = vld [vmem:[#allocation148_spill] sm:$0xff] }
 0x757   : > { %v5783_v31 = vsel %vm19270_vm14, %v5780_v4, %v5782_v7  ;;  %v17127_v59 = vpack.c.bf16 %v5913_v24, %v5911_v14  ;;  %vm19273_vm12 = vmmov %vm19268_vm2  ;;  %6357 = vmatprep.mubr.bf16.mxu1 %v16965_v28  ;;  %vm19276_vm15 = vnez %v19275_v32  ;;  %v19277_v4 = vld [vmem:[#allocation128_spill] sm:$0xff]  ;;  %v19279_v61 = vld [vmem:[#allocation149_spill] sm:$0xff]  ;;  %vm19283_vm6 = vnez %v19282_v60 }
 0x758   : > { %v17129_v35 = vpack.c.bf16 %v5783_v31, %v5781_v47  ;;  %v5785_v27 = vsel %vm19273_vm12, %v5782_v7, %v5784_v34  ;;  %vm19278_vm2 = vnez %v19277_v4  ;;  %vm19280_vm13 = vnez %v19279_v61  ;;  %v11883_v34 = vld [vmem:[#allocation15 + $0x2d0] sm:$0xff]   ;;  %v19284_v47 = vld [vmem:[#allocation136_spill] sm:$0xff]  ;;  %v11899_v62 = vld [vmem:[#allocation15 + $0x2e8] sm:$0xff]  }
 0x759   : > { %v17133_v16 = vpack.c.bf16 %v5787_v51, %v5785_v27  ;;  %11107 = vmatprep.mubr.msk.bf16.mxu0 %vm19276_vm15, %v17127_v59  ;;  %v19281_v51 = vmov 0   ;;  %vm19285_vm14 = vnez %v19284_v47  ;;  %v11892_v7 = vld [vmem:[#allocation15 + $0x2d8] sm:$0xff]   ;;  %v11902_v14 = vld [vmem:[#allocation15 + $0x440] sm:$0xff]   ;;  %v19290_v24 = vld [vmem:[#allocation143_spill] sm:$0xff] }
 0x75a   : > { %v11901_v39 = vld [vmem:[#allocation15 + $0x2f8] sm:$0xff]   ;;  %v19292_v31 = vld [vmem:[#allocation145_spill] sm:$0xff]  ;;  %v19294_v27 = vld [vmem:[#allocation147_spill] sm:$0xff] }
 0x75b   : > { %vm19293_vm15 = vnez %v19292_v31  ;;  %vm19295_vm8 = vnez %v19294_v27  ;;  %v19314_v4 = vld [vmem:[#allocation79_spill] sm:$0xff]  ;;  %v19315_v60 = vld [vmem:[#allocation125_spill] sm:$0xff]  ;;  %v19329_v27 = vld [vmem:[#allocation142_spill] sm:$0xff] }
 0x75c   : > { %v19318_v47 = vld [vmem:[#allocation129_spill] sm:$0xff] }
 0x75e   : > { %9180 = vmatmul.mubr.msk.bf16.gmra.mrb[220].mxu1 %vm19278_vm2, %v17004_v48  ;;  %11108 = vmatmul.mubr.msk.bf16.gmra.mrb[188].mxu0 %vm19280_vm13, %v17121_v58  ;;  %vm19291_vm13 = vnez %v19290_v24 }
 0x75f   : > { %6365 = vmatprep.mubr.bf16.mxu1 %v16992_v49  ;;  %6767 = vmatprep.mubr.bf16.mxu0 %v19281_v51 }
 0x766   : > { %9183 = vmatmul.mubr.msk.bf16.gmra.mrb[224].mxu1 %vm19283_vm6, %v17011_v36  ;;  %6768 = vmatmul.mubr.bf16.vlgmr.msra.gmra.mrb[192].mxu0 %v19281_v51 }
 0x767   : > { %6373 = vmatprep.mubr.bf16.mxu1 %v17015_v37  ;;  %11112 = vmatpush3.bf16.msra.mxu0 %v16841_v57  ;;  %v19286_v57 = vld [vmem:[#allocation138_spill] sm:$0xff] }
 0x768   : > { %6775 = vmatprep.mubr.bf16.mxu0 %v16506_v50  ;;  %11113 = vmatprep.subr.bf16.mxu0 %v11879_v17  ;;  %v11898_v50 = vld [vmem:[#allocation15 + $0x2e0] sm:$0xff]   ;;  %vm19287_vm12 = vnez %v19286_v57 }
 0x76b   : > { %11114 = vmatpush3.bf16.msra.mxu0 %v11879_v17  ;;  %v19296_v17 = vld [vmem:[#allocation150_spill] sm:$0xff] }
 0x76c   : > { %11115 = vmatprep.subr.bf16.mxu0 %v11883_v34  ;;  %vm19297_vm11 = vnez %v19296_v17  ;;  %v19333_v17 = vld [vmem:[#allocation44_spill] sm:$0xff] }
 0x76e   : > { %9186 = vmatmul.mubr.msk.bf16.gmra.mrb[228].mxu1 %vm19285_vm14, %v17027_v56  ;;  %9669 = vmatmul.mubr.msk.bf16.gmra.mrb[196].mxu0 %vm14573_vm7, %v16458_v21  ;;  %v11900_v21 = vld [vmem:[#allocation15 + $0x2f0] sm:$0xff]   ;;  %vm19289_vm7 = vnez %v19288_v29 }
 0x76f   : > { %6381 = vmatprep.mubr.bf16.mxu1 %v17031_v45  ;;  %6783 = vmatprep.mubr.bf16.mxu0 %v16568_v54 }
 0x770   : > { %11116 = vmatpush3.bf16.msra.mxu0 %v11883_v34  ;;  %v19317_v34 = vld [vmem:[#allocation75_spill] sm:$0xff] }
 0x771   : > { %11117 = vmatprep.subr.bf16.mxu0 %v11892_v7 }
 0x774   : > { %11118 = vmatpush3.bf16.msra.mxu0 %v11892_v7  ;;  %v19321_v7 = vld [vmem:[#allocation132_spill] sm:$0xff] }
 0x775   : > { %11119 = vmatprep.subr.bf16.mxu0 %v11898_v50 }
 0x776   : > { %9189 = vmatmul.mubr.msk.bf16.gmra.mrb[232].mxu1 %vm19287_vm12, %v17043_v52  ;;  %9672 = vmatmul.mubr.msk.bf16.gmra.mrb[200].mxu0 %vm19130_vm0, %v16656_v9 }
 0x777   : > { %6389 = vmatprep.mubr.bf16.mxu1 %v17047_v12  ;;  %6791 = vmatprep.mubr.bf16.mxu0 %v16665_v38 }
 0x778   : > { %11120 = vmatpush3.bf16.msra.mxu0 %v11898_v50 }
 0x779   : > { %11121 = vmatprep.subr.bf16.mxu0 %v11899_v62 }
 0x77c   : > { %11122 = vmatpush3.bf16.msra.mxu0 %v11899_v62 }
 0x77d   : > { %11123 = vmatprep.subr.bf16.mxu0 %v11900_v21 }
 0x77e   : > { %9192 = vmatmul.mubr.msk.bf16.gmra.mrb[236].mxu1 %vm19289_vm7, %v17063_v13  ;;  %9675 = vmatmul.mubr.msk.bf16.gmra.mrb[204].mxu0 %vm19152_vm1, %v16749_v3 }
 0x77f   : > { %6397 = vmatprep.mubr.bf16.mxu1 %v17067_v44  ;;  %6799 = vmatprep.mubr.bf16.mxu0 %v16769_v25 }
 0x780   : > { %11124 = vmatpush3.bf16.msra.mxu0 %v11900_v21 }
 0x781   : > { %11125 = vmatprep.subr.bf16.mxu0 %v11901_v39 }
 0x784   : > { %11126 = vmatpush3.bf16.msra.mxu0 %v11901_v39 }
 0x785   : > { %11159 = vmatprep.subr.bf16.mxu0 %v11902_v14 }
 0x786   : > { %9195 = vmatmul.mubr.msk.bf16.gmra.mrb[240].mxu1 %vm19291_vm13, %v17086_v11  ;;  %9678 = vmatmul.mubr.msk.bf16.gmra.mrb[208].mxu0 %vm19191_vm5, %v16816_v23 }
 0x787   : > { %6405 = vmatprep.mubr.bf16.mxu1 %v17081_v43  ;;  %6807 = vmatprep.mubr.bf16.mxu0 %v16824_v53 }
 0x78e   : > { %9198 = vmatmul.mubr.msk.bf16.gmra.mrb[244].mxu1 %vm19293_vm15, %v17097_v8  ;;  %9681 = vmatmul.mubr.msk.bf16.gmra.mrb[212].mxu0 %vm19212_vm3, %v16861_v18 }
 0x78f   : > { %6413 = vmatprep.mubr.bf16.mxu1 %v17116_v5  ;;  %6815 = vmatprep.mubr.bf16.mxu0 %v16897_v26 }
 0x796   : > { %9201 = vmatmul.mubr.msk.bf16.gmra.mrb[248].mxu1 %vm19295_vm8, %v17129_v35  ;;  %9684 = vmatmul.mubr.msk.bf16.gmra.mrb[216].mxu0 %vm19252_vm10, %v16929_v63 }
 0x797   : > { %6421 = vmatprep.mubr.bf16.mxu1 %v17110_v22  ;;  %6823 = vmatprep.mubr.bf16.mxu0 %v16937_v55 }
 0x79e   : > { %9204 = vmatmul.mubr.msk.bf16.gmra.mrb[252].mxu1 %vm19297_vm11, %v17133_v16  ;;  %9687 = vmatmul.mubr.msk.bf16.gmra.mrb[220].mxu0 %vm19272_vm9, %v16970_v42 }
 0x79f   : > { %7281 = vmatprep.mubr.bf16.mxu1 %v16568_v54  ;;  %6831 = vmatprep.mubr.bf16.mxu0 %v16965_v28 }
 0x7a6   : > { %9759 = vmatmul.mubr.msk.bf16.vlgmr.msra.gmra.mrb[0].mxu1 %vm19130_vm0, %v16656_v9  ;;  %9690 = vmatmul.mubr.msk.bf16.gmra.mrb[224].mxu0 %vm19278_vm2, %v17004_v48  ;;  %vm19307_vm0 = vnez %v19306_v19 }
 0x7a7   : > { %7289 = vmatprep.mubr.bf16.mxu1 %v16665_v38  ;;  %6839 = vmatprep.mubr.bf16.mxu0 %v16992_v49 }
 0x7ae   : > { %9762 = vmatmul.mubr.msk.bf16.gmra.mrb[4].mxu1 %vm19152_vm1, %v16749_v3  ;;  %9693 = vmatmul.mubr.msk.bf16.gmra.mrb[228].mxu0 %vm19283_vm6, %v17011_v36 }
 0x7af   : > { %7297 = vmatprep.mubr.bf16.mxu1 %v16769_v25  ;;  %6847 = vmatprep.mubr.bf16.mxu0 %v17015_v37  ;;  %v19298_v25 = vld [vmem:[#allocation103_spill] sm:$0xff] }
 0x7b6   : > { %9765 = vmatmul.mubr.msk.bf16.gmra.mrb[8].mxu1 %vm19191_vm5, %v16816_v23  ;;  %9696 = vmatmul.mubr.msk.bf16.gmra.mrb[232].mxu0 %vm19285_vm14, %v17027_v56  ;;  %v19300_v23 = vld [vmem:[#allocation70_spill] sm:$0xff] }
 0x7b7   : > { %7305 = vmatprep.mubr.bf16.mxu1 %v16824_v53  ;;  %6855 = vmatprep.mubr.bf16.mxu0 %v17031_v45  ;;  %v19301_v53 = vld [vmem:[#allocation106_spill] sm:$0xff] }
 0x7b8   : > { %vm19302_vm1 = vnez %v19301_v53 }
 0x7be   : > { %9768 = vmatmul.mubr.msk.bf16.gmra.mrb[12].mxu1 %vm19212_vm3, %v16861_v18  ;;  %9699 = vmatmul.mubr.msk.bf16.gmra.mrb[236].mxu0 %vm19287_vm12, %v17043_v52  ;;  %v11904_v18 = vld [vmem:[#allocation15 + $0x450] sm:$0xff]  }
 0x7bf   : > { %7313 = vmatprep.mubr.bf16.mxu1 %v16897_v26  ;;  %6863 = vmatprep.mubr.bf16.mxu0 %v17047_v12  ;;  %v19303_v26 = vld [vmem:[#allocation71_spill] sm:$0xff] }
 0x7c6   : > { %9771 = vmatmul.mubr.msk.bf16.gmra.mrb[16].mxu1 %vm19252_vm10, %v16929_v63  ;;  %9702 = vmatmul.mubr.msk.bf16.gmra.mrb[240].mxu0 %vm19289_vm7, %v17063_v13  ;;  %vm19316_vm10 = vnez %v19315_v60 }
 0x7c7   : > { %7321 = vmatprep.mubr.bf16.mxu1 %v16937_v55  ;;  %6871 = vmatprep.mubr.bf16.mxu0 %v17067_v44 }
 0x7ce   : > { %9774 = vmatmul.mubr.msk.bf16.gmra.mrb[20].mxu1 %vm19272_vm9, %v16970_v42  ;;  %9705 = vmatmul.mubr.msk.bf16.gmra.mrb[244].mxu0 %vm19291_vm13, %v17086_v11  ;;  %vm19299_vm9 = vnez %v19298_v25  ;;  %v11907_v42 = vld [vmem:[#allocation15 + $0x468] sm:$0xff]  }
 0x7cf   : > { %7329 = vmatprep.mubr.bf16.mxu1 %v16965_v28  ;;  %6879 = vmatprep.mubr.bf16.mxu0 %v17081_v43  ;;  %v11906_v28 = vld [vmem:[#allocation15 + $0x460] sm:$0xff]  }
 0x7d2   : > { %v10319_v63 = vpop.f32.mrb[192].mxu1 }
 0x7d3   : > { %v10320_v54 = vpop.f32.mrb[193].mxu1 }
 0x7d4   : > { %v17279_v9 = vadd.f32 %v10320_v54, %v10319_v63  ;;  %v10322_v38 = vpop.f32.mrb[194].mxu1 }
 0x7d5   : > { %v10323_v3 = vpop.f32.mrb[195].mxu1 }
 0x7d6   : > { %9777 = vmatmul.mubr.msk.bf16.gmra.mrb[24].mxu1 %vm19278_vm2, %v17004_v48  ;;  %9708 = vmatmul.mubr.msk.bf16.gmra.mrb[248].mxu0 %vm19293_vm15, %v17097_v8  ;;  %v17282_v20 = vadd.f32 %v10323_v3, %v10322_v38  ;;  %v19309_v48 = vld [vmem:[#allocation115_spill] sm:$0xff]  ;;  %vm19319_vm2 = vnez %v19318_v47 }
 0x7d7   : > { %7337 = vmatprep.mubr.bf16.mxu1 %v16992_v49  ;;  %6887 = vmatprep.mubr.bf16.mxu0 %v17116_v5  ;;  %v19308_v49 = vld [vmem:[#allocation74_spill] sm:$0xff]  ;;  %vm19310_vm5 = vnez %v19309_v48 }
 0x7de   : > { %9780 = vmatmul.mubr.msk.bf16.gmra.mrb[28].mxu1 %vm19283_vm6, %v17011_v36  ;;  %9711 = vmatmul.mubr.msk.bf16.gmra.mrb[252].mxu0 %vm19295_vm8, %v17129_v35  ;;  %v19311_v36 = vld [vmem:[#allocation78_spill] sm:$0xff]  ;;  %vm19323_vm6 = vnez %v19223_v2 }
 0x7df   : > { %7345 = vmatprep.mubr.bf16.mxu1 %v17015_v37  ;;  %11127 = vmatprep.mubr.bf16.mxu0 %v19281_v51  ;;  %v19312_v37 = vld [vmem:[#allocation121_spill] sm:$0xff] }
 0x7e0   : > { %vm19313_vm3 = vnez %v19312_v37  ;;  %v11913_v37 = vld [vmem:[#allocation20 + $0x8] sm:$0xff]  }
 0x7e6   : > { %9783 = vmatmul.mubr.msk.bf16.gmra.mrb[32].mxu1 %vm19285_vm14, %v17027_v56  ;;  %11128 = vmatmul.mubr.msk.bf16.vlgmr.msra.gmra.mrb[160].mxu0 %vm19299_vm9, %v16589_v40  ;;  %v19305_v40 = vld [vmem:[#allocation67_spill] sm:$0xff] }
 0x7e7   : > { %7353 = vmatprep.mubr.bf16.mxu1 %v17031_v45  ;;  %11160 = vmatpush3.bf16.msra.mxu0 %v11902_v14  ;;  %v11908_v56 = vld [vmem:[#allocation15 + $0x470] sm:$0xff]   ;;  %v19326_v14 = vld [vmem:[#allocation141_spill] sm:$0xff] }
 0x7e8   : > { %11131 = vmatprep.mubr.msk.bf16.mxu0 %vm19302_vm1, %v19300_v23  ;;  %11161 = vmatprep.subr.bf16.mxu0 %v11903_v0  ;;  %vm19327_vm14 = vnez %v19326_v14 }
 0x7eb   : > { %11162 = vmatpush3.bf16.msra.mxu0 %v11903_v0 }
 0x7ec   : > { %11163 = vmatprep.subr.bf16.mxu0 %v11904_v18  ;;  %v10325_v45 = vpop.f32.mrb[196].mxu1 }
 0x7ee   : > { %9786 = vmatmul.mubr.msk.bf16.gmra.mrb[36].mxu1 %vm19287_vm12, %v17043_v52  ;;  %11132 = vmatmul.mubr.msk.bf16.gmra.mrb[164].mxu0 %vm19007_vm4, %v19303_v26  ;;  %v10326_v52 = vpop.f32.mrb[197].mxu1  ;;  %vm19331_vm12 = vnez %v19274_v10 }
 0x7ef   : > { %7361 = vmatprep.mubr.bf16.mxu1 %v17047_v12  ;;  %11135 = vmatprep.mubr.msk.bf16.mxu0 %vm19307_vm0, %v19305_v40  ;;  %v17313_v12 = vadd.f32 %v10326_v52, %v10325_v45  ;;  %v10328_v30 = vpop.f32.mrb[198].mxu1 }
 0x7f0   : > { %11164 = vmatpush3.bf16.msra.mxu0 %v11904_v18 }
 0x7f1   : > { %11165 = vmatprep.subr.bf16.mxu0 %v11905_v41 }
 0x7f4   : > { %11166 = vmatpush3.bf16.msra.mxu0 %v11905_v41 }
 0x7f5   : > { %11167 = vmatprep.subr.bf16.mxu0 %v11906_v28 }
 0x7f6   : > { %9789 = vmatmul.mubr.msk.bf16.gmra.mrb[40].mxu1 %vm19289_vm7, %v17063_v13  ;;  %11136 = vmatmul.mubr.msk.bf16.gmra.mrb[168].mxu0 %vm19310_vm5, %v19308_v49  ;;  %v10329_v13 = vpop.f32.mrb[199].mxu1 }
 0x7f7   : > { %7369 = vmatprep.mubr.bf16.mxu1 %v17067_v44  ;;  %11139 = vmatprep.mubr.msk.bf16.mxu0 %vm19313_vm3, %v19311_v36  ;;  %v11909_v44 = vld [vmem:[#allocation15 + $0x478] sm:$0xff]   ;;  %v17316_v33 = vadd.f32 %v10329_v13, %v10328_v30 }
 0x7f8   : > { %11168 = vmatpush3.bf16.msra.mxu0 %v11906_v28 }
 0x7f9   : > { %11169 = vmatprep.subr.bf16.mxu0 %v11907_v42 }
 0x7fc   : > { %11170 = vmatpush3.bf16.msra.mxu0 %v11907_v42 }
 0x7fd   : > { %11171 = vmatprep.subr.bf16.mxu0 %v11908_v56 }
 0x7fe   : > { %9792 = vmatmul.mubr.msk.bf16.gmra.mrb[44].mxu1 %vm19291_vm13, %v17086_v11  ;;  %11140 = vmatmul.mubr.msk.bf16.gmra.mrb[172].mxu0 %vm19316_vm10, %v19314_v4  ;;  %v19320_v11 = vld [vmem:[#allocation82_spill] sm:$0xff]  ;;  %vm19322_vm13 = vnez %v19321_v7 }
 0x7ff   : > { %7377 = vmatprep.mubr.bf16.mxu1 %v17081_v43  ;;  %11143 = vmatprep.mubr.msk.bf16.mxu0 %vm19319_vm2, %v19317_v34  ;;  %v10331_v43 = vpop.f32.mrb[200].mxu1 }
 0x800   : > { %11172 = vmatpush3.bf16.msra.mxu0 %v11908_v56  ;;  %v10332_v50 = vpop.f32.mrb[201].mxu1 }
 0x801   : > { %11173 = vmatprep.subr.bf16.mxu0 %v11909_v44  ;;  %v17334_v57 = vadd.f32 %v10332_v50, %v10331_v43  ;;  %v10334_v62 = vpop.f32.mrb[202].mxu1  ;;  %v11911_v50 = vld [vmem:[#allocation20] sm:$0xff]  }
 0x802   : > { %v10335_v21 = vpop.f32.mrb[203].mxu1 }
 0x803   : > { %v17336_v29 = vadd.f32 %v10335_v21, %v10334_v62 }
 0x804   : > { %11174 = vmatpush3.bf16.msra.mxu0 %v11909_v44 }
 0x806   : > { %9795 = vmatmul.mubr.msk.bf16.gmra.mrb[48].mxu1 %vm19293_vm15, %v17097_v8  ;;  %11144 = vmatmul.mubr.msk.bf16.gmra.mrb[176].mxu0 %vm19322_vm13, %v19320_v11  ;;  %v19324_v8 = vld [vmem:[#allocation139_spill] sm:$0xff] }
 0x807   : > { %7385 = vmatprep.mubr.bf16.mxu1 %v17116_v5  ;;  %11147 = vmatprep.mubr.msk.bf16.mxu0 %vm19323_vm6, %v16917_v6  ;;  %vm19325_vm15 = vnez %v19324_v8 }
 0x808   : > { %v10337_v5 = vpop.f32.mrb[204].mxu1 }
 0x809   : > { %v10338_v39 = vpop.f32.mrb[205].mxu1 }
 0x80a   : > { %v17348_v24 = vadd.f32 %v10338_v39, %v10337_v5  ;;  %v10340_v31 = vpop.f32.mrb[206].mxu1 }
 0x80b   : > { %v10341_v63 = vpop.f32.mrb[207].mxu1 }
 0x80c   : > { %v17350_v54 = vadd.f32 %v10341_v63, %v10340_v31 }
 0x80e   : > { %9798 = vmatmul.mubr.msk.bf16.gmra.mrb[52].mxu1 %vm19295_vm8, %v17129_v35  ;;  %11148 = vmatmul.mubr.msk.bf16.gmra.mrb[180].mxu0 %vm19325_vm15, %v16946_v15  ;;  %v19328_v35 = vld [vmem:[#allocation83_spill] sm:$0xff]  ;;  %vm19330_vm8 = vnez %v19329_v27 }
 0x80f   : > { %7393 = vmatprep.mubr.bf16.mxu1 %v17110_v22  ;;  %11151 = vmatprep.mubr.msk.bf16.mxu0 %vm19327_vm14, %v16948_v1 }
 0x811   : > { %v10343_v22 = vpop.f32.mrb[208].mxu1 }
 0x812   : > { %v10344_v38 = vpop.f32.mrb[209].mxu1 }
 0x813   : > { %v17362_v0 = vadd.f32 %v10344_v38, %v10343_v22  ;;  %v10346_v3 = vpop.f32.mrb[210].mxu1 }
 0x814   : > { %v10347_v25 = vpop.f32.mrb[211].mxu1 }
 0x815   : > { %v17364_v18 = vadd.f32 %v10347_v25, %v10346_v3 }
 0x816   : > { %9801 = vmatmul.mubr.msk.bf16.gmra.mrb[56].mxu1 %vm19297_vm11, %v17133_v16  ;;  %11152 = vmatmul.mubr.msk.bf16.gmra.mrb[184].mxu0 %vm19330_vm8, %v19328_v35  ;;  %v19332_v16 = vld [vmem:[#allocation45_spill] sm:$0xff]  ;;  %vm19335_vm11 = vnez %v19275_v32 }
 0x817   : > { %7401 = vmatprep.mubr.bf16.mxu1 %v19281_v51  ;;  %11155 = vmatprep.mubr.msk.bf16.mxu0 %vm19331_vm12, %v17112_v46  ;;  %v19334_v41 = vpack.c.bf16 %v19332_v16, %v19333_v17 }
 0x81e   : > { %7402 = vmatmul.mubr.bf16.gmra.mrb[60].mxu1 %v19281_v51  ;;  %11156 = vmatmul.mubr.msk.bf16.gmra.mrb[188].mxu0 %vm19335_vm11, %v17127_v59 }
 0x81f   : > { %8107 = vmatprep.mubr.bf16.mxu1 %v19334_v41  ;;  %11175 = vmatprep.mubr.msk.bf16.mxu0 %vm19302_vm1, %v19300_v23  ;;  %v11910_v23 = vld [vmem:[#allocation20 + $0x40] sm:$0xff]  }
 0x820   : > { %v10349_v28 = vpop.f32.mrb[212].mxu1  ;;  %11207 = vmatprep.subr.bf16.mxu1 %v11910_v23  ;;  %10711 = vmatprep.subr.bf16.mxu0 %v11910_v23 }
 0x821   : > { %v10350_v42 = vpop.f32.mrb[213].mxu1  ;;  %11215 = vmatpush3.bf16.msra.mxu1 %v11911_v50 }
 0x822   : > { %v17376_v56 = vadd.f32 %v10350_v42, %v10349_v28  ;;  %v10352_v45 = vpop.f32.mrb[214].mxu1 }
 0x823   : > { %v10353_v52 = vpop.f32.mrb[215].mxu1 }
 0x824   : > { %v17378_v30 = vadd.f32 %v10353_v52, %v10352_v45 }
 0x826   : > { %11176 = vmatmul.mubr.msk.bf16.vlgmr.msra.gmra.mrb[160].mxu0 %vm19007_vm4, %v19303_v26  ;;  %vm19336_vm4 = vnez %v19279_v61 }
 0x827   : > { %11179 = vmatprep.mubr.msk.bf16.mxu0 %vm19307_vm0, %v19305_v40  ;;  %10712 = vmatpush3.bf16.msra.mxu0 %v11911_v50 }
 0x829   : > { %v10355_v13 = vpop.f32.mrb[216].mxu1 }
 0x82a   : > { %v10356_v44 = vpop.f32.mrb[217].mxu1 }
 0x82b   : > { %v17386_v43 = vadd.f32 %v10356_v44, %v10355_v13  ;;  %v10358_v53 = vpop.f32.mrb[218].mxu1 }
 0x82c   : > { %v10359_v62 = vpop.f32.mrb[219].mxu1 }
 0x82d   : > { %v17388_v21 = vadd.f32 %v10359_v62, %v10358_v53 }
 0x82e   : > { %11180 = vmatmul.mubr.msk.bf16.gmra.mrb[164].mxu0 %vm19310_vm5, %v19308_v49 }
 0x82f   : > { %11183 = vmatprep.mubr.msk.bf16.mxu0 %vm19313_vm3, %v19311_v36  ;;  %v11912_v36 = vld [vmem:[#allocation20 + $0x48] sm:$0xff]  }
 0x830   : > { %11208 = vmatprep.subr.bf16.mxu1 %v11912_v36  ;;  %10713 = vmatprep.subr.bf16.mxu0 %v11912_v36 }
 0x831   : > { %v10361_v5 = vpop.f32.mrb[220].mxu1  ;;  %11216 = vmatpush3.bf16.msra.mxu1 %v11913_v37  ;;  %10714 = vmatpush3.bf16.msra.mxu0 %v11913_v37 }
 0x832   : > { %v10362_v26 = vpop.f32.mrb[221].mxu1 }
 0x833   : > { %v17396_v55 = vadd.f32 %v10362_v26, %v10361_v5  ;;  %v10364_v40 = vpop.f32.mrb[222].mxu1  ;;  %v11914_v26 = vld [vmem:[#allocation20 + $0x50] sm:$0xff]  }
 0x834   : > { %v10365_v19 = vpop.f32.mrb[223].mxu1  ;;  %11209 = vmatprep.subr.bf16.mxu1 %v11914_v26  ;;  %10715 = vmatprep.subr.bf16.mxu0 %v11914_v26 }
 0x835   : > { %v17398_v39 = vadd.f32 %v10365_v19, %v10364_v40 }
 0x836   : > { %11184 = vmatmul.mubr.msk.bf16.gmra.mrb[168].mxu0 %vm19316_vm10, %v19314_v4 }
 0x837   : > { %11187 = vmatprep.mubr.msk.bf16.mxu0 %vm19319_vm2, %v19317_v34 }
 0x839   : > { %v10367_v31 = vpop.f32.mrb[224].mxu1  ;;  %v10455_v38 = vpop.f32.mrb[192].mxu0 }
 0x83a   : > { %v10368_v63 = vpop.f32.mrb[225].mxu1  ;;  %v10456_v25 = vpop.f32.mrb[193].mxu0 }
 0x83b   : > { %v17406_v49 = vadd.f32 %v10368_v63, %v10367_v31  ;;  %v10370_v48 = vpop.f32.mrb[226].mxu1  ;;  %v10457_v16 = vadd.f32 %v10456_v25, %v10455_v38  ;;  %v10458_v60 = vpop.f32.mrb[194].mxu0 }
 0x83c   : > { %v10371_v22 = vpop.f32.mrb[227].mxu1  ;;  %v10459_v4 = vpop.f32.mrb[195].mxu0 }
 0x83d   : > { %v17408_v3 = vadd.f32 %v10371_v22, %v10370_v48  ;;  %v17411_v47 = vadd.f32 %v10457_v16, %v17279_v9  ;;  %v10460_v34 = vadd.f32 %v10459_v4, %v10458_v60 }
 0x83e   : > { %11188 = vmatmul.mubr.msk.bf16.gmra.mrb[172].mxu0 %vm19322_vm13, %v19320_v11 }
 0x83f   : > { %v17417_v28 = vadd.f32 %v10460_v34, %v17282_v20  ;;  %11191 = vmatprep.mubr.msk.bf16.mxu0 %vm19323_vm6, %v16917_v6 }
 0x841   : > { %v10373_v17 = vpop.f32.mrb[228].mxu1  ;;  %v10461_v9 = vpop.f32.mrb[196].mxu0 }
 0x842   : > { %v10374_v41 = vpop.f32.mrb[229].mxu1  ;;  %v10462_v44 = vpop.f32.mrb[197].mxu0 }
 0x843   : > { %v17422_v42 = vadd.f32 %v10374_v41, %v10373_v17  ;;  %v10376_v45 = vpop.f32.mrb[230].mxu1  ;;  %v10463_v53 = vadd.f32 %v10462_v44, %v10461_v9  ;;  %v10464_v23 = vpop.f32.mrb[198].mxu0 }
 0x844   : > { %v10377_v52 = vpop.f32.mrb[231].mxu1  ;;  %v10465_v7 = vpop.f32.mrb[199].mxu0 }
 0x845   : > { %v17424_v13 = vadd.f32 %v10377_v52, %v10376_v45  ;;  %v17427_v11 = vadd.f32 %v10463_v53, %v17313_v12  ;;  %v10466_v20 = vadd.f32 %v10465_v7, %v10464_v23  ;;  %v11915_v12 = vld [vmem:[#allocation20 + $0x10] sm:$0xff]   ;;  %v11916_v52 = vld [vmem:[#allocation20 + $0x58] sm:$0xff]  }
 0x846   : > { %11192 = vmatmul.mubr.msk.bf16.gmra.mrb[176].mxu0 %vm19325_vm15, %v16946_v15  ;;  %11217 = vmatpush3.bf16.msra.mxu1 %v11915_v12 }
 0x847   : > { %v17433_v2 = vadd.f32 %v10466_v20, %v17316_v33  ;;  %11195 = vmatprep.mubr.msk.bf16.mxu0 %vm19327_vm14, %v16948_v1  ;;  %10716 = vmatpush3.bf16.msra.mxu0 %v11915_v12 }
 0x848   : > { %11210 = vmatprep.subr.bf16.mxu1 %v11916_v52  ;;  %10717 = vmatprep.subr.bf16.mxu0 %v11916_v52 }
 0x849   : > { %v10379_v50 = vpop.f32.mrb[232].mxu1  ;;  %v10467_v19 = vpop.f32.mrb[200].mxu0 }
 0x84a   : > { %v10380_v6 = vpop.f32.mrb[233].mxu1  ;;  %v10468_v63 = vpop.f32.mrb[201].mxu0 }
 0x84b   : > { %v17438_v62 = vadd.f32 %v10380_v6, %v10379_v50  ;;  %v10382_v5 = vpop.f32.mrb[234].mxu1  ;;  %v10469_v15 = vadd.f32 %v10468_v63, %v10467_v19  ;;  %v10470_v8 = vpop.f32.mrb[202].mxu0  ;;  %v19337_v6 = vld [vmem:[#allocation41_spill] sm:$0xff] }
 0x84c   : > { %v10383_v40 = vpop.f32.mrb[235].mxu1  ;;  %v10471_v33 = vpop.f32.mrb[203].mxu0 }
 0x84d   : > { %v17440_v31 = vadd.f32 %v10383_v40, %v10382_v5  ;;  %v17443_v14 = vadd.f32 %v10469_v15, %v17334_v57  ;;  %v10472_v1 = vadd.f32 %v10471_v33, %v10470_v8  ;;  %v19338_v5 = vld [vmem:[#allocation40_spill] sm:$0xff] }
 0x84e   : > { %11196 = vmatmul.mubr.msk.bf16.gmra.mrb[180].mxu0 %vm19330_vm8, %v19328_v35  ;;  %v19339_v26 = vpack.c.bf16 %v19337_v6, %v19338_v5  ;;  %v11921_v6 = vld [vmem:[#allocation20 + $0x28] sm:$0xff]  }
 0x84f   : > { %v17449_v37 = vadd.f32 %v10472_v1, %v17336_v29  ;;  %11199 = vmatprep.mubr.msk.bf16.mxu0 %vm19331_vm12, %v17112_v46 }
 0x851   : > { %v10385_v48 = vpop.f32.mrb[236].mxu1  ;;  %v10473_v57 = vpop.f32.mrb[204].mxu0 }
 0x852   : > { %v10386_v36 = vpop.f32.mrb[237].mxu1  ;;  %v10474_v60 = vpop.f32.mrb[205].mxu0 }
 0x853   : > { %v17454_v22 = vadd.f32 %v10386_v36, %v10385_v48  ;;  %v10388_v38 = vpop.f32.mrb[238].mxu1  ;;  %v10475_v4 = vadd.f32 %v10474_v60, %v10473_v57  ;;  %v10476_v34 = vpop.f32.mrb[206].mxu0  ;;  %v11918_v60 = vld [vmem:[#allocation20 + $0x60] sm:$0xff]  }
 0x854   : > { %v10389_v25 = vpop.f32.mrb[239].mxu1  ;;  %v10477_v27 = vpop.f32.mrb[207].mxu0 }
 0x855   : > { %v17456_v16 = vadd.f32 %v10389_v25, %v10388_v38  ;;  %v17459_v35 = vadd.f32 %v10475_v4, %v17348_v24  ;;  %v10478_v29 = vadd.f32 %v10477_v27, %v10476_v34  ;;  %v11917_v24 = vld [vmem:[#allocation20 + $0x18] sm:$0xff]   ;;  %v11919_v4 = vld [vmem:[#allocation20 + $0x20] sm:$0xff]  }
 0x856   : > { %11200 = vmatmul.mubr.msk.bf16.gmra.mrb[184].mxu0 %vm19335_vm11, %v17127_v59  ;;  %11218 = vmatpush3.bf16.msra.mxu1 %v11917_v24 }
 0x857   : > { %v17465_v10 = vadd.f32 %v10478_v29, %v17350_v54  ;;  %11203 = vmatprep.mubr.msk.bf16.mxu0 %vm19336_vm4, %v17121_v58  ;;  %10718 = vmatpush3.bf16.msra.mxu0 %v11917_v24 }
 0x858   : > { %11211 = vmatprep.subr.bf16.mxu1 %v11918_v60  ;;  %10719 = vmatprep.subr.bf16.mxu0 %v11918_v60 }
 0x859   : > { %v10391_v17 = vpop.f32.mrb[240].mxu1  ;;  %v10479_v44 = vpop.f32.mrb[208].mxu0 }
 0x85a   : > { %v10392_v46 = vpop.f32.mrb[241].mxu1  ;;  %v10480_v23 = vpop.f32.mrb[209].mxu0  ;;  %11219 = vmatpush3.bf16.msra.mxu1 %v11919_v4 }
 0x85b   : > { %v17470_v41 = vadd.f32 %v10392_v46, %v10391_v17  ;;  %v10394_v45 = vpop.f32.mrb[242].mxu1  ;;  %v10481_v59 = vadd.f32 %v10480_v23, %v10479_v44  ;;  %v10482_v32 = vpop.f32.mrb[210].mxu0  ;;  %10720 = vmatpush3.bf16.msra.mxu0 %v11919_v4 }
 0x85c   : > { %v10395_v9 = vpop.f32.mrb[243].mxu1  ;;  %v10483_v54 = vpop.f32.mrb[211].mxu0 }
 0x85d   : > { %v17472_v53 = vadd.f32 %v10395_v9, %v10394_v45  ;;  %v17475_v61 = vadd.f32 %v10481_v59, %v17362_v0  ;;  %v10484_v58 = vadd.f32 %v10483_v54, %v10482_v32 }
 0x85e   : > { %11204 = vmatmul.mubr.bf16.gmra.mrb[188].mxu0 %v19281_v51 }
 0x85f   : > { %v17479_v50 = vadd.f32 %v10484_v58, %v17364_v18  ;;  %8099 = vmatprep.mubr.bf16.mxu0 %v19339_v26 }
 0x861   : > { %v10397_v7 = vpop.f32.mrb[244].mxu1  ;;  %v10485_v63 = vpop.f32.mrb[212].mxu0 }
 0x862   : > { %v10398_v20 = vpop.f32.mrb[245].mxu1  ;;  %v10486_v0 = vpop.f32.mrb[213].mxu0 }
 0x863   : > { %v17484_v12 = vadd.f32 %v10398_v20, %v10397_v7  ;;  %v10400_v40 = vpop.f32.mrb[246].mxu1  ;;  %v10487_v8 = vadd.f32 %v10486_v0, %v10485_v63  ;;  %v10488_v33 = vpop.f32.mrb[214].mxu0  ;;  %v11920_v20 = vld [vmem:[#allocation20 + $0x68] sm:$0xff]  }
 0x864   : > { %v10401_v19 = vpop.f32.mrb[247].mxu1  ;;  %v10489_v1 = vpop.f32.mrb[215].mxu0  ;;  %11212 = vmatprep.subr.bf16.mxu1 %v11920_v20  ;;  %10721 = vmatprep.subr.bf16.mxu0 %v11920_v20 }
 0x865   : > { %v17486_v15 = vadd.f32 %v10401_v19, %v10400_v40  ;;  %v17489_v51 = vadd.f32 %v10487_v8, %v17376_v56  ;;  %v10490_v18 = vadd.f32 %v10489_v1, %v10488_v33  ;;  %11220 = vmatpush3.bf16.msra.mxu1 %v11921_v6  ;;  %10722 = vmatpush3.bf16.msra.mxu0 %v11921_v6 }
 0x867   : > { %v17492_v38 = vadd.f32 %v10490_v18, %v17378_v30 }
 0x869   : > { %v10403_v48 = vpop.f32.mrb[248].mxu1  ;;  %v10491_v27 = vpop.f32.mrb[216].mxu0 }
 0x86a   : > { %v10404_v36 = vpop.f32.mrb[249].mxu1  ;;  %v10492_v17 = vpop.f32.mrb[217].mxu0 }
 0x86b   : > { %v17494_v25 = vadd.f32 %v10404_v36, %v10403_v48  ;;  %v10406_v57 = vpop.f32.mrb[250].mxu1  ;;  %v10493_v56 = vadd.f32 %v10492_v17, %v10491_v27  ;;  %v10494_v46 = vpop.f32.mrb[218].mxu0 }
 0x86c   : > { %v10407_v34 = vpop.f32.mrb[251].mxu1  ;;  %v10495_v45 = vpop.f32.mrb[219].mxu0 }
 0x86d   : > { %v17496_v29 = vadd.f32 %v10407_v34, %v10406_v57  ;;  %v17499_v30 = vadd.f32 %v10493_v56, %v17386_v43  ;;  %v10496_v52 = vadd.f32 %v10495_v45, %v10494_v46 }
 0x86f   : > { %v17502_v44 = vadd.f32 %v10496_v52, %v17388_v21 }
 0x871   : > { %v10409_v24 = vpop.f32.mrb[252].mxu1  ;;  %v10497_v54 = vpop.f32.mrb[220].mxu0 }
 0x872   : > { %v10410_v9 = vpop.f32.mrb[253].mxu1  ;;  %v10498_v7 = vpop.f32.mrb[221].mxu0 }
 0x873   : > { %v17504_v23 = vadd.f32 %v10410_v9, %v10409_v24  ;;  %v10412_v59 = vpop.f32.mrb[254].mxu1  ;;  %v10499_v5 = vadd.f32 %v10498_v7, %v10497_v54  ;;  %v10500_v26 = vpop.f32.mrb[222].mxu0 }
 0x874   : > { %v10413_v32 = vpop.f32.mrb[255].mxu1  ;;  %v10501_v43 = vpop.f32.mrb[223].mxu0 }
 0x875   : > { %v17506_v58 = vadd.f32 %v10413_v32, %v10412_v59  ;;  %v17509_v40 = vadd.f32 %v10499_v5, %v17396_v55  ;;  %v10502_v21 = vadd.f32 %v10501_v43, %v10500_v26 }
 0x877   : > { %v17512_v63 = vadd.f32 %v10502_v21, %v17398_v39 }
 0x879   : > { %v10591_v19 = vpop.f32.mrb[0].mxu1  ;;  %v10503_v18 = vpop.f32.mrb[224].mxu0 }
 0x87a   : > { %v10592_v0 = vpop.f32.mrb[1].mxu1  ;;  %v10504_v36 = vpop.f32.mrb[225].mxu0 }
 0x87b   : > { %v10593_v8 = vadd.f32 %v10592_v0, %v10591_v19  ;;  %v10594_v33 = vpop.f32.mrb[2].mxu1  ;;  %v10505_v60 = vadd.f32 %v10504_v36, %v10503_v18  ;;  %v10506_v55 = vpop.f32.mrb[226].mxu0 }
 0x87c   : > { %v10595_v1 = vpop.f32.mrb[3].mxu1  ;;  %v10507_v4 = vpop.f32.mrb[227].mxu0 }
 0x87d   : > { %v10596_v48 = vadd.f32 %v10595_v1, %v10594_v33  ;;  %v17515_v57 = vadd.f32 %v17411_v47, %v10593_v8  ;;  %v17521_v27 = vadd.f32 %v10505_v60, %v17406_v49  ;;  %v10508_v39 = vadd.f32 %v10507_v4, %v10506_v55 }
 0x87f   : > { %v17518_v34 = vadd.f32 %v17417_v28, %v10596_v48  ;;  %v17524_v56 = vadd.f32 %v10508_v39, %v17408_v3 }
 0x881   : > { %v10597_v17 = vpop.f32.mrb[4].mxu1  ;;  %v10509_v47 = vpop.f32.mrb[228].mxu0 }
 0x882   : > { %v10598_v46 = vpop.f32.mrb[5].mxu1  ;;  %v10510_v59 = vpop.f32.mrb[229].mxu0 }
 0x883   : > { %v10599_v45 = vadd.f32 %v10598_v46, %v10597_v17  ;;  %v10600_v52 = vpop.f32.mrb[6].mxu1  ;;  %v10511_v28 = vadd.f32 %v10510_v59, %v10509_v47  ;;  %v10512_v54 = vpop.f32.mrb[230].mxu0 }
 0x884   : > { %v10601_v24 = vpop.f32.mrb[7].mxu1  ;;  %v10513_v7 = vpop.f32.mrb[231].mxu0 }
 0x885   : > { %v10602_v9 = vadd.f32 %v10601_v24, %v10600_v52  ;;  %v17527_v32 = vadd.f32 %v17427_v11, %v10599_v45  ;;  %v17533_v20 = vadd.f32 %v10511_v28, %v17422_v42  ;;  %v10514_v3 = vadd.f32 %v10513_v7, %v10512_v54 }
 0x887   : > { %v17530_v49 = vadd.f32 %v17433_v2, %v10602_v9  ;;  %v17536_v5 = vadd.f32 %v10514_v3, %v17424_v13 }
 0x889   : > { %v10603_v6 = vpop.f32.mrb[8].mxu1  ;;  %v10515_v11 = vpop.f32.mrb[232].mxu0 }
 0x88a   : > { %v10604_v26 = vpop.f32.mrb[9].mxu1  ;;  %v10516_v8 = vpop.f32.mrb[233].mxu0 }
 0x88b   : > { %v10605_v43 = vadd.f32 %v10604_v26, %v10603_v6  ;;  %v10606_v21 = vpop.f32.mrb[10].mxu1  ;;  %v10517_v2 = vadd.f32 %v10516_v8, %v10515_v11  ;;  %v10518_v1 = vpop.f32.mrb[234].mxu0 }
 0x88c   : > { %v10607_v19 = vpop.f32.mrb[11].mxu1  ;;  %v10519_v18 = vpop.f32.mrb[235].mxu0 }
 0x88d   : > { %v10608_v0 = vadd.f32 %v10607_v19, %v10606_v21  ;;  %v17539_v33 = vadd.f32 %v17443_v14, %v10605_v43  ;;  %v17545_v48 = vadd.f32 %v10517_v2, %v17438_v62  ;;  %v10520_v13 = vadd.f32 %v10519_v18, %v10518_v1 }
 0x88f   : > { %v17542_v42 = vadd.f32 %v17449_v37, %v10608_v0  ;;  %v17548_v60 = vadd.f32 %v10520_v13, %v17440_v31 }
 0x891   : > { %v10609_v36 = vpop.f32.mrb[12].mxu1  ;;  %v10521_v14 = vpop.f32.mrb[236].mxu0 }
 0x892   : > { %v10610_v55 = vpop.f32.mrb[13].mxu1  ;;  %v10522_v45 = vpop.f32.mrb[237].mxu0 }
 0x893   : > { %v10611_v4 = vadd.f32 %v10610_v55, %v10609_v36  ;;  %v10612_v39 = vpop.f32.mrb[14].mxu1  ;;  %v10523_v37 = vadd.f32 %v10522_v45, %v10521_v14  ;;  %v10524_v24 = vpop.f32.mrb[238].mxu0 }
 0x894   : > { %v10613_v17 = vpop.f32.mrb[15].mxu1  ;;  %v10525_v47 = vpop.f32.mrb[239].mxu0 }
 0x895   : > { %v10614_v46 = vadd.f32 %v10613_v17, %v10612_v39  ;;  %v17551_v52 = vadd.f32 %v17459_v35, %v10611_v4  ;;  %v17557_v9 = vadd.f32 %v10523_v37, %v17454_v22  ;;  %v10526_v31 = vadd.f32 %v10525_v47, %v10524_v24 }
 0x897   : > { %v17554_v62 = vadd.f32 %v17465_v10, %v10614_v46  ;;  %v17560_v28 = vadd.f32 %v10526_v31, %v17456_v16 }
 0x899   : > { %v10615_v59 = vpop.f32.mrb[16].mxu1  ;;  %v10527_v35 = vpop.f32.mrb[240].mxu0 }
 0x89a   : > { %v10616_v54 = vpop.f32.mrb[17].mxu1  ;;  %v10528_v43 = vpop.f32.mrb[241].mxu0 }
 0x89b   : > { %v10617_v7 = vadd.f32 %v10616_v54, %v10615_v59  ;;  %v10618_v3 = vpop.f32.mrb[18].mxu1  ;;  %v10529_v10 = vadd.f32 %v10528_v43, %v10527_v35  ;;  %v10530_v19 = vpop.f32.mrb[242].mxu0  ;;  %v11922_v35 = vld [vmem:[#allocation20 + $0x70] sm:$0xff]  }
 0x89c   : > { %v10619_v6 = vpop.f32.mrb[19].mxu1  ;;  %v10531_v11 = vpop.f32.mrb[243].mxu0  ;;  %11213 = vmatprep.subr.bf16.mxu1 %v11922_v35  ;;  %10723 = vmatprep.subr.bf16.mxu0 %v11922_v35 }
 0x89d   : > { %v10620_v26 = vadd.f32 %v10619_v6, %v10618_v3  ;;  %v17563_v21 = vadd.f32 %v17475_v61, %v10617_v7  ;;  %v17569_v0 = vadd.f32 %v10529_v10, %v17470_v41  ;;  %v10532_v16 = vadd.f32 %v10531_v11, %v10530_v19 }
 0x89f   : > { %v17566_v22 = vadd.f32 %v17479_v50, %v10620_v26  ;;  %v17572_v2 = vadd.f32 %v10532_v16, %v17472_v53 }
 0x8a1   : > { %v10621_v8 = vpop.f32.mrb[20].mxu1  ;;  %v10533_v61 = vpop.f32.mrb[244].mxu0 }
 0x8a2   : > { %v10622_v1 = vpop.f32.mrb[21].mxu1  ;;  %v10534_v4 = vpop.f32.mrb[245].mxu0 }
 0x8a3   : > { %v10623_v18 = vadd.f32 %v10622_v1, %v10621_v8  ;;  %v10624_v13 = vpop.f32.mrb[22].mxu1  ;;  %v10535_v50 = vadd.f32 %v10534_v4, %v10533_v61  ;;  %v10536_v17 = vpop.f32.mrb[246].mxu0  ;;  %v11925_v4 = vld [vmem:[#allocation20 + $0x38] sm:$0xff]  }
 0x8a4   : > { %v10625_v36 = vpop.f32.mrb[23].mxu1  ;;  %v10537_v14 = vpop.f32.mrb[247].mxu0 }
 0x8a5   : > { %v10626_v55 = vadd.f32 %v10625_v36, %v10624_v13  ;;  %v17575_v39 = vadd.f32 %v17489_v51, %v10623_v18  ;;  %v17581_v46 = vadd.f32 %v10535_v50, %v17484_v12  ;;  %v10538_v53 = vadd.f32 %v10537_v14, %v10536_v17  ;;  %v11923_v12 = vld [vmem:[#allocation20 + $0x30] sm:$0xff]  }
 0x8a6   : > { %11221 = vmatpush3.bf16.msra.mxu1 %v11923_v12  ;;  %10724 = vmatpush3.bf16.msra.mxu0 %v11923_v12 }
 0x8a7   : > { %v17578_v41 = vadd.f32 %v17492_v38, %v10626_v55  ;;  %v17584_v37 = vadd.f32 %v10538_v53, %v17486_v15 }
 0x8a9   : > { %v10627_v45 = vpop.f32.mrb[24].mxu1  ;;  %v10539_v51 = vpop.f32.mrb[248].mxu0 }
 0x8aa   : > { %v10628_v24 = vpop.f32.mrb[25].mxu1  ;;  %v10540_v7 = vpop.f32.mrb[249].mxu0 }
 0x8ab   : > { %v10629_v47 = vadd.f32 %v10628_v24, %v10627_v45  ;;  %v10630_v31 = vpop.f32.mrb[26].mxu1  ;;  %v10541_v38 = vadd.f32 %v10540_v7, %v10539_v51  ;;  %v10542_v6 = vpop.f32.mrb[250].mxu0 }
 0x8ac   : > { %v10631_v59 = vpop.f32.mrb[27].mxu1  ;;  %v10543_v26 = vpop.f32.mrb[251].mxu0 }
 0x8ad   : > { %v10632_v54 = vadd.f32 %v10631_v59, %v10630_v31  ;;  %v17587_v3 = vadd.f32 %v17499_v30, %v10629_v47  ;;  %v17593_v15 = vadd.f32 %v10541_v38, %v17494_v25  ;;  %v10544_v10 = vadd.f32 %v10543_v26, %v10542_v6  ;;  %v11924_v25 = vld [vmem:[#allocation20 + $0x78] sm:$0xff]  }
 0x8ae   : > { %11214 = vmatprep.subr.bf16.mxu1 %v11924_v25  ;;  %10725 = vmatprep.subr.bf16.mxu0 %v11924_v25 }
 0x8af   : > { %v17590_v43 = vadd.f32 %v17502_v44, %v10632_v54  ;;  %v17596_v30 = vadd.f32 %v10544_v10, %v17496_v29  ;;  %11222 = vmatpush3.bf16.msra.mxu1 %v11925_v4  ;;  %10726 = vmatpush3.bf16.msra.mxu0 %v11925_v4 }
 0x8b1   : > { %v10633_v19 = vpop.f32.mrb[28].mxu1  ;;  %v10545_v18 = vpop.f32.mrb[252].mxu0 }
 0x8b2   : > { %v10634_v11 = vpop.f32.mrb[29].mxu1  ;;  %v10546_v44 = vpop.f32.mrb[253].mxu0 }
 0x8b3   : > { %v10635_v16 = vadd.f32 %v10634_v11, %v10633_v19  ;;  %v10636_v8 = vpop.f32.mrb[30].mxu1  ;;  %v10547_v61 = vadd.f32 %v10546_v44, %v10545_v18  ;;  %v10548_v55 = vpop.f32.mrb[254].mxu0 }
 0x8b4   : > { %v10637_v1 = vpop.f32.mrb[31].mxu1  ;;  %v10549_v50 = vpop.f32.mrb[255].mxu0 }
 0x8b5   : > { %v10638_v13 = vadd.f32 %v10637_v1, %v10636_v8  ;;  %v17599_v36 = vadd.f32 %v17509_v40, %v10635_v16  ;;  %v17605_v29 = vadd.f32 %v10547_v61, %v17504_v23  ;;  %v10550_v14 = vadd.f32 %v10549_v50, %v10548_v55 }
 0x8b7   : > { %v17602_v17 = vadd.f32 %v17512_v63, %v10638_v13  ;;  %v17608_v40 = vadd.f32 %v10550_v14, %v17506_v58 }
 0x8b9   : > { %v10639_v53 = vpop.f32.mrb[32].mxu1 }
 0x8ba   : > { %v10640_v45 = vpop.f32.mrb[33].mxu1 }
 0x8bb   : > { %v10641_v24 = vadd.f32 %v10640_v45, %v10639_v53  ;;  %v10642_v47 = vpop.f32.mrb[34].mxu1 }
 0x8bc   : > { %v10643_v31 = vpop.f32.mrb[35].mxu1 }
 0x8bd   : > { %v10644_v59 = vadd.f32 %v10643_v31, %v10642_v47  ;;  %v17611_v63 = vadd.f32 %v17521_v27, %v10641_v24 }
 0x8bf   : > { %v17614_v51 = vadd.f32 %v17524_v56, %v10644_v59 }
 0x8c1   : > { %v10645_v23 = vpop.f32.mrb[36].mxu1 }
 0x8c2   : > { %v10646_v54 = vpop.f32.mrb[37].mxu1 }
 0x8c3   : > { %v10647_v7 = vadd.f32 %v10646_v54, %v10645_v23  ;;  %v10648_v38 = vpop.f32.mrb[38].mxu1 }
 0x8c4   : > { %v10649_v6 = vpop.f32.mrb[39].mxu1 }
 0x8c5   : > { %v10650_v35 = vadd.f32 %v10649_v6, %v10648_v38  ;;  %v17617_v58 = vadd.f32 %v17533_v20, %v10647_v7 }
 0x8c7   : > { %v17620_v12 = vadd.f32 %v17536_v5, %v10650_v35 }
 0x8c9   : > { %v10651_v26 = vpop.f32.mrb[40].mxu1 }
 0x8ca   : > { %v10652_v10 = vpop.f32.mrb[41].mxu1 }
 0x8cb   : > { %v10653_v19 = vadd.f32 %v10652_v10, %v10651_v26  ;;  %v10654_v27 = vpop.f32.mrb[42].mxu1 }
 0x8cc   : > { %v10655_v11 = vpop.f32.mrb[43].mxu1 }
 0x8cd   : > { %v10656_v16 = vadd.f32 %v10655_v11, %v10654_v27  ;;  %v17623_v56 = vadd.f32 %v17545_v48, %v10653_v19 }
 0x8cf   : > { %v17626_v8 = vadd.f32 %v17548_v60, %v10656_v16 }
 0x8d1   : > { %v10657_v1 = vpop.f32.mrb[44].mxu1 }
 0x8d2   : > { %v10658_v18 = vpop.f32.mrb[45].mxu1 }
 0x8d3   : > { %v10659_v13 = vadd.f32 %v10658_v18, %v10657_v1  ;;  %v10660_v20 = vpop.f32.mrb[46].mxu1 }
 0x8d4   : > { %v10661_v44 = vpop.f32.mrb[47].mxu1 }
 0x8d5   : > { %v10662_v25 = vadd.f32 %v10661_v44, %v10660_v20  ;;  %v17629_v5 = vadd.f32 %v17557_v9, %v10659_v13  ;;  %v17658_v20 = vld [vmem:[#allocation17 + $0x1] ss:$0 sm:$0xff] }
 0x8d7   : > { %v17632_v61 = vadd.f32 %v17560_v28, %v10662_v25 }
 0x8d9   : > { %v10663_v55 = vpop.f32.mrb[48].mxu1 }
 0x8da   : > { %v10664_v4 = vpop.f32.mrb[49].mxu1 }
 0x8db   : > { %v10665_v50 = vadd.f32 %v10664_v4, %v10663_v55  ;;  %v10666_v48 = vpop.f32.mrb[50].mxu1 }
 0x8dc   : > { %v10667_v14 = vpop.f32.mrb[51].mxu1 }
 0x8dd   : > { %v10668_v53 = vadd.f32 %v10667_v14, %v10666_v48  ;;  %v17635_v60 = vadd.f32 %v17569_v0, %v10665_v50 }
 0x8df   : > { %v17638_v45 = vadd.f32 %v17572_v2, %v10668_v53 }
 0x8e1   : > { %v10669_v24 = vpop.f32.mrb[52].mxu1 }
 0x8e2   : > { %v10670_v47 = vpop.f32.mrb[53].mxu1 }
 0x8e3   : > { %v10671_v31 = vadd.f32 %v10670_v47, %v10669_v24  ;;  %v10672_v9 = vpop.f32.mrb[54].mxu1 }
 0x8e4   : > { %v10673_v59 = vpop.f32.mrb[55].mxu1 }
 0x8e5   : > { %v10674_v23 = vadd.f32 %v10673_v59, %v10672_v9  ;;  %v17641_v28 = vadd.f32 %v17581_v46, %v10671_v31 }
 0x8e7   : > { %v17644_v54 = vadd.f32 %v17584_v37, %v10674_v23 }
 0x8e9   : > { %v10675_v7 = vpop.f32.mrb[56].mxu1 }
 0x8ea   : > { %v10676_v38 = vpop.f32.mrb[57].mxu1 }
 0x8eb   : > { %v10677_v6 = vadd.f32 %v10676_v38, %v10675_v7  ;;  %v10678_v0 = vpop.f32.mrb[58].mxu1 }
 0x8ec   : > { %v10679_v35 = vpop.f32.mrb[59].mxu1 }
 0x8ed   : > { %v10680_v26 = vadd.f32 %v10679_v35, %v10678_v0  ;;  %v17647_v2 = vadd.f32 %v17593_v15, %v10677_v6 }
 0x8ef   : > { %v17650_v10 = vadd.f32 %v17596_v30, %v10680_v26  ;;  %v17661_v30 = vld [vmem:[#allocation18 + $0x1] ss:$0 sm:$0xff] }
 0x8f1   : > { %v10681_v19 = vpop.f32.mrb[60].mxu1 }
 0x8f2   : > { %v10682_v27 = vpop.f32.mrb[61].mxu1 }
 0x8f3   : > { %v10683_v11 = vadd.f32 %v10682_v27, %v10681_v19  ;;  %v10684_v46 = vpop.f32.mrb[62].mxu1 }
 0x8f4   : > { %v10685_v16 = vpop.f32.mrb[63].mxu1 }
 0x8f5   : > { %v10686_v1 = vadd.f32 %v10685_v16, %v10684_v46  ;;  %v17653_v37 = vadd.f32 %v17605_v29, %v10683_v11 }
 0x8f7   : > { %v17656_v18 = vadd.f32 %v17608_v40, %v10686_v1 }
 0x8f9   : > { %v11177_v13 = vpop.f32.mrb[160].mxu0 }
 0x8fa   : > { %v11321_v15 = vadd.f32 %v17527_v32, %v11177_v13  ;;  %v7444_v44 = vpop.f32.mrb[161].mxu0 }
 0x8fb   : > { %v11324_v25 = vadd.f32 %v17515_v57, %v7444_v44  ;;  %v11178_v55 = vpop.f32.mrb[162].mxu0 }
 0x8fc   : > { %v7613_v4 = vmul.f32 %v11321_v15, %v17658_v20  ;;  %v11327_v50 = vadd.f32 %v17530_v49, %v11178_v55  ;;  %v7447_v29 = vpop.f32.mrb[163].mxu0 }
 0x8fd   : > { %v7611_v48 = vmul.f32 %v11324_v25, %v17658_v20  ;;  %v11330_v40 = vadd.f32 %v17518_v34, %v7447_v29 }
 0x8fe   : > { %v17669_v14 = vadd.f32 %v17661_v30, %v7613_v4  ;;  %v7614_v32 = vmul.f32 %v11327_v50, %v17658_v20 }
 0x8ff   : > { %v17673_v53 = vadd.f32 %v17661_v30, %v7611_v48  ;;  %v7612_v57 = vmul.f32 %v11330_v40, %v17658_v20 }
 0x900   : > { %v7685_v24 = vsub.f32 0.0, %v17669_v14  ;;  %v17678_v47 = vadd.f32 %v17661_v30, %v7614_v32 }
 0x901   : > { %v7683_v49 = vsub.f32 0.0, %v17673_v53  ;;  %v17682_v31 = vadd.f32 %v17661_v30, %v7612_v57  ;;  %v11181_v34 = vpop.f32.mrb[164].mxu0 }
 0x902   : > { %v7719_v9 = vmul.f32 1.442695, %v7685_v24  ;;  %v7686_v59 = vsub.f32 0.0, %v17678_v47  ;;  %v11333_v23 = vadd.f32 %v17551_v52, %v11181_v34  ;;  %v7460_v7 = vpop.f32.mrb[165].mxu0 }
 0x903   : > { %v7715_v38 = vmul.f32 1.442695, %v7683_v49  ;;  %v7684_v6 = vsub.f32 0.0, %v17682_v31  ;;  %v11336_v0 = vadd.f32 %v17539_v33, %v7460_v7  ;;  %v11182_v35 = vpop.f32.mrb[166].mxu0 }
 0x904   : > { %12566 = vpow2.f32 %v7719_v9  ;;  %v7721_v26 = vmul.f32 1.442695, %v7686_v59  ;;  %v7617_v19 = vmul.f32 %v11333_v23, %v17658_v20  ;;  %v11339_v27 = vadd.f32 %v17554_v62, %v11182_v35  ;;  %v7463_v11 = vpop.f32.mrb[167].mxu0 }
 0x905   : > { %12568 = vpow2.f32 %v7715_v38  ;;  %v7717_v46 = vmul.f32 1.442695, %v7684_v6  ;;  %v7615_v16 = vmul.f32 %v11336_v0, %v17658_v20  ;;  %v11342_v52 = vadd.f32 %v17542_v42, %v7463_v11 }
 0x906   : > { %12570 = vpow2.f32 %v7721_v26  ;;  %v17693_v1 = vadd.f32 %v17661_v30, %v7617_v19  ;;  %v7618_v33 = vmul.f32 %v11339_v27, %v17658_v20 }
 0x907   : > { %12572 = vpow2.f32 %v7717_v46  ;;  %v17697_v13 = vadd.f32 %v17661_v30, %v7615_v16  ;;  %v7616_v15 = vmul.f32 %v11342_v52, %v17658_v20 }
 0x908   : > { %v7689_v62 = vsub.f32 0.0, %v17693_v1  ;;  %v17702_v44 = vadd.f32 %v17661_v30, %v7618_v33 }
 0x909   : > { %v7687_v25 = vsub.f32 0.0, %v17697_v13  ;;  %v17706_v42 = vadd.f32 %v17661_v30, %v7616_v15  ;;  %v11185_v55 = vpop.f32.mrb[168].mxu0 }
 0x90a   : > { %v7727_v4 = vmul.f32 1.442695, %v7689_v62  ;;  %v7690_v50 = vsub.f32 0.0, %v17702_v44  ;;  %v11345_v29 = vadd.f32 %v17575_v39, %v11185_v55  ;;  %v7476_v48 = vpop.f32.mrb[169].mxu0 }
 0x90b   : > { %v7723_v40 = vmul.f32 1.442695, %v7687_v25  ;;  %v7688_v32 = vsub.f32 0.0, %v17706_v42  ;;  %v11348_v57 = vadd.f32 %v17563_v21, %v7476_v48  ;;  %v11186_v24 = vpop.f32.mrb[170].mxu0 }
 0x90c   : > { %12574 = vpow2.f32 %v7727_v4  ;;  %v7729_v49 = vmul.f32 1.442695, %v7690_v50  ;;  %v7621_v34 = vmul.f32 %v11345_v29, %v17658_v20  ;;  %v11351_v9 = vadd.f32 %v17578_v41, %v11186_v24  ;;  %v7479_v59 = vpop.f32.mrb[171].mxu0 }
 0x90d   : > { %12576 = vpow2.f32 %v7723_v40  ;;  %v7725_v23 = vmul.f32 1.442695, %v7688_v32  ;;  %v7619_v7 = vmul.f32 %v11348_v57, %v17658_v20  ;;  %v11354_v39 = vadd.f32 %v17566_v22, %v7479_v59 }
 0x90e   : > { %v12567_v38 = vpop.eup %12566  ;;  %12578 = vpow2.f32 %v7729_v49  ;;  %v17717_v6 = vadd.f32 %v17661_v30, %v7621_v34  ;;  %v7622_v21 = vmul.f32 %v11351_v9, %v17658_v20 }
 0x90f   : > { %v12569_v0 = vpop.eup %12568  ;;  %v7781_v35 = vadd.f32 1.0, %v12567_v38  ;;  %12580 = vpow2.f32 %v7725_v23  ;;  %v17721_v26 = vadd.f32 %v17661_v30, %v7619_v7  ;;  %v7620_v41 = vmul.f32 %v11354_v39, %v17658_v20 }
 0x910   : > { %v12571_v19 = vpop.eup %12570  ;;  %v7779_v27 = vadd.f32 1.0, %v12569_v0  ;;  %v7693_v11 = vsub.f32 0.0, %v17717_v6  ;;  %v17726_v22 = vadd.f32 %v17661_v30, %v7622_v21 }
 0x911   : > { %v12573_v46 = vpop.eup %12572  ;;  %12582 = vrcp.f32 %v7781_v35  ;;  %v7782_v16 = vadd.f32 1.0, %v12571_v19  ;;  %v7691_v52 = vsub.f32 0.0, %v17721_v26  ;;  %v17730_v33 = vadd.f32 %v17661_v30, %v7620_v41  ;;  %v11189_v15 = vpop.f32.mrb[172].mxu0 }
 0x912   : > { %12584 = vrcp.f32 %v7779_v27  ;;  %v7780_v62 = vadd.f32 1.0, %v12573_v46  ;;  %v7735_v25 = vmul.f32 1.442695, %v7693_v11  ;;  %v7694_v55 = vsub.f32 0.0, %v17726_v22  ;;  %v7492_v4 = vpop.f32.mrb[173].mxu0 }
 0x913   : > { %12586 = vrcp.f32 %v7782_v16  ;;  %v7731_v50 = vmul.f32 1.442695, %v7691_v52  ;;  %v7692_v29 = vsub.f32 0.0, %v17730_v33  ;;  %v11357_v48 = vadd.f32 %v17599_v36, %v11189_v15  ;;  %v11190_v40 = vpop.f32.mrb[174].mxu0 }
 0x914   : > { %12588 = vrcp.f32 %v7780_v62  ;;  %v7737_v32 = vmul.f32 1.442695, %v7694_v55  ;;  %v11360_v57 = vadd.f32 %v17587_v3, %v7492_v4  ;;  %v11363_v24 = vadd.f32 %v17602_v17, %v11190_v40  ;;  %v7495_v49 = vpop.f32.mrb[175].mxu0 }
 0x915   : > { %12590 = vpow2.f32 %v7735_v25  ;;  %v7733_v34 = vmul.f32 1.442695, %v7692_v29  ;;  %v7625_v9 = vmul.f32 %v11357_v48, %v17658_v20  ;;  %v11366_v59 = vadd.f32 %v17590_v43, %v7495_v49 }
 0x916   : > { %v12575_v23 = vpop.eup %12574  ;;  %12592 = vpow2.f32 %v7731_v50  ;;  %v7623_v7 = vmul.f32 %v11360_v57, %v17658_v20  ;;  %v7626_v36 = vmul.f32 %v11363_v24, %v17658_v20 }
 0x917   : > { %v12577_v39 = vpop.eup %12576  ;;  %v7785_v38 = vadd.f32 1.0, %v12575_v23  ;;  %12594 = vpow2.f32 %v7737_v32  ;;  %v17742_v3 = vadd.f32 %v17661_v30, %v7625_v9  ;;  %v7624_v17 = vmul.f32 %v11366_v59, %v17658_v20 }
 0x918   : > { %v12579_v21 = vpop.eup %12578  ;;  %v7783_v0 = vadd.f32 1.0, %v12577_v39  ;;  %12596 = vpow2.f32 %v7733_v34  ;;  %v17746_v35 = vadd.f32 %v17661_v30, %v7623_v7  ;;  %v17749_v43 = vadd.f32 %v17661_v30, %v7626_v36  ;;  %v19340_v7 = vld [vmem:[#allocation124_spill] sm:$0xff] }
 0x919   : > { %v12581_v41 = vpop.eup %12580  ;;  %12598 = vrcp.f32 %v7785_v38  ;;  %v7786_v19 = vadd.f32 1.0, %v12579_v21  ;;  %v7697_v27 = vsub.f32 0.0, %v17742_v3  ;;  %v17753_v11 = vadd.f32 %v17661_v30, %v7624_v17  ;;  %v11193_v46 = vpop.f32.mrb[176].mxu0  ;;  %v19341_v38 = vld [vmem:[#allocation126_spill] sm:$0xff] }
 0x91a   : > { %12600 = vrcp.f32 %v7783_v0  ;;  %v7784_v16 = vadd.f32 1.0, %v12581_v41  ;;  %v7695_v52 = vsub.f32 0.0, %v17746_v35  ;;  %v7698_v15 = vsub.f32 0.0, %v17749_v43  ;;  %v7508_v62 = vpop.f32.mrb[177].mxu0  ;;  %v19342_v41 = vld [vmem:[#allocation120_spill] sm:$0xff] }
 0x91b   : > { %v12583_v25 = vpop.eup %12582  ;;  %12602 = vrcp.f32 %v7786_v19  ;;  %v7743_v55 = vmul.f32 1.442695, %v7697_v27  ;;  %v7696_v4 = vsub.f32 0.0, %v17753_v11  ;;  %v11369_v50 = vadd.f32 %v17617_v58, %v11193_v46  ;;  %v11194_v29 = vpop.f32.mrb[178].mxu0 }
 0x91c   : > { %v12585_v48 = vpop.eup %12584  ;;  %v7845_v40 = vmul.f32 %v12583_v25, %v17669_v14  ;;  %12604 = vrcp.f32 %v7784_v16  ;;  %v7739_v32 = vmul.f32 1.442695, %v7695_v52  ;;  %v7745_v57 = vmul.f32 1.442695, %v7698_v15  ;;  %v7511_v24 = vpop.f32.mrb[179].mxu0  ;;  %v19343_v16 = vld [vmem:[#allocation134_spill] sm:$0xff] }
 0x91d   : > { %v12587_v49 = vpop.eup %12586  ;;  %v7843_v34 = vmul.f32 %v12585_v48, %v17673_v53  ;;  %12606 = vpow2.f32 %v7743_v55  ;;  %v7741_v9 = vmul.f32 1.442695, %v7696_v4  ;;  %v7629_v59 = vmul.f32 %v11369_v50, %v17658_v20 }
 0x91e   : > { %v12589_v23 = vpop.eup %12588  ;;  %v7877_v36 = vadd.f32 %v7845_v40, %v19340_v7  ;;  %v7846_v58 = vmul.f32 %v12587_v49, %v17678_v47  ;;  %12608 = vpow2.f32 %v7739_v32  ;;  %v11372_v39 = vadd.f32 %v17611_v63, %v7508_v62 }
 0x91f   : > { %v12591_v14 = vpop.eup %12590  ;;  %v7875_v17 = vadd.f32 %v7843_v34, %v19341_v38  ;;  %v7844_v21 = vmul.f32 %v12589_v23, %v17682_v31  ;;  %12610 = vpow2.f32 %v7745_v57  ;;  %v17768_v53 = vadd.f32 %v17661_v30, %v7629_v59  ;;  %v19345_v38 = vld [vmem:[#allocation48_spill] sm:$0xff] }
 0x920   : > { %v12593_v0 = vpop.eup %12592  ;;  %v7878_v19 = vadd.f32 %v7846_v58, %v19342_v41  ;;  %v7789_v27 = vadd.f32 1.0, %v12591_v14  ;;  %12612 = vpow2.f32 %v7741_v9  ;;  %v7627_v46 = vmul.f32 %v11372_v39, %v17658_v20  ;;  %v19344_v14 = vld [vmem:[#allocation49_spill] sm:$0xff] }
 0x921   : > { %v12595_v47 = vpop.eup %12594  ;;  %v7876_v52 = vadd.f32 %v7844_v21, %v19343_v16  ;;  %v7787_v63 = vadd.f32 1.0, %v12593_v0  ;;  %v7701_v15 = vsub.f32 0.0, %v17768_v53  ;;  %v11375_v62 = vadd.f32 %v17620_v12, %v11194_v29  ;;  %v11197_v31 = vpop.f32.mrb[180].mxu0  ;;  %v19347_v21 = vld [vmem:[#allocation107_spill] sm:$0xff]  ;;  %v19349_v16 = vld [vmem:[#allocation110_spill] sm:$0xff] }
 0x922   : > { %v12597_v25 = vpop.eup %12596  ;;  %v7909_v55 = vpack.c.bf16 %v7878_v19, %v7877_v36  ;;  %12614 = vrcp.f32 %v7789_v27  ;;  %v7790_v4 = vadd.f32 1.0, %v12595_v47  ;;  %v17776_v50 = vadd.f32 %v17661_v30, %v7627_v46  ;;  %v7524_v48 = vpop.f32.mrb[181].mxu0 }
 0x923   : > { %v12599_v40 = vpop.eup %12598  ;;  %v7907_v32 = vpack.c.bf16 %v7876_v52, %v7875_v17  ;;  %12616 = vrcp.f32 %v7787_v63  ;;  %v7788_v57 = vadd.f32 1.0, %v12597_v25  ;;  %v7751_v49 = vmul.f32 1.442695, %v7701_v15  ;;  %v11198_v34 = vpop.f32.mrb[182].mxu0 }
 0x924   : > { %v12601_v9 = vpop.eup %12600  ;;  %v7849_v59 = vmul.f32 %v12599_v40, %v17693_v1  ;;  %12618 = vrcp.f32 %v7790_v4  ;;  %v7699_v12 = vsub.f32 0.0, %v17776_v50  ;;  %v7630_v29 = vmul.f32 %v11375_v62, %v17658_v20  ;;  %v7527_v23 = vpop.f32.mrb[183].mxu0  ;;  %8108 = vmatmul.mubr.bf16.vlgmr.msra.gmra.mrb[64].mxu1 %v7909_v55  ;;  %v19350_v62 = vld [vmem:[#allocation104_spill] sm:$0xff] }
 0x925   : > { %v12603_v7 = vpop.eup %12602  ;;  %v7847_v36 = vmul.f32 %v12601_v9, %v17697_v13  ;;  %12620 = vrcp.f32 %v7788_v57  ;;  %v11378_v58 = vadd.f32 %v17614_v51, %v7511_v24  ;;  %v11381_v39 = vadd.f32 %v17629_v5, %v11197_v31  ;;  %8100 = vmatmul.mubr.bf16.vlgmr.msra.gmra.mrb[0].mxu0 %v7907_v32  ;;  %v19348_v13 = vld [vmem:[#allocation135_spill] sm:$0xff] }
 0x926   : > { %v19346_v17 = vpack.c.bf16 %v19344_v14, %v19345_v38  ;;  %v12605_v1 = vpop.eup %12604  ;;  %v17788_v0 = vadd.f32 %v7849_v59, %v19347_v21  ;;  %v7850_v41 = vmul.f32 %v12603_v7, %v17702_v44  ;;  %12622 = vpow2.f32 %v7751_v49 }
 0x927   : > { %v7747_v19 = vmul.f32 1.442695, %v7699_v12  ;;  %v12607_v27 = vpop.eup %12606  ;;  %v7879_v46 = vadd.f32 %v7847_v36, %v19348_v13  ;;  %v7848_v51 = vmul.f32 %v12605_v1, %v17706_v42  ;;  %v17794_v5 = vadd.f32 %v17661_v30, %v7630_v29 }
 0x928   : > { %8115 = vmatprep.mubr.bf16.mxu1 %v19346_v17  ;;  %v7628_v24 = vmul.f32 %v11378_v58, %v17658_v20  ;;  %v12609_v47 = vpop.eup %12608  ;;  %v17798_v52 = vadd.f32 %v7850_v41, %v19349_v16  ;;  %v7793_v63 = vadd.f32 1.0, %v12607_v27  ;;  %v7633_v44 = vmul.f32 %v11381_v39, %v17658_v20 }
 0x929   : > { %12624 = vpow2.f32 %v7747_v19  ;;  %v12611_v15 = vpop.eup %12610  ;;  %v7880_v31 = vadd.f32 %v7848_v51, %v19350_v62  ;;  %v7791_v25 = vadd.f32 1.0, %v12609_v47  ;;  %v7702_v55 = vsub.f32 0.0, %v17794_v5  ;;  %v11201_v4 = vpop.f32.mrb[184].mxu0  ;;  %v19351_v51 = vld [vmem:[#allocation53_spill] sm:$0xff]  ;;  %v19354_v47 = vld [vmem:[#allocation122_spill] sm:$0xff] }
 0x92a   : > { %v17804_v42 = vadd.f32 %v17661_v30, %v7628_v24  ;;  %v12613_v40 = vpop.eup %12612  ;;  %v7913_v32 = vpack.c.bf16 %v17798_v52, %v17788_v0  ;;  %12626 = vrcp.f32 %v7793_v63  ;;  %v7794_v57 = vadd.f32 1.0, %v12611_v15  ;;  %v7540_v9 = vpop.f32.mrb[185].mxu0  ;;  %v19352_v24 = vld [vmem:[#allocation52_spill] sm:$0xff]  ;;  %v19356_v15 = vld [vmem:[#allocation127_spill] sm:$0xff] }
 0x92b   : > { %v17809_v49 = vadd.f32 %v17661_v30, %v7633_v44  ;;  %v7911_v59 = vpack.c.bf16 %v7880_v31, %v7879_v46  ;;  %12628 = vrcp.f32 %v7791_v25  ;;  %v7792_v12 = vadd.f32 1.0, %v12613_v40  ;;  %v17811_v7 = vpop.f32.mrb[186].mxu0  ;;  %v19357_v40 = vld [vmem:[#allocation116_spill] sm:$0xff] }
 0x92c   : > { %v7753_v29 = vmul.f32 1.442695, %v7702_v55  ;;  %v12615_v36 = vpop.eup %12614  ;;  %12630 = vrcp.f32 %v7794_v57  ;;  %v7700_v58 = vsub.f32 0.0, %v17804_v42  ;;  %v11384_v14 = vadd.f32 %v17623_v56, %v7524_v48  ;;  %v17816_v38 = vpop.f32.mrb[187].mxu0 }
 0x92d   : > { %v7705_v39 = vsub.f32 0.0, %v17809_v49  ;;  %v12617_v17 = vpop.eup %12616  ;;  %v7853_v1 = vmul.f32 %v12615_v36, %v17717_v6  ;;  %12632 = vrcp.f32 %v7792_v12  ;;  %v11387_v21 = vadd.f32 %v17632_v61, %v11198_v34  ;;  %8116 = vmatmul.mubr.bf16.gmra.mrb[68].mxu1 %v7911_v59 }
 0x92e   : > { %v11390_v41 = vadd.f32 %v17626_v8, %v7527_v23  ;;  %v12619_v19 = vpop.eup %12618  ;;  %v7851_v27 = vmul.f32 %v12617_v17, %v17721_v26  ;;  %12634 = vpow2.f32 %v7753_v29  ;;  %v7749_v13 = vmul.f32 1.442695, %v7700_v58  ;;  %v19355_v23 = vld [vmem:[#allocation113_spill] sm:$0xff] }
 0x92f   : > { %v7759_v46 = vmul.f32 1.442695, %v7705_v39  ;;  %v19353_v56 = vpack.c.bf16 %v19351_v51, %v19352_v24  ;;  %v12621_v48 = vpop.eup %12620  ;;  %v17826_v16 = vadd.f32 %v7853_v1, %v19354_v47  ;;  %v7854_v6 = vmul.f32 %v12619_v19, %v17726_v22 }
 0x930   : > { %v7631_v61 = vmul.f32 %v11384_v14, %v17658_v20  ;;  %v7634_v8 = vmul.f32 %v11387_v21, %v17658_v20  ;;  %v12623_v34 = vpop.eup %12622  ;;  %v17832_v26 = vadd.f32 %v7851_v27, %v19355_v23  ;;  %v7852_v63 = vmul.f32 %v12621_v48, %v17730_v33 }
 0x931   : > { %8123 = vmatprep.mubr.bf16.mxu1 %v19353_v56  ;;  %12636 = vpow2.f32 %v7749_v13  ;;  %v7632_v44 = vmul.f32 %v11390_v41, %v17658_v20  ;;  %v17837_v62 = vadd.f32 %v7854_v6, %v19356_v15  ;;  %v7797_v31 = vadd.f32 1.0, %v12623_v34  ;;  %v11205_v25 = vpop.f32.mrb[188].mxu0  ;;  %v19358_v6 = vld [vmem:[#allocation57_spill] sm:$0xff]  ;;  %v19361_v34 = vld [vmem:[#allocation43_spill] sm:$0xff] }
 0x932   : > { %12638 = vpow2.f32 %v7759_v46  ;;  %v17840_v22 = vadd.f32 %v17661_v30, %v7631_v61  ;;  %v7884_v57 = vadd.f32 %v7852_v63, %v19357_v40  ;;  %v17844_v59 = vadd.f32 %v17661_v30, %v7634_v8  ;;  %v7556_v29 = vpop.f32.mrb[189].mxu0  ;;  %v19359_v61 = vld [vmem:[#allocation56_spill] sm:$0xff] }
 0x933   : > { %v12625_v55 = vpop.eup %12624  ;;  %v17847_v33 = vadd.f32 %v17661_v30, %v7632_v44  ;;  %v11393_v12 = vadd.f32 %v17641_v28, %v11201_v4  ;;  %v7917_v36 = vpack.c.bf16 %v17837_v62, %v17826_v16  ;;  %12640 = vrcp.f32 %v7797_v31  ;;  %v11206_v14 = vpop.f32.mrb[190].mxu0  ;;  %v19363_v63 = vld [vmem:[#allocation144_spill] sm:$0xff]  ;;  %v19372_v16 = vld [vmem:[#allocation42_spill] sm:$0xff] }
 0x934   : > { %v7795_v58 = vadd.f32 1.0, %v12625_v55  ;;  %v7703_v39 = vsub.f32 0.0, %v17840_v22  ;;  %v12627_v17 = vpop.eup %12626  ;;  %v7915_v1 = vpack.c.bf16 %v7884_v57, %v17832_v26  ;;  %v7706_v21 = vsub.f32 0.0, %v17844_v59  ;;  %v7559_v27 = vpop.f32.mrb[191].mxu0  ;;  %v19364_v55 = vld [vmem:[#allocation133_spill] sm:$0xff] }
 0x935   : > { %v7704_v41 = vsub.f32 0.0, %v17847_v33  ;;  %v7637_v19 = vmul.f32 %v11393_v12, %v17658_v20  ;;  %v12629_v28 = vpop.eup %12628  ;;  %v7857_v4 = vmul.f32 %v12627_v17, %v17742_v3  ;;  %v11396_v46 = vadd.f32 %v17635_v60, %v7540_v9  ;;  %8124 = vmatmul.mubr.bf16.gmra.mrb[72].mxu1 %v7913_v32 }
 0x936   : > { %12642 = vrcp.f32 %v7795_v58  ;;  %v7755_v13 = vmul.f32 1.442695, %v7703_v39  ;;  %v12631_v51 = vpop.eup %12630  ;;  %v7855_v24 = vmul.f32 %v12629_v28, %v17746_v35  ;;  %v7761_v56 = vmul.f32 1.442695, %v7706_v21  ;;  %v19362_v35 = vld [vmem:[#allocation130_spill] sm:$0xff] }
 0x937   : > { %v7757_v48 = vmul.f32 1.442695, %v7704_v41  ;;  %v17864_v47 = vadd.f32 %v17661_v30, %v7637_v19  ;;  %v19360_v8 = vpack.c.bf16 %v19358_v6, %v19359_v61  ;;  %v12633_v3 = vpop.eup %12632  ;;  %v17870_v23 = vadd.f32 %v7857_v4, %v19361_v34 }
 0x938   : > { %v7858_v60 = vmul.f32 %v12631_v51, %v17749_v43  ;;  %12644 = vpow2.f32 %v7755_v13  ;;  %v7635_v0 = vmul.f32 %v11396_v46, %v17658_v20  ;;  %v12635_v52 = vpop.eup %12634  ;;  %v17875_v32 = vadd.f32 %v7855_v24, %v19362_v35  ;;  %v19365_v46 = vld [vmem:[#allocation61_spill] sm:$0xff]  ;;  %v19366_v51 = vld [vmem:[#allocation60_spill] sm:$0xff] }
 0x939   : > { %8131 = vmatprep.mubr.bf16.mxu1 %v19360_v8  ;;  %v7856_v9 = vmul.f32 %v12633_v3, %v17753_v11  ;;  %12646 = vpow2.f32 %v7761_v56  ;;  %v7709_v26 = vsub.f32 0.0, %v17864_v47  ;;  %v7798_v15 = vadd.f32 1.0, %v12635_v52 }
 0x93a   : > { %v17880_v44 = vadd.f32 %v7858_v60, %v19363_v63  ;;  %12648 = vpow2.f32 %v7757_v48  ;;  %v17883_v31 = vadd.f32 %v17661_v30, %v7635_v0  ;;  %v11399_v12 = vadd.f32 %v17644_v54, %v17811_v7 }
 0x93b   : > { %v12637_v43 = vpop.eup %12636  ;;  %v17886_v40 = vadd.f32 %v7856_v9, %v19364_v55  ;;  %v7767_v57 = vmul.f32 1.442695, %v7709_v26  ;;  %v11402_v11 = vadd.f32 %v17638_v45, %v17816_v38  ;;  %12650 = vrcp.f32 %v7798_v15 }
 0x93c   : > { %v12639_v58 = vpop.eup %12638  ;;  %v7921_v39 = vpack.c.bf16 %v17880_v44, %v17870_v23  ;;  %v7796_v17 = vadd.f32 1.0, %v12637_v43  ;;  %v7707_v21 = vsub.f32 0.0, %v17883_v31  ;;  %v7638_v28 = vmul.f32 %v11399_v12, %v17658_v20 }
 0x93d   : > { %v7919_v41 = vpack.c.bf16 %v17886_v40, %v17875_v32  ;;  %v7801_v19 = vadd.f32 1.0, %v12639_v58  ;;  %v12641_v4 = vpop.eup %12640  ;;  %v7636_v7 = vmul.f32 %v11402_v11, %v17658_v20  ;;  %v11405_v45 = vadd.f32 %v17653_v37, %v11205_v25  ;;  %8132 = vmatmul.mubr.bf16.gmra.mrb[76].mxu1 %v7915_v1  ;;  %v19368_v58 = vld [vmem:[#allocation65_spill] sm:$0xff]  ;;  %v19378_v40 = vld [vmem:[#allocation50_spill] sm:$0xff] }
 0x93e   : > { %12652 = vrcp.f32 %v7796_v17  ;;  %v7763_v54 = vmul.f32 1.442695, %v7707_v21  ;;  %v17901_v38 = vadd.f32 %v17661_v30, %v7638_v28  ;;  %v11408_v13 = vadd.f32 %v17647_v2, %v7556_v29  ;;  %v19369_v17 = vld [vmem:[#allocation64_spill] sm:$0xff] }
 0x93f   : > { %12654 = vpow2.f32 %v7767_v57  ;;  %v19367_v24 = vpack.c.bf16 %v19365_v46, %v19366_v51  ;;  %v17908_v48 = vadd.f32 %v17661_v30, %v7636_v7  ;;  %v7641_v6 = vmul.f32 %v11405_v45, %v17658_v20  ;;  %v19373_v45 = vld [vmem:[#allocation118_spill] sm:$0xff]  ;;  %v19374_v51 = vld [vmem:[#allocation117_spill] sm:$0xff] }
 0x940   : > { %v12643_v56 = vpop.eup %12642  ;;  %12656 = vrcp.f32 %v7801_v19  ;;  %v11411_v37 = vadd.f32 %v17656_v18, %v11206_v14  ;;  %v7710_v25 = vsub.f32 0.0, %v17901_v38  ;;  %v7639_v1 = vmul.f32 %v11408_v13, %v17658_v20 }
 0x941   : > { %8139 = vmatprep.mubr.bf16.mxu1 %v19367_v24  ;;  %12658 = vpow2.f32 %v7763_v54  ;;  %v7708_v2 = vsub.f32 0.0, %v17908_v48  ;;  %v17916_v29 = vadd.f32 %v17661_v30, %v7641_v6  ;;  %v11414_v3 = vadd.f32 %v17650_v10, %v7559_v27 }
 0x942   : > { %v12645_v61 = vpop.eup %12644  ;;  %v7642_v8 = vmul.f32 %v11411_v37, %v17658_v20  ;;  %v7861_v60 = vmul.f32 %v12641_v4, %v17768_v53  ;;  %v7769_v18 = vmul.f32 1.442695, %v7710_v25  ;;  %v17922_v14 = vadd.f32 %v17661_v30, %v7639_v1 }
 0x943   : > { %v12647_v34 = vpop.eup %12646  ;;  %v7799_v0 = vadd.f32 1.0, %v12645_v61  ;;  %v7765_v9 = vmul.f32 1.442695, %v7708_v2  ;;  %v7713_v26 = vsub.f32 0.0, %v17916_v29  ;;  %v7640_v27 = vmul.f32 %v11414_v3, %v17658_v20  ;;  %v19375_v61 = vld [vmem:[#allocation69_spill] sm:$0xff]  ;;  %v19376_v2 = vld [vmem:[#allocation68_spill] sm:$0xff] }
 0x944   : > { %v12649_v52 = vpop.eup %12648  ;;  %v7802_v35 = vadd.f32 1.0, %v12647_v34  ;;  %v17926_v63 = vadd.f32 %v17661_v30, %v7642_v8  ;;  %v7711_v10 = vsub.f32 0.0, %v17922_v14  ;;  %v7859_v43 = vmul.f32 %v12643_v56, %v17776_v50  ;;  %v19371_v50 = vld [vmem:[#allocation47_spill] sm:$0xff] }
 0x945   : > { %12660 = vrcp.f32 %v7799_v0  ;;  %v7800_v15 = vadd.f32 1.0, %v12649_v52  ;;  %v12651_v53 = vpop.eup %12650  ;;  %8140 = vmatmul.mubr.bf16.gmra.mrb[80].mxu1 %v7917_v36  ;;  %v7775_v12 = vmul.f32 1.442695, %v7713_v26  ;;  %v17937_v11 = vadd.f32 %v17661_v30, %v7640_v27  ;;  %v19380_v26 = vld [vmem:[#allocation38_spill] sm:$0xff] }
 0x946   : > { %12662 = vrcp.f32 %v7802_v35  ;;  %v7714_v55 = vsub.f32 0.0, %v17926_v63  ;;  %v7862_v57 = vmul.f32 %v12651_v53, %v17794_v5  ;;  %v19370_v20 = vpack.c.bf16 %v19368_v58, %v19369_v17  ;;  %v19383_v58 = vld [vmem:[#allocation72_spill] sm:$0xff] }
 0x947   : > { %12664 = vrcp.f32 %v7800_v15  ;;  %v17943_v19 = vadd.f32 %v7861_v60, %v19371_v50  ;;  %v7771_v28 = vmul.f32 1.442695, %v7711_v10  ;;  %v7712_v30 = vsub.f32 0.0, %v17937_v11  ;;  %v19381_v10 = vld [vmem:[#allocation39_spill] sm:$0xff] }
 0x948   : > { %8147 = vmatprep.mubr.bf16.mxu1 %v19370_v20  ;;  %v12653_v21 = vpop.eup %12652  ;;  %12666 = vpow2.f32 %v7769_v18  ;;  %v17946_v62 = vadd.f32 %v7862_v57, %v19372_v16  ;;  %v7777_v54 = vmul.f32 1.442695, %v7714_v55  ;;  %v7891_v13 = vadd.f32 %v7859_v43, %v19373_v45 }
 0x949   : > { %v12655_v4 = vpop.eup %12654  ;;  %v7860_v5 = vmul.f32 %v12653_v21, %v17804_v42  ;;  %12668 = vpow2.f32 %v7765_v9  ;;  %v7773_v56 = vmul.f32 1.442695, %v7712_v30  ;;  %v19377_v8 = vpack.c.bf16 %v19375_v61, %v19376_v2  ;;  %v19386_v30 = vld [vmem:[#allocation76_spill] sm:$0xff] }
 0x94a   : > { %v12657_v36 = vpop.eup %12656  ;;  %v7925_v46 = vpack.c.bf16 %v17946_v62, %v17943_v19  ;;  %12670 = vpow2.f32 %v7775_v12  ;;  %v7805_v37 = vadd.f32 1.0, %v12655_v4  ;;  %v19382_v12 = vld [vmem:[#allocation73_spill] sm:$0xff]  ;;  %v19400_v19 = vld [vmem:[#allocation84_spill] sm:$0xff] }
 0x94b   : > { %v12659_v7 = vpop.eup %12658  ;;  %v7892_v24 = vadd.f32 %v7860_v5, %v19374_v51  ;;  %12672 = vpow2.f32 %v7771_v28  ;;  %v7865_v1 = vmul.f32 %v12657_v36, %v17809_v49  ;;  %v19379_v49 = vld [vmem:[#allocation46_spill] sm:$0xff]  ;;  %v19384_v17 = vpack.c.bf16 %v19382_v12, %v19383_v58 }
 0x94c   : > { %v7803_v25 = vadd.f32 1.0, %v12659_v7  ;;  %12674 = vpow2.f32 %v7777_v54  ;;  %v19388_v51 = vld [vmem:[#allocation58_spill] sm:$0xff] }
 0x94d   : > { %v7923_v6 = vpack.c.bf16 %v7892_v24, %v7891_v13  ;;  %8148 = vmatmul.mubr.bf16.gmra.mrb[84].mxu1 %v7919_v41  ;;  %12676 = vpow2.f32 %v7773_v56  ;;  %v7897_v41 = vadd.f32 %v7865_v1, %v19378_v40  ;;  %v19389_v56 = vld [vmem:[#allocation54_spill] sm:$0xff] }
 0x94e   : > { %8155 = vmatprep.mubr.bf16.mxu1 %v19377_v8  ;;  %12678 = vrcp.f32 %v7805_v37 }
 0x94f   : > { %v12661_v42 = vpop.eup %12660  ;;  %12680 = vrcp.f32 %v7803_v25 }
 0x950   : > { %v12663_v3 = vpop.eup %12662  ;;  %v7863_v34 = vmul.f32 %v12661_v42, %v17840_v22  ;;  %v19391_v42 = vld [vmem:[#allocation55_spill] sm:$0xff] }
 0x951   : > { %v12665_v60 = vpop.eup %12664  ;;  %v7866_v0 = vmul.f32 %v12663_v3, %v17844_v59 }
 0x952   : > { %v12667_v18 = vpop.eup %12666  ;;  %v7864_v52 = vmul.f32 %v12665_v60, %v17847_v33  ;;  %v7895_v15 = vadd.f32 %v7863_v34, %v19380_v26  ;;  %v19392_v60 = vld [vmem:[#allocation81_spill] sm:$0xff] }
 0x953   : > { %v12669_v32 = vpop.eup %12668  ;;  %v7898_v35 = vadd.f32 %v7866_v0, %v19379_v49  ;;  %v7806_v9 = vadd.f32 1.0, %v12667_v18  ;;  %v19393_v0 = vld [vmem:[#allocation80_spill] sm:$0xff]  ;;  %v19399_v26 = vld [vmem:[#allocation85_spill] sm:$0xff] }
 0x954   : > { %v7896_v27 = vadd.f32 %v7864_v52, %v19381_v10  ;;  %v7804_v53 = vadd.f32 1.0, %v12669_v32  ;;  %v12671_v22 = vpop.eup %12670  ;;  %v19394_v18 = vpack.c.bf16 %v19392_v60, %v19393_v0  ;;  %v19395_v52 = vld [vmem:[#allocation66_spill] sm:$0xff]  ;;  %v19401_v62 = vpack.c.bf16 %v19399_v26, %v19400_v19  ;;  %v19405_v10 = vld [vmem:[#allocation93_spill] sm:$0xff] }
 0x955   : > { %v7929_v43 = vpack.c.bf16 %v7898_v35, %v7897_v41  ;;  %12682 = vrcp.f32 %v7806_v9  ;;  %v12673_v59 = vpop.eup %12672  ;;  %v7809_v57 = vadd.f32 1.0, %v12671_v22  ;;  %8156 = vmatmul.mubr.bf16.gmra.mrb[88].mxu1 %v7921_v39  ;;  %v19385_v39 = vld [vmem:[#allocation77_spill] sm:$0xff]  ;;  %v19397_v41 = vld [vmem:[#allocation59_spill] sm:$0xff] }
 0x956   : > { %v7927_v55 = vpack.c.bf16 %v7896_v27, %v7895_v15  ;;  %12684 = vrcp.f32 %v7804_v53  ;;  %v7807_v33 = vadd.f32 1.0, %v12673_v59  ;;  %8163 = vmatprep.mubr.bf16.mxu1 %v19384_v17  ;;  %v12675_v20 = vpop.eup %12674  ;;  %v19387_v36 = vpack.c.bf16 %v19385_v39, %v19386_v30  ;;  %v19406_v27 = vld [vmem:[#allocation92_spill] sm:$0xff]  ;;  %v19408_v22 = vld [vmem:[#allocation97_spill] sm:$0xff] }
 0x957   : > { %12686 = vrcp.f32 %v7809_v57  ;;  %v12677_v21 = vpop.eup %12676  ;;  %v7810_v50 = vadd.f32 1.0, %v12675_v20  ;;  %v19407_v53 = vpack.c.bf16 %v19405_v10, %v19406_v27  ;;  %v19409_v59 = vld [vmem:[#allocation96_spill] sm:$0xff]  ;;  %v18014_v20 = vld [vmem:[#allocation21] ss:$0 sm:$0xff] }
 0x958   : > { %12688 = vrcp.f32 %v7807_v33  ;;  %v7808_v28 = vadd.f32 1.0, %v12677_v21  ;;  %v12679_v4 = vpop.eup %12678  ;;  %v19410_v57 = vpack.c.bf16 %v19408_v22, %v19409_v59  ;;  %v19412_v33 = vld [vmem:[#allocation100_spill] sm:$0xff] }
 0x959   : > { %12690 = vrcp.f32 %v7810_v50  ;;  %v12681_v16 = vpop.eup %12680  ;;  %v7869_v5 = vmul.f32 %v12679_v4, %v17864_v47  ;;  %v19390_v47 = vld [vmem:[#allocation51_spill] sm:$0xff]  ;;  %v18016_v4 = vld [vmem:[#allocation23] ss:$0 sm:$0xff] }
 0x95a   : > { %12692 = vrcp.f32 %v7808_v28  ;;  %v7867_v44 = vmul.f32 %v12681_v16, %v17883_v31 }
 0x95b   : > { %v7901_v24 = vadd.f32 %v7869_v5, %v19388_v51 }
 0x95d   : > { %8164 = vmatmul.mubr.bf16.gmra.mrb[92].mxu1 %v7923_v6  ;;  %v7899_v6 = vadd.f32 %v7867_v44, %v19390_v47 }
 0x95e   : > { %8171 = vmatprep.mubr.bf16.mxu1 %v19387_v36 }
 0x95f   : > { %v12683_v23 = vpop.eup %12682 }
 0x960   : > { %v12685_v54 = vpop.eup %12684  ;;  %v7870_v7 = vmul.f32 %v12683_v23, %v17901_v38 }
 0x961   : > { %v7868_v45 = vmul.f32 %v12685_v54, %v17908_v48  ;;  %v12687_v13 = vpop.eup %12686 }
 0x962   : > { %v7902_v37 = vadd.f32 %v7870_v7, %v19389_v56  ;;  %v12689_v25 = vpop.eup %12688  ;;  %v7873_v61 = vmul.f32 %v12687_v13, %v17916_v29  ;;  %v19396_v29 = vld [vmem:[#allocation62_spill] sm:$0xff] }
 0x963   : > { %v7900_v1 = vadd.f32 %v7868_v45, %v19391_v42  ;;  %v12691_v2 = vpop.eup %12690  ;;  %v7871_v3 = vmul.f32 %v12689_v25, %v17922_v14  ;;  %v19398_v14 = vld [vmem:[#allocation63_spill] sm:$0xff] }
 0x964   : > { %v7933_v31 = vpack.c.bf16 %v7902_v37, %v7901_v24  ;;  %v12693_v38 = vpop.eup %12692  ;;  %v7874_v48 = vmul.f32 %v12691_v2, %v17926_v63  ;;  %v7905_v32 = vadd.f32 %v7873_v61, %v19395_v52 }
 0x965   : > { %v7931_v8 = vpack.c.bf16 %v7900_v1, %v7899_v6  ;;  %8172 = vmatmul.mubr.bf16.gmra.mrb[96].mxu1 %v7925_v46  ;;  %v7872_v34 = vmul.f32 %v12693_v38, %v17937_v11  ;;  %v7903_v49 = vadd.f32 %v7871_v3, %v19397_v41  ;;  %v19402_v11 = vld [vmem:[#allocation89_spill] sm:$0xff]  ;;  %v19403_v46 = vld [vmem:[#allocation88_spill] sm:$0xff] }
 0x966   : > { %8179 = vmatprep.mubr.bf16.mxu1 %v19394_v18  ;;  %v7906_v40 = vadd.f32 %v7874_v48, %v19396_v29  ;;  %v19404_v15 = vpack.c.bf16 %v19402_v11, %v19403_v46 }
 0x967   : > { %v7904_v35 = vadd.f32 %v7872_v34, %v19398_v14 }
 0x968   : > { %v7937_v9 = vpack.c.bf16 %v7906_v40, %v7905_v32 }
 0x969   : > { %v7935_v63 = vpack.c.bf16 %v7904_v35, %v7903_v49 }
 0x96d   : > { %8180 = vmatmul.mubr.bf16.gmra.mrb[100].mxu1 %v7927_v55  ;;  %v19411_v55 = vld [vmem:[#allocation101_spill] sm:$0xff] }
 0x96e   : > { %8187 = vmatprep.mubr.bf16.mxu1 %v19401_v62  ;;  %v19413_v12 = vpack.c.bf16 %v19411_v55, %v19412_v33 }
 0x975   : > { %8188 = vmatmul.mubr.bf16.gmra.mrb[104].mxu1 %v7929_v43 }
 0x976   : > { %8195 = vmatprep.mubr.bf16.mxu1 %v19404_v15 }
 0x97d   : > { %8196 = vmatmul.mubr.bf16.gmra.mrb[108].mxu1 %v7931_v8 }
 0x97e   : > { %8203 = vmatprep.mubr.bf16.mxu1 %v19407_v53 }
 0x985   : > { %8204 = vmatmul.mubr.bf16.gmra.mrb[112].mxu1 %v7933_v31 }
 0x986   : > { %8211 = vmatprep.mubr.bf16.mxu1 %v19410_v57 }
 0x98d   : > { %8212 = vmatmul.mubr.bf16.gmra.mrb[116].mxu1 %v7935_v63 }
 0x98e   : > { %8219 = vmatprep.mubr.bf16.mxu1 %v19413_v12 }
 0x995   : > { %8220 = vmatmul.mubr.bf16.gmra.mrb[120].mxu1 %v7937_v9 }
 0x9f7   : > { %v10733_v43 = vpop.f32.mrb[64].mxu1 }
 0x9f8   : > { %v10727_v58 = vpop.f32.mrb[0].mxu0  ;;  %v10734_v17 = vpop.f32.mrb[65].mxu1 }
 0x9f9   : > { %v10735_v21 = vadd.f32 %v10734_v17, %v10733_v43  ;;  %v10728_v50 = vpop.f32.mrb[1].mxu0  ;;  %v10736_v28 = vpop.f32.mrb[66].mxu1 }
 0x9fa   : > { %v10729_v16 = vadd.f32 %v10728_v50, %v10727_v58  ;;  %v10730_v5 = vpop.f32.mrb[2].mxu0  ;;  %v10737_v23 = vpop.f32.mrb[67].mxu1 }
 0x9fb   : > { %v8237_v44 = vmul.f32 %v10735_v21, %v18014_v20  ;;  %v10738_v39 = vadd.f32 %v10737_v23, %v10736_v28  ;;  %v10731_v30 = vpop.f32.mrb[3].mxu0 }
 0x9fc   : > { %v8235_v36 = vmul.f32 %v10729_v16, %v18014_v20  ;;  %v10732_v54 = vadd.f32 %v10731_v30, %v10730_v5 }
 0x9fd   : > { %v18021_v7 = vadd.f32 %v18016_v4, %v8237_v44  ;;  %v8238_v45 = vmul.f32 %v10738_v39, %v18014_v20 }
 0x9fe   : > { %v18025_v13 = vadd.f32 %v18016_v4, %v8235_v36  ;;  %v8236_v51 = vmul.f32 %v10732_v54, %v18014_v20 }
 0x9ff   : > { %v8308_v24 = vsub.f32 0.0, %v18021_v7  ;;  %v18030_v56 = vadd.f32 %v18016_v4, %v8238_v45 }
 0xa00   : > { %v8306_v37 = vsub.f32 0.0, %v18025_v13  ;;  %v18034_v25 = vadd.f32 %v18016_v4, %v8236_v51  ;;  %v10739_v47 = vpop.f32.mrb[68].mxu1 }
 0xa01   : > { %v8342_v6 = vmul.f32 1.442695, %v8308_v24  ;;  %v8309_v42 = vsub.f32 0.0, %v18030_v56  ;;  %v10740_v1 = vpop.f32.mrb[69].mxu1 }
 0xa02   : > { %v8338_v31 = vmul.f32 1.442695, %v8306_v37  ;;  %v8307_v61 = vsub.f32 0.0, %v18034_v25  ;;  %v10741_v2 = vadd.f32 %v10740_v1, %v10739_v47  ;;  %v10742_v8 = vpop.f32.mrb[70].mxu1 }
 0xa03   : > { %12694 = vpow2.f32 %v8342_v6  ;;  %v8344_v3 = vmul.f32 1.442695, %v8309_v42  ;;  %v10743_v38 = vpop.f32.mrb[71].mxu1 }
 0xa04   : > { %12696 = vpow2.f32 %v8338_v31  ;;  %v8340_v48 = vmul.f32 1.442695, %v8307_v61  ;;  %v8239_v34 = vmul.f32 %v10741_v2, %v18014_v20  ;;  %v10744_v60 = vadd.f32 %v10743_v38, %v10742_v8 }
 0xa05   : > { %12698 = vpow2.f32 %v8344_v3 }
 0xa06   : > { %12700 = vpow2.f32 %v8340_v48  ;;  %v18040_v0 = vadd.f32 %v18016_v4, %v8239_v34  ;;  %v8240_v18 = vmul.f32 %v10744_v60, %v18014_v20 }
 0xa08   : > { %v8310_v52 = vsub.f32 0.0, %v18040_v0  ;;  %v18045_v32 = vadd.f32 %v18016_v4, %v8240_v18  ;;  %v10745_v29 = vpop.f32.mrb[72].mxu1 }
 0xa09   : > { %v10746_v40 = vpop.f32.mrb[73].mxu1 }
 0xa0a   : > { %v8346_v41 = vmul.f32 1.442695, %v8310_v52  ;;  %v8311_v49 = vsub.f32 0.0, %v18045_v32  ;;  %v10747_v14 = vadd.f32 %v10746_v40, %v10745_v29  ;;  %v10748_v35 = vpop.f32.mrb[74].mxu1 }
 0xa0b   : > { %v10749_v9 = vpop.f32.mrb[75].mxu1 }
 0xa0c   : > { %12702 = vpow2.f32 %v8346_v41  ;;  %v8348_v63 = vmul.f32 1.442695, %v8311_v49  ;;  %v8241_v26 = vmul.f32 %v10747_v14, %v18014_v20  ;;  %v10750_v19 = vadd.f32 %v10749_v9, %v10748_v35 }
 0xa0d   : > { %v12695_v62 = vpop.eup %12694 }
 0xa0e   : > { %v12697_v11 = vpop.eup %12696  ;;  %v8404_v46 = vadd.f32 1.0, %v12695_v62  ;;  %12704 = vpow2.f32 %v8348_v63  ;;  %v18050_v15 = vadd.f32 %v18016_v4, %v8241_v26  ;;  %v8242_v10 = vmul.f32 %v10750_v19, %v18014_v20 }
 0xa0f   : > { %v12699_v27 = vpop.eup %12698  ;;  %v8402_v53 = vadd.f32 1.0, %v12697_v11 }
 0xa10   : > { %v12701_v22 = vpop.eup %12700  ;;  %12706 = vrcp.f32 %v8404_v46  ;;  %v8405_v59 = vadd.f32 1.0, %v12699_v27  ;;  %v8312_v57 = vsub.f32 0.0, %v18050_v15  ;;  %v18055_v55 = vadd.f32 %v18016_v4, %v8242_v10  ;;  %v10751_v33 = vpop.f32.mrb[76].mxu1 }
 0xa11   : > { %12708 = vrcp.f32 %v8402_v53  ;;  %v8403_v12 = vadd.f32 1.0, %v12701_v22  ;;  %v10752_v43 = vpop.f32.mrb[77].mxu1 }
 0xa12   : > { %12710 = vrcp.f32 %v8405_v59  ;;  %v8350_v58 = vmul.f32 1.442695, %v8312_v57  ;;  %v8313_v17 = vsub.f32 0.0, %v18055_v55  ;;  %v10753_v21 = vadd.f32 %v10752_v43, %v10751_v33  ;;  %v10754_v50 = vpop.f32.mrb[78].mxu1 }
 0xa13   : > { %12712 = vrcp.f32 %v8403_v12  ;;  %v10755_v28 = vpop.f32.mrb[79].mxu1 }
 0xa14   : > { %12714 = vpow2.f32 %v8350_v58  ;;  %v8352_v16 = vmul.f32 1.442695, %v8313_v17  ;;  %v8243_v5 = vmul.f32 %v10753_v21, %v18014_v20  ;;  %v10756_v23 = vadd.f32 %v10755_v28, %v10754_v50 }
 0xa16   : > { %v12703_v44 = vpop.eup %12702  ;;  %12716 = vpow2.f32 %v8352_v16  ;;  %v18060_v39 = vadd.f32 %v18016_v4, %v8243_v5  ;;  %v8244_v30 = vmul.f32 %v10756_v23, %v18014_v20 }
 0xa17   : > { %v8406_v36 = vadd.f32 1.0, %v12703_v44 }
 0xa18   : > { %v12705_v54 = vpop.eup %12704  ;;  %v8314_v45 = vsub.f32 0.0, %v18060_v39  ;;  %v18065_v51 = vadd.f32 %v18016_v4, %v8244_v30  ;;  %v10757_v24 = vpop.f32.mrb[80].mxu1 }
 0xa19   : > { %12718 = vrcp.f32 %v8406_v36  ;;  %v8407_v37 = vadd.f32 1.0, %v12705_v54  ;;  %v10758_v47 = vpop.f32.mrb[81].mxu1 }
 0xa1a   : > { %v12707_v6 = vpop.eup %12706  ;;  %v8354_v42 = vmul.f32 1.442695, %v8314_v45  ;;  %v8315_v1 = vsub.f32 0.0, %v18065_v51  ;;  %v10759_v31 = vadd.f32 %v10758_v47, %v10757_v24  ;;  %v10760_v61 = vpop.f32.mrb[82].mxu1 }
 0xa1b   : > { %v12709_v2 = vpop.eup %12708  ;;  %12720 = vrcp.f32 %v8407_v37  ;;  %v10761_v8 = vpop.f32.mrb[83].mxu1  ;;  %v8468_v60 = vmul.f32 %v12707_v6, %v18021_v7 }
 0xa1c   : > { %v12711_v3 = vpop.eup %12710  ;;  %12722 = vpow2.f32 %v8354_v42  ;;  %v8356_v38 = vmul.f32 1.442695, %v8315_v1  ;;  %v8245_v48 = vmul.f32 %v10759_v31, %v18014_v20  ;;  %v10762_v52 = vadd.f32 %v10761_v8, %v10760_v61 }
 0xa1d   : > { %v12713_v34 = vpop.eup %12712  ;;  %v8469_v18 = vmul.f32 %v12711_v3, %v18030_v56  ;;  %v8466_v40 = vmul.f32 %v12709_v2, %v18025_v13 }
 0xa1e   : > { %v12715_v29 = vpop.eup %12714  ;;  %v8467_v41 = vmul.f32 %v12713_v34, %v18034_v25  ;;  %12724 = vpow2.f32 %v8356_v38  ;;  %v18074_v49 = vadd.f32 %v18016_v4, %v8245_v48  ;;  %v8246_v9 = vmul.f32 %v10762_v52, %v18014_v20 }
 0xa1f   : > { %v9400_v14 = vpack.c.bf16 %v8469_v18, %v8468_v60  ;;  %v8408_v35 = vadd.f32 1.0, %v12715_v29 }
 0xa20   : > { %v12717_v63 = vpop.eup %12716  ;;  %v9395_v26 = vpack.c.bf16 %v8467_v41, %v8466_v40  ;;  %v8316_v7 = vsub.f32 0.0, %v18074_v49  ;;  %v10763_v19 = vpop.f32.mrb[84].mxu1  ;;  %v18084_v56 = vadd.f32 %v18016_v4, %v8246_v9 }
 0xa21   : > { %9472 = vst [vmem:[%s18080_s25 + $0x8] sm:$0xff] %v9400_v14   ;;  %12726 = vrcp.f32 %v8408_v35  ;;  %v8409_v13 = vadd.f32 1.0, %v12717_v63  ;;  %v10764_v25 = vpop.f32.mrb[85].mxu1 }
 0xa22   : > { %9396 = vst [vmem:[%s18080_s25] sm:$0xff] %v9395_v26   ;;  %v8358_v62 = vmul.f32 1.442695, %v8316_v7  ;;  %v10765_v11 = vadd.f32 %v10764_v25, %v10763_v19  ;;  %v10766_v46 = vpop.f32.mrb[86].mxu1  ;;  %v8317_v27 = vsub.f32 0.0, %v18084_v56 }
 0xa23   : > { %v12719_v10 = vpop.eup %12718  ;;  %12728 = vrcp.f32 %v8409_v13  ;;  %v10767_v53 = vpop.f32.mrb[87].mxu1 }
 0xa24   : > { %12730 = vpow2.f32 %v8358_v62  ;;  %v8247_v22 = vmul.f32 %v10765_v11, %v18014_v20  ;;  %v10768_v59 = vadd.f32 %v10767_v53, %v10766_v46  ;;  %v8360_v33 = vmul.f32 1.442695, %v8317_v27 }
 0xa25   : > { %v12721_v57 = vpop.eup %12720  ;;  %v8470_v43 = vmul.f32 %v12719_v10, %v18040_v0 }
 0xa26   : > { %v12723_v12 = vpop.eup %12722  ;;  %v8471_v58 = vmul.f32 %v12721_v57, %v18045_v32  ;;  %v18092_v17 = vadd.f32 %v18016_v4, %v8247_v22  ;;  %v8248_v21 = vmul.f32 %v10768_v59, %v18014_v20  ;;  %12732 = vpow2.f32 %v8360_v33 }
 0xa27   : > { %v8410_v50 = vadd.f32 1.0, %v12723_v12 }
 0xa28   : > { %v12725_v28 = vpop.eup %12724  ;;  %v9405_v16 = vpack.c.bf16 %v8471_v58, %v8470_v43  ;;  %v8318_v5 = vsub.f32 0.0, %v18092_v17  ;;  %v18097_v23 = vadd.f32 %v18016_v4, %v8248_v21  ;;  %v10769_v44 = vpop.f32.mrb[88].mxu1 }
 0xa29   : > { %12734 = vrcp.f32 %v8410_v50  ;;  %v8411_v30 = vadd.f32 1.0, %v12725_v28  ;;  %v10770_v0 = vpop.f32.mrb[89].mxu1 }
 0xa2a   : > { %9473 = vst [vmem:[%s18080_s25 + $0x10] sm:$0xff] %v9405_v16   ;;  %v8362_v32 = vmul.f32 1.442695, %v8318_v5  ;;  %v8319_v36 = vsub.f32 0.0, %v18097_v23  ;;  %v10771_v54 = vadd.f32 %v10770_v0, %v10769_v44  ;;  %v10772_v45 = vpop.f32.mrb[90].mxu1 }
 0xa2b   : > { %v12727_v24 = vpop.eup %12726  ;;  %12736 = vrcp.f32 %v8411_v30  ;;  %v10773_v37 = vpop.f32.mrb[91].mxu1 }
 0xa2c   : > { %12738 = vpow2.f32 %v8362_v32  ;;  %v8364_v47 = vmul.f32 1.442695, %v8319_v36  ;;  %v8249_v6 = vmul.f32 %v10771_v54, %v18014_v20  ;;  %v10774_v1 = vadd.f32 %v10773_v37, %v10772_v45 }
 0xa2d   : > { %v12729_v42 = vpop.eup %12728  ;;  %v8472_v61 = vmul.f32 %v12727_v24, %v18050_v15 }
 0xa2e   : > { %v12731_v31 = vpop.eup %12730  ;;  %v8473_v2 = vmul.f32 %v12729_v42, %v18055_v55  ;;  %12740 = vpow2.f32 %v8364_v47  ;;  %v18105_v8 = vadd.f32 %v18016_v4, %v8249_v6  ;;  %v8250_v38 = vmul.f32 %v10774_v1, %v18014_v20 }
 0xa2f   : > { %v8412_v3 = vadd.f32 1.0, %v12731_v31 }
 0xa30   : > { %v9410_v48 = vpack.c.bf16 %v8473_v2, %v8472_v61  ;;  %v8320_v34 = vsub.f32 0.0, %v18105_v8  ;;  %v10775_v60 = vpop.f32.mrb[92].mxu1  ;;  %v12733_v18 = vpop.eup %12732  ;;  %v18110_v52 = vadd.f32 %v18016_v4, %v8250_v38 }
 0xa31   : > { %v10776_v29 = vpop.f32.mrb[93].mxu1  ;;  %12742 = vrcp.f32 %v8412_v3  ;;  %v8413_v15 = vadd.f32 1.0, %v12733_v18 }
 0xa32   : > { %9474 = vst [vmem:[%s18080_s25 + $0x18] sm:$0xff] %v9410_v48   ;;  %v8366_v55 = vmul.f32 1.442695, %v8320_v34  ;;  %v10777_v40 = vadd.f32 %v10776_v29, %v10775_v60  ;;  %v10778_v41 = vpop.f32.mrb[94].mxu1  ;;  %v8321_v35 = vsub.f32 0.0, %v18110_v52 }
 0xa33   : > { %v12735_v14 = vpop.eup %12734  ;;  %v10779_v9 = vpop.f32.mrb[95].mxu1  ;;  %12744 = vrcp.f32 %v8413_v15 }
 0xa34   : > { %v8251_v63 = vmul.f32 %v10777_v40, %v18014_v20  ;;  %v10780_v26 = vadd.f32 %v10779_v9, %v10778_v41  ;;  %12746 = vpow2.f32 %v8366_v55  ;;  %v8368_v19 = vmul.f32 1.442695, %v8321_v35 }
 0xa35   : > { %v12737_v7 = vpop.eup %12736  ;;  %v8474_v25 = vmul.f32 %v12735_v14, %v18060_v39 }
 0xa36   : > { %v12739_v13 = vpop.eup %12738  ;;  %v8475_v62 = vmul.f32 %v12737_v7, %v18065_v51  ;;  %v18118_v11 = vadd.f32 %v18016_v4, %v8251_v63  ;;  %v8252_v46 = vmul.f32 %v10780_v26, %v18014_v20  ;;  %12748 = vpow2.f32 %v8368_v19 }
 0xa37   : > { %v8414_v10 = vadd.f32 1.0, %v12739_v13 }
 0xa38   : > { %v12741_v27 = vpop.eup %12740  ;;  %v9415_v53 = vpack.c.bf16 %v8475_v62, %v8474_v25  ;;  %v8322_v22 = vsub.f32 0.0, %v18118_v11  ;;  %v18123_v59 = vadd.f32 %v18016_v4, %v8252_v46  ;;  %v10781_v57 = vpop.f32.mrb[96].mxu1 }
 0xa39   : > { %12750 = vrcp.f32 %v8414_v10  ;;  %v8415_v33 = vadd.f32 1.0, %v12741_v27  ;;  %v10782_v39 = vpop.f32.mrb[97].mxu1 }
 0xa3a   : > { %9475 = vst [vmem:[%s18080_s25 + $0x20] sm:$0xff] %v9415_v53   ;;  %v8370_v51 = vmul.f32 1.442695, %v8322_v22  ;;  %v8323_v12 = vsub.f32 0.0, %v18123_v59  ;;  %v10783_v43 = vadd.f32 %v10782_v39, %v10781_v57  ;;  %v10784_v58 = vpop.f32.mrb[98].mxu1 }
 0xa3b   : > { %12752 = vrcp.f32 %v8415_v33  ;;  %v10785_v21 = vpop.f32.mrb[99].mxu1  ;;  %v12743_v50 = vpop.eup %12742 }
 0xa3c   : > { %12754 = vpow2.f32 %v8370_v51  ;;  %v8372_v28 = vmul.f32 1.442695, %v8323_v12  ;;  %v8253_v16 = vmul.f32 %v10783_v43, %v18014_v20  ;;  %v10786_v5 = vadd.f32 %v10785_v21, %v10784_v58 }
 0xa3d   : > { %v12745_v44 = vpop.eup %12744  ;;  %v8476_v32 = vmul.f32 %v12743_v50, %v18074_v49 }
 0xa3e   : > { %12756 = vpow2.f32 %v8372_v28  ;;  %v18129_v30 = vadd.f32 %v18016_v4, %v8253_v16  ;;  %v12747_v0 = vpop.eup %12746  ;;  %v8477_v36 = vmul.f32 %v12745_v44, %v18084_v56  ;;  %v8254_v54 = vmul.f32 %v10786_v5, %v18014_v20 }
 0xa3f   : > { %v8416_v45 = vadd.f32 1.0, %v12747_v0 }
 0xa40   : > { %v8324_v24 = vsub.f32 0.0, %v18129_v30  ;;  %v10787_v37 = vpop.f32.mrb[100].mxu1  ;;  %v12749_v47 = vpop.eup %12748  ;;  %v9420_v6 = vpack.c.bf16 %v8477_v36, %v8476_v32  ;;  %v18136_v42 = vadd.f32 %v18016_v4, %v8254_v54 }
 0xa41   : > { %v10788_v1 = vpop.f32.mrb[101].mxu1  ;;  %12758 = vrcp.f32 %v8416_v45  ;;  %v8417_v31 = vadd.f32 1.0, %v12749_v47 }
 0xa42   : > { %v8374_v61 = vmul.f32 1.442695, %v8324_v24  ;;  %v10789_v2 = vadd.f32 %v10788_v1, %v10787_v37  ;;  %v10790_v49 = vpop.f32.mrb[102].mxu1  ;;  %9476 = vst [vmem:[%s18080_s25 + $0x28] sm:$0xff] %v9420_v6   ;;  %v8325_v56 = vsub.f32 0.0, %v18136_v42 }
 0xa43   : > { %v12751_v3 = vpop.eup %12750  ;;  %v10791_v38 = vpop.f32.mrb[103].mxu1  ;;  %12760 = vrcp.f32 %v8417_v31 }
 0xa44   : > { %v8255_v48 = vmul.f32 %v10789_v2, %v18014_v20  ;;  %v10792_v34 = vadd.f32 %v10791_v38, %v10790_v49  ;;  %12762 = vpow2.f32 %v8374_v61  ;;  %v8376_v18 = vmul.f32 1.442695, %v8325_v56 }
 0xa45   : > { %v12753_v60 = vpop.eup %12752  ;;  %v8478_v15 = vmul.f32 %v12751_v3, %v18092_v17 }
 0xa46   : > { %v12755_v29 = vpop.eup %12754  ;;  %v8479_v55 = vmul.f32 %v12753_v60, %v18097_v23  ;;  %v18144_v40 = vadd.f32 %v18016_v4, %v8255_v48  ;;  %v8256_v41 = vmul.f32 %v10792_v34, %v18014_v20  ;;  %12764 = vpow2.f32 %v8376_v18 }
 0xa47   : > { %v8418_v14 = vadd.f32 1.0, %v12755_v29 }
 0xa48   : > { %v12757_v35 = vpop.eup %12756  ;;  %v9425_v9 = vpack.c.bf16 %v8479_v55, %v8478_v15  ;;  %v8326_v63 = vsub.f32 0.0, %v18144_v40  ;;  %v18149_v26 = vadd.f32 %v18016_v4, %v8256_v41  ;;  %v10793_v7 = vpop.f32.mrb[104].mxu1 }
 0xa49   : > { %12766 = vrcp.f32 %v8418_v14  ;;  %v8419_v19 = vadd.f32 1.0, %v12757_v35  ;;  %v10794_v17 = vpop.f32.mrb[105].mxu1 }
 0xa4a   : > { %9477 = vst [vmem:[%s18080_s25 + $0x30] sm:$0xff] %v9425_v9   ;;  %v8378_v23 = vmul.f32 1.442695, %v8326_v63  ;;  %v8327_v13 = vsub.f32 0.0, %v18149_v26  ;;  %v10795_v25 = vadd.f32 %v10794_v17, %v10793_v7  ;;  %v10796_v62 = vpop.f32.mrb[106].mxu1 }
 0xa4b   : > { %12768 = vrcp.f32 %v8419_v19  ;;  %v10797_v46 = vpop.f32.mrb[107].mxu1  ;;  %v12759_v10 = vpop.eup %12758 }
 0xa4c   : > { %12770 = vpow2.f32 %v8378_v23  ;;  %v8380_v27 = vmul.f32 1.442695, %v8327_v13  ;;  %v8257_v53 = vmul.f32 %v10795_v25, %v18014_v20  ;;  %v10798_v22 = vadd.f32 %v10797_v46, %v10796_v62 }
 0xa4d   : > { %v12761_v57 = vpop.eup %12760  ;;  %v8480_v12 = vmul.f32 %v12759_v10, %v18105_v8 }
 0xa4e   : > { %12772 = vpow2.f32 %v8380_v27  ;;  %v18155_v33 = vadd.f32 %v18016_v4, %v8257_v53  ;;  %v8258_v39 = vmul.f32 %v10798_v22, %v18014_v20  ;;  %v12763_v51 = vpop.eup %12762  ;;  %v8481_v43 = vmul.f32 %v12761_v57, %v18110_v52 }
 0xa4f   : > { %v8420_v58 = vadd.f32 1.0, %v12763_v51 }
 0xa50   : > { %v8328_v21 = vsub.f32 0.0, %v18155_v33  ;;  %v18162_v50 = vadd.f32 %v18016_v4, %v8258_v39  ;;  %v10799_v28 = vpop.f32.mrb[108].mxu1  ;;  %v12765_v16 = vpop.eup %12764  ;;  %v9430_v5 = vpack.c.bf16 %v8481_v43, %v8480_v12 }
 0xa51   : > { %v10800_v44 = vpop.f32.mrb[109].mxu1  ;;  %12774 = vrcp.f32 %v8420_v58  ;;  %v8421_v0 = vadd.f32 1.0, %v12765_v16 }
 0xa52   : > { %v8382_v32 = vmul.f32 1.442695, %v8328_v21  ;;  %v8329_v36 = vsub.f32 0.0, %v18162_v50  ;;  %v10802_v54 = vpop.f32.mrb[110].mxu1  ;;  %9478 = vst [vmem:[%s18080_s25 + $0x38] sm:$0xff] %v9430_v5   ;;  %v10801_v8 = vadd.f32 %v10800_v44, %v10799_v28 }
 0xa53   : > { %v12767_v45 = vpop.eup %12766  ;;  %v10803_v52 = vpop.f32.mrb[111].mxu1  ;;  %12776 = vrcp.f32 %v8421_v0 }
 0xa54   : > { %v8384_v24 = vmul.f32 1.442695, %v8329_v36  ;;  %v10804_v37 = vadd.f32 %v10803_v52, %v10802_v54  ;;  %12778 = vpow2.f32 %v8382_v32  ;;  %v8259_v6 = vmul.f32 %v10801_v8, %v18014_v20 }
 0xa55   : > { %v12769_v47 = vpop.eup %12768  ;;  %v8482_v31 = vmul.f32 %v12767_v45, %v18118_v11 }
 0xa56   : > { %v12771_v1 = vpop.eup %12770  ;;  %v8483_v61 = vmul.f32 %v12769_v47, %v18123_v59  ;;  %12780 = vpow2.f32 %v8384_v24  ;;  %v8260_v2 = vmul.f32 %v10804_v37, %v18014_v20  ;;  %v18171_v3 = vadd.f32 %v18016_v4, %v8259_v6 }
 0xa57   : > { %v8422_v49 = vadd.f32 1.0, %v12771_v1 }
 0xa58   : > { %v12773_v56 = vpop.eup %12772  ;;  %v9435_v38 = vpack.c.bf16 %v8483_v61, %v8482_v31  ;;  %v18174_v48 = vadd.f32 %v18016_v4, %v8260_v2  ;;  %v10805_v34 = vpop.f32.mrb[112].mxu1  ;;  %v8330_v18 = vsub.f32 0.0, %v18171_v3 }
 0xa59   : > { %12782 = vrcp.f32 %v8422_v49  ;;  %v8423_v60 = vadd.f32 1.0, %v12773_v56  ;;  %v10806_v11 = vpop.f32.mrb[113].mxu1 }
 0xa5a   : > { %9479 = vst [vmem:[%s18080_s25 + $0x40] sm:$0xff] %v9435_v38   ;;  %v8331_v59 = vsub.f32 0.0, %v18174_v48  ;;  %v10807_v29 = vadd.f32 %v10806_v11, %v10805_v34  ;;  %v10808_v15 = vpop.f32.mrb[114].mxu1  ;;  %v8386_v55 = vmul.f32 1.442695, %v8330_v18 }
 0xa5b   : > { %12784 = vrcp.f32 %v8423_v60  ;;  %v10809_v41 = vpop.f32.mrb[115].mxu1  ;;  %v12775_v14 = vpop.eup %12774 }
 0xa5c   : > { %v8388_v35 = vmul.f32 1.442695, %v8331_v59  ;;  %v8261_v9 = vmul.f32 %v10807_v29, %v18014_v20  ;;  %v10810_v63 = vadd.f32 %v10809_v41, %v10808_v15  ;;  %12786 = vpow2.f32 %v8386_v55 }
 0xa5d   : > { %v12777_v7 = vpop.eup %12776  ;;  %v8484_v13 = vmul.f32 %v12775_v14, %v18129_v30 }
 0xa5e   : > { %12788 = vpow2.f32 %v8388_v35  ;;  %v18181_v19 = vadd.f32 %v18016_v4, %v8261_v9  ;;  %v8262_v17 = vmul.f32 %v10810_v63, %v18014_v20  ;;  %v12779_v23 = vpop.eup %12778  ;;  %v8485_v25 = vmul.f32 %v12777_v7, %v18136_v42 }
 0xa5f   : > { %v8424_v46 = vadd.f32 1.0, %v12779_v23 }
 0xa60   : > { %v12781_v62 = vpop.eup %12780  ;;  %v8332_v10 = vsub.f32 0.0, %v18181_v19  ;;  %v18188_v27 = vadd.f32 %v18016_v4, %v8262_v17  ;;  %v10811_v53 = vpop.f32.mrb[116].mxu1  ;;  %v9440_v22 = vpack.c.bf16 %v8485_v25, %v8484_v13 }
 0xa61   : > { %v8425_v57 = vadd.f32 1.0, %v12781_v62  ;;  %v10812_v39 = vpop.f32.mrb[117].mxu1  ;;  %12790 = vrcp.f32 %v8424_v46 }
 0xa62   : > { %v8390_v51 = vmul.f32 1.442695, %v8332_v10  ;;  %v8333_v12 = vsub.f32 0.0, %v18188_v27  ;;  %v10813_v43 = vadd.f32 %v10812_v39, %v10811_v53  ;;  %v10814_v30 = vpop.f32.mrb[118].mxu1  ;;  %9480 = vst [vmem:[%s18080_s25 + $0x48] sm:$0xff] %v9440_v22  }
 0xa63   : > { %v12783_v58 = vpop.eup %12782  ;;  %12792 = vrcp.f32 %v8425_v57  ;;  %v10815_v42 = vpop.f32.mrb[119].mxu1 }
 0xa64   : > { %12794 = vpow2.f32 %v8390_v51  ;;  %v8392_v21 = vmul.f32 1.442695, %v8333_v12  ;;  %v8263_v28 = vmul.f32 %v10813_v43, %v18014_v20  ;;  %v10816_v5 = vadd.f32 %v10815_v42, %v10814_v30 }
 0xa65   : > { %v12785_v16 = vpop.eup %12784  ;;  %v8486_v44 = vmul.f32 %v12783_v58, %v18144_v40 }
 0xa66   : > { %v8487_v0 = vmul.f32 %v12785_v16, %v18149_v26  ;;  %12796 = vpow2.f32 %v8392_v21  ;;  %v18196_v32 = vadd.f32 %v18016_v4, %v8263_v28  ;;  %v12787_v36 = vpop.eup %12786  ;;  %v8264_v54 = vmul.f32 %v10816_v5, %v18014_v20 }
 0xa67   : > { %v8426_v52 = vadd.f32 1.0, %v12787_v36 }
 0xa68   : > { %v12789_v45 = vpop.eup %12788  ;;  %v9445_v8 = vpack.c.bf16 %v8487_v0, %v8486_v44  ;;  %v8334_v24 = vsub.f32 0.0, %v18196_v32  ;;  %v10817_v37 = vpop.f32.mrb[120].mxu1  ;;  %v18201_v6 = vadd.f32 %v18016_v4, %v8264_v54 }
 0xa69   : > { %v8427_v47 = vadd.f32 1.0, %v12789_v45  ;;  %v10818_v40 = vpop.f32.mrb[121].mxu1  ;;  %12798 = vrcp.f32 %v8426_v52 }
 0xa6a   : > { %9481 = vst [vmem:[%s18080_s25 + $0x50] sm:$0xff] %v9445_v8   ;;  %v8394_v26 = vmul.f32 1.442695, %v8334_v24  ;;  %v10819_v1 = vadd.f32 %v10818_v40, %v10817_v37  ;;  %v10820_v31 = vpop.f32.mrb[122].mxu1  ;;  %v8335_v61 = vsub.f32 0.0, %v18201_v6 }
 0xa6b   : > { %12800 = vrcp.f32 %v8427_v47  ;;  %v10821_v2 = vpop.f32.mrb[123].mxu1  ;;  %v12791_v49 = vpop.eup %12790 }
 0xa6c   : > { %12802 = vpow2.f32 %v8394_v26  ;;  %v8265_v56 = vmul.f32 %v10819_v1, %v18014_v20  ;;  %v10822_v38 = vadd.f32 %v10821_v2, %v10820_v31  ;;  %v8396_v60 = vmul.f32 1.442695, %v8335_v61 }
 0xa6d   : > { %v12793_v34 = vpop.eup %12792  ;;  %v8488_v11 = vmul.f32 %v12791_v49, %v18155_v33 }
 0xa6e   : > { %v12795_v18 = vpop.eup %12794  ;;  %v8489_v59 = vmul.f32 %v12793_v34, %v18162_v50  ;;  %v8304_v29 = vadd.f32 %v18016_v4, %v8265_v56  ;;  %v8266_v15 = vmul.f32 %v10822_v38, %v18014_v20  ;;  %12804 = vpow2.f32 %v8396_v60 }
 0xa6f   : > { %v8428_v55 = vadd.f32 1.0, %v12795_v18 }
 0xa70   : > { %v12797_v41 = vpop.eup %12796  ;;  %v9450_v14 = vpack.c.bf16 %v8489_v59, %v8488_v11  ;;  %v8336_v35 = vsub.f32 0.0, %v8304_v29  ;;  %v8305_v9 = vadd.f32 %v18016_v4, %v8266_v15 }
 0xa71   : > { %12806 = vrcp.f32 %v8428_v55  ;;  %v8429_v63 = vadd.f32 1.0, %v12797_v41 }
 0xa72   : > { %9482 = vst [vmem:[%s18080_s25 + $0x58] sm:$0xff] %v9450_v14   ;;  %v8398_v7 = vmul.f32 1.442695, %v8336_v35  ;;  %v8337_v17 = vsub.f32 0.0, %v8305_v9 }
 0xa73   : > { %12808 = vrcp.f32 %v8429_v63  ;;  %v12799_v33 = vpop.eup %12798 }
 0xa74   : > { %12810 = vpow2.f32 %v8398_v7  ;;  %v8400_v50 = vmul.f32 1.442695, %v8337_v17  ;;  %v8490_v20 = vmul.f32 %v12799_v33, %v18171_v3 }
 0xa75   : > { %v12801_v23 = vpop.eup %12800 }
 0xa76   : > { %v12803_v13 = vpop.eup %12802  ;;  %v8491_v25 = vmul.f32 %v12801_v23, %v18174_v48  ;;  %12812 = vpow2.f32 %v8400_v50 }
 0xa77   : > { %v8430_v62 = vadd.f32 1.0, %v12803_v13 }
 0xa78   : > { %v9455_v46 = vpack.c.bf16 %v8491_v25, %v8490_v20  ;;  %v12805_v4 = vpop.eup %12804 }
 0xa79   : > { %12814 = vrcp.f32 %v8430_v62  ;;  %v8431_v10 = vadd.f32 1.0, %v12805_v4 }
 0xa7a   : > { %9483 = vst [vmem:[%s18080_s25 + $0x60] sm:$0xff] %v9455_v46  }
 0xa7b   : > { %v12807_v53 = vpop.eup %12806  ;;  %12816 = vrcp.f32 %v8431_v10 }
 0xa7c   : > { %v8492_v39 = vmul.f32 %v12807_v53, %v18181_v19 }
 0xa7d   : > { %v12809_v22 = vpop.eup %12808 }
 0xa7e   : > { %v12811_v57 = vpop.eup %12810  ;;  %v8493_v3 = vmul.f32 %v12809_v22, %v18188_v27 }
 0xa7f   : > { %v8432_v48 = vadd.f32 1.0, %v12811_v57 }
 0xa80   : > { %v12813_v51 = vpop.eup %12812  ;;  %v9460_v12 = vpack.c.bf16 %v8493_v3, %v8492_v39 }
 0xa81   : > { %12818 = vrcp.f32 %v8432_v48  ;;  %v8433_v43 = vadd.f32 1.0, %v12813_v51 }
 0xa82   : > { %9484 = vst [vmem:[%s18080_s25 + $0x68] sm:$0xff] %v9460_v12  }
 0xa83   : > { %12820 = vrcp.f32 %v8433_v43  ;;  %v12815_v30 = vpop.eup %12814 }
 0xa84   : > { %v8494_v42 = vmul.f32 %v12815_v30, %v18196_v32 }
 0xa85   : > { %v12817_v58 = vpop.eup %12816 }
 0xa86   : > { %v8495_v21 = vmul.f32 %v12817_v58, %v18201_v6 }
 0xa88   : > { %v9465_v19 = vpack.c.bf16 %v8495_v21, %v8494_v42 }
 0xa8a   : > { %9485 = vst [vmem:[%s18080_s25 + $0x70] sm:$0xff] %v9465_v19  }
 0xa8b   : > { %v12819_v28 = vpop.eup %12818 }
 0xa8c   : > { %v8496_v16 = vmul.f32 %v12819_v28, %v8304_v29 }
 0xa8d   : > { %v12821_v27 = vpop.eup %12820 }
 0xa8e   : > { %v8497_v5 = vmul.f32 %v12821_v27, %v8305_v9 }
 0xa90   : > { %v9470_v44 = vpack.c.bf16 %v8497_v5, %v8496_v16 }
 0xa92   : > { %9486 = vst [vmem:[%s18080_s25 + $0x78] sm:$0xff] %v9470_v44  }
 0xa93   : > { %13203 = shalt.err (!%p13200_p8)
}
 0xa94   : > { %s13204_s25 = scalar_lea.hbm %s18226_s22, 2048  ;;  %s13208_s21 = scalar_lea.hbm %s19415_s19, 4096 }
 0xa95   : > { %p13205_p9 = scmp.ne.s32.totalorder %s18226_s22, %s13204_s25  ;;  %p13209_p3 = scmp.lt.u32.totalorder %s18226_s22, %s19415_s19 }
 0xa96   : > { %p13210_p7 = scmp.lt.u32.totalorder %s13208_s21, %s13204_s25  ;;  %p13212_p11 = scmp.lt.u32.totalorder %s13204_s25, %s18226_s22 }
 0xa97   : > { %p13206_p4 = pnand %p13205_p9, %p19416_p0 }
 0xa98   : > { %p13211_p12 = por %p13210_p7, %p13209_p3 }
 0xa99   : > { %p13207_p6 = pneg %p13206_p4 }
 0xa9a   : > { %p13213_p5 = por %p13212_p11, %p13211_p12 }
 0xa9c   : > { %p13214_p1 = pnand %p13213_p5, %p13207_p6 }
 0xa9e   : > { %13217 = shalt.err (!%p13214_p1)
}
 0xa9f   : > { %s13318_s28 = smov 64   ;;  %s13319_s23 = smov 4  }
 0xaa0   : > { %11593 = dma.vmem_to_hbm [thread:$0]  (%p19416_p0), %s18228_s3, 2048, %s18226_s22, %s8659_s0, %s13318_s28, %s13318_s28, %s13319_s23  }
 0xaa1 PF: > { %s19417_s2 = sld [smem:[#allocation33_spill]]  ;;  %p19418_p10 = scmp.ne.s32.totalorder %s18653_s20, 0 }
 0xaa2   : > { %p19419_p13 = scmp.ge.s32.totalorder %s13296_s30, 2 }
 0xaa4   : > { %p11637_p2 = pnand %p19419_p13, %p19418_p10 }
 0xaa7   : > { %s8689_s18 = sand.u32 1, %s19417_s2  }
 0xaa8   : > { %s8690_s25 = scalar_lea.sflag [#allocation5], %s8689_s18 }
 0xaa9   : > { %13271 = dma.done.wait (!%p11637_p2), %s8690_s25, 2048  }
 0xaaa   : > { %13273 = vsyncadd (!%p11637_p2), %s8690_s25, 4294965248  ;;  %s35_s30 = sadd.s32 1, %s13296_s30   ;;  %s19420_s25 = sld [smem:[#allocation34_spill]] }
 0xaab   : > { %p32_p8 = scmp.ge.s32.totalorder %s35_s30, 4   ;;  %s19421_s26 = smov %s13284_s27 }
 0xaac   : > { %s19422_s27 = smov %s13728_s15  ;;  %s19423_s28 = smov %s13292_s29 }
 0xaad   : > { %s19424_s29 = smov %s19426_s1  ;;  %34 = sbr.rel (!%p32_p8) target bundleno = 18 (0x12), region = 171 }
 0xab4   :  { %8695 = vsyncpa [#allocation4], 1 }
 0xab5   :  { %8697 = vsyncpa [#allocation4 + $0x1], 1 }
 0xab6   :  { %8698 = vsyncpa [#allocation7], 1 }
 0xab7   :  { %8699 = vsyncpa [#allocation10], 1 }
 0xab8   :  { %8700 = vsyncpa [#allocation13], 1 }
 0xab9   :  { %8701 = vsyncpa [#allocation16], 1 }
 0xaba   :  { %8702 = vsyncpa [#allocation19], 1 }
 0xabb   :  { %8703 = vsyncpa [#allocation22], 1 }
 0xabc   :  { %8704 = vsyncpa [#allocation5], 1 }
 0xabd   :  { %8706 = vsyncpa [#allocation5 + $0x1], 1 }

</bundles_post_ra>
